<compile_context>
chip_gen: v7x
topology: tpu7x:2x2x1
jax: 0.10.0
libtpu: 0.0.40
codegen_flags: <defaults>
</compile_context>

<pallas_src>
import jax
import jax.numpy as jnp
import numpy as np
from jax.experimental import pallas as pl
from jax.experimental.pallas import tpu as pltpu


# ---------------------------------------------------------------------------
# In-kernel helpers: zero-filled row / lane shifts (explicit, no wraparound).
# ---------------------------------------------------------------------------
def _rows_up(x, k):
    """out[r] = x[r + k]; last k rows are zero."""
    return jnp.concatenate(
        [x[k:, :], jnp.zeros((k, x.shape[1]), x.dtype)], axis=0)


def _rows_down(x, k):
    """out[r] = x[r - k]; first k rows are zero."""
    return jnp.concatenate(
        [jnp.zeros((k, x.shape[1]), x.dtype), x[:-k, :]], axis=0)


def _lanes_up(x, k):
    """out[:, l] = x[:, l + k]; last k lanes are zero."""
    return jnp.concatenate(
        [x[:, k:], jnp.zeros((x.shape[0], k), x.dtype)], axis=1)


# ---------------------------------------------------------------------------
# Fused whole-network kernel (one batch block of bb images).
#
# Layouts (all f32):
#   x_ref : [bb*32, 28]    rows = (image, padded-row p: 0 zero, 1..28 data,
#                          29..31 zero), lanes = raw x column.
#   h1    : [bb*32, 512]   rows = (image, y in 0..27 valid), lane = 16*x + c
#   p1    : pooled1 embedded at rows (image, 2*y2), lane 32*x2 + c
#   o2    : conv2 output embedded at rows (image, 2*y2), lane 32*x2 + co
#   pooled2 embedded at rows (image, 4*y4), lane 64*x4 + co
# ---------------------------------------------------------------------------
def _cnn_fused_kernel(x_ref, w1_ref, b1_ref, w2_ref, b2_ref,
                      wf1_ref, bf1_ref, wf2_ref, bf2_ref, o_ref):
    R = x_ref.shape[0]                    # bb * 32
    bb = R // 32
    x = x_ref[...]                        # [bb*32, 28]

    # ---- conv1: 3 accumulated row-Toeplitz matmuls (K=28, N=512) -----------
    h1 = jnp.dot(x, w1_ref[0], preferred_element_type=jnp.float32)
    h1 += jnp.dot(_rows_up(x, 1), w1_ref[1], preferred_element_type=jnp.float32)
    h1 += jnp.dot(_rows_up(x, 2), w1_ref[2], preferred_element_type=jnp.float32)
    # bias + ReLU, and zero the 4 garbage rows per image (rows 28..31) so they
    # act as conv2's vertical zero padding after pooling.
    row = jax.lax.broadcasted_iota(jnp.int32, (R, 1), 0) % 32
    h1 = jnp.where(row < 28, jnp.maximum(h1 + b1_ref[...], 0.0), 0.0)

    # ---- 2x2 max-pool #1 (stays embedded, no compaction) -------------------
    h1 = jnp.maximum(h1, _lanes_up(h1, 16))        # pool over W (x pairs)
    p1 = jnp.maximum(h1, _rows_up(h1, 1))          # pool over H (row pairs)
    # pooled1[b, y2, x2, c] sits at row b*32 + 2*y2, lane 32*x2 + c.

    # ---- conv2: 3 accumulated row-Toeplitz matmuls (K=512, N=512) ----------
    o2 = jnp.dot(p1, w2_ref[1], preferred_element_type=jnp.float32)
    o2 += jnp.dot(_rows_down(p1, 2), w2_ref[0], preferred_element_type=jnp.float32)
    o2 += jnp.dot(_rows_up(p1, 2), w2_ref[2], preferred_element_type=jnp.float32)
    o2 = jnp.maximum(o2 + b2_ref[...], 0.0)

    # ---- 2x2 max-pool #2 (W via lane shift; H fused into the fc1 loop) -----
    o2 = jnp.maximum(o2, _lanes_up(o2, 32))
    o2 = o2.reshape(bb, 32, 512)

    # ---- fc1: 7 accumulated matmuls, one per pooled row y4 -----------------
    z = jnp.zeros((bb, 128), jnp.float32)
    for y4 in range(7):
        rowv = jnp.maximum(o2[:, 4 * y4, :], o2[:, 4 * y4 + 2, :])  # H-pool
        z += jnp.dot(rowv, wf1_ref[y4], preferred_element_type=jnp.float32)
    z = jnp.maximum(z + bf1_ref[...], 0.0)

    # ---- fc2 + softmax ------------------------------------------------------
    logits = jnp.dot(z, wf2_ref[...], preferred_element_type=jnp.float32)
    logits = logits + bf2_ref[...]
    m = jnp.max(logits, axis=-1, keepdims=True)
    e = jnp.exp(logits - m)
    o_ref[...] = e / jnp.sum(e, axis=-1, keepdims=True)


# ---------------------------------------------------------------------------
# Wrapper: weight re-layout (banded Toeplitz matrices) + pallas_call plumbing.
# ---------------------------------------------------------------------------
def cnn_forward(x_nchw, p, block_n=64):
    """x_nchw: [N, 1, 28, 28] float32 -> [N, 10] softmax probabilities."""
    f32 = jnp.float32
    N = x_nchw.shape[0]
    if N <= block_n:
        bb = N
    else:
        bb = block_n
        assert bb % 8 == 0, "block_n must be a multiple of 8 when grid > 1"
    n_pad = ((N + bb - 1) // bb) * bb
    grid = n_pad // bb

    # ---- input prep: [N,1,28,28] -> row-padded merged layout [n_pad*32, 28]
    x = x_nchw[:, 0, :, :]
    x = jnp.pad(x, ((0, n_pad - N), (1, 3), (0, 0)))   # 1 zero, 28 data, 3 zero
    x = x.reshape(n_pad * 32, 28)

    # ---- conv1 banded weights: [3(ky), 28(x_in), 512(=32*x_out + pad, 16 c)]
    xi = np.arange(28)[:, None]
    xo = np.arange(28)[None, :]
    sel1 = np.stack([(xi == xo + kx - 1) for kx in range(3)]).astype(np.float32)
    w1r = p["w_conv1"][:, :, 0, :]                       # [ky, kx, c]
    w1 = jnp.einsum('kio,ykc->yioc', sel1, w1r)          # [3, 28, 28, 16]
    w1 = jnp.pad(w1, ((0, 0), (0, 0), (0, 4), (0, 0))).reshape(3, 28, 512)
    b1 = jnp.concatenate(
        [jnp.tile(p["b_conv1"], 28), jnp.zeros((64,), f32)]).reshape(1, 512)

    # ---- conv2 banded weights: [3(ky), 512(x2_in,ci), 512(x2_out,co)] -------
    xi2 = np.arange(14)[:, None]
    xo2 = np.arange(14)[None, :]
    sel2 = np.stack([(xi2 == xo2 + kx - 1) for kx in range(3)]).astype(np.float32)
    w2 = jnp.einsum('kio,ykab->yiaob', sel2, p["w_conv2"])  # [3,14,16,14,32]
    w2 = jnp.pad(w2, ((0, 0), (0, 2), (0, 16), (0, 2), (0, 0))).reshape(3, 512, 512)
    b2 = jnp.concatenate(
        [jnp.tile(p["b_conv2"], 14), jnp.zeros((64,), f32)]).reshape(1, 512)

    # ---- fc1 weights in the embedded pooled2 layout: [7(y4), 512, 128] ------
    # torch flatten order of (co, y4, x4); embedded lane index is 64*x4 + co.
    wf1 = p["w_fc1"].reshape(32, 7, 7, 128).transpose(1, 2, 0, 3)  # [y4,x4,co,j]
    wf1 = jnp.pad(wf1, ((0, 0), (0, 1), (0, 32), (0, 0))).reshape(7, 512, 128)
    bf1 = p["b_fc1"].reshape(1, 128)
    wf2 = p["w_fc2"]
    bf2 = p["b_fc2"].reshape(1, 10)

    def cspec(shape):
        return pl.BlockSpec(shape, lambda n, _nd=len(shape): (0,) * _nd)

    out = pl.pallas_call(
        _cnn_fused_kernel,
        out_shape=jax.ShapeDtypeStruct((n_pad, 10), f32),
        grid=(grid,),
        in_specs=[
            pl.BlockSpec((bb * 32, 28), lambda n: (n, 0)),   # images
            cspec((3, 28, 512)),                             # w1
            cspec((1, 512)),                                 # b1
            cspec((3, 512, 512)),                            # w2
            cspec((1, 512)),                                 # b2
            cspec((7, 512, 128)),                            # wf1
            cspec((1, 128)),                                 # bf1
            cspec((128, 10)),                                # wf2
            cspec((1, 10)),                                  # bf2
        ],
        out_specs=pl.BlockSpec((bb, 10), lambda n: (n, 0)),
        compiler_params=pltpu.CompilerParams(
            dimension_semantics=("parallel",),               # batch blocks
            vmem_limit_bytes=48 * 1024 * 1024),
    )(x, w1, b1, w2, b2, wf1, bf1, wf2, bf2)
    return out[:N]


# ---------------------------------------------------------------------------
# Deterministic parameter init (same shapes as the PyTorch module)
# ---------------------------------------------------------------------------
def init_params(key):
    ks = jax.random.split(key, 8)

    def u(k, shape, fan_in):
        bound = 1.0 / (fan_in ** 0.5)
        return jax.random.uniform(k, shape, jnp.float32, -bound, bound)

    return {
        "w_conv1": u(ks[0], (3, 3, 1, 16), 9.0),
        "b_conv1": u(ks[1], (16,), 9.0),
        "w_conv2": u(ks[2], (3, 3, 16, 32), 144.0),
        "b_conv2": u(ks[3], (32,), 144.0),
        "w_fc1":   u(ks[4], (1568, 128), 1568.0),
        "b_fc1":   u(ks[5], (128,), 1568.0),
        "w_fc2":   u(ks[6], (128, 10), 128.0),
        "b_fc2":   u(ks[7], (10,), 128.0),
    }


# ---------------------------------------------------------------------------
# Pure-JAX reference (correctness check only)
# ---------------------------------------------------------------------------
def reference_forward(x_nchw, p):
    x = jnp.transpose(x_nchw, (0, 2, 3, 1))

    def block(x, w, b):
        y = jax.lax.conv_general_dilated(
            x, w, window_strides=(1, 1), padding="SAME",
            dimension_numbers=("NHWC", "HWIO", "NHWC"))
        y = jax.nn.relu(y + b)
        n, h, w_, c = y.shape
        return y.reshape(n, h // 2, 2, w_ // 2, 2, c).max(axis=(2, 4))

    x = block(x, p["w_conv1"], p["b_conv1"])
    x = block(x, p["w_conv2"], p["b_conv2"])
    feat = jnp.transpose(x, (0, 3, 1, 2)).reshape(x.shape[0], -1)  # torch flatten
    h = jax.nn.relu(feat @ p["w_fc1"] + p["b_fc1"])
    logits = h @ p["w_fc2"] + p["b_fc2"]
    return jax.nn.softmax(logits, axis=1)


if __name__ == "__main__":
    key = jax.random.PRNGKey(0)
    k_x, k_p = jax.random.split(key)
    # fc1 expects 1568 = 32*7*7 features -> input must be [N, 1, 28, 28]
    x = jax.random.normal(k_x, (2, 1, 28, 28), jnp.float32)
    params = init_params(k_p)

    out = jax.block_until_ready(cnn_forward(x, params))
    ref = jax.block_until_ready(reference_forward(x, params))

    assert out.shape == (2, 10), out.shape
    assert bool(jnp.all(jnp.isfinite(out)))
    assert bool(jnp.allclose(jnp.sum(out, axis=1), 1.0, atol=1e-5))
    assert bool(jnp.allclose(out, ref, atol=1e-4, rtol=1e-4))
    print("KERNEL_OK")
</pallas_src>

<mosaic_0001>
module attributes {stable_mosaic.version = 11 : i64} {
  func.func @_cnn_fused_kernel(%arg0: i32, %arg1: memref<64x28xf32, #tpu.memory_space<vmem>>, %arg2: memref<3x28x512xf32, #tpu.memory_space<vmem>>, %arg3: memref<1x512xf32, #tpu.memory_space<vmem>>, %arg4: memref<3x512x512xf32, #tpu.memory_space<vmem>>, %arg5: memref<1x512xf32, #tpu.memory_space<vmem>>, %arg6: memref<7x512x128xf32, #tpu.memory_space<vmem>>, %arg7: memref<1x128xf32, #tpu.memory_space<vmem>>, %arg8: memref<128x10xf32, #tpu.memory_space<vmem>>, %arg9: memref<1x10xf32, #tpu.memory_space<vmem>>, %arg10: memref<2x10xf32, #tpu.memory_space<vmem>>) attributes {dimension_semantics = [#tpu.dimension_semantics<parallel>], iteration_bounds = array<i64: 1>, scalar_prefetch = 0 : i64, scratch_operands = 0 : i64, tpu.core_type = #tpu.core_type<tc>, window_params = [{transform_indices = @transform_0, window_bounds = array<i64: 64, 28>}, {pipeline_mode = #tpu.pipeline_mode<synchronous>, transform_indices = @transform_1, window_bounds = array<i64: 3, 28, 512>}, {pipeline_mode = #tpu.pipeline_mode<synchronous>, transform_indices = @transform_2, window_bounds = array<i64: 1, 512>}, {pipeline_mode = #tpu.pipeline_mode<synchronous>, transform_indices = @transform_3, window_bounds = array<i64: 3, 512, 512>}, {pipeline_mode = #tpu.pipeline_mode<synchronous>, transform_indices = @transform_4, window_bounds = array<i64: 1, 512>}, {pipeline_mode = #tpu.pipeline_mode<synchronous>, transform_indices = @transform_5, window_bounds = array<i64: 7, 512, 128>}, {pipeline_mode = #tpu.pipeline_mode<synchronous>, transform_indices = @transform_6, window_bounds = array<i64: 1, 128>}, {pipeline_mode = #tpu.pipeline_mode<synchronous>, transform_indices = @transform_7, window_bounds = array<i64: 128, 10>}, {pipeline_mode = #tpu.pipeline_mode<synchronous>, transform_indices = @transform_8, window_bounds = array<i64: 1, 10>}, {transform_indices = @transform_9, window_bounds = array<i64: 2, 10>}]} {
    %c0 = arith.constant 0 : index
    %c0_0 = arith.constant 0 : index
    %0 = vector.load %arg1[%c0, %c0_0] : memref<64x28xf32, #tpu.memory_space<vmem>>, vector<64x28xf32>
    %c0_1 = arith.constant 0 : index
    %c0_2 = arith.constant 0 : index
    %c0_3 = arith.constant 0 : index
    %1 = vector.load %arg2[%c0_1, %c0_2, %c0_3] : memref<3x28x512xf32, #tpu.memory_space<vmem>>, vector<1x28x512xf32>
    %2 = vector.shape_cast %1 : vector<1x28x512xf32> to vector<28x512xf32>
    %cst = arith.constant dense<0.000000e+00> : vector<64x512xf32>
    %3 = tpu.matmul %0, %2, %cst {dimension_numbers = #tpu.dot_dimension_numbers<[1], [0], [0], [1], [0, 0, 1, 1], [], []>} : vector<64x28xf32>, vector<28x512xf32>, vector<64x512xf32> -> vector<64x512xf32>
    %4 = vector.extract_strided_slice %0 {offsets = [1, 0], sizes = [63, 28], strides = [1, 1]} : vector<64x28xf32> to vector<63x28xf32>
    %cst_4 = arith.constant 0.000000e+00 : f32
    %5 = vector.broadcast %cst_4 : f32 to vector<1x28xf32>
    %6 = tpu.concatenate %4, %5 in 0 : vector<63x28xf32>, vector<1x28xf32> -> vector<64x28xf32>
    %c1 = arith.constant 1 : index
    %c0_5 = arith.constant 0 : index
    %c0_6 = arith.constant 0 : index
    %7 = vector.load %arg2[%c1, %c0_5, %c0_6] : memref<3x28x512xf32, #tpu.memory_space<vmem>>, vector<1x28x512xf32>
    %8 = vector.shape_cast %7 : vector<1x28x512xf32> to vector<28x512xf32>
    %cst_7 = arith.constant dense<0.000000e+00> : vector<64x512xf32>
    %9 = tpu.matmul %6, %8, %cst_7 {dimension_numbers = #tpu.dot_dimension_numbers<[1], [0], [0], [1], [0, 0, 1, 1], [], []>} : vector<64x28xf32>, vector<28x512xf32>, vector<64x512xf32> -> vector<64x512xf32>
    %10 = arith.addf %3, %9 : vector<64x512xf32>
    %11 = vector.extract_strided_slice %0 {offsets = [2, 0], sizes = [62, 28], strides = [1, 1]} : vector<64x28xf32> to vector<62x28xf32>
    %cst_8 = arith.constant 0.000000e+00 : f32
    %12 = vector.broadcast %cst_8 : f32 to vector<2x28xf32>
    %13 = tpu.concatenate %11, %12 in 0 : vector<62x28xf32>, vector<2x28xf32> -> vector<64x28xf32>
    %c2 = arith.constant 2 : index
    %c0_9 = arith.constant 0 : index
    %c0_10 = arith.constant 0 : index
    %14 = vector.load %arg2[%c2, %c0_9, %c0_10] : memref<3x28x512xf32, #tpu.memory_space<vmem>>, vector<1x28x512xf32>
    %15 = vector.shape_cast %14 : vector<1x28x512xf32> to vector<28x512xf32>
    %cst_11 = arith.constant dense<0.000000e+00> : vector<64x512xf32>
    %16 = tpu.matmul %13, %15, %cst_11 {dimension_numbers = #tpu.dot_dimension_numbers<[1], [0], [0], [1], [0, 0, 1, 1], [], []>} : vector<64x28xf32>, vector<28x512xf32>, vector<64x512xf32> -> vector<64x512xf32>
    %17 = arith.addf %10, %16 : vector<64x512xf32>
    %18 = tpu.iota {dimensions = array<i32: 0>} : vector<64x1xi32>
    %c32_i32 = arith.constant 32 : i32
    %c0_i32 = arith.constant 0 : i32
    %19 = arith.cmpi eq, %c32_i32, %c0_i32 : i32
    %c1_i32 = arith.constant 1 : i32
    %20 = arith.select %19, %c1_i32, %c32_i32 : i32
    %21 = vector.broadcast %20 : i32 to vector<64x1xi32>
    %22 = arith.remsi %18, %21 : vector<64x1xi32>
    %c0_i32_12 = arith.constant 0 : i32
    %23 = vector.broadcast %c0_i32_12 : i32 to vector<64x1xi32>
    %24 = arith.cmpi ne, %22, %23 : vector<64x1xi32>
    %c0_i32_13 = arith.constant 0 : i32
    %25 = vector.broadcast %c0_i32_13 : i32 to vector<64x1xi32>
    %26 = arith.cmpi slt, %22, %25 : vector<64x1xi32>
    %c0_i32_14 = arith.constant 0 : i32
    %27 = arith.cmpi slt, %20, %c0_i32_14 : i32
    %28 = vector.broadcast %27 : i1 to vector<64x1xi1>
    %29 = vector.broadcast %28 : vector<64x1xi1> to vector<64x1xi1>
    %30 = arith.xori %26, %29 : vector<64x1xi1>
    %31 = arith.andi %30, %24 : vector<64x1xi1>
    %32 = vector.broadcast %20 : i32 to vector<64x1xi32>
    %33 = arith.addi %22, %32 : vector<64x1xi32>
    %34 = arith.select %31, %33, %22 : vector<64x1xi1>, vector<64x1xi32>
    %c28_i32 = arith.constant 28 : i32
    %35 = vector.broadcast %c28_i32 : i32 to vector<64x1xi32>
    %36 = arith.cmpi slt, %34, %35 : vector<64x1xi32>
    %c0_15 = arith.constant 0 : index
    %c0_16 = arith.constant 0 : index
    %37 = vector.load %arg3[%c0_15, %c0_16] : memref<1x512xf32, #tpu.memory_space<vmem>>, vector<1x512xf32>
    %38 = vector.broadcast %37 : vector<1x512xf32> to vector<64x512xf32>
    %39 = arith.addf %17, %38 : vector<64x512xf32>
    %cst_17 = arith.constant 0.000000e+00 : f32
    %40 = vector.broadcast %cst_17 : f32 to vector<64x512xf32>
    %41 = arith.maximumf %39, %40 : vector<64x512xf32>
    %cst_18 = arith.constant 0.000000e+00 : f32
    %42 = vector.shape_cast %36 : vector<64x1xi1> to vector<64x1xi1>
    %43 = vector.broadcast %42 : vector<64x1xi1> to vector<64x512xi1>
    %44 = vector.broadcast %cst_18 : f32 to vector<64x512xf32>
    %45 = arith.select %43, %41, %44 : vector<64x512xi1>, vector<64x512xf32>
    %46 = vector.extract_strided_slice %45 {offsets = [0, 16], sizes = [64, 496], strides = [1, 1]} : vector<64x512xf32> to vector<64x496xf32>
    %cst_19 = arith.constant 0.000000e+00 : f32
    %47 = vector.broadcast %cst_19 : f32 to vector<64x16xf32>
    %48 = tpu.concatenate %46, %47 in 1 : vector<64x496xf32>, vector<64x16xf32> -> vector<64x512xf32>
    %49 = arith.maximumf %45, %48 : vector<64x512xf32>
    %50 = vector.extract_strided_slice %49 {offsets = [1, 0], sizes = [63, 512], strides = [1, 1]} : vector<64x512xf32> to vector<63x512xf32>
    %cst_20 = arith.constant 0.000000e+00 : f32
    %51 = vector.broadcast %cst_20 : f32 to vector<1x512xf32>
    %52 = tpu.concatenate %50, %51 in 0 : vector<63x512xf32>, vector<1x512xf32> -> vector<64x512xf32>
    %53 = arith.maximumf %49, %52 : vector<64x512xf32>
    %c1_21 = arith.constant 1 : index
    %c0_22 = arith.constant 0 : index
    %c0_23 = arith.constant 0 : index
    %54 = vector.load %arg4[%c1_21, %c0_22, %c0_23] : memref<3x512x512xf32, #tpu.memory_space<vmem>>, vector<1x512x512xf32>
    %55 = vector.shape_cast %54 : vector<1x512x512xf32> to vector<512x512xf32>
    %cst_24 = arith.constant dense<0.000000e+00> : vector<64x512xf32>
    %56 = tpu.matmul %53, %55, %cst_24 {dimension_numbers = #tpu.dot_dimension_numbers<[1], [0], [0], [1], [0, 0, 1, 1], [], []>} : vector<64x512xf32>, vector<512x512xf32>, vector<64x512xf32> -> vector<64x512xf32>
    %cst_25 = arith.constant 0.000000e+00 : f32
    %57 = vector.broadcast %cst_25 : f32 to vector<2x512xf32>
    %58 = vector.extract_strided_slice %53 {offsets = [0, 0], sizes = [62, 512], strides = [1, 1]} : vector<64x512xf32> to vector<62x512xf32>
    %59 = tpu.concatenate %57, %58 in 0 : vector<2x512xf32>, vector<62x512xf32> -> vector<64x512xf32>
    %c0_26 = arith.constant 0 : index
    %c0_27 = arith.constant 0 : index
    %c0_28 = arith.constant 0 : index
    %60 = vector.load %arg4[%c0_26, %c0_27, %c0_28] : memref<3x512x512xf32, #tpu.memory_space<vmem>>, vector<1x512x512xf32>
    %61 = vector.shape_cast %60 : vector<1x512x512xf32> to vector<512x512xf32>
    %cst_29 = arith.constant dense<0.000000e+00> : vector<64x512xf32>
    %62 = tpu.matmul %59, %61, %cst_29 {dimension_numbers = #tpu.dot_dimension_numbers<[1], [0], [0], [1], [0, 0, 1, 1], [], []>} : vector<64x512xf32>, vector<512x512xf32>, vector<64x512xf32> -> vector<64x512xf32>
    %63 = arith.addf %56, %62 : vector<64x512xf32>
    %64 = vector.extract_strided_slice %53 {offsets = [2, 0], sizes = [62, 512], strides = [1, 1]} : vector<64x512xf32> to vector<62x512xf32>
    %cst_30 = arith.constant 0.000000e+00 : f32
    %65 = vector.broadcast %cst_30 : f32 to vector<2x512xf32>
    %66 = tpu.concatenate %64, %65 in 0 : vector<62x512xf32>, vector<2x512xf32> -> vector<64x512xf32>
    %c2_31 = arith.constant 2 : index
    %c0_32 = arith.constant 0 : index
    %c0_33 = arith.constant 0 : index
    %67 = vector.load %arg4[%c2_31, %c0_32, %c0_33] : memref<3x512x512xf32, #tpu.memory_space<vmem>>, vector<1x512x512xf32>
    %68 = vector.shape_cast %67 : vector<1x512x512xf32> to vector<512x512xf32>
    %cst_34 = arith.constant dense<0.000000e+00> : vector<64x512xf32>
    %69 = tpu.matmul %66, %68, %cst_34 {dimension_numbers = #tpu.dot_dimension_numbers<[1], [0], [0], [1], [0, 0, 1, 1], [], []>} : vector<64x512xf32>, vector<512x512xf32>, vector<64x512xf32> -> vector<64x512xf32>
    %70 = arith.addf %63, %69 : vector<64x512xf32>
    %c0_35 = arith.constant 0 : index
    %c0_36 = arith.constant 0 : index
    %71 = vector.load %arg5[%c0_35, %c0_36] : memref<1x512xf32, #tpu.memory_space<vmem>>, vector<1x512xf32>
    %72 = vector.broadcast %71 : vector<1x512xf32> to vector<64x512xf32>
    %73 = arith.addf %70, %72 : vector<64x512xf32>
    %cst_37 = arith.constant 0.000000e+00 : f32
    %74 = vector.broadcast %cst_37 : f32 to vector<64x512xf32>
    %75 = arith.maximumf %73, %74 : vector<64x512xf32>
    %76 = vector.extract_strided_slice %75 {offsets = [0, 32], sizes = [64, 480], strides = [1, 1]} : vector<64x512xf32> to vector<64x480xf32>
    %cst_38 = arith.constant 0.000000e+00 : f32
    %77 = vector.broadcast %cst_38 : f32 to vector<64x32xf32>
    %78 = tpu.concatenate %76, %77 in 1 : vector<64x480xf32>, vector<64x32xf32> -> vector<64x512xf32>
    %79 = arith.maximumf %75, %78 : vector<64x512xf32>
    %80 = vector.shape_cast %79 : vector<64x512xf32> to vector<2x32x512xf32>
    %cst_39 = arith.constant 0.000000e+00 : f32
    %81 = vector.broadcast %cst_39 : f32 to vector<2x128xf32>
    %82 = vector.extract_strided_slice %80 {offsets = [0, 0, 0], sizes = [2, 1, 512], strides = [1, 1, 1]} : vector<2x32x512xf32> to vector<2x1x512xf32>
    %83 = vector.shape_cast %82 : vector<2x1x512xf32> to vector<2x512xf32>
    %84 = vector.extract_strided_slice %80 {offsets = [0, 2, 0], sizes = [2, 1, 512], strides = [1, 1, 1]} : vector<2x32x512xf32> to vector<2x1x512xf32>
    %85 = vector.shape_cast %84 : vector<2x1x512xf32> to vector<2x512xf32>
    %86 = arith.maximumf %83, %85 : vector<2x512xf32>
    %c0_40 = arith.constant 0 : index
    %c0_41 = arith.constant 0 : index
    %c0_42 = arith.constant 0 : index
    %87 = vector.load %arg6[%c0_40, %c0_41, %c0_42] : memref<7x512x128xf32, #tpu.memory_space<vmem>>, vector<1x512x128xf32>
    %88 = vector.shape_cast %87 : vector<1x512x128xf32> to vector<512x128xf32>
    %cst_43 = arith.constant dense<0.000000e+00> : vector<2x128xf32>
    %89 = tpu.matmul %86, %88, %cst_43 {dimension_numbers = #tpu.dot_dimension_numbers<[1], [0], [0], [1], [0, 0, 1, 1], [], []>} : vector<2x512xf32>, vector<512x128xf32>, vector<2x128xf32> -> vector<2x128xf32>
    %90 = arith.addf %81, %89 : vector<2x128xf32>
    %91 = vector.extract_strided_slice %80 {offsets = [0, 4, 0], sizes = [2, 1, 512], strides = [1, 1, 1]} : vector<2x32x512xf32> to vector<2x1x512xf32>
    %92 = vector.shape_cast %91 : vector<2x1x512xf32> to vector<2x512xf32>
    %93 = vector.extract_strided_slice %80 {offsets = [0, 6, 0], sizes = [2, 1, 512], strides = [1, 1, 1]} : vector<2x32x512xf32> to vector<2x1x512xf32>
    %94 = vector.shape_cast %93 : vector<2x1x512xf32> to vector<2x512xf32>
    %95 = arith.maximumf %92, %94 : vector<2x512xf32>
    %c1_44 = arith.constant 1 : index
    %c0_45 = arith.constant 0 : index
    %c0_46 = arith.constant 0 : index
    %96 = vector.load %arg6[%c1_44, %c0_45, %c0_46] : memref<7x512x128xf32, #tpu.memory_space<vmem>>, vector<1x512x128xf32>
    %97 = vector.shape_cast %96 : vector<1x512x128xf32> to vector<512x128xf32>
    %cst_47 = arith.constant dense<0.000000e+00> : vector<2x128xf32>
    %98 = tpu.matmul %95, %97, %cst_47 {dimension_numbers = #tpu.dot_dimension_numbers<[1], [0], [0], [1], [0, 0, 1, 1], [], []>} : vector<2x512xf32>, vector<512x128xf32>, vector<2x128xf32> -> vector<2x128xf32>
    %99 = arith.addf %90, %98 : vector<2x128xf32>
    %100 = vector.extract_strided_slice %80 {offsets = [0, 8, 0], sizes = [2, 1, 512], strides = [1, 1, 1]} : vector<2x32x512xf32> to vector<2x1x512xf32>
    %101 = vector.shape_cast %100 : vector<2x1x512xf32> to vector<2x512xf32>
    %102 = vector.extract_strided_slice %80 {offsets = [0, 10, 0], sizes = [2, 1, 512], strides = [1, 1, 1]} : vector<2x32x512xf32> to vector<2x1x512xf32>
    %103 = vector.shape_cast %102 : vector<2x1x512xf32> to vector<2x512xf32>
    %104 = arith.maximumf %101, %103 : vector<2x512xf32>
    %c2_48 = arith.constant 2 : index
    %c0_49 = arith.constant 0 : index
    %c0_50 = arith.constant 0 : index
    %105 = vector.load %arg6[%c2_48, %c0_49, %c0_50] : memref<7x512x128xf32, #tpu.memory_space<vmem>>, vector<1x512x128xf32>
    %106 = vector.shape_cast %105 : vector<1x512x128xf32> to vector<512x128xf32>
    %cst_51 = arith.constant dense<0.000000e+00> : vector<2x128xf32>
    %107 = tpu.matmul %104, %106, %cst_51 {dimension_numbers = #tpu.dot_dimension_numbers<[1], [0], [0], [1], [0, 0, 1, 1], [], []>} : vector<2x512xf32>, vector<512x128xf32>, vector<2x128xf32> -> vector<2x128xf32>
    %108 = arith.addf %99, %107 : vector<2x128xf32>
    %109 = vector.extract_strided_slice %80 {offsets = [0, 12, 0], sizes = [2, 1, 512], strides = [1, 1, 1]} : vector<2x32x512xf32> to vector<2x1x512xf32>
    %110 = vector.shape_cast %109 : vector<2x1x512xf32> to vector<2x512xf32>
    %111 = vector.extract_strided_slice %80 {offsets = [0, 14, 0], sizes = [2, 1, 512], strides = [1, 1, 1]} : vector<2x32x512xf32> to vector<2x1x512xf32>
    %112 = vector.shape_cast %111 : vector<2x1x512xf32> to vector<2x512xf32>
    %113 = arith.maximumf %110, %112 : vector<2x512xf32>
    %c3 = arith.constant 3 : index
    %c0_52 = arith.constant 0 : index
    %c0_53 = arith.constant 0 : index
    %114 = vector.load %arg6[%c3, %c0_52, %c0_53] : memref<7x512x128xf32, #tpu.memory_space<vmem>>, vector<1x512x128xf32>
    %115 = vector.shape_cast %114 : vector<1x512x128xf32> to vector<512x128xf32>
    %cst_54 = arith.constant dense<0.000000e+00> : vector<2x128xf32>
    %116 = tpu.matmul %113, %115, %cst_54 {dimension_numbers = #tpu.dot_dimension_numbers<[1], [0], [0], [1], [0, 0, 1, 1], [], []>} : vector<2x512xf32>, vector<512x128xf32>, vector<2x128xf32> -> vector<2x128xf32>
    %117 = arith.addf %108, %116 : vector<2x128xf32>
    %118 = vector.extract_strided_slice %80 {offsets = [0, 16, 0], sizes = [2, 1, 512], strides = [1, 1, 1]} : vector<2x32x512xf32> to vector<2x1x512xf32>
    %119 = vector.shape_cast %118 : vector<2x1x512xf32> to vector<2x512xf32>
    %120 = vector.extract_strided_slice %80 {offsets = [0, 18, 0], sizes = [2, 1, 512], strides = [1, 1, 1]} : vector<2x32x512xf32> to vector<2x1x512xf32>
    %121 = vector.shape_cast %120 : vector<2x1x512xf32> to vector<2x512xf32>
    %122 = arith.maximumf %119, %121 : vector<2x512xf32>
    %c4 = arith.constant 4 : index
    %c0_55 = arith.constant 0 : index
    %c0_56 = arith.constant 0 : index
    %123 = vector.load %arg6[%c4, %c0_55, %c0_56] : memref<7x512x128xf32, #tpu.memory_space<vmem>>, vector<1x512x128xf32>
    %124 = vector.shape_cast %123 : vector<1x512x128xf32> to vector<512x128xf32>
    %cst_57 = arith.constant dense<0.000000e+00> : vector<2x128xf32>
    %125 = tpu.matmul %122, %124, %cst_57 {dimension_numbers = #tpu.dot_dimension_numbers<[1], [0], [0], [1], [0, 0, 1, 1], [], []>} : vector<2x512xf32>, vector<512x128xf32>, vector<2x128xf32> -> vector<2x128xf32>
    %126 = arith.addf %117, %125 : vector<2x128xf32>
    %127 = vector.extract_strided_slice %80 {offsets = [0, 20, 0], sizes = [2, 1, 512], strides = [1, 1, 1]} : vector<2x32x512xf32> to vector<2x1x512xf32>
    %128 = vector.shape_cast %127 : vector<2x1x512xf32> to vector<2x512xf32>
    %129 = vector.extract_strided_slice %80 {offsets = [0, 22, 0], sizes = [2, 1, 512], strides = [1, 1, 1]} : vector<2x32x512xf32> to vector<2x1x512xf32>
    %130 = vector.shape_cast %129 : vector<2x1x512xf32> to vector<2x512xf32>
    %131 = arith.maximumf %128, %130 : vector<2x512xf32>
    %c5 = arith.constant 5 : index
    %c0_58 = arith.constant 0 : index
    %c0_59 = arith.constant 0 : index
    %132 = vector.load %arg6[%c5, %c0_58, %c0_59] : memref<7x512x128xf32, #tpu.memory_space<vmem>>, vector<1x512x128xf32>
    %133 = vector.shape_cast %132 : vector<1x512x128xf32> to vector<512x128xf32>
    %cst_60 = arith.constant dense<0.000000e+00> : vector<2x128xf32>
    %134 = tpu.matmul %131, %133, %cst_60 {dimension_numbers = #tpu.dot_dimension_numbers<[1], [0], [0], [1], [0, 0, 1, 1], [], []>} : vector<2x512xf32>, vector<512x128xf32>, vector<2x128xf32> -> vector<2x128xf32>
    %135 = arith.addf %126, %134 : vector<2x128xf32>
    %136 = vector.extract_strided_slice %80 {offsets = [0, 24, 0], sizes = [2, 1, 512], strides = [1, 1, 1]} : vector<2x32x512xf32> to vector<2x1x512xf32>
    %137 = vector.shape_cast %136 : vector<2x1x512xf32> to vector<2x512xf32>
    %138 = vector.extract_strided_slice %80 {offsets = [0, 26, 0], sizes = [2, 1, 512], strides = [1, 1, 1]} : vector<2x32x512xf32> to vector<2x1x512xf32>
    %139 = vector.shape_cast %138 : vector<2x1x512xf32> to vector<2x512xf32>
    %140 = arith.maximumf %137, %139 : vector<2x512xf32>
    %c6 = arith.constant 6 : index
    %c0_61 = arith.constant 0 : index
    %c0_62 = arith.constant 0 : index
    %141 = vector.load %arg6[%c6, %c0_61, %c0_62] : memref<7x512x128xf32, #tpu.memory_space<vmem>>, vector<1x512x128xf32>
    %142 = vector.shape_cast %141 : vector<1x512x128xf32> to vector<512x128xf32>
    %cst_63 = arith.constant dense<0.000000e+00> : vector<2x128xf32>
    %143 = tpu.matmul %140, %142, %cst_63 {dimension_numbers = #tpu.dot_dimension_numbers<[1], [0], [0], [1], [0, 0, 1, 1], [], []>} : vector<2x512xf32>, vector<512x128xf32>, vector<2x128xf32> -> vector<2x128xf32>
    %144 = arith.addf %135, %143 : vector<2x128xf32>
    %c0_64 = arith.constant 0 : index
    %c0_65 = arith.constant 0 : index
    %145 = vector.load %arg7[%c0_64, %c0_65] : memref<1x128xf32, #tpu.memory_space<vmem>>, vector<1x128xf32>
    %146 = vector.broadcast %145 : vector<1x128xf32> to vector<2x128xf32>
    %147 = arith.addf %144, %146 : vector<2x128xf32>
    %cst_66 = arith.constant 0.000000e+00 : f32
    %148 = vector.broadcast %cst_66 : f32 to vector<2x128xf32>
    %149 = arith.maximumf %147, %148 : vector<2x128xf32>
    %c0_67 = arith.constant 0 : index
    %c0_68 = arith.constant 0 : index
    %150 = vector.load %arg8[%c0_67, %c0_68] : memref<128x10xf32, #tpu.memory_space<vmem>>, vector<128x10xf32>
    %cst_69 = arith.constant dense<0.000000e+00> : vector<2x10xf32>
    %151 = tpu.matmul %149, %150, %cst_69 {dimension_numbers = #tpu.dot_dimension_numbers<[1], [0], [0], [1], [0, 0, 1, 1], [], []>} : vector<2x128xf32>, vector<128x10xf32>, vector<2x10xf32> -> vector<2x10xf32>
    %c0_70 = arith.constant 0 : index
    %c0_71 = arith.constant 0 : index
    %152 = vector.load %arg9[%c0_70, %c0_71] : memref<1x10xf32, #tpu.memory_space<vmem>>, vector<1x10xf32>
    %153 = vector.broadcast %152 : vector<1x10xf32> to vector<2x10xf32>
    %154 = arith.addf %151, %153 : vector<2x10xf32>
    %cst_72 = arith.constant dense<0xFF800000> : vector<2xf32>
    %155 = vector.multi_reduction <maximumf>, %154, %cst_72 [1] : vector<2x10xf32> to vector<2xf32>
    %156 = vector.shape_cast %155 : vector<2xf32> to vector<2x1xf32>
    %157 = vector.broadcast %156 : vector<2x1xf32> to vector<2x10xf32>
    %158 = arith.subf %154, %157 : vector<2x10xf32>
    %159 = math.exp %158 : vector<2x10xf32>
    %cst_73 = arith.constant dense<0.000000e+00> : vector<2xf32>
    %160 = vector.multi_reduction <add>, %159, %cst_73 [1] : vector<2x10xf32> to vector<2xf32>
    %161 = vector.shape_cast %160 : vector<2xf32> to vector<2x1xf32>
    %162 = vector.broadcast %161 : vector<2x1xf32> to vector<2x10xf32>
    %163 = arith.divf %159, %162 : vector<2x10xf32>
    %c0_74 = arith.constant 0 : index
    %c0_75 = arith.constant 0 : index
    %164 = vector.load %arg10[%c0_74, %c0_75] : memref<2x10xf32, #tpu.memory_space<vmem>>, vector<2x10xf32>
    tpu.vector_store %arg10[%c0_74, %c0_75], %163 {strides = array<i32>} : memref<2x10xf32, #tpu.memory_space<vmem>>, vector<2x10xf32>,
    return
  }
  func.func @transform_0(%arg0: i32) -> (i32, i32) {
    %c0_i32 = arith.constant 0 : i32
    %c0_i32_0 = arith.constant 0 : i32
    return %arg0, %c0_i32 : i32, i32
  }
  func.func @transform_1(%arg0: i32) -> (i32, i32, i32) {
    %c0_i32 = arith.constant 0 : i32
    %c0_i32_0 = arith.constant 0 : i32
    %c0_i32_1 = arith.constant 0 : i32
    %c0_i32_2 = arith.constant 0 : i32
    return %c0_i32, %c0_i32_0, %c0_i32_1 : i32, i32, i32
  }
  func.func @transform_2(%arg0: i32) -> (i32, i32) {
    %c0_i32 = arith.constant 0 : i32
    %c0_i32_0 = arith.constant 0 : i32
    %c0_i32_1 = arith.constant 0 : i32
    return %c0_i32, %c0_i32_0 : i32, i32
  }
  func.func @transform_3(%arg0: i32) -> (i32, i32, i32) {
    %c0_i32 = arith.constant 0 : i32
    %c0_i32_0 = arith.constant 0 : i32
    %c0_i32_1 = arith.constant 0 : i32
    %c0_i32_2 = arith.constant 0 : i32
    return %c0_i32, %c0_i32_0, %c0_i32_1 : i32, i32, i32
  }
  func.func @transform_4(%arg0: i32) -> (i32, i32) {
    %c0_i32 = arith.constant 0 : i32
    %c0_i32_0 = arith.constant 0 : i32
    %c0_i32_1 = arith.constant 0 : i32
    return %c0_i32, %c0_i32_0 : i32, i32
  }
  func.func @transform_5(%arg0: i32) -> (i32, i32, i32) {
    %c0_i32 = arith.constant 0 : i32
    %c0_i32_0 = arith.constant 0 : i32
    %c0_i32_1 = arith.constant 0 : i32
    %c0_i32_2 = arith.constant 0 : i32
    return %c0_i32, %c0_i32_0, %c0_i32_1 : i32, i32, i32
  }
  func.func @transform_6(%arg0: i32) -> (i32, i32) {
    %c0_i32 = arith.constant 0 : i32
    %c0_i32_0 = arith.constant 0 : i32
    %c0_i32_1 = arith.constant 0 : i32
    return %c0_i32, %c0_i32_0 : i32, i32
  }
  func.func @transform_7(%arg0: i32) -> (i32, i32) {
    %c0_i32 = arith.constant 0 : i32
    %c0_i32_0 = arith.constant 0 : i32
    %c0_i32_1 = arith.constant 0 : i32
    return %c0_i32, %c0_i32_0 : i32, i32
  }
  func.func @transform_8(%arg0: i32) -> (i32, i32) {
    %c0_i32 = arith.constant 0 : i32
    %c0_i32_0 = arith.constant 0 : i32
    %c0_i32_1 = arith.constant 0 : i32
    return %c0_i32, %c0_i32_0 : i32, i32
  }
  func.func @transform_9(%arg0: i32) -> (i32, i32) {
    %c0_i32 = arith.constant 0 : i32
    %c0_i32_0 = arith.constant 0 : i32
    return %arg0, %c0_i32 : i32, i32
  }
}

</mosaic_0001>

<bundles_post_ra>
// kernel: tpu_custom_call.1
= control target key start
LH: loop header
LB: loop body
LE: loop exit
PB: predicated region body
PF: predicated region fallthrough
CT: control target
= control target key end

     0   :  { %14 = vsyncpa [#allocation3], 0  ;;  %s11280_s0 = inlined_call_operand.vmem [shape: f32[64,28], index: 0, kind: input, shape index: {}]   ;;  %s11281_s1 = inlined_call_operand.hbm [shape: f32[3,28,512], index: 1, kind: input, shape index: {}]   ;;  %s11282_s2 = inlined_call_operand.hbm [shape: f32[1,512], index: 2, kind: input, shape index: {}]   ;;  %s11283_s3 = inlined_call_operand.hbm [shape: f32[3,512,512], index: 3, kind: input, shape index: {}]   ;;  %s11284_s4 = inlined_call_operand.hbm [shape: f32[1,512], index: 4, kind: input, shape index: {}]   ;;  %s11285_s5 = inlined_call_operand.hbm [shape: f32[7,512,128], index: 5, kind: input, shape index: {}]   ;;  %s11286_s6 = inlined_call_operand.hbm [shape: f32[1,128], index: 6, kind: input, shape index: {}]   ;;  %s11287_s7 = inlined_call_operand.vmem [shape: f32[128,10], index: 7, kind: input, shape index: {}]   ;;  %s11288_s8 = inlined_call_operand.hbm [shape: f32[1,10], index: 8, kind: input, shape index: {}]   ;;  %s11289_s9 = inlined_call_operand.hbm [shape: f32[2,10], index: 9, kind: output, shape index: {}]  }
   0x1   :  { %15 = vsyncpa [#allocation6], 0 }
   0x2   :  { %16 = vsyncpa [#allocation9], 0 }
   0x3   :  { %17 = vsyncpa [#allocation12], 0 }
   0x4   :  { %18 = vsyncpa [#allocation4], 0  ;;  %s8590_s30 = smov [#allocation5]   ;;  %s8591_s11 = smov [#allocation8]  }
   0x5   :  { %s39_s10 = sshll.u32 %s8590_s30, 4  ;;  %s61_s12 = sshll.u32 %s8591_s11, 4  ;;  %s40_s10 = int_to_ptr.vmem [resolvable:$true] %s39_s10  ;;  %s62_s12 = int_to_ptr.vmem [resolvable:$true] %s61_s12 }
   0x6   :  { %s8404_s15 = scalar_lea.hbm %s11282_s2, 64 }
   0x7   :  { %p8405_p0 = scmp.ne.s32.totalorder %s11282_s2, %s8404_s15  ;;  %p8408_p1 = scmp.lt.u32.totalorder %s8404_s15, %s11282_s2 }
   0x9   :  { %p8410_p2 = pnand %p8408_p1, %p8405_p0 }
   0xb   :  { %8413 = shalt.err (!%p8410_p2)
}
   0xc   :  { %s8414_s20 = scalar_lea.vmem %s40_s10, 64  ;;  %p8419_p4 = scmp.lt.s32.totalorder %s40_s10, %s40_s10 }
   0xd   :  { %p8415_p3 = scmp.ne.s32.totalorder %s40_s10, %s8414_s20  ;;  %p8420_p5 = scmp.lt.s32.totalorder %s8414_s20, %s8414_s20 }
   0xf   :  { %p8421_p6 = por %p8420_p5, %p8419_p4 }
  0x11   :  { %p8422_p7 = pnand %p8421_p6, %p8415_p3 }
  0x13   :  { %8425 = shalt.err (!%p8422_p7)
}
  0x14   :  { %42 = dma.hbm_to_vmem [thread:$0]  %s11282_s2, 64, %s40_s10, [#allocation6]  }
  0x15   :  { %s8426_s25 = scalar_lea.hbm %s11284_s4, 64 }
  0x16   :  { %p8427_p8 = scmp.ne.s32.totalorder %s11284_s4, %s8426_s25  ;;  %p8430_p9 = scmp.lt.u32.totalorder %s8426_s25, %s11284_s4 }
  0x18   :  { %p8432_p10 = pnand %p8430_p9, %p8427_p8 }
  0x1a   :  { %8435 = shalt.err (!%p8432_p10)
}
  0x1b   :  { %s8436_s30 = scalar_lea.vmem %s62_s12, 64  ;;  %p8441_p12 = scmp.lt.s32.totalorder %s62_s12, %s62_s12 }
  0x1c   :  { %p8437_p11 = scmp.ne.s32.totalorder %s62_s12, %s8436_s30  ;;  %p8442_p13 = scmp.lt.s32.totalorder %s8436_s30, %s8436_s30 }
  0x1e   :  { %p8443_p0 = por %p8442_p13, %p8441_p12 }
  0x20   :  { %p8444_p1 = pnand %p8443_p0, %p8437_p11 }
  0x22   :  { %8447 = shalt.err (!%p8444_p1)
}
  0x23   :  { %64 = dma.hbm_to_vmem [thread:$0]  %s11284_s4, 64, %s62_s12, [#allocation9]  }
  0x24   :  { %s8592_s11 = smov [#allocation11]   ;;  %s8593_s14 = smov [#allocation2]  }
  0x25   :  { %s83_s13 = sshll.u32 %s8592_s11, 4  ;;  %s26_s15 = sshll.u32 %s8593_s14, 4  ;;  %s84_s13 = int_to_ptr.vmem [resolvable:$true] %s83_s13  ;;  %s8682_s15 = int_to_ptr.vmem [resolvable:$true] %s26_s15 }
  0x26   :  { %s8448_s18 = scalar_lea.hbm %s11286_s6, 16 }
  0x27   :  { %p8449_p2 = scmp.ne.s32.totalorder %s11286_s6, %s8448_s18  ;;  %p8452_p3 = scmp.lt.u32.totalorder %s8448_s18, %s11286_s6 }
  0x29   :  { %p8454_p4 = pnand %p8452_p3, %p8449_p2 }
  0x2b   :  { %8457 = shalt.err (!%p8454_p4)
}
  0x2c   :  { %s8458_s4 = scalar_lea.vmem %s84_s13, 16  ;;  %s8462_s12 = scalar_lea.vmem %s84_s13, 32 }
  0x2d   :  { %p8459_p5 = scmp.ne.s32.totalorder %s84_s13, %s8458_s4  ;;  %p8463_p6 = scmp.lt.s32.totalorder %s84_s13, %s84_s13 }
  0x2e   :  { %p8464_p7 = scmp.lt.s32.totalorder %s8462_s12, %s8458_s4 }
  0x30   :  { %p8465_p8 = por %p8464_p7, %p8463_p6 }
  0x32   :  { %p8466_p9 = pnand %p8465_p8, %p8459_p5 }
  0x34   :  { %8469 = shalt.err (!%p8466_p9)
}
  0x35   :  { %86 = dma.hbm_to_vmem [thread:$0]  %s11286_s6, 16, %s84_s13, [#allocation12]  }
  0x36   :  { %s8470_s27 = scalar_lea.hbm %s11281_s1, 6144 }
  0x37   :  { %p8471_p10 = scmp.ne.s32.totalorder %s11281_s1, %s8470_s27  ;;  %p8474_p11 = scmp.lt.u32.totalorder %s8470_s27, %s11281_s1 }
  0x39   :  { %p8476_p12 = pnand %p8474_p11, %p8471_p10 }
  0x3b   :  { %8479 = shalt.err (!%p8476_p12)
}
  0x3c   :  { %s8480_s10 = scalar_lea.vmem %s8682_s15, 6144  ;;  %p8485_p0 = scmp.lt.s32.totalorder %s8682_s15, %s8682_s15 }
  0x3d   :  { %p8481_p13 = scmp.ne.s32.totalorder %s8682_s15, %s8480_s10  ;;  %p8486_p1 = scmp.lt.s32.totalorder %s8480_s10, %s8480_s10 }
  0x3f   :  { %p8487_p2 = por %p8486_p1, %p8485_p0 }
  0x41   :  { %p8488_p3 = pnand %p8487_p2, %p8481_p13 }
  0x43   :  { %8491 = shalt.err (!%p8488_p3)
}
  0x44   :  { %s8594_s6 = smov 512   ;;  %s8595_s11 = smov 32  }
  0x45   :  { %32 = dma.hbm_to_vmem [thread:$0]  %s11281_s1, 6144, %s8682_s15, [#allocation3], %s8594_s6, %s8594_s6, %s8595_s11  }
  0x46   :  { %s8596_s16 = smov [#allocation7]   ;;  %s8597_s18 = smov [#allocation10]  }
  0x47   :  { %s48_s17 = sshll.u32 %s8596_s16, 4  ;;  %s70_s19 = sshll.u32 %s8597_s18, 4  ;;  %s49_s17 = int_to_ptr.vmem [resolvable:$true] %s48_s17  ;;  %s8713_s19 = int_to_ptr.vmem [resolvable:$true] %s70_s19 }
  0x48   :  { %s8492_s22 = scalar_lea.hbm %s11283_s3, 98304 }
  0x49   :  { %p8493_p4 = scmp.ne.s32.totalorder %s11283_s3, %s8492_s22  ;;  %p8496_p5 = scmp.lt.u32.totalorder %s8492_s22, %s11283_s3 }
  0x4b   :  { %p8498_p6 = pnand %p8496_p5, %p8493_p4 }
  0x4d   :  { %8501 = shalt.err (!%p8498_p6)
}
  0x4e   :  { %s8502_s1 = scalar_lea.vmem %s49_s17, 98304  ;;  %p8507_p8 = scmp.lt.s32.totalorder %s49_s17, %s49_s17 }
  0x4f   :  { %p8503_p7 = scmp.ne.s32.totalorder %s49_s17, %s8502_s1  ;;  %p8508_p9 = scmp.lt.s32.totalorder %s8502_s1, %s8502_s1 }
  0x51   :  { %p8509_p10 = por %p8508_p9, %p8507_p8 }
  0x53   :  { %p8510_p11 = pnand %p8509_p10, %p8503_p7 }
  0x55   :  { %8513 = shalt.err (!%p8510_p11)
}
  0x56   :  { %54 = dma.hbm_to_vmem [thread:$0]  %s11283_s3, 98304, %s49_s17, [#allocation6], %s8594_s6, %s8594_s6, %s8595_s11  }
  0x57   :  { %s8514_s28 = scalar_lea.hbm %s11285_s5, 57344 }
  0x58   :  { %p8515_p12 = scmp.ne.s32.totalorder %s11285_s5, %s8514_s28  ;;  %p8518_p13 = scmp.lt.u32.totalorder %s8514_s28, %s11285_s5 }
  0x5a   :  { %p8520_p0 = pnand %p8518_p13, %p8515_p12 }
  0x5c   :  { %8523 = shalt.err (!%p8520_p0)
}
  0x5d   :  { %s8524_s13 = scalar_lea.vmem %s8713_s19, 57344  ;;  %p8529_p2 = scmp.lt.s32.totalorder %s8713_s19, %s8713_s19 }
  0x5e   :  { %p8525_p1 = scmp.ne.s32.totalorder %s8713_s19, %s8524_s13  ;;  %p8530_p3 = scmp.lt.s32.totalorder %s8524_s13, %s8524_s13 }
  0x60   :  { %p8531_p4 = por %p8530_p3, %p8529_p2 }
  0x62   :  { %p8532_p5 = pnand %p8531_p4, %p8525_p1 }
  0x64   :  { %8535 = shalt.err (!%p8532_p5)
}
  0x65   :  { %s8598_s3 = smov 128   ;;  %s8599_s6 = smov 8  }
  0x66   :  { %76 = dma.hbm_to_vmem [thread:$0]  %s11285_s5, 57344, %s8713_s19, [#allocation9], %s8598_s3, %s8598_s3, %s8599_s6  }
  0x67   :  { %s8600_s16 = smov [#allocation13]   ;;  %s8536_s21 = scalar_lea.hbm %s11288_s8, 16 }
  0x68   :  { %s95_s17 = sshll.u32 %s8600_s16, 4  ;;  %p8537_p6 = scmp.ne.s32.totalorder %s11288_s8, %s8536_s21  ;;  %s96_s17 = int_to_ptr.vmem [resolvable:$true] %s95_s17 }
  0x69   :  { %p8540_p7 = scmp.lt.u32.totalorder %s8536_s21, %s11288_s8 }
  0x6b   :  { %p8542_p8 = pnand %p8540_p7, %p8537_p6 }
  0x6d   :  { %8545 = shalt.err (!%p8542_p8)
}
  0x6e   :  { %s8546_s24 = scalar_lea.vmem %s96_s17, 16  ;;  %s8550_s5 = scalar_lea.vmem %s96_s17, 32 }
  0x6f   :  { %p8547_p9 = scmp.ne.s32.totalorder %s96_s17, %s8546_s24  ;;  %p8551_p10 = scmp.lt.s32.totalorder %s96_s17, %s96_s17 }
  0x70   :  { %p8552_p11 = scmp.lt.s32.totalorder %s8550_s5, %s8546_s24 }
  0x72   :  { %p8553_p12 = por %p8552_p11, %p8551_p10 }
  0x74   :  { %p8554_p13 = pnand %p8553_p12, %p8547_p9 }
  0x76   :  { %8557 = shalt.err (!%p8554_p13)
}
  0x77   :  { %98 = dma.hbm_to_vmem [thread:$0]  %s11288_s8, 16, %s96_s17, [#allocation12]  }
  0x78   :  { %8580 = dma.done.wait [#allocation3], 6144  }
  0x79   :  { %8581 = vsyncadd [#allocation3], 4294961152 }
  0x7a   :  { %8582 = dma.done.wait [#allocation6], 98368  }
  0x7b   :  { %8583 = vsyncadd [#allocation6], 4294868928 }
  0x7c   :  { %8584 = dma.done.wait [#allocation9], 57408  }
  0x7d   :  { %8585 = vsyncadd [#allocation9], 4294909888 }
  0x7e   :  { %8586 = dma.done.wait [#allocation12], 32  }
  0x7f   :  { %8587 = vsyncadd [#allocation12], 4294967264  ;;  %v11290_v0 = vmov 0.0   ;;  %vm205_vm0 = vcmask 1043456   ;;  %vm8602_vm1 = vmmov 1   ;;  %v172_v2 = vld [vmem:[#allocation2 + $0x88] sm:$0xff] }
  0x80   :  { %282 = vmatprep.mubr.f32.mxu0 %v11290_v0  ;;  %306 = vmatprep.mubr.f32.mxu1 %v11290_v0  ;;  %vm8758_vm2 = vmpackc.low %vm205_vm0, %vm8602_vm1  ;;  %v176_v3 = vld [vmem:[#allocation2 + $0xa8] sm:$0xff]  ;;  %v171_v4 = vld [vmem:[#allocation2 + $0x80] sm:$0xff]  ;;  %vm152_vm3 = vcmask 1046528   ;;  %vm187_vm4 = vcmask 228352   ;;  %vm698_vm5 = vcmask 1045504   ;;  %vm1363_vm8 = vcmask 916480  }
  0x81   :  { %v6739_v5 = vpack.c.bf16 %v176_v3, %v172_v2  ;;  %v175_v6 = vld [vmem:[#allocation2 + $0xa0] sm:$0xff]  ;;  %v180_v7 = vld [vmem:[#allocation2 + $0xc8] sm:$0xff]  ;;  %v174_v22 = vld [vmem:[#allocation2 + $0x98] sm:$0xff]  ;;  %vm1909_vm9 = vcmask 1041408   ;;  %s8604_s17 = smov 96   ;;  %vm4185_vm11 = vcmask 785408  }
  0x82   :  { %v184_v8 = vld [vmem:[#allocation2 + $0xe8] sm:$0xf]  ;;  %v6741_v9 = vpack.c.bf16 %v175_v6, %v171_v4  ;;  %v179_v11 = vld [vmem:[#allocation2 + $0xc0] sm:$0xff]  ;;  %v178_v23 = vld [vmem:[#allocation2 + $0xb8] sm:$0xff]  ;;  %vm4453_vm12 = vcmask 1041409   ;;  %vm8606_vm13 = vmmov 0  }
  0x83   :  { %v6743_v10 = vpack.c.bf16 %v184_v8, %v180_v7  ;;  %v183_v12 = vld [vmem:[#allocation2 + $0xe0] sm:$0xf]  ;;  %6740 = vmatprep.subr.bf16.mxu0 %v6739_v5  ;;  %8039 = vmatprep.subr.bf16.mxu1 %v6739_v5  ;;  %v8770_v14 = vld [vmem:[%s11280_s0 + $0x8] sm:$0xff]  ;;  %v173_v24 = vld [vmem:[#allocation2 + $0x90] sm:$0xff]  ;;  %v6749_v25 = vpack.c.bf16 %v178_v23, %v174_v22  ;;  %vm6080_vm14 = vcmask 74752  }
  0x84   :  { %v8765_v13 = vld [vmem:[%s11280_s0] sm:$0xff]  ;;  %v8781_v17 = vld [vmem:[%s11280_s0 + $0x28] sm:$0xff]  ;;  %6742 = vmatpush1.bf16.msra.mxu0 %v6741_v9  ;;  %8041 = vmatpush1.bf16.msra.mxu1 %v6741_v9  ;;  %v6746_v18 = vpack.c.bf16 %v183_v12, %v179_v11  ;;  %v154_v19 = vrot.slane %v8770_v14, 1  ;;  %v177_v26 = vld [vmem:[#allocation2 + $0xb0] sm:$0xff] }
  0x85   :  { %v153_v15 = vrot.slane %v8765_v13, 1  ;;  %v8776_v16 = vld [vmem:[%s11280_s0 + $0x20] sm:$0xff]  ;;  %v162_v21 = vrot.slane %v8781_v17, 1  ;;  %6745 = vmatprep.subr.msk.bf16.mxu0 %vm8758_vm2, %v6743_v10  ;;  %8040 = vmatprep.subr.msk.bf16.mxu1 %vm8758_vm2, %v6743_v10  ;;  %v8793_v27 = vld [vmem:[%s11280_s0 + $0x10] sm:$0xff]  ;;  %v182_v29 = vld [vmem:[#allocation2 + $0xd8] sm:$0xff]  ;;  %v6751_v34 = vpack.c.bf16 %v177_v26, %v173_v24 }
  0x86   :  { %v160_v20 = vrot.slane %v8776_v16, 1  ;;  %v8798_v28 = vld [vmem:[%s11280_s0 + $0x30] sm:$0xff]  ;;  %v186_v31 = vld [vmem:[#allocation2 + $0xf8] sm:$0xf]  ;;  %v129_v32 = vld [vmem:[#allocation2 + $0x8] sm:$0xff]  ;;  %v156_v35 = vrot.slane %v8793_v27, 1 }
  0x87   :  { %v8801_v30 = vsel %vm152_vm3, %v153_v15, %v154_v19  ;;  %v164_v36 = vrot.slane %v8798_v28, 1  ;;  %v8817_v37 = vld [vmem:[%s11280_s0 + $0x18] sm:$0xff]  ;;  %v133_v38 = vld [vmem:[#allocation2 + $0x28] sm:$0xff]  ;;  %v6753_v40 = vpack.c.bf16 %v186_v31, %v182_v29  ;;  %v181_v41 = vld [vmem:[#allocation2 + $0xd0] sm:$0xff] }
  0x88   :  { %6748 = vmatpush1.bf16.msk.msra.mxu0 %vm8758_vm2, %v6746_v18  ;;  %8042 = vmatpush1.bf16.msk.msra.mxu1 %vm8758_vm2, %v6746_v18  ;;  %v8810_v33 = vsel %vm152_vm3, %v160_v20, %v162_v21  ;;  %v8822_v39 = vld [vmem:[%s11280_s0 + $0x38] sm:$0xff]  ;;  %v185_v42 = vld [vmem:[#allocation2 + $0xf0] sm:$0xf]  ;;  %v6759_v43 = vpack.c.bf16 %v133_v38, %v129_v32  ;;  %v128_v44 = vld [vmem:[#allocation2] sm:$0xff]  ;;  %v8830_v50 = vsel %vm152_vm3, %v154_v19, %v156_v35  ;;  %v158_v52 = vrot.slane %v8817_v37, 1  ;;  %s8603_s0 = smov 112  }
  0x89   :  { %6750 = vmatprep.subr.bf16.mxu1 %v6749_v25  ;;  %v132_v45 = vld [vmem:[#allocation2 + $0x20] sm:$0xff]  ;;  %v137_v46 = vld [vmem:[#allocation2 + $0x48] sm:$0xff]  ;;  %v131_v48 = vld [vmem:[#allocation2 + $0x18] sm:$0xff]  ;;  %v8833_v51 = vsel %vm152_vm3, %v162_v21, %v164_v36  ;;  %v166_v53 = vrot.slane %v8822_v39, 1  ;;  %v6756_v54 = vpack.c.bf16 %v185_v42, %v181_v41 }
  0x8a   :  { %v141_v47 = vld [vmem:[#allocation2 + $0x68] sm:$0xf]  ;;  %v135_v49 = vld [vmem:[#allocation2 + $0x38] sm:$0xff]  ;;  %v6761_v55 = vpack.c.bf16 %v132_v45, %v128_v44  ;;  %6760 = vmatprep.subr.bf16.mxu0 %v6759_v43  ;;  %v136_v57 = vld [vmem:[#allocation2 + $0x40] sm:$0xff]  ;;  %v159_v62 = vsel %vm152_vm3, %v156_v35, %v158_v52  ;;  %v161_v4 = vsel %vm152_vm3, %v158_v52, %v160_v20  ;;  %v702_v43 = vrot.slane %v8793_v27, 2 }
  0x8b   :  { %6113 = vmatmul.mubr.msk.f32.vlgmr.msra.gmra.mrb[0].mxu0 %vm187_vm4, %v8801_v30  ;;  %6117 = vmatmul.mubr.msk.f32.vlgmr.msra.gmra.mrb[0].mxu1 %vm187_vm4, %v8810_v33  ;;  %v6763_v56 = vpack.c.bf16 %v141_v47, %v137_v46  ;;  %v140_v58 = vld [vmem:[#allocation2 + $0x60] sm:$0xf]  ;;  %v6769_v59 = vpack.c.bf16 %v135_v49, %v131_v48  ;;  %v718_v60 = vld [vmem:[#allocation2 + $0x108] sm:$0xff]  ;;  %v8848_v63 = vsel %vm152_vm3, %v164_v36, %v166_v53  ;;  %v8863_v5 = vsel %vm152_vm3, %v166_v53, 0.0  ;;  %v130_v6 = vld [vmem:[#allocation2 + $0x10] sm:$0xff] }
  0x8c   :  { %6752 = vmatpush1.bf16.msra.mxu1 %v6751_v34  ;;  %288 = vmatprep.mubr.f32.mxu0 %v11290_v0  ;;  %v722_v61 = vld [vmem:[#allocation2 + $0x128] sm:$0xff]  ;;  %v6766_v2 = vpack.c.bf16 %v140_v58, %v136_v57  ;;  %v134_v7 = vld [vmem:[#allocation2 + $0x30] sm:$0xff]  ;;  %v139_v8 = vld [vmem:[#allocation2 + $0x58] sm:$0xff]  ;;  %v704_v48 = vrot.slane %v8817_v37, 2  ;;  %v712_v52 = vrot.slane %v8822_v39, 2 }
  0x8d   :  { %312 = vmatprep.mubr.f32.mxu1 %v11290_v0  ;;  %6755 = vmatprep.subr.msk.bf16.mxu1 %vm8758_vm2, %v6753_v40  ;;  %v6779_v3 = vpack.c.bf16 %v722_v61, %v718_v60  ;;  %v143_v9 = vld [vmem:[#allocation2 + $0x78] sm:$0xf]  ;;  %v717_v10 = vld [vmem:[#allocation2 + $0x100] sm:$0xff]  ;;  %v6771_v12 = vpack.c.bf16 %v134_v7, %v130_v6  ;;  %v138_v18 = vld [vmem:[#allocation2 + $0x50] sm:$0xff] }
  0x8e   :  { %6762 = vmatpush1.bf16.msra.mxu0 %v6761_v55  ;;  %v721_v11 = vld [vmem:[#allocation2 + $0x120] sm:$0xff]  ;;  %v6773_v15 = vpack.c.bf16 %v143_v9, %v139_v8  ;;  %v142_v19 = vld [vmem:[#allocation2 + $0x70] sm:$0xf]  ;;  %v726_v21 = vld [vmem:[#allocation2 + $0x148] sm:$0xff]  ;;  %v715_v53 = vsel %vm698_vm5, %v712_v52, 0.0 }
  0x8f   :  { %6114 = vmatmul.mubr.msk.f32.gmra.mrb[2].mxu0 %vm187_vm4, %v8830_v50  ;;  %6118 = vmatmul.mubr.msk.f32.gmra.mrb[2].mxu1 %vm187_vm4, %v8833_v51  ;;  %v6781_v20 = vpack.c.bf16 %v721_v11, %v717_v10  ;;  %v730_v22 = vld [vmem:[#allocation2 + $0x168] sm:$0xf]  ;;  %v725_v23 = vld [vmem:[#allocation2 + $0x140] sm:$0xff]  ;;  %v720_v25 = vld [vmem:[#allocation2 + $0x118] sm:$0xff]  ;;  %v6776_v29 = vpack.c.bf16 %v142_v19, %v138_v18 }
  0x90   :  { %294 = vmatprep.mubr.f32.mxu0 %v11290_v0  ;;  %318 = vmatprep.mubr.f32.mxu1 %v11290_v0  ;;  %v729_v24 = vld [vmem:[#allocation2 + $0x160] sm:$0xf]  ;;  %v724_v26 = vld [vmem:[#allocation2 + $0x138] sm:$0xff]  ;;  %v6783_v31 = vpack.c.bf16 %v730_v22, %v726_v21  ;;  %v719_v35 = vld [vmem:[#allocation2 + $0x110] sm:$0xff] }
  0x91   :  { %6758 = vmatpush1.bf16.msk.msra.mxu1 %vm8758_vm2, %v6756_v54  ;;  %6765 = vmatprep.subr.msk.bf16.mxu0 %vm8758_vm2, %v6763_v56  ;;  %v6786_v32 = vpack.c.bf16 %v729_v24, %v725_v23  ;;  %v6789_v34 = vpack.c.bf16 %v724_v26, %v720_v25  ;;  %v723_v36 = vld [vmem:[#allocation2 + $0x130] sm:$0xff]  ;;  %v728_v38 = vld [vmem:[#allocation2 + $0x158] sm:$0xff]  ;;  %v2006_v61 = vld [vmem:[#allocation7] sm:$0xff] }
  0x92   :  { %6770 = vmatprep.subr.bf16.mxu1 %v6769_v59  ;;  %6768 = vmatpush1.bf16.msk.msra.mxu0 %vm8758_vm2, %v6766_v2  ;;  %v732_v40 = vld [vmem:[#allocation2 + $0x178] sm:$0xf]  ;;  %v6791_v42 = vpack.c.bf16 %v723_v36, %v719_v35  ;;  %v727_v45 = vld [vmem:[#allocation2 + $0x150] sm:$0xff]  ;;  %v2009_v57 = vld [vmem:[#allocation7 + $0x18] sm:$0xff] }
  0x93   :  { %6115 = vmatmul.mubr.msk.f32.gmra.mrb[4].mxu0 %vm187_vm4, %v159_v62  ;;  %6119 = vmatmul.mubr.msk.f32.gmra.mrb[4].mxu1 %vm187_vm4, %v8848_v63  ;;  %v6793_v44 = vpack.c.bf16 %v732_v40, %v728_v38  ;;  %v731_v46 = vld [vmem:[#allocation2 + $0x170] sm:$0xf]  ;;  %v2013_v60 = vld [vmem:[#allocation7 + $0x38] sm:$0xff]  ;;  %v2018_v18 = vld [vmem:[#allocation7 + $0x60] sm:$0xff] }
  0x94   :  { %300 = vmatprep.mubr.f32.mxu0 %v11290_v0  ;;  %324 = vmatprep.mubr.f32.mxu1 %v11290_v0  ;;  %v6796_v49 = vpack.c.bf16 %v731_v46, %v727_v45  ;;  %v2007_v55 = vld [vmem:[#allocation7 + $0x8] sm:$0xff]  ;;  %v6927_v2 = vpack.c.bf16 %v2013_v60, %v2009_v57  ;;  %v2017_v9 = vld [vmem:[#allocation7 + $0x58] sm:$0xff]  ;;  %v2016_v19 = vld [vmem:[#allocation7 + $0x50] sm:$0xff] }
  0x95   :  { %6780 = vmatprep.subr.bf16.mxu0 %v6779_v3  ;;  %v2011_v56 = vld [vmem:[#allocation7 + $0x28] sm:$0xff]  ;;  %v2021_v10 = vld [vmem:[#allocation7 + $0x78] sm:$0xff]  ;;  %v2020_v22 = vld [vmem:[#allocation7 + $0x70] sm:$0xff] }
  0x96   :  { %v6799_v59 = vpack.c.bf16 %v2011_v56, %v2007_v55  ;;  %v2015_v6 = vld [vmem:[#allocation7 + $0x48] sm:$0xff]  ;;  %v6933_v26 = vpack.c.bf16 %v2020_v22, %v2016_v19  ;;  %v2024_v35 = vld [vmem:[#allocation7 + $0x90] sm:$0xff]  ;;  %v2037_v45 = vld [vmem:[#allocation7 + $0xf8] sm:$0xff] }
  0x97   :  { %6116 = vmatmul.mubr.msk.f32.gmra.mrb[6].mxu0 %vm187_vm4, %v161_v4  ;;  %6120 = vmatmul.mubr.msk.f32.gmra.mrb[6].mxu1 %vm187_vm4, %v8863_v5  ;;  %v2019_v8 = vld [vmem:[#allocation7 + $0x68] sm:$0xff]  ;;  %v2028_v36 = vld [vmem:[#allocation7 + $0xb0] sm:$0xff]  ;;  %v2030_v46 = vld [vmem:[#allocation7 + $0xc0] sm:$0xff] }
  0x98   :  { %395 = vmatprep.mubr.f32.mxu1 %v11290_v0  ;;  %536 = vmatprep.mubr.f32.mxu0 %v11290_v0  ;;  %v6803_v11 = vpack.c.bf16 %v2019_v8, %v2015_v6  ;;  %v2023_v23 = vld [vmem:[#allocation7 + $0x88] sm:$0xff]  ;;  %v2038_v55 = vld [vmem:[#allocation7 + $0x100] sm:$0xff]  ;;  %v2040_v60 = vld [vmem:[#allocation7 + $0x110] sm:$0xff] }
  0x99   :  { %v2027_v24 = vld [vmem:[#allocation7 + $0xa8] sm:$0xff]  ;;  %v2042_v56 = vld [vmem:[#allocation7 + $0x120] sm:$0xff]  ;;  %v2049_v6 = vld [vmem:[#allocation7 + $0x158] sm:$0xff] }
  0x9a   :  { %v2031_v40 = vld [vmem:[#allocation7 + $0xc8] sm:$0xff]  ;;  %v2053_v8 = vld [vmem:[#allocation7 + $0x178] sm:$0xff]  ;;  %vm9450_vm10 = vmneg %vm1909_vm9 }
  0x9b   :  { %6123 = vmatmul.mubr.msk.f32.vlgmr.msra.gmra.mrb[8].mxu1 %vm187_vm4, %v8801_v30  ;;  %6133 = vmatmul.mubr.msk.f32.vlgmr.msra.gmra.mrb[0].mxu0 %vm187_vm4, %v8765_v13  ;;  %v699_v30 = vrot.slane %v8765_v13, 2  ;;  %v2055_v19 = vld [vmem:[#allocation7 + $0x188] sm:$0xff] }
  0x9c   :  { %6772 = vmatpush1.bf16.msra.mxu1 %v6771_v12  ;;  %401 = vmatprep.mubr.f32.mxu1 %v11290_v0  ;;  %v6931_v12 = vpack.c.bf16 %v2021_v10, %v2017_v9  ;;  %v2046_v9 = vld [vmem:[#allocation7 + $0x140] sm:$0xff]  ;;  %v2059_v22 = vld [vmem:[#allocation7 + $0x1a8] sm:$0xff] }
  0x9d   :  { %542 = vmatprep.mubr.f32.mxu0 %v11290_v0  ;;  %6775 = vmatprep.subr.msk.bf16.mxu1 %vm8758_vm2, %v6773_v15  ;;  %v2014_v15 = vld [vmem:[#allocation7 + $0x40] sm:$0xff] }
  0x9e   :  { %6782 = vmatpush1.bf16.msra.mxu0 %v6781_v20  ;;  %v6805_v21 = vpack.c.bf16 %v2018_v18, %v2014_v15  ;;  %v2050_v10 = vld [vmem:[#allocation7 + $0x160] sm:$0xff]  ;;  %v2048_v15 = vld [vmem:[#allocation7 + $0x150] sm:$0xff] }
  0x9f   :  { %6124 = vmatmul.mubr.msk.f32.gmra.mrb[10].mxu1 %vm187_vm4, %v8830_v50  ;;  %6134 = vmatmul.mubr.msk.f32.gmra.mrb[2].mxu0 %vm187_vm4, %v8770_v14  ;;  %v706_v50 = vrot.slane %v8776_v16, 2  ;;  %v2052_v18 = vld [vmem:[#allocation7 + $0x170] sm:$0xff] }
  0xa0   :  { %407 = vmatprep.mubr.f32.mxu1 %v11290_v0  ;;  %548 = vmatprep.mubr.f32.mxu0 %v11290_v0 }
  0xa1   :  { %6778 = vmatpush1.bf16.msk.msra.mxu1 %vm8758_vm2, %v6776_v29  ;;  %6785 = vmatprep.subr.msk.bf16.mxu0 %vm8758_vm2, %v6783_v31  ;;  %v6807_v29 = vpack.c.bf16 %v2027_v24, %v2023_v23  ;;  %v2025_v31 = vld [vmem:[#allocation7 + $0x98] sm:$0xff] }
  0xa2   :  { %6788 = vmatpush1.bf16.msk.msra.mxu0 %vm8758_vm2, %v6786_v32  ;;  %6790 = vmatprep.subr.bf16.mxu1 %v6789_v34  ;;  %v2029_v32 = vld [vmem:[#allocation7 + $0xb8] sm:$0xff]  ;;  %v2022_v34 = vld [vmem:[#allocation7 + $0x80] sm:$0xff] }
  0xa3   :  { %6125 = vmatmul.mubr.msk.f32.gmra.mrb[12].mxu1 %vm187_vm4, %v159_v62  ;;  %6135 = vmatmul.mubr.msk.f32.gmra.mrb[4].mxu0 %vm187_vm4, %v8793_v27  ;;  %v2010_v62 = vld [vmem:[#allocation7 + $0x20] sm:$0xff]  ;;  %v2057_v23 = vld [vmem:[#allocation7 + $0x198] sm:$0xff] }
  0xa4   :  { %413 = vmatprep.mubr.f32.mxu1 %v11290_v0  ;;  %554 = vmatprep.mubr.f32.mxu0 %v11290_v0  ;;  %v6801_v3 = vpack.c.bf16 %v2010_v62, %v2006_v61  ;;  %v2044_v61 = vld [vmem:[#allocation7 + $0x130] sm:$0xff]  ;;  %v9018_v62 = vld [vmem:[#allocation5] sm:$0xf] }
  0xa5   :  { %6800 = vmatprep.subr.bf16.mxu0 %v6799_v59  ;;  %v6817_v59 = vpack.c.bf16 %v2042_v56, %v2038_v55  ;;  %v2061_v24 = vld [vmem:[#allocation7 + $0x1b8] sm:$0xff]  ;;  %v2070_v55 = vld [vmem:[#allocation7 + $0x200] sm:$0xff] }
  0xa6   :  { %v2074_v56 = vld [vmem:[#allocation7 + $0x220] sm:$0xff] }
  0xa7   :  { %6126 = vmatmul.mubr.msk.f32.gmra.mrb[14].mxu1 %vm187_vm4, %v161_v4  ;;  %6136 = vmatmul.mubr.msk.f32.gmra.mrb[6].mxu0 %vm187_vm4, %v8817_v37  ;;  %v2008_v4 = vld [vmem:[#allocation7 + $0x10] sm:$0xff] }
  0xa8   :  { %419 = vmatprep.mubr.f32.mxu1 %v11290_v0  ;;  %560 = vmatprep.mubr.f32.mxu0 %v11290_v0 }
  0xab   :  { %6127 = vmatmul.mubr.msk.f32.gmra.mrb[16].mxu1 %vm187_vm4, %v8810_v33  ;;  %6137 = vmatmul.mubr.msk.f32.gmra.mrb[8].mxu0 %vm187_vm4, %v8776_v16  ;;  %v700_v33 = vrot.slane %v8770_v14, 2 }
  0xac   :  { %425 = vmatprep.mubr.f32.mxu1 %v11290_v0  ;;  %566 = vmatprep.mubr.f32.mxu0 %v11290_v0 }
  0xad   :  { %v701_v41 = vsel %vm698_vm5, %v699_v30, %v700_v33  ;;  %v703_v47 = vsel %vm698_vm5, %v700_v33, %v702_v43  ;;  %v6935_v30 = vpack.c.bf16 %v2029_v32, %v2025_v31  ;;  %v2026_v33 = vld [vmem:[#allocation7 + $0xa0] sm:$0xff]  ;;  %v6951_v31 = vpack.c.bf16 %v2061_v24, %v2057_v23  ;;  %v2084_v24 = vld [vmem:[#allocation7 + $0x270] sm:$0xff] }
  0xae   :  { %v6809_v38 = vpack.c.bf16 %v2026_v33, %v2022_v34  ;;  %v2054_v32 = vld [vmem:[#allocation7 + $0x180] sm:$0xff] }
  0xaf   :  { %6128 = vmatmul.mubr.msk.f32.gmra.mrb[18].mxu1 %vm187_vm4, %v8833_v51  ;;  %6138 = vmatmul.mubr.msk.f32.gmra.mrb[10].mxu0 %vm187_vm4, %v8781_v17  ;;  %v708_v51 = vrot.slane %v8781_v17, 2  ;;  %v2058_v34 = vld [vmem:[#allocation7 + $0x1a0] sm:$0xff] }
  0xb0   :  { %431 = vmatprep.mubr.f32.mxu1 %v11290_v0  ;;  %572 = vmatprep.mubr.f32.mxu0 %v11290_v0  ;;  %v6825_v33 = vpack.c.bf16 %v2058_v34, %v2054_v32  ;;  %v2089_v34 = vld [vmem:[#allocation7 + $0x298] sm:$0xff] }
  0xb1   :  { %v709_v1 = vsel %vm698_vm5, %v706_v50, %v708_v51 }
  0xb3   :  { %6129 = vmatmul.mubr.msk.f32.gmra.mrb[20].mxu1 %vm187_vm4, %v8848_v63  ;;  %6139 = vmatmul.mubr.msk.f32.gmra.mrb[12].mxu0 %vm187_vm4, %v8798_v28 }
  0xb4   :  { %437 = vmatprep.mubr.f32.mxu1 %v11290_v0  ;;  %578 = vmatprep.mubr.f32.mxu0 %v11290_v0 }
  0xb7   :  { %6130 = vmatmul.mubr.msk.f32.gmra.mrb[22].mxu1 %vm187_vm4, %v8863_v5  ;;  %6140 = vmatmul.mubr.msk.f32.gmra.mrb[14].mxu0 %vm187_vm4, %v8822_v39  ;;  %v2012_v5 = vld [vmem:[#allocation7 + $0x30] sm:$0xff] }
  0xb8   :  { %649 = vmatprep.mubr.f32.mxu1 %v11290_v0  ;;  %826 = vmatprep.mubr.f32.mxu0 %v11290_v0  ;;  %v6929_v7 = vpack.c.bf16 %v2012_v5, %v2008_v4  ;;  %v2047_v4 = vld [vmem:[#allocation7 + $0x148] sm:$0xff] }
  0xb9   :  { %v2051_v5 = vld [vmem:[#allocation7 + $0x168] sm:$0xff] }
  0xbb   :  { %6143 = vmatmul.mubr.msk.f32.vlgmr.msra.gmra.mrb[8].mxu1 %vm187_vm4, %v8765_v13  ;;  %6153 = vmatmul.mubr.msk.f32.vlgmr.msra.gmra.mrb[0].mxu0 %vm187_vm4, %v701_v41  ;;  %v705_v13 = vsel %vm698_vm5, %v702_v43, %v704_v48  ;;  %v6937_v43 = vpack.c.bf16 %v2028_v36, %v2024_v35  ;;  %v2060_v35 = vld [vmem:[#allocation7 + $0x1b0] sm:$0xff]  ;;  %v2063_v36 = vld [vmem:[#allocation7 + $0x1c8] sm:$0xff] }
  0xbc   :  { %6792 = vmatpush1.bf16.msra.mxu1 %v6791_v42  ;;  %655 = vmatprep.mubr.f32.mxu1 %v11290_v0  ;;  %v2033_v42 = vld [vmem:[#allocation7 + $0xd8] sm:$0xff] }
  0xbd   :  { %832 = vmatprep.mubr.f32.mxu0 %v11290_v0  ;;  %6795 = vmatprep.subr.msk.bf16.mxu1 %vm8758_vm2, %v6793_v44 }
  0xbe   :  { %6802 = vmatpush1.bf16.msra.mxu0 %v6801_v3 }
  0xbf   :  { %6144 = vmatmul.mubr.msk.f32.gmra.mrb[10].mxu1 %vm187_vm4, %v8770_v14  ;;  %6154 = vmatmul.mubr.msk.f32.gmra.mrb[2].mxu0 %vm187_vm4, %v703_v47  ;;  %v707_v14 = vsel %vm698_vm5, %v704_v48, %v706_v50  ;;  %v6939_v48 = vpack.c.bf16 %v2037_v45, %v2033_v42  ;;  %v2062_v45 = vld [vmem:[#allocation7 + $0x1c0] sm:$0xff] }
  0xc0   :  { %661 = vmatprep.mubr.f32.mxu1 %v11290_v0  ;;  %838 = vmatprep.mubr.f32.mxu0 %v11290_v0 }
  0xc1   :  { %6798 = vmatpush1.bf16.msk.msra.mxu1 %vm8758_vm2, %v6796_v49  ;;  %6804 = vmatprep.subr.bf16.mxu0 %v6803_v11  ;;  %v2032_v49 = vld [vmem:[#allocation7 + $0xd0] sm:$0xff]  ;;  %v6947_v11 = vpack.c.bf16 %v2053_v8, %v2049_v6  ;;  %v2083_v6 = vld [vmem:[#allocation7 + $0x268] sm:$0xff]  ;;  %v2085_v8 = vld [vmem:[#allocation7 + $0x278] sm:$0xff] }
  0xc2   :  { %6928 = vmatprep.subr.bf16.mxu1 %v6927_v2  ;;  %6806 = vmatpush1.bf16.msra.mxu0 %v6805_v21  ;;  %v6945_v2 = vpack.c.bf16 %v2044_v61, %v2040_v60  ;;  %v6949_v21 = vpack.c.bf16 %v2052_v18, %v2048_v15  ;;  %v2072_v61 = vld [vmem:[#allocation7 + $0x210] sm:$0xff]  ;;  %v2078_v15 = vld [vmem:[#allocation7 + $0x240] sm:$0xff] }
  0xc3   :  { %6145 = vmatmul.mubr.msk.f32.gmra.mrb[12].mxu1 %vm187_vm4, %v8793_v27  ;;  %6155 = vmatmul.mubr.msk.f32.gmra.mrb[4].mxu0 %vm187_vm4, %v705_v13  ;;  %v710_v27 = vrot.slane %v8798_v28, 2  ;;  %v2082_v18 = vld [vmem:[#allocation7 + $0x260] sm:$0xff] }
  0xc4   :  { %667 = vmatprep.mubr.f32.mxu1 %v11290_v0  ;;  %844 = vmatprep.mubr.f32.mxu0 %v11290_v0 }
  0xc5   :  { %6808 = vmatprep.subr.bf16.mxu0 %v6807_v29  ;;  %v6823_v29 = vpack.c.bf16 %v2059_v22, %v2055_v19  ;;  %v2080_v19 = vld [vmem:[#allocation7 + $0x250] sm:$0xff] }
  0xc6   :  { %6810 = vmatpush1.bf16.msra.mxu0 %v6809_v38  ;;  %v2067_v38 = vld [vmem:[#allocation7 + $0x1e8] sm:$0xff] }
  0xc7   :  { %6146 = vmatmul.mubr.msk.f32.gmra.mrb[14].mxu1 %vm187_vm4, %v8817_v37  ;;  %6156 = vmatmul.mubr.msk.f32.gmra.mrb[6].mxu0 %vm187_vm4, %v707_v14  ;;  %v711_v37 = vsel %vm698_vm5, %v708_v51, %v710_v27  ;;  %v1020_v51 = vlaneseq  ;;  %v6827_v42 = vpack.c.bf16 %v2067_v38, %v2063_v36  ;;  %v2086_v38 = vld [vmem:[#allocation7 + $0x280] sm:$0xff] }
  0xc8   :  { %673 = vmatprep.mubr.f32.mxu1 %v11290_v0  ;;  %850 = vmatprep.mubr.f32.mxu0 %v11290_v0 }
  0xcb   :  { %6147 = vmatmul.mubr.msk.f32.gmra.mrb[16].mxu1 %vm187_vm4, %v8776_v16  ;;  %6157 = vmatmul.mubr.msk.f32.gmra.mrb[8].mxu0 %vm187_vm4, %v709_v1  ;;  %v713_v16 = vsel %vm698_vm5, %v710_v27, %v712_v52  ;;  %v2039_v27 = vld [vmem:[#allocation7 + $0x108] sm:$0xff]  ;;  %v2041_v52 = vld [vmem:[#allocation7 + $0x118] sm:$0xff] }
  0xcc   :  { %679 = vmatprep.mubr.f32.mxu1 %v11290_v0  ;;  %856 = vmatprep.mubr.f32.mxu0 %v11290_v0 }
  0xcf   :  { %6148 = vmatmul.mubr.msk.f32.gmra.mrb[18].mxu1 %vm187_vm4, %v8781_v17  ;;  %6158 = vmatmul.mubr.msk.f32.gmra.mrb[10].mxu0 %vm187_vm4, %v711_v37 }
  0xd0   :  { %685 = vmatprep.mubr.f32.mxu1 %v11290_v0  ;;  %862 = vmatprep.mubr.f32.mxu0 %v11290_v0 }
  0xd3   :  { %6149 = vmatmul.mubr.msk.f32.gmra.mrb[20].mxu1 %vm187_vm4, %v8798_v28  ;;  %6159 = vmatmul.mubr.msk.f32.gmra.mrb[12].mxu0 %vm187_vm4, %v713_v16 }
  0xd4   :  { %691 = vmatprep.mubr.f32.mxu1 %v11290_v0  ;;  %868 = vmatprep.mubr.f32.mxu0 %v11290_v0 }
  0xd7   :  { %6150 = vmatmul.mubr.msk.f32.gmra.mrb[22].mxu1 %vm187_vm4, %v8822_v39  ;;  %6160 = vmatmul.mubr.msk.f32.gmra.mrb[14].mxu0 %vm187_vm4, %v715_v53 }
  0xd8   :  { %939 = vmatprep.mubr.f32.mxu1 %v11290_v0 }
  0xdb   :  { %6163 = vmatmul.mubr.msk.f32.vlgmr.msra.gmra.mrb[8].mxu1 %vm187_vm4, %v701_v41  ;;  %v2035_v41 = vld [vmem:[#allocation7 + $0xe8] sm:$0xff] }
  0xdc   :  { %945 = vmatprep.mubr.f32.mxu1 %v11290_v0  ;;  %6930 = vmatpush1.bf16.msra.mxu1 %v6929_v7  ;;  %v6811_v44 = vpack.c.bf16 %v2035_v41, %v2031_v40  ;;  %v6819_v7 = vpack.c.bf16 %v2051_v5, %v2047_v4  ;;  %v2079_v4 = vld [vmem:[#allocation7 + $0x248] sm:$0xff] }
  0xdd   :  { %6932 = vmatprep.subr.bf16.mxu1 %v6931_v12  ;;  %v6821_v12 = vpack.c.bf16 %v2050_v10, %v2046_v9  ;;  %v6833_v10 = vpack.c.bf16 %v2074_v56, %v2070_v55  ;;  %v2096_v55 = vld [vmem:[#allocation7 + $0x2d0] sm:$0xff] }
  0xde   :  { %6812 = vmatprep.subr.bf16.mxu0 %v6811_v44  ;;  %v2069_v44 = vld [vmem:[#allocation7 + $0x1f8] sm:$0xff]  ;;  %v2100_v56 = vld [vmem:[#allocation7 + $0x2f0] sm:$0xff] }
  0xdf   :  { %6164 = vmatmul.mubr.msk.f32.gmra.mrb[10].mxu1 %vm187_vm4, %v703_v47  ;;  %v2034_v47 = vld [vmem:[#allocation7 + $0xe0] sm:$0xff] }
  0xe0   :  { %951 = vmatprep.mubr.f32.mxu1 %v11290_v0  ;;  %6934 = vmatpush1.bf16.msra.mxu1 %v6933_v26  ;;  %v6813_v50 = vpack.c.bf16 %v2034_v47, %v2030_v46 }
  0xe1   :  { %6936 = vmatprep.subr.bf16.mxu1 %v6935_v30  ;;  %v2056_v30 = vld [vmem:[#allocation7 + $0x190] sm:$0xff] }
  0xe2   :  { %6814 = vmatpush1.bf16.msra.mxu0 %v6813_v50  ;;  %v6953_v41 = vpack.c.bf16 %v2060_v35, %v2056_v30  ;;  %v2093_v30 = vld [vmem:[#allocation7 + $0x2b8] sm:$0xff]  ;;  %v6965_v35 = vpack.c.bf16 %v2084_v24, %v2080_v19  ;;  %v2106_v19 = vld [vmem:[#allocation7 + $0x320] sm:$0xff] }
  0xe3   :  { %6165 = vmatmul.mubr.msk.f32.gmra.mrb[12].mxu1 %vm187_vm4, %v705_v13  ;;  %v2036_v13 = vld [vmem:[#allocation7 + $0xf0] sm:$0xff] }
  0xe4   :  { %957 = vmatprep.mubr.f32.mxu1 %v11290_v0  ;;  %6938 = vmatpush1.bf16.msra.mxu1 %v6937_v43  ;;  %v2065_v43 = vld [vmem:[#allocation7 + $0x1d8] sm:$0xff] }
  0xe5   :  { %6940 = vmatprep.subr.bf16.mxu1 %v6939_v48  ;;  %v6955_v47 = vpack.c.bf16 %v2069_v44, %v2065_v43  ;;  %v2066_v48 = vld [vmem:[#allocation7 + $0x1e0] sm:$0xff]  ;;  %v6967_v44 = vpack.c.bf16 %v2093_v30, %v2089_v34  ;;  %v2108_v34 = vld [vmem:[#allocation7 + $0x330] sm:$0xff] }
  0xe7   :  { %6166 = vmatmul.mubr.msk.f32.gmra.mrb[14].mxu1 %vm187_vm4, %v707_v14  ;;  %v6941_v14 = vpack.c.bf16 %v2036_v13, %v2032_v49  ;;  %v2064_v49 = vld [vmem:[#allocation7 + $0x1d0] sm:$0xff] }
  0xe8   :  { %963 = vmatprep.mubr.f32.mxu1 %v11290_v0  ;;  %v2068_v13 = vld [vmem:[#allocation7 + $0x1f0] sm:$0xff] }
  0xe9   :  { %6942 = vmatpush1.bf16.msra.mxu1 %v6941_v14  ;;  %v6829_v14 = vpack.c.bf16 %v2066_v48, %v2062_v45  ;;  %v2092_v45 = vld [vmem:[#allocation7 + $0x2b0] sm:$0xff] }
  0xeb   :  { %6167 = vmatmul.mubr.msk.f32.gmra.mrb[16].mxu1 %vm187_vm4, %v709_v1  ;;  %v9016_v1 = vshrl.u32 %v1020_v51, 7  ;;  %v2071_v51 = vld [vmem:[#allocation7 + $0x208] sm:$0xff] }
  0xec   :  { %969 = vmatprep.mubr.f32.mxu1 %v11290_v0 }
  0xed   :  { %11450 = vst [vmem:[#allocation20_spill] sm:$0xff] %v9016_v1  ;;  %v11293_v3 = vsub.s32 1, %v9016_v1  ;;  %v1028_v24 = vadd.s32 56, %v9016_v1  ;;  %v11292_v30 = vsub.s32 0, %v9016_v1 }
  0xef   :  { %6168 = vmatmul.mubr.msk.f32.gmra.mrb[18].mxu1 %vm187_vm4, %v711_v37  ;;  %v2043_v37 = vld [vmem:[#allocation7 + $0x128] sm:$0xff]  ;;  %v9024_v26 = vrot.slane %v9018_v62, %v11293_v3  ;;  %v9324_v3 = vld [vmem:[#allocation7 + $0x420] sm:$0xff] }
  0xf0   :  { %975 = vmatprep.mubr.f32.mxu1 %v11290_v0 }
  0xf3   :  { %6169 = vmatmul.mubr.msk.f32.gmra.mrb[20].mxu1 %vm187_vm4, %v713_v16  ;;  %v6815_v16 = vpack.c.bf16 %v2043_v37, %v2039_v27  ;;  %v2075_v27 = vld [vmem:[#allocation7 + $0x228] sm:$0xff]  ;;  %v2073_v37 = vld [vmem:[#allocation7 + $0x218] sm:$0xff] }
  0xf4   :  { %981 = vmatprep.mubr.f32.mxu1 %v11290_v0 }
  0xf5   :  { %6816 = vmatprep.subr.bf16.mxu0 %v6815_v16  ;;  %v6831_v16 = vpack.c.bf16 %v2075_v27, %v2071_v51 }
  0xf6   :  { %6818 = vmatpush1.bf16.msra.mxu0 %v6817_v59 }
  0xf7   :  { %6170 = vmatmul.mubr.msk.f32.gmra.mrb[22].mxu1 %vm187_vm4, %v715_v53  ;;  %v2045_v53 = vld [vmem:[#allocation7 + $0x138] sm:$0xff]  ;;  %6820 = vmatprep.subr.bf16.mxu0 %v6819_v7 }
  0xf8   :  { %v6943_v57 = vpack.c.bf16 %v2045_v53, %v2041_v52  ;;  %v6957_v52 = vpack.c.bf16 %v2068_v13, %v2064_v49  ;;  %v2077_v53 = vld [vmem:[#allocation7 + $0x238] sm:$0xff] }
  0xf9   :  { %v6959_v60 = vpack.c.bf16 %v2077_v53, %v2073_v37  ;;  %v2081_v7 = vld [vmem:[#allocation7 + $0x258] sm:$0xff]  ;;  %v2094_v37 = vld [vmem:[#allocation7 + $0x2c0] sm:$0xff] }
  0xfa   :  { %6944 = vmatprep.subr.bf16.mxu1 %v6943_v57  ;;  %6822 = vmatpush1.bf16.msra.mxu0 %v6821_v12  ;;  %v6835_v12 = vpack.c.bf16 %v2083_v6, %v2079_v4  ;;  %v6963_v23 = vpack.c.bf16 %v2085_v8, %v2081_v7  ;;  %v2097_v49 = vld [vmem:[#allocation7 + $0x2d8] sm:$0xff] }
  0xfb   :  { %6946 = vmatpush1.bf16.msra.mxu1 %v6945_v2  ;;  %6824 = vmatprep.subr.bf16.mxu0 %v6823_v29  ;;  %v2076_v2 = vld [vmem:[#allocation7 + $0x230] sm:$0xff]  ;;  %v2087_v29 = vld [vmem:[#allocation7 + $0x288] sm:$0xff]  ;;  %v2101_v13 = vld [vmem:[#allocation7 + $0x2f8] sm:$0xff] }
  0xfc   :  { %6948 = vmatprep.subr.bf16.mxu1 %v6947_v11  ;;  %v6961_v11 = vpack.c.bf16 %v2076_v2, %v2072_v61  ;;  %v6971_v53 = vpack.c.bf16 %v2101_v13, %v2097_v49  ;;  %v2114_v49 = vld [vmem:[#allocation7 + $0x360] sm:$0xff] }
  0xfe   :  { %6826 = vmatpush1.bf16.msra.mxu0 %v6825_v33  ;;  %v6837_v33 = vpack.c.bf16 %v2082_v18, %v2078_v15  ;;  %v2109_v15 = vld [vmem:[#allocation7 + $0x338] sm:$0xff]  ;;  %v2102_v18 = vld [vmem:[#allocation7 + $0x300] sm:$0xff] }
  0xff   :  { %6950 = vmatpush1.bf16.msra.mxu1 %v6949_v21  ;;  %6828 = vmatprep.subr.bf16.mxu0 %v6827_v42  ;;  %v2088_v42 = vld [vmem:[#allocation7 + $0x290] sm:$0xff] }
 0x100   :  { %6952 = vmatprep.subr.bf16.mxu1 %v6951_v31  ;;  %v2091_v31 = vld [vmem:[#allocation7 + $0x2a8] sm:$0xff]  ;;  %v6969_v51 = vpack.c.bf16 %v2092_v45, %v2088_v42  ;;  %v2113_v45 = vld [vmem:[#allocation7 + $0x358] sm:$0xff] }
 0x101   :  { %v6839_v36 = vpack.c.bf16 %v2091_v31, %v2087_v29  ;;  %v6849_v31 = vpack.c.bf16 %v2106_v19, %v2102_v18  ;;  %v2111_v42 = vld [vmem:[#allocation7 + $0x348] sm:$0xff] }
 0x102   :  { %6830 = vmatpush1.bf16.msra.mxu0 %v6829_v14 }
 0x103   :  { %6954 = vmatpush1.bf16.msra.mxu1 %v6953_v41  ;;  %6832 = vmatprep.subr.bf16.mxu0 %v6831_v16  ;;  %v2090_v41 = vld [vmem:[#allocation7 + $0x2a0] sm:$0xff] }
 0x104   :  { %6956 = vmatprep.subr.bf16.mxu1 %v6955_v47  ;;  %v2099_v47 = vld [vmem:[#allocation7 + $0x2e8] sm:$0xff]  ;;  %v6841_v14 = vpack.c.bf16 %v2090_v41, %v2086_v38  ;;  %v11291_v41 = vsub.s32 3, %v9016_v1 }
 0x106   :  { %6834 = vmatpush1.bf16.msra.mxu0 %v6833_v10 }
 0x107   :  { %6958 = vmatpush1.bf16.msra.mxu1 %v6957_v52  ;;  %6836 = vmatprep.subr.bf16.mxu0 %v6835_v12  ;;  %v2098_v52 = vld [vmem:[#allocation7 + $0x2e0] sm:$0xff]  ;;  %v2105_v12 = vld [vmem:[#allocation7 + $0x318] sm:$0xff] }
 0x108   :  { %6960 = vmatprep.subr.bf16.mxu1 %v6959_v60  ;;  %v6845_v4 = vpack.c.bf16 %v2098_v52, %v2094_v37  ;;  %v6975_v29 = vpack.c.bf16 %v2109_v15, %v2105_v12  ;;  %v2112_v37 = vld [vmem:[#allocation7 + $0x350] sm:$0xff]  ;;  %v2118_v12 = vld [vmem:[#allocation7 + $0x380] sm:$0xff] }
 0x109   :  { %v2116_v52 = vld [vmem:[#allocation7 + $0x370] sm:$0xff] }
 0x10a   :  { %6838 = vmatpush1.bf16.msra.mxu0 %v6837_v33 }
 0x10b   :  { %6962 = vmatpush1.bf16.msra.mxu1 %v6961_v11  ;;  %6840 = vmatprep.subr.bf16.mxu0 %v6839_v36  ;;  %v2107_v11 = vld [vmem:[#allocation7 + $0x328] sm:$0xff] }
 0x10c   :  { %6964 = vmatprep.subr.bf16.mxu1 %v6963_v23 }
 0x10e   :  { %6842 = vmatpush1.bf16.msra.mxu0 %v6841_v14  ;;  %v1082_v14 = vand.u32 31, %v1028_v24  ;;  %v2124_v24 = vld [vmem:[#allocation7 + $0x3b0] sm:$0xff] }
 0x10f   :  { %6966 = vmatpush1.bf16.msra.mxu1 %v6965_v35  ;;  %v11294_v35 = vsub.s32 2, %v9016_v1 }
 0x110   :  { %6968 = vmatprep.subr.bf16.mxu1 %v6967_v44  ;;  %v2115_v44 = vld [vmem:[#allocation7 + $0x368] sm:$0xff]  ;;  %vm9093_vm6 = vcmp.lt.s32.totalorder %v1082_v14, 28  ;;  %v2133_v14 = vld [vmem:[#allocation7 + $0x3f8] sm:$0xff] }
 0x113   :  { %6970 = vmatpush1.bf16.msra.mxu1 %v6969_v51 }
 0x114   :  { %6972 = vmatprep.subr.bf16.mxu1 %v6971_v53 }
 0x15e   :  { %v9000_v17 = vpop.f32.mrb[0].mxu1 }
 0x15f   :  { %v9002_v28 = vpop.f32.mrb[1].mxu1 }
 0x162   :  { %v9004_v39 = vpop.f32.mrb[2].mxu1 }
 0x163   :  { %v9006_v54 = vpop.f32.mrb[3].mxu1 }
 0x166   :  { %v9008_v58 = vpop.f32.mrb[4].mxu1 }
 0x167   :  { %v9010_v63 = vpop.f32.mrb[5].mxu1 }
 0x16a   :  { %v9012_v20 = vpop.f32.mrb[6].mxu1 }
 0x16b   :  { %v9014_v25 = vpop.f32.mrb[7].mxu1 }
 0x18e   :  { %v9026_v40 = vpop.f32.mrb[0].mxu0 }
 0x18f   :  { %v830_v46 = vpop.f32.mrb[1].mxu0 }
 0x190   :  { %v9029_v50 = vadd.f32 %v9024_v26, %v830_v46  ;;  %v2095_v46 = vld [vmem:[#allocation7 + $0x2c8] sm:$0xff] }
 0x191   :  { %v6843_v27 = vpack.c.bf16 %v2099_v47, %v2095_v46  ;;  %v6851_v46 = vpack.c.bf16 %v2115_v44, %v2111_v42  ;;  %v2117_v47 = vld [vmem:[#allocation7 + $0x378] sm:$0xff] }
 0x192   :  { %v1188_v57 = vmax.f32 %v9029_v50, 0.0  ;;  %v9032_v59 = vpop.f32.mrb[2].mxu0  ;;  %v6979_v51 = vpack.c.bf16 %v2117_v47, %v2113_v45  ;;  %v2127_v45 = vld [vmem:[#allocation7 + $0x3c8] sm:$0xff]  ;;  %v2129_v47 = vld [vmem:[#allocation7 + $0x3d8] sm:$0xff]  ;;  %v9363_v50 = vld [vmem:[#allocation7 + $0x4a0] sm:$0xff] }
 0x193   :  { %v836_v5 = vpop.f32.mrb[3].mxu0  ;;  %6844 = vmatprep.subr.bf16.mxu0 %v6843_v27 }
 0x194   :  { %v9035_v9 = vadd.f32 %v9024_v26, %v836_v5  ;;  %1301 = vrot.lane.b32.xlu0 %v1188_v57, %s8603_s0  ;;  %v6973_v5 = vpack.c.bf16 %v2100_v56, %v2096_v55  ;;  %6846 = vmatpush1.bf16.msra.mxu0 %v6845_v4  ;;  %v9083_v55 = vrot.slane %v9018_v62, %v11294_v35  ;;  %v9326_v35 = vld [vmem:[#allocation7 + $0x410] sm:$0xff] }
 0x195   :  { %v6981_v56 = vpack.c.bf16 %v2116_v52, %v2112_v37  ;;  %v9089_v4 = vrot.slane %v9018_v62, %v11291_v41 }
 0x196   :  { %v1192_v21 = vmax.f32 %v9035_v9, 0.0  ;;  %v9041_v22 = vpop.f32.mrb[4].mxu0  ;;  %6974 = vmatpush1.bf16.msra.mxu1 %v6973_v5  ;;  %v2119_v5 = vld [vmem:[#allocation7 + $0x388] sm:$0xff] }
 0x197   :  { %v9043_v32 = vpop.f32.mrb[5].mxu0  ;;  %6976 = vmatprep.subr.bf16.mxu1 %v6975_v29  ;;  %v1024_v29 = vadd.s32 24, %v9016_v1  ;;  %v9391_v1 = vld [vmem:[#allocation7 + $0x4f8] sm:$0xff]  ;;  %v9413_v9 = vld [vmem:[#allocation7 + $0x508] sm:$0xff] }
 0x198   :  { %1309 = vrot.lane.b32.xlu1 %v1192_v21, %s8603_s0  ;;  %11480 = vst [vmem:[#allocation45_spill] sm:$0xff] %v9413_v9 }
 0x19a   :  { %v9048_v43 = vpop.f32.mrb[6].mxu0 }
 0x19b   :  { %v9050_v48 = vpop.f32.mrb[7].mxu0 }
 0x19e   :  { %v852_v16 = vpop.f32.mrb[8].mxu0 }
 0x19f   :  { %v9053_v60 = vadd.f32 %v852_v16, %v9000_v17  ;;  %v854_v61 = vpop.f32.mrb[9].mxu0  ;;  %v2103_v17 = vld [vmem:[#allocation7 + $0x308] sm:$0xff] }
 0x1a0   :  { %v9056_v2 = vadd.f32 %v854_v61, %v9002_v28  ;;  %v6847_v28 = vpack.c.bf16 %v2107_v11, %v2103_v17  ;;  %v2125_v11 = vld [vmem:[#allocation7 + $0x3b8] sm:$0xff] }
 0x1a2   :  { %v858_v6 = vpop.f32.mrb[10].mxu0  ;;  %6848 = vmatprep.subr.bf16.mxu0 %v6847_v28  ;;  %v2122_v28 = vld [vmem:[#allocation7 + $0x3a0] sm:$0xff] }
 0x1a3   :  { %v9059_v7 = vadd.f32 %v858_v6, %v9004_v39  ;;  %v860_v8 = vpop.f32.mrb[11].mxu0  ;;  %v2104_v39 = vld [vmem:[#allocation7 + $0x310] sm:$0xff]  ;;  %6850 = vmatpush1.bf16.msra.mxu0 %v6849_v31  ;;  %v2123_v6 = vld [vmem:[#allocation7 + $0x3a8] sm:$0xff]  ;;  %v6857_v19 = vpack.c.bf16 %v2122_v28, %v2118_v12 }
 0x1a4   :  { %v9062_v10 = vadd.f32 %v860_v8, %v9006_v54  ;;  %v6977_v36 = vpack.c.bf16 %v2108_v34, %v2104_v39  ;;  %6852 = vmatprep.subr.bf16.mxu0 %v6851_v46  ;;  %v6855_v17 = vpack.c.bf16 %v2123_v6, %v2119_v5  ;;  %v2131_v46 = vld [vmem:[#allocation7 + $0x3e8] sm:$0xff]  ;;  %v1054_v5 = vand.u32 31, %v1024_v29 }
 0x1a5   :  { %v2139_v12 = vld [vmem:[#allocation7 + $0x428] sm:$0xff] }
 0x1a6   :  { %v864_v23 = vpop.f32.mrb[12].mxu0  ;;  %6978 = vmatpush1.bf16.msra.mxu1 %v6977_v36  ;;  %vm9142_vm7 = vcmp.lt.s32.totalorder %v1054_v5, 28 }
 0x1a7   :  { %v9067_v54 = vadd.f32 %v864_v23, %v9008_v58  ;;  %v866_v33 = vpop.f32.mrb[13].mxu0  ;;  %v2110_v58 = vld [vmem:[#allocation7 + $0x340] sm:$0xff]  ;;  %6980 = vmatprep.subr.bf16.mxu1 %v6979_v51  ;;  %v2120_v23 = vld [vmem:[#allocation7 + $0x390] sm:$0xff] }
 0x1a8   :  { %v9071_v38 = vadd.f32 %v866_v33, %v9010_v63  ;;  %v6853_v27 = vpack.c.bf16 %v2114_v49, %v2110_v58  ;;  %v9077_v63 = vrot.slane %v9018_v62, %v11292_v30  ;;  %v6985_v33 = vpack.c.bf16 %v2124_v24, %v2120_v23  ;;  %v2130_v51 = vld [vmem:[#allocation7 + $0x3e0] sm:$0xff]  ;;  %v2141_v23 = vld [vmem:[#allocation7 + $0x438] sm:$0xff] }
 0x1aa   :  { %v870_v13 = vpop.f32.mrb[14].mxu0  ;;  %6854 = vmatpush1.bf16.msra.mxu0 %v6853_v27  ;;  %6982 = vmatpush1.bf16.msra.mxu1 %v6981_v56  ;;  %v9103_v36 = vadd.f32 %v9077_v63, %v9026_v40  ;;  %v2126_v40 = vld [vmem:[#allocation7 + $0x3c0] sm:$0xff]  ;;  %v1168_v27 = vadd.f32 %v9024_v26, %v9050_v48  ;;  %v2128_v56 = vld [vmem:[#allocation7 + $0x3d0] sm:$0xff]  ;;  %v9131_v28 = vadd.f32 %v9077_v63, %v9032_v59 }
 0x1ab   :  { %v8049_v16 = vadd.f32 %v870_v13, %v9012_v20  ;;  %v872_v53 = vpop.f32.mrb[15].mxu0  ;;  %v2121_v20 = vld [vmem:[#allocation7 + $0x398] sm:$0xff]  ;;  %6856 = vmatprep.subr.bf16.mxu0 %v6855_v17  ;;  %v6859_v13 = vpack.c.bf16 %v2131_v46, %v2127_v45 }
 0x1ac   :  { %v8050_v61 = vadd.f32 %v872_v53, %v9014_v25  ;;  %v6983_v62 = vpack.c.bf16 %v2125_v11, %v2121_v20  ;;  %v6861_v53 = vpack.c.bf16 %v2130_v51, %v2126_v40  ;;  %v2135_v11 = vld [vmem:[#allocation7 + $0x408] sm:$0xff]  ;;  %v1200_v24 = vmax.f32 %v1168_v27, 0.0 }
 0x1ad   :  { %v1183_v8 = vadd.f32 %v8049_v16, %v9077_v63  ;;  %v6987_v16 = vpack.c.bf16 %v2133_v14, %v2129_v47  ;;  %v11315_v45 = vmax.f32 %v9131_v28, 0.0 }
 0x1ae   :  { %v1184_v15 = vadd.f32 %v8050_v61, %v9024_v26  ;;  %v941_v25 = vpop.f32.mrb[8].mxu1  ;;  %6984 = vmatprep.subr.bf16.mxu1 %v6983_v62  ;;  %6858 = vmatpush1.bf16.msra.mxu0 %v6857_v19  ;;  %v2132_v61 = vld [vmem:[#allocation7 + $0x3f0] sm:$0xff]  ;;  %v6863_v62 = vpack.c.bf16 %v2139_v12, %v2135_v11  ;;  %v2137_v19 = vld [vmem:[#allocation7 + $0x418] sm:$0xff]  ;;  %v9165_v47 = vsel %vm9142_vm7, %v1200_v24, 0.0  ;;  %v9216_v24 = vadd.f32 %v9059_v7, %v9077_v63 }
 0x1af   :  { %v1215_v31 = vmax.f32 %v1183_v8, 0.0  ;;  %v9099_v39 = vadd.f32 %v9083_v55, %v941_v25  ;;  %v943_v34 = vpop.f32.mrb[9].mxu1  ;;  %6986 = vmatpush1.bf16.msra.mxu1 %v6985_v33  ;;  %6860 = vmatprep.subr.bf16.mxu0 %v6859_v13  ;;  %v6989_v48 = vpack.c.bf16 %v2132_v61, %v2128_v56  ;;  %v11316_v8 = vmax.f32 %v9103_v36, 0.0 }
 0x1b0   :  { %v1216_v42 = vmax.f32 %v1184_v15, 0.0  ;;  %v9106_v44 = vadd.f32 %v9089_v4, %v943_v34  ;;  %6988 = vmatprep.subr.bf16.mxu1 %v6987_v16  ;;  %v9135_v15 = vadd.f32 %v9024_v26, %v9043_v32  ;;  %v9140_v34 = vadd.f32 %v9077_v63, %v9041_v22 }
 0x1b1   :  { %11453 = vst [vmem:[#allocation21_spill] sm:$0xff] %v9099_v39  ;;  %v11306_v58 = vmax.f32 %v9099_v39, 0.0  ;;  %v9111_v49 = vsel %vm9093_vm6, %v1215_v31, 0.0  ;;  %v6991_v31 = vpack.c.bf16 %v2141_v23, %v2137_v19  ;;  %v1167_v32 = vadd.f32 %v9077_v63, %v9048_v43 }
 0x1b2   :  { %11454 = vst [vmem:[#allocation22_spill] sm:$0xff] %v9106_v44  ;;  %11455 = vst [vmem:[#allocation23_spill] sm:$0xff] %v9111_v49  ;;  %v947_v37 = vpop.f32.mrb[10].mxu1  ;;  %v9117_v52 = vsel %vm9093_vm6, %v1216_v42, 0.0  ;;  %6862 = vmatpush1.bf16.msra.mxu0 %v6861_v53  ;;  %v11314_v43 = vmax.f32 %v9135_v15, 0.0  ;;  %v11313_v14 = vmax.f32 %v9140_v34, 0.0  ;;  %v9178_v16 = vadd.f32 %v9062_v10, %v9024_v26 }
 0x1b3   :  { %11456 = vst [vmem:[#allocation24_spill] sm:$0xff] %v9117_v52  ;;  %v9120_v6 = vadd.f32 %v9083_v55, %v947_v37  ;;  %v949_v20 = vpop.f32.mrb[11].mxu1  ;;  %1303 = vrot.lane.b32.xlu0 %v11306_v58, %s8603_s0  ;;  %6990 = vmatpush1.bf16.msra.mxu1 %v6989_v48  ;;  %v1199_v40 = vmax.f32 %v1167_v32, 0.0  ;;  %v9185_v56 = vadd.f32 %v9056_v2, %v9024_v26 }
 0x1b4   :  { %v9127_v17 = vadd.f32 %v9089_v4, %v949_v20  ;;  %6864 = vmatprep.subr.bf16.mxu0 %v6863_v62  ;;  %6992 = vmatprep.subr.bf16.mxu1 %v6991_v31  ;;  %v8285_v5 = vpack.i.bf16 %v9165_v47, %v11313_v14  ;;  %v9193_v20 = vadd.f32 %v9053_v60, %v9077_v63  ;;  %v11309_v62 = vmax.f32 %v9178_v16, 0.0  ;;  %v9361_v14 = vld [vmem:[#allocation7 + $0x480] sm:$0xff] }
 0x1b5   :  { %11457 = vst [vmem:[#allocation25_spill] sm:$0xff] %v9120_v6  ;;  %v11304_v25 = vmax.f32 %v9120_v6, 0.0  ;;  %v9197_v48 = vsel %vm9142_vm7, %v1199_v40, 0.0  ;;  %v11312_v23 = vmax.f32 %v9185_v56, 0.0 }
 0x1b6   :  { %11458 = vst [vmem:[#allocation26_spill] sm:$0xff] %v9127_v17  ;;  %v953_v29 = vpop.f32.mrb[12].mxu1  ;;  %v11311_v31 = vmax.f32 %v9193_v20, 0.0 }
 0x1b7   :  { %v9149_v33 = vadd.f32 %v9083_v55, %v953_v29  ;;  %v955_v42 = vpop.f32.mrb[13].mxu1  ;;  %1299 = vrot.lane.b32.xlu0 %v11316_v8, %s8603_s0  ;;  %1311 = vrot.lane.b32.xlu1 %v11304_v25, %s8603_s0  ;;  %v9415_v8 = vld [vmem:[#allocation7 + $0x528] sm:$0xff] }
 0x1b8   :  { %v9158_v22 = vadd.f32 %v9089_v4, %v955_v42  ;;  %v8300_v7 = vpack.i.bf16 %v11309_v62, %v11311_v31  ;;  %v9354_v62 = vld [vmem:[#allocation7 + $0x498] sm:$0xff]  ;;  %11481 = vst [vmem:[#allocation46_spill] sm:$0xff] %v9415_v8  ;;  %v11495_v8 = vmax.f32 %v9135_v15, 0.0 }
 0x1b9   :  { %11461 = vst [vmem:[#allocation27_spill] sm:$0xff] %v9149_v33  ;;  %v11305_v46 = vmax.f32 %v9149_v33, 0.0  ;;  %v9460_v33 = vld [vmem:[#allocation7 + $0x568] sm:$0xff] }
 0x1ba   :  { %11462 = vst [vmem:[#allocation28_spill] sm:$0xff] %v9158_v22  ;;  %v959_v13 = vpop.f32.mrb[14].mxu1  ;;  %11492 = vst [vmem:[#allocation53_spill] sm:$0xff] %v9460_v33  ;;  %v9518_v33 = vld [vmem:[#allocation7 + $0x5a8] sm:$0xff] }
 0x1bb   :  { %v8290_v51 = vpack.i.bf16 %v11305_v46, %v11314_v43  ;;  %v1169_v27 = vadd.f32 %v9083_v55, %v959_v13  ;;  %v961_v37 = vpop.f32.mrb[15].mxu1  ;;  %1307 = vrot.lane.b32.xlu1 %v11315_v45, %s8603_s0  ;;  %v9375_v43 = vld [vmem:[#allocation7 + $0x4b0] sm:$0xff]  ;;  %v9377_v45 = vld [vmem:[#allocation7 + $0x4c8] sm:$0xff] }
 0x1bc   :  { %v9181_v53 = vadd.f32 %v9089_v4, %v961_v37  ;;  %v9238_v37 = vadd.f32 %v9071_v38, %v9024_v26 }
 0x1bd   :  { %v1201_v61 = vmax.f32 %v1169_v27, 0.0  ;;  %8291 = vrot.lane.b32.xlu0 %v8290_v51, %s8603_s0  ;;  %v11310_v27 = vmax.f32 %v9216_v24, 0.0 }
 0x1be   :  { %v965_v10 = vpop.f32.mrb[16].mxu1  ;;  %v1202_v18 = vmax.f32 %v9181_v53, 0.0 }
 0x1bf   :  { %v9201_v2 = vsel %vm9142_vm7, %v1201_v61, 0.0  ;;  %v9204_v11 = vadd.f32 %v9083_v55, %v965_v10  ;;  %v967_v12 = vpop.f32.mrb[17].mxu1  ;;  %8286 = vrot.lane.b32.xlu1 %v8285_v5, %s8603_s0  ;;  %v9245_v10 = vadd.f32 %v9067_v54, %v9077_v63 }
 0x1c0   :  { %11463 = vst [vmem:[#allocation29_spill] sm:$0xff] %v9201_v2  ;;  %v9209_v60 = vadd.f32 %v9089_v4, %v967_v12  ;;  %v8295_v19 = vpack.i.bf16 %v9197_v48, %v9201_v2  ;;  %v9430_v2 = vld [vmem:[#allocation7 + $0x518] sm:$0xff] }
 0x1c1   :  { %11464 = vst [vmem:[#allocation30_spill] sm:$0xff] %v9204_v11  ;;  %v11302_v29 = vmax.f32 %v9204_v11, 0.0  ;;  %v11307_v63 = vmax.f32 %v9245_v10, 0.0  ;;  %11485 = vst [vmem:[#allocation48_spill] sm:$0xff] %v9430_v2  ;;  %v9434_v11 = vld [vmem:[#allocation7 + $0x500] sm:$0xff]  ;;  %v9489_v2 = vld [vmem:[#allocation7 + $0x570] sm:$0xff] }
 0x1c2   :  { %11465 = vst [vmem:[#allocation31_spill] sm:$0xff] %v9209_v60  ;;  %v971_v32 = vpop.f32.mrb[18].mxu1  ;;  %8296 = vrot.lane.b32.xlu0 %v8295_v19, %s8603_s0  ;;  %11497 = vst [vmem:[#allocation56_spill] sm:$0xff] %v9489_v2 }
 0x1c3   :  { %v8305_v42 = vpack.i.bf16 %v11302_v29, %v11312_v23  ;;  %v9226_v13 = vadd.f32 %v9083_v55, %v971_v32  ;;  %v973_v40 = vpop.f32.mrb[19].mxu1  ;;  %v11308_v32 = vmax.f32 %v9238_v37, 0.0  ;;  %v9342_v29 = vld [vmem:[#allocation7 + $0x450] sm:$0xff]  ;;  %v9359_v23 = vld [vmem:[#allocation7 + $0x4b8] sm:$0xff] }
 0x1c4   :  { %v9229_v51 = vadd.f32 %v9089_v4, %v973_v40 }
 0x1c5   :  { %11466 = vst [vmem:[#allocation32_spill] sm:$0xff] %v9226_v13  ;;  %v11299_v61 = vmax.f32 %v9226_v13, 0.0  ;;  %8306 = vrot.lane.b32.xlu1 %v8305_v42, %s8603_s0 }
 0x1c6   :  { %11467 = vst [vmem:[#allocation33_spill] sm:$0xff] %v9229_v51  ;;  %v977_v5 = vpop.f32.mrb[20].mxu1  ;;  %8301 = vrot.lane.b32.xlu0 %v8300_v7, %s8603_s0  ;;  %v11296_v53 = vmax.f32 %v9229_v51, 0.0 }
 0x1c7   :  { %v8310_v12 = vpack.i.bf16 %v11310_v27, %v11299_v61  ;;  %v9252_v19 = vadd.f32 %v9083_v55, %v977_v5  ;;  %v979_v26 = vpop.f32.mrb[21].mxu1  ;;  %v9336_v61 = vld [vmem:[#allocation7 + $0x478] sm:$0xff] }
 0x1c8   :  { %v9255_v38 = vadd.f32 %v9089_v4, %v979_v26 }
 0x1c9   :  { %11468 = vst [vmem:[#allocation34_spill] sm:$0xff] %v9252_v19  ;;  %v11300_v42 = vmax.f32 %v9252_v19, 0.0  ;;  %8311 = vrot.lane.b32.xlu1 %v8310_v12, %s8603_s0 }
 0x1ca   :  { %11469 = vst [vmem:[#allocation35_spill] sm:$0xff] %v9255_v38  ;;  %v983_v54 = vpop.f32.mrb[22].mxu1 }
 0x1cb   :  { %v8315_v40 = vpack.i.bf16 %v11300_v42, %v11308_v32  ;;  %v1185_v7 = vadd.f32 %v9083_v55, %v983_v54  ;;  %v985_v5 = vpop.f32.mrb[23].mxu1  ;;  %v11301_v55 = vmax.f32 %v9106_v44, 0.0  ;;  %v11297_v54 = vmax.f32 %v9209_v60, 0.0  ;;  %v9338_v42 = vld [vmem:[#allocation7 + $0x440] sm:$0xff]  ;;  %v9352_v32 = vld [vmem:[#allocation7 + $0x4a8] sm:$0xff]  ;;  %v9432_v44 = vld [vmem:[#allocation7 + $0x538] sm:$0xff] }
 0x1cc   :  { %v1186_v26 = vadd.f32 %v9089_v4, %v985_v5  ;;  %v11298_v4 = vmax.f32 %v9158_v22, 0.0  ;;  %v9400_v60 = vld [vmem:[#allocation7 + $0x4e0] sm:$0xff]  ;;  %11486 = vst [vmem:[#allocation49_spill] sm:$0xff] %v9432_v44 }
 0x1cd   :  { %v1217_v0 = vmax.f32 %v1185_v7, 0.0  ;;  %1347 = vrot.lane.b32.xlu1 %v11307_v63, %s8603_s0  ;;  %8316 = vrot.lane.b32.xlu0 %v8315_v40, %s8603_s0  ;;  %v9301_v40 = vsel %vm9142_vm7, %v1202_v18, 0.0  ;;  %v11295_v7 = vmax.f32 %v9255_v38, 0.0  ;;  %v9322_v18 = vld [vmem:[#allocation7 + $0x400] sm:$0xff]  ;;  %v9350_v63 = vld [vmem:[#allocation7 + $0x488] sm:$0xff]  ;;  %11477 = vst [vmem:[#allocation42_spill] sm:$0xff] %v9400_v60 }
 0x1ce   :  { %v1218_v12 = vmax.f32 %v1186_v26, 0.0  ;;  %11472 = vst [vmem:[#allocation38_spill] sm:$0xff] %v9301_v40  ;;  %v9487_v60 = vld [vmem:[#allocation7 + $0x550] sm:$0xff] }
 0x1cf   :  { %v9273_v41 = vsel %vm9093_vm6, %v1217_v0, 0.0  ;;  %v11303_v0 = vmax.f32 %v9127_v17, 0.0  ;;  %11496 = vst [vmem:[#allocation55_spill] sm:$0xff] %v9487_v60 }
 0x1d0   :  { %11470 = vst [vmem:[#allocation36_spill] sm:$0xff] %v9273_v41  ;;  %v9277_v30 = vsel %vm9093_vm6, %v1218_v12, 0.0 }
 0x1d1   :  { %11471 = vst [vmem:[#allocation37_spill] sm:$0xff] %v9277_v30  ;;  %1359 = vrot.lane.b32.xlu1 %v9273_v41, %s8603_s0  ;;  %1357 = vrot.lane.b32.xlu0 %v9117_v52, %s8603_s0  ;;  %v9470_v52 = vld [vmem:[#allocation7 + $0x558] sm:$0xff] }
 0x1d2   :  { %11494 = vst [vmem:[#allocation54_spill] sm:$0xff] %v9470_v52 }
 0x1d5   :  { %1305 = vrot.lane.b32.xlu1 %v11301_v55, %s8603_s0  ;;  %1355 = vrot.lane.b32.xlu0 %v9111_v49, %s8603_s0  ;;  %v9340_v55 = vld [vmem:[#allocation7 + $0x460] sm:$0xff] }
 0x1d9   :  { %1321 = vrot.lane.b32.xlu1 %v11298_v4, %s8603_s0  ;;  %1313 = vrot.lane.b32.xlu0 %v11303_v0, %s8603_s0  ;;  %v9334_v4 = vld [vmem:[#allocation7 + $0x458] sm:$0xff]  ;;  %v9344_v0 = vld [vmem:[#allocation7 + $0x470] sm:$0xff] }
 0x1dd   :  { %1337 = vrot.lane.b32.xlu1 %v11297_v54, %s8603_s0  ;;  %1329 = vrot.lane.b32.xlu0 %v9301_v40, %s8603_s0  ;;  %v9332_v54 = vld [vmem:[#allocation7 + $0x468] sm:$0xff] }
 0x1e1   :  { %1353 = vrot.lane.b32.xlu1 %v11295_v7, %s8603_s0  ;;  %1345 = vrot.lane.b32.xlu0 %v11296_v53, %s8603_s0  ;;  %v9328_v7 = vld [vmem:[#allocation7 + $0x430] sm:$0xff]  ;;  %v9330_v53 = vld [vmem:[#allocation7 + $0x448] sm:$0xff] }
 0x1e5   :  { %1361 = vrot.lane.b32.xlu0 %v9277_v30, %s8603_s0  ;;  %v11475_v30 = vmax.f32 %v9103_v36, 0.0  ;;  %v9446_v36 = vld [vmem:[#allocation7 + $0x530] sm:$0xff] }
 0x206   :  { %v1302_v59 = vpop.permute.xlu0 %1301 }
 0x20a   :  { %v1310_v5 = vpop.permute.xlu1 %1309 }
 0x225   :  { %v9318_v26 = vpop.permute.xlu0 %1303 }
 0x226   :  { %11473 = vst [vmem:[#allocation39_spill] sm:$0xff] %v9318_v26  ;;  %v1365_v12 = vsel %vm1363_vm8, %v1302_v59, %v9318_v26 }
 0x227   :  { %v1429_v25 = vmax.f32 %v1188_v57, %v1365_v12  ;;  %v9387_v12 = vld [vmem:[#allocation7 + $0x4e8] sm:$0xff] }
 0x229   :  { %v1300_v46 = vpop.permute.xlu0 %1299  ;;  %v9348_v58 = vpop.permute.xlu1 %1311  ;;  %v1495_v41 = vrot.slane %v1429_v25, 1 }
 0x22a   :  { %11474 = vst [vmem:[#allocation40_spill] sm:$0xff] %v9348_v58  ;;  %v1364_v27 = vsel %vm1363_vm8, %v1300_v46, %v1302_v59  ;;  %v1368_v31 = vsel %vm1363_vm8, %v1310_v5, %v9348_v58  ;;  %v9373_v59 = vld [vmem:[#allocation7 + $0x490] sm:$0xff]  ;;  %v9389_v46 = vld [vmem:[#allocation7 + $0x4d8] sm:$0xff] }
 0x22b   :  { %v9367_v57 = vmax.f32 %v1192_v21, %v1368_v31  ;;  %v1428_v38 = vmax.f32 %v11475_v30, %v1364_v27  ;;  %v9398_v21 = vld [vmem:[#allocation7 + $0x4c0] sm:$0xff]  ;;  %v9402_v31 = vld [vmem:[#allocation7 + $0x4d0] sm:$0xff] }
 0x22c   :  { %11476 = vst [vmem:[#allocation41_spill] sm:$0xff] %v9398_v21  ;;  %11478 = vst [vmem:[#allocation43_spill] sm:$0xff] %v9402_v31  ;;  %v9411_v27 = vld [vmem:[#allocation7 + $0x4f0] sm:$0xff]  ;;  %v9485_v31 = vld [vmem:[#allocation7 + $0x560] sm:$0xff] }
 0x22d   :  { %v1308_v51 = vpop.permute.xlu1 %1307  ;;  %11479 = vst [vmem:[#allocation44_spill] sm:$0xff] %v9411_v27  ;;  %v11482_v13 = vrot.slane %v9367_v57, 1  ;;  %v1492_v30 = vrot.slane %v1428_v38, 1 }
 0x22e   :  { %v1367_v40 = vsel %vm1363_vm8, %v1308_v51, %v1310_v5  ;;  %v11483_v51 = vmax.f32 %v9131_v28, 0.0 }
 0x22f   :  { %v1497_v19 = vsel %vm152_vm3, %v1495_v41, %v11482_v13  ;;  %v9424_v22 = vpop.permute.xlu0 %8291  ;;  %v9458_v41 = vld [vmem:[#allocation7 + $0x548] sm:$0xff]  ;;  %v9474_v13 = vld [vmem:[#allocation7 + $0x540] sm:$0xff] }
 0x230   :  { %v9422_v5 = vmax.f32 %v11483_v51, %v1367_v40  ;;  %11484 = vst [vmem:[#allocation47_spill] sm:$0xff] %v9424_v22  ;;  %v9436_v17 = vmax.f32 %v1429_v25, %v1497_v19  ;;  %v8293_v28 = vunpack.i.l.bf16 %v9424_v22  ;;  %v9442_v40 = vld [vmem:[#allocation7 + $0x520] sm:$0xff]  ;;  %v9444_v51 = vld [vmem:[#allocation7 + $0x510] sm:$0xff]  ;;  %v11488_v25 = vmov 0  ;;  %11491 = vst [vmem:[#allocation52_spill] sm:$0xff] %v9458_v41 }
 0x231   :  { %v8287_v58 = vpop.permute.xlu1 %8286  ;;  %v11489_v25 = vsel %vm9450_vm10, 4294967295, %v11488_v25  ;;  %v11493_v39 = vunpack.i.h.bf16 %v9424_v22  ;;  %v9472_v19 = vld [vmem:[#allocation7 + $0x578] sm:$0xff]  ;;  %v9516_v41 = vld [vmem:[#allocation7 + $0x588] sm:$0xff] }
 0x232   :  { %11487 = vst [vmem:[#allocation50_spill] sm:$0xff] %v9436_v17  ;;  %v1493_v6 = vrot.slane %v9422_v5, 1  ;;  %11490 = vst [vmem:[#allocation51_spill] sm:$0xff] %v11489_v25  ;;  %v8288_v26 = vunpack.i.l.bf16 %v8287_v58  ;;  %v9466_v21 = vrot.slane %v9436_v17, 6  ;;  %v8289_v27 = vunpack.i.h.bf16 %v8287_v58 }
 0x233   :  { %v1371_v49 = vsel %vm1363_vm8, %v8293_v28, %v11493_v39 }
 0x234   :  { %v1494_v9 = vsel %vm152_vm3, %v1492_v30, %v1493_v6  ;;  %v9479_v22 = vmax.f32 %v11495_v8, %v1371_v49  ;;  %v1370_v30 = vsel %vm1363_vm8, %v8288_v26, %v8293_v28  ;;  %6172 = vmatprep.mubr.msk.f32.mxu0 %vm9450_vm10, %v9466_v21  ;;  %6180 = vmatprep.mubr.msk.f32.mxu1 %vm9450_vm10, %v9466_v21  ;;  %v9500_v49 = vpop.permute.xlu0 %8296 }
 0x235   :  { %v9491_v44 = vmax.f32 %v1428_v38, %v1494_v9  ;;  %v11499_v38 = vmax.f32 %v9140_v34, 0.0  ;;  %v8299_v26 = vunpack.i.h.bf16 %v9500_v49  ;;  %v11500_v34 = vrot.slane %v9367_v57, 1 }
 0x236   :  { %v1506_v15 = vrot.slane %v9479_v22, 1 }
 0x237   :  { %11498 = vst [vmem:[#allocation57_spill] sm:$0xff] %v9491_v44  ;;  %v1436_v58 = vmax.f32 %v11499_v38, %v1370_v30  ;;  %v1910_v28 = vrot.slane %v9491_v44, 6  ;;  %v1373_v9 = vsel %vm1363_vm8, %v8299_v26, %v8289_v27  ;;  %v11501_v44 = vunpack.i.l.bf16 %v9500_v49  ;;  %v9527_v52 = vpop.permute.xlu1 %8306 }
 0x238   :  { %v1507_v30 = vsel %vm152_vm3, %v11500_v34, %v1506_v15  ;;  %v9530_v39 = vmax.f32 %v9197_v48, %v1373_v9  ;;  %v8308_v2 = vunpack.i.l.bf16 %v9527_v52  ;;  %v8302_v26 = vpop.permute.xlu0 %8301  ;;  %v6887_v9 = vpack.c.bf16 %v9518_v33, %v9516_v41 }
 0x239   :  { %v1504_v38 = vrot.slane %v1436_v58, 1  ;;  %v1374_v17 = vsel %vm1363_vm8, %v8289_v27, %v11501_v44  ;;  %6174 = vmatmul.mubr.msk.f32.vlgmr.msra.gmra.mrb[16].mxu0 %vm9450_vm10, %v1910_v28  ;;  %6182 = vmatmul.mubr.msk.f32.vlgmr.msra.gmra.mrb[24].mxu1 %vm9450_vm10, %v1910_v28  ;;  %v11502_v27 = vpack.c.bf16 %v9324_v3, %v9322_v18  ;;  %v9547_v48 = vmax.f32 %v9367_v57, %v1507_v30 }
 0x23a   :  { %v1441_v8 = vmax.f32 %v9165_v47, %v1374_v17  ;;  %v11503_v17 = vpack.c.bf16 %v9328_v7, %v9326_v35  ;;  %v8303_v47 = vunpack.i.l.bf16 %v8302_v26  ;;  %v1512_v34 = vrot.slane %v9530_v39, 1 }
 0x23b   :  { %v1505_v44 = vsel %vm152_vm3, %v1493_v6, %v1504_v38  ;;  %6866 = vmatpush1.bf16.msra.mxu0 %v11502_v27  ;;  %v11504_v6 = vunpack.i.h.bf16 %v9527_v52  ;;  %v11505_v3 = vpack.c.bf16 %v9332_v54, %v9330_v53  ;;  %v11506_v35 = vpack.c.bf16 %v9336_v61, %v9334_v4 }
 0x23c   :  { %6994 = vmatpush1.bf16.msra.mxu1 %v11503_v17  ;;  %v1514_v60 = vrot.slane %v1441_v8, 1  ;;  %v9562_v7 = vmax.f32 %v9422_v5, %v1505_v44  ;;  %v11507_v18 = vmax.f32 %v9185_v56, 0.0  ;;  %v8304_v30 = vunpack.i.h.bf16 %v8302_v26  ;;  %v9569_v17 = vpop.permute.xlu1 %8311 }
 0x23d   :  { %v1377_v25 = vsel %vm1363_vm8, %v8308_v2, %v11504_v6  ;;  %6868 = vmatprep.subr.bf16.mxu0 %v11505_v3  ;;  %6996 = vmatprep.subr.bf16.mxu1 %v11506_v35  ;;  %v1376_v27 = vsel %vm1363_vm8, %v8303_v47, %v8308_v2  ;;  %v1916_v6 = vrot.slane %v9547_v48, 6  ;;  %v1513_v54 = vsel %vm152_vm3, %v1504_v38, %v1512_v34 }
 0x23e   :  { %v9566_v57 = vmax.f32 %v11507_v18, %v1377_v25  ;;  %v1515_v53 = vsel %vm152_vm3, %v1506_v15, %v1514_v60  ;;  %v11508_v61 = vmax.f32 %v9193_v20, 0.0  ;;  %v8314_v5 = vunpack.i.h.bf16 %v9569_v17 }
 0x23f   :  { %v11359_v25 = vunpack.i.l.bf16 %v9569_v17  ;;  %v11509_v2 = vpack.c.bf16 %v9340_v55, %v9338_v42  ;;  %v11510_v26 = vpack.c.bf16 %v9344_v0, %v9342_v29  ;;  %v1917_v15 = vsel %vm1909_vm9, %v9466_v21, %v1916_v6  ;;  %v9609_v18 = vpop.permute.xlu0 %8316 }
 0x240   :  { %v9576_v4 = vmax.f32 %v11508_v61, %v1376_v27  ;;  %v1522_v56 = vrot.slane %v9566_v57, 1  ;;  %v1914_v20 = vrot.slane %v9562_v7, 6  ;;  %v1379_v44 = vsel %vm1363_vm8, %v8314_v5, %v8304_v30  ;;  %2332 = vmatprep.mubr.f32.mxu0 %v1917_v15  ;;  %2558 = vmatprep.mubr.f32.mxu1 %v1917_v15 }
 0x241   :  { %6870 = vmatpush1.bf16.msra.mxu0 %v11509_v2  ;;  %6998 = vmatpush1.bf16.msra.mxu1 %v11510_v26  ;;  %v9593_v47 = vmax.f32 %v9479_v22, %v1515_v53  ;;  %v9595_v42 = vmax.f32 %v1436_v58, %v1513_v54  ;;  %v1380_v29 = vsel %vm1363_vm8, %v8304_v30, %v11359_v25  ;;  %v11511_v0 = vmax.f32 %v9216_v24, 0.0  ;;  %v1348_v22 = vpop.permute.xlu1 %1347  ;;  %v9620_v54 = vld [vmem:[#allocation7 + $0x5b8] sm:$0xff] }
 0x242   :  { %v1520_v38 = vrot.slane %v9576_v4, 1  ;;  %v1523_v55 = vsel %vm152_vm3, %v1514_v60, %v1522_v56  ;;  %v1915_v3 = vsel %vm1909_vm9, %v1910_v28, %v1914_v20  ;;  %v11512_v35 = vpack.c.bf16 %v9352_v32, %v9350_v63  ;;  %v9618_v28 = vld [vmem:[#allocation7 + $0x598] sm:$0xff] }
 0x243   :  { %v9603_v21 = vmax.f32 %v11511_v0, %v1379_v44  ;;  %v11513_v60 = vmax.f32 %v9178_v16, 0.0  ;;  %2333 = vmatmul.mubr.f32.gmra.mrb[18].mxu0 %v1915_v3  ;;  %2559 = vmatmul.mubr.f32.gmra.mrb[26].mxu1 %v1915_v3  ;;  %v11360_v24 = vunpack.i.h.bf16 %v9609_v18  ;;  %v8318_v30 = vunpack.i.l.bf16 %v9609_v18 }
 0x244   :  { %6872 = vmatprep.subr.bf16.mxu0 %v11512_v35  ;;  %v1521_v58 = vsel %vm152_vm3, %v1512_v34, %v1520_v38  ;;  %v11514_v63 = vpack.c.bf16 %v9359_v23, %v9354_v62  ;;  %v11515_v16 = vpack.c.bf16 %v9363_v50, %v9361_v14  ;;  %v1924_v34 = vrot.slane %v9593_v47, 6 }
 0x245   :  { %v9614_v27 = vmax.f32 %v11513_v60, %v1380_v29  ;;  %v1528_v32 = vrot.slane %v9603_v21, 1  ;;  %v1922_v53 = vrot.slane %v9595_v42, 6  ;;  %v9631_v61 = vmax.f32 %v1441_v8, %v1523_v55  ;;  %v9671_v55 = vld [vmem:[#allocation7 + $0x590] sm:$0xff]  ;;  %v9686_v60 = vld [vmem:[#allocation7 + $0x5e8] sm:$0xff] }
 0x246   :  { %7000 = vmatprep.subr.bf16.mxu1 %v11514_v63  ;;  %6874 = vmatpush1.bf16.msra.mxu0 %v11515_v16  ;;  %v1382_v2 = vsel %vm1363_vm8, %v1348_v22, %v8318_v30  ;;  %v1383_v26 = vsel %vm1363_vm8, %v8318_v30, %v11360_v24  ;;  %v11516_v62 = vpack.c.bf16 %v9375_v43, %v9373_v59  ;;  %v11518_v8 = vmax.f32 %v9238_v37, 0.0  ;;  %v9658_v59 = vpop.permute.xlu1 %1359  ;;  %v9673_v29 = vld [vmem:[#allocation7 + $0x5b0] sm:$0xff]  ;;  %v9688_v30 = vld [vmem:[#allocation7 + $0x5d8] sm:$0xff] }
 0x247   :  { %v1530_v5 = vrot.slane %v9614_v27, 1  ;;  %v11517_v14 = vpack.c.bf16 %v9387_v12, %v9377_v45  ;;  %v9645_v23 = vmax.f32 %v9530_v39, %v1521_v58  ;;  %v1529_v50 = vsel %vm152_vm3, %v1520_v38, %v1528_v32  ;;  %v1358_v45 = vpop.permute.xlu0 %1357  ;;  %v9662_v39 = vld [vmem:[#allocation7 + $0x580] sm:$0xff]  ;;  %v9684_v58 = vld [vmem:[#allocation7 + $0x5c8] sm:$0xff]  ;;  %v11523_v16 = vld [vmem:[#allocation41_spill] sm:$0xff] }
 0x248   :  { %7002 = vmatpush1.bf16.msra.mxu1 %v11516_v62  ;;  %v9652_v15 = vmax.f32 %v11518_v8, %v1383_v26  ;;  %v1925_v44 = vsel %vm1909_vm9, %v1916_v6, %v1924_v34  ;;  %v11519_v43 = vpack.c.bf16 %v9391_v1, %v9389_v46  ;;  %v1923_v37 = vsel %vm1909_vm9, %v1914_v20, %v1922_v53  ;;  %v9669_v46 = vld [vmem:[#allocation7 + $0x5a0] sm:$0xff]  ;;  %v11521_v20 = vld [vmem:[#allocation24_spill] sm:$0xff] }
 0x249   :  { %6876 = vmatprep.subr.bf16.mxu0 %v11517_v14  ;;  %v1531_v38 = vsel %vm152_vm3, %v1522_v56, %v1530_v5  ;;  %2338 = vmatprep.mubr.f32.mxu0 %v1925_v44  ;;  %v1386_v6 = vsel %vm1363_vm8, %v1358_v45, %v9658_v59  ;;  %v1932_v1 = vrot.slane %v9631_v61, 6  ;;  %v11520_v0 = vmax.f32 %v9245_v10, 0.0  ;;  %v11522_v63 = vld [vmem:[#allocation42_spill] sm:$0xff]  ;;  %v11526_v26 = vld [vmem:[#allocation43_spill] sm:$0xff] }
 0x24a   :  { %7004 = vmatprep.subr.bf16.mxu1 %v11519_v43  ;;  %2564 = vmatprep.mubr.f32.mxu1 %v1925_v44  ;;  %v1538_v56 = vrot.slane %v9652_v15, 1  ;;  %v9681_v35 = vmax.f32 %v11521_v20, %v1386_v6  ;;  %v1930_v22 = vrot.slane %v9645_v23, 6  ;;  %v11524_v10 = vpack.c.bf16 %v11522_v63, %v11523_v16  ;;  %v9703_v43 = vld [vmem:[#allocation7 + $0x5f8] sm:$0xff]  ;;  %v9707_v6 = vld [vmem:[#allocation7 + $0x5e0] sm:$0xff]  ;;  %v1306_v63 = vpop.permute.xlu1 %1305 }
 0x24b   :  { %v9677_v3 = vmax.f32 %v11520_v0, %v1382_v2  ;;  %2339 = vmatmul.mubr.f32.gmra.mrb[20].mxu0 %v1923_v37  ;;  %2565 = vmatmul.mubr.f32.gmra.mrb[28].mxu1 %v1923_v37  ;;  %v11525_v2 = vld [vmem:[#allocation44_spill] sm:$0xff]  ;;  %v1933_v14 = vsel %vm1909_vm9, %v1924_v34, %v1932_v1  ;;  %v9698_v8 = vmax.f32 %v9566_v57, %v1531_v38  ;;  %v9705_v37 = vld [vmem:[#allocation7 + $0x5c0] sm:$0xff]  ;;  %v1356_v34 = vpop.permute.xlu0 %1355  ;;  %v11559_v41 = vunpack.i.h.bf16 %v9527_v52 }
 0x24c   :  { %6878 = vmatpush1.bf16.msra.mxu0 %v11524_v10  ;;  %v11527_v62 = vpack.c.bf16 %v11525_v2, %v11526_v26  ;;  %v9701_v44 = vmax.f32 %v9576_v4, %v1529_v50  ;;  %v1546_v0 = vrot.slane %v9681_v35, 1  ;;  %2344 = vmatprep.mubr.f32.mxu0 %v1933_v14  ;;  %v1931_v20 = vsel %vm1909_vm9, %v1922_v53, %v1930_v22  ;;  %v9715_v50 = vld [vmem:[#allocation7 + $0x5d0] sm:$0xff]  ;;  %v11528_v16 = vld [vmem:[#allocation46_spill] sm:$0xff]  ;;  %v11534_v53 = vld [vmem:[#allocation39_spill] sm:$0xff] }
 0x24d   :  { %2570 = vmatprep.mubr.f32.mxu1 %v1933_v14  ;;  %v9717_v38 = vld [vmem:[#allocation7 + $0x5f0] sm:$0xff]  ;;  %v1366_v25 = vsel %vm1363_vm8, %v11534_v53, %v1306_v63  ;;  %v1385_v24 = vsel %vm1363_vm8, %v1356_v34, %v1358_v45  ;;  %v1940_v57 = vrot.slane %v9698_v8, 6  ;;  %v1539_v12 = vsel %vm152_vm3, %v1530_v5, %v1538_v56 }
 0x24e   :  { %7006 = vmatpush1.bf16.msra.mxu1 %v11527_v62  ;;  %v11529_v10 = vld [vmem:[#allocation45_spill] sm:$0xff]  ;;  %v11532_v62 = vld [vmem:[#allocation48_spill] sm:$0xff]  ;;  %v11536_v45 = vpack.c.bf16 %v9442_v40, %v9434_v11  ;;  %v11537_v5 = vpack.c.bf16 %v9446_v36, %v9444_v51  ;;  %v11543_v51 = vld [vmem:[#allocation54_spill] sm:$0xff]  ;;  %v9763_v34 = vpop.permute.xlu1 %1321 }
 0x24f   :  { %v11530_v2 = vpack.c.bf16 %v11528_v16, %v11529_v10  ;;  %v11531_v26 = vld [vmem:[#allocation49_spill] sm:$0xff]  ;;  %2345 = vmatmul.mubr.f32.gmra.mrb[22].mxu0 %v1931_v20  ;;  %2571 = vmatmul.mubr.f32.gmra.mrb[30].mxu1 %v1931_v20  ;;  %v11361_v20 = vrot.slane %v9701_v44, 6  ;;  %v1941_v11 = vsel %vm1909_vm9, %v1932_v1, %v1940_v57  ;;  %v1314_v10 = vpop.permute.xlu0 %1313  ;;  %v9765_v16 = vld [vmem:[#allocation7 + $0x608] sm:$0xff] }
 0x250   :  { %v11533_v14 = vpack.c.bf16 %v11531_v26, %v11532_v62  ;;  %v11535_v26 = vld [vmem:[#allocation23_spill] sm:$0xff]  ;;  %v11538_v53 = vld [vmem:[#allocation21_spill] sm:$0xff]  ;;  %2350 = vmatprep.mubr.f32.mxu0 %v1941_v11  ;;  %2576 = vmatprep.mubr.f32.mxu1 %v1941_v11  ;;  %v11549_v11 = vld [vmem:[#allocation40_spill] sm:$0xff] }
 0x251   :  { %6880 = vmatprep.subr.bf16.mxu0 %v11530_v2  ;;  %v1536_v2 = vrot.slane %v9677_v3, 1  ;;  %v9738_v62 = vmax.f32 %v11535_v26, %v1385_v24  ;;  %v11539_v24 = vmax.f32 %v11538_v53, 0.0  ;;  %v11540_v40 = vld [vmem:[#allocation53_spill] sm:$0xff]  ;;  %v11545_v1 = vld [vmem:[#allocation47_spill] sm:$0xff] }
 0x252   :  { %7008 = vmatprep.subr.bf16.mxu1 %v11533_v14  ;;  %6882 = vmatpush1.bf16.msra.mxu0 %v11536_v45  ;;  %v1547_v14 = vsel %vm152_vm3, %v1538_v56, %v1546_v0  ;;  %v11541_v45 = vld [vmem:[#allocation52_spill] sm:$0xff]  ;;  %v11546_v53 = vunpack.i.h.bf16 %v11545_v1 }
 0x253   :  { %7010 = vmatpush1.bf16.msra.mxu1 %v11537_v5  ;;  %v1430_v26 = vmax.f32 %v11539_v24, %v1366_v25  ;;  %v11542_v36 = vpack.c.bf16 %v11540_v40, %v11541_v45  ;;  %v11544_v5 = vpack.c.bf16 %v9472_v19, %v11543_v51  ;;  %v9767_v56 = vld [vmem:[#allocation7 + $0x628] sm:$0xff]  ;;  %v1939_v25 = vsel %vm1909_vm9, %v1930_v22, %v11361_v20 }
 0x254   :  { %v1372_v24 = vsel %vm1363_vm8, %v11546_v53, %v9763_v34  ;;  %v9777_v19 = vmax.f32 %v9614_v27, %v1539_v12  ;;  %v1544_v40 = vrot.slane %v9738_v62, 1  ;;  %2351 = vmatmul.mubr.f32.gmra.mrb[24].mxu0 %v1939_v25  ;;  %2577 = vmatmul.mubr.f32.gmra.mrb[32].mxu1 %v1939_v25  ;;  %v11547_v45 = vld [vmem:[#allocation27_spill] sm:$0xff]  ;;  %v1421_v22 = vsel %vm1363_vm8, %v1314_v10, 0.0  ;;  %v11550_v53 = vld [vmem:[#allocation25_spill] sm:$0xff]  ;;  %v11553_v25 = vld [vmem:[#allocation56_spill] sm:$0xff] }
 0x255   :  { %6884 = vmatprep.subr.bf16.mxu0 %v11542_v36  ;;  %7012 = vmatprep.subr.bf16.mxu1 %v11544_v5  ;;  %v11548_v36 = vmax.f32 %v11547_v45, 0.0  ;;  %v1369_v5 = vsel %vm1363_vm8, %v11549_v11, %v1314_v10  ;;  %v1537_v1 = vsel %vm152_vm3, %v1528_v32, %v1536_v2  ;;  %v11551_v27 = vmax.f32 %v11550_v53, 0.0  ;;  %v11554_v45 = vld [vmem:[#allocation55_spill] sm:$0xff] }
 0x256   :  { %v11552_v20 = vpack.c.bf16 %v9485_v31, %v9474_v13  ;;  %v9801_v10 = vmax.f32 %v9652_v15, %v1547_v14  ;;  %v1420_v11 = vsel %vm1363_vm8, %v1306_v63, 0.0  ;;  %v1498_v32 = vrot.slane %v1430_v26, 1  ;;  %v9811_v13 = vpop.permute.xlu1 %1337  ;;  %v9817_v15 = vld [vmem:[#allocation7 + $0x638] sm:$0xff] }
 0x257   :  { %v9782_v51 = vmax.f32 %v11548_v36, %v1372_v24  ;;  %v1434_v12 = vmax.f32 %v11551_v27, %v1369_v5  ;;  %v11555_v24 = vpack.c.bf16 %v11553_v25, %v11554_v45  ;;  %v11556_v31 = vpack.c.bf16 %v9620_v54, %v9618_v28  ;;  %v9815_v5 = vld [vmem:[#allocation7 + $0x618] sm:$0xff] }
 0x258   :  { %6886 = vmatpush1.bf16.msra.mxu0 %v11552_v20  ;;  %v9813_v20 = vpop.permute.xlu0 %1329  ;;  %v11557_v63 = vld [vmem:[#allocation26_spill] sm:$0xff]  ;;  %v1948_v33 = vrot.slane %v9777_v19, 6  ;;  %v1545_v28 = vsel %vm152_vm3, %v1536_v2, %v1544_v40 }
 0x259   :  { %7014 = vmatpush1.bf16.msra.mxu1 %v11555_v24  ;;  %v1508_v53 = vrot.slane %v9782_v51, 1  ;;  %6888 = vmatprep.subr.bf16.mxu0 %v6887_v9  ;;  %v11558_v14 = vmax.f32 %v11557_v63, 0.0  ;;  %v1499_v25 = vrot.slane %v1434_v12, 1  ;;  %v1378_v9 = vsel %vm1363_vm8, %v11559_v41, %v9811_v13  ;;  %v11560_v54 = vld [vmem:[#allocation30_spill] sm:$0xff] }
 0x25a   :  { %7016 = vmatprep.subr.bf16.mxu1 %v11556_v31  ;;  %v11561_v45 = vmax.f32 %v11560_v54, 0.0  ;;  %v9834_v31 = vmax.f32 %v9603_v21, %v1537_v1  ;;  %v11565_v41 = vpack.c.bf16 %v9669_v46, %v9662_v39  ;;  %v7023_v21 = vpack.c.bf16 %v9817_v15, %v9815_v5  ;;  %v2198_v1 = vld [vmem:[#allocation7 + $0x600] sm:$0xff]  ;;  %v9862_v39 = vpop.permute.xlu1 %1353  ;;  %v2204_v5 = vld [vmem:[#allocation7 + $0x630] sm:$0xff] }
 0x25b   :  { %v9821_v27 = vmax.f32 %v11558_v14, %v1421_v22  ;;  %v11562_v22 = vunpack.i.l.bf16 %v9500_v49  ;;  %v11563_v14 = vld [vmem:[#allocation22_spill] sm:$0xff]  ;;  %v1500_v52 = vsel %vm152_vm3, %v1498_v32, %v1499_v25  ;;  %v1509_v2 = vsel %vm152_vm3, %v1499_v25, %v1508_v53 }
 0x25c   :  { %v9831_v24 = vmax.f32 %v11561_v45, %v1378_v9  ;;  %v11564_v36 = vmax.f32 %v11563_v14, 0.0  ;;  %6890 = vmatpush1.bf16.msra.mxu0 %v11565_v41  ;;  %v1585_v49 = vsel %vm152_vm3, %v1546_v0, 0.0  ;;  %v9857_v32 = vmax.f32 %v1434_v12, %v1509_v2  ;;  %v2202_v46 = vld [vmem:[#allocation7 + $0x620] sm:$0xff]  ;;  %v2200_v9 = vld [vmem:[#allocation7 + $0x610] sm:$0xff]  ;;  %v2211_v2 = vld [vmem:[#allocation7 + $0x668] sm:$0xff] }
 0x25d   :  { %v1375_v63 = vsel %vm1363_vm8, %v11562_v22, %v9813_v20  ;;  %v11566_v25 = vpack.c.bf16 %v9673_v29, %v9671_v55  ;;  %v9865_v15 = vmax.f32 %v9677_v3, %v1545_v28  ;;  %v1502_v0 = vrot.slane %v9821_v27, 1  ;;  %v11569_v12 = vld [vmem:[#allocation29_spill] sm:$0xff]  ;;  %v9885_v22 = vpop.permute.xlu0 %1345 }
 0x25e   :  { %v1431_v4 = vmax.f32 %v11564_v36, %v1420_v11  ;;  %v1584_v36 = vsel %vm152_vm3, %v1544_v40, 0.0  ;;  %v9855_v11 = vmax.f32 %v1430_v26, %v1500_v52  ;;  %v1949_v26 = vsel %vm1909_vm9, %v1940_v57, %v1948_v33  ;;  %v2207_v52 = vld [vmem:[#allocation7 + $0x648] sm:$0xff] }
 0x25f   :  { %7018 = vmatpush1.bf16.msra.mxu1 %v11566_v25  ;;  %v1946_v40 = vrot.slane %v9834_v31, 6  ;;  %v11567_v55 = vpack.c.bf16 %v9686_v60, %v9684_v58  ;;  %v11568_v29 = vpack.c.bf16 %v9703_v43, %v9688_v30  ;;  %2356 = vmatprep.mubr.f32.mxu0 %v1949_v26  ;;  %v1524_v3 = vrot.slane %v9831_v24, 1 }
 0x260   :  { %2582 = vmatprep.mubr.f32.mxu1 %v1949_v26  ;;  %v1442_v28 = vmax.f32 %v11569_v12, %v1375_v63  ;;  %v1956_v54 = vrot.slane %v9801_v10, 6  ;;  %v11570_v57 = vunpack.i.h.bf16 %v9609_v18  ;;  %v1501_v58 = vrot.slane %v1431_v4, 1  ;;  %v11573_v26 = vld [vmem:[#allocation34_spill] sm:$0xff] }
 0x261   :  { %6892 = vmatprep.subr.bf16.mxu0 %v11567_v55  ;;  %7020 = vmatprep.subr.bf16.mxu1 %v11568_v29  ;;  %v11571_v60 = vrot.slane %v9701_v44, 6  ;;  %v11572_v43 = vpack.c.bf16 %v9707_v6, %v9705_v37  ;;  %v6897_v14 = vpack.c.bf16 %v2202_v46, %v2198_v1  ;;  %v7025_v63 = vpack.c.bf16 %v2204_v5, %v2200_v9  ;;  %v2209_v12 = vld [vmem:[#allocation7 + $0x658] sm:$0xff] }
 0x262   :  { %v1384_v45 = vsel %vm1363_vm8, %v11570_v57, %v9862_v39  ;;  %v9894_v41 = vmax.f32 %v9681_v35, %v1585_v49  ;;  %v1516_v18 = vrot.slane %v1442_v28, 1  ;;  %v1957_v25 = vsel %vm1909_vm9, %v1948_v33, %v1956_v54  ;;  %v2213_v57 = vld [vmem:[#allocation7 + $0x678] sm:$0xff] }
 0x263   :  { %v1947_v30 = vsel %vm1909_vm9, %v11571_v60, %v1946_v40  ;;  %6894 = vmatpush1.bf16.msra.mxu0 %v11572_v43  ;;  %v11574_v55 = vmax.f32 %v11573_v26, 0.0  ;;  %v9902_v37 = vmax.f32 %v9738_v62, %v1584_v36  ;;  %v1503_v6 = vsel %vm152_vm3, %v1501_v58, %v1502_v0  ;;  %v2206_v58 = vld [vmem:[#allocation7 + $0x640] sm:$0xff]  ;;  %v2208_v60 = vld [vmem:[#allocation7 + $0x650] sm:$0xff] }
 0x264   :  { %2357 = vmatmul.mubr.f32.gmra.mrb[26].mxu0 %v1947_v30  ;;  %2583 = vmatmul.mubr.f32.gmra.mrb[34].mxu1 %v1947_v30  ;;  %v1954_v35 = vrot.slane %v9865_v15, 6  ;;  %v11575_v33 = vunpack.i.l.bf16 %v9569_v17  ;;  %v1517_v49 = vsel %vm152_vm3, %v1508_v53, %v1516_v18  ;;  %v1525_v62 = vsel %vm152_vm3, %v1516_v18, %v1524_v3  ;;  %v2210_v53 = vld [vmem:[#allocation7 + $0x660] sm:$0xff]  ;;  %v11578_v43 = vld [vmem:[#allocation32_spill] sm:$0xff] }
 0x265   :  { %v9899_v29 = vmax.f32 %v11574_v55, %v1384_v45  ;;  %2362 = vmatprep.mubr.f32.mxu0 %v1957_v25  ;;  %2588 = vmatprep.mubr.f32.mxu1 %v1957_v25  ;;  %v11576_v36 = vpack.c.bf16 %v9717_v38, %v9715_v50  ;;  %v11577_v46 = vpack.c.bf16 %v9767_v56, %v9765_v16  ;;  %v11579_v16 = vmax.f32 %v11578_v43, 0.0  ;;  %v2221_v25 = vld [vmem:[#allocation7 + $0x6b8] sm:$0xff]  ;;  %v2226_v43 = vld [vmem:[#allocation7 + $0x6e0] sm:$0xff] }
 0x266   :  { %v1381_v1 = vsel %vm1363_vm8, %v11575_v33, %v9885_v22  ;;  %v6899_v9 = vpack.c.bf16 %v2211_v2, %v2207_v52  ;;  %v9923_v5 = vmax.f32 %v9782_v51, %v1517_v49  ;;  %v9925_v17 = vmax.f32 %v1442_v28, %v1525_v62  ;;  %v2212_v52 = vld [vmem:[#allocation7 + $0x670] sm:$0xff]  ;;  %v2215_v51 = vld [vmem:[#allocation7 + $0x688] sm:$0xff]  ;;  %v2214_v33 = vld [vmem:[#allocation7 + $0x680] sm:$0xff] }
 0x267   :  { %7022 = vmatpush1.bf16.msra.mxu1 %v11576_v36  ;;  %6896 = vmatprep.subr.bf16.mxu0 %v11577_v46  ;;  %v7027_v45 = vpack.c.bf16 %v2213_v57, %v2209_v12  ;;  %v9927_v30 = vmax.f32 %v1431_v4, %v1503_v6  ;;  %v1540_v50 = vrot.slane %v9899_v29, 1  ;;  %v1955_v38 = vsel %vm1909_vm9, %v1946_v40, %v1954_v35  ;;  %v2219_v2 = vld [vmem:[#allocation7 + $0x6a8] sm:$0xff]  ;;  %v2217_v4 = vld [vmem:[#allocation7 + $0x698] sm:$0xff]  ;;  %v2220_v36 = vld [vmem:[#allocation7 + $0x6b0] sm:$0xff] }
 0x268   :  { %7024 = vmatprep.subr.bf16.mxu1 %v7023_v21  ;;  %v1450_v56 = vmax.f32 %v11579_v16, %v1381_v1  ;;  %6898 = vmatpush1.bf16.msra.mxu0 %v6897_v14  ;;  %v1964_v21 = vrot.slane %v9894_v41, 6  ;;  %v1962_v28 = vrot.slane %v9902_v37, 6  ;;  %v6901_v26 = vpack.c.bf16 %v2210_v53, %v2206_v58  ;;  %v2218_v1 = vld [vmem:[#allocation7 + $0x6a0] sm:$0xff]  ;;  %v2223_v46 = vld [vmem:[#allocation7 + $0x6c8] sm:$0xff]  ;;  %v2229_v58 = vld [vmem:[#allocation7 + $0x6f8] sm:$0xff] }
 0x269   :  { %2363 = vmatmul.mubr.f32.gmra.mrb[28].mxu0 %v1955_v38  ;;  %2589 = vmatmul.mubr.f32.gmra.mrb[36].mxu1 %v1955_v38  ;;  %v7029_v55 = vpack.c.bf16 %v2212_v52, %v2208_v60  ;;  %v6903_v14 = vpack.c.bf16 %v2219_v2, %v2215_v51  ;;  %v2222_v38 = vld [vmem:[#allocation7 + $0x6c0] sm:$0xff]  ;;  %v2224_v16 = vld [vmem:[#allocation7 + $0x6d0] sm:$0xff]  ;;  %v2231_v51 = vld [vmem:[#allocation7 + $0x708] sm:$0xff] }
 0x26a   :  { %v1532_v18 = vrot.slane %v1450_v56, 1  ;;  %6900 = vmatprep.subr.bf16.mxu0 %v6899_v9  ;;  %v1965_v40 = vsel %vm1909_vm9, %v1956_v54, %v1964_v21  ;;  %v1963_v6 = vsel %vm1909_vm9, %v1954_v35, %v1962_v28  ;;  %v2216_v54 = vld [vmem:[#allocation7 + $0x690] sm:$0xff]  ;;  %v2227_v9 = vld [vmem:[#allocation7 + $0x6e8] sm:$0xff]  ;;  %v2225_v35 = vld [vmem:[#allocation7 + $0x6d8] sm:$0xff] }
 0x26b   :  { %7026 = vmatpush1.bf16.msra.mxu1 %v7025_v63  ;;  %2368 = vmatprep.mubr.f32.mxu0 %v1965_v40  ;;  %v9942_v63 = vrot.slane %v9927_v30, 6  ;;  %v7033_v53 = vpack.c.bf16 %v2220_v36, %v2216_v54  ;;  %v6907_v60 = vpack.c.bf16 %v2227_v9, %v2223_v46  ;;  %v2228_v52 = vld [vmem:[#allocation7 + $0x6f0] sm:$0xff]  ;;  %v2235_v2 = vld [vmem:[#allocation7 + $0x728] sm:$0xff]  ;;  %v2233_v21 = vld [vmem:[#allocation7 + $0x718] sm:$0xff]  ;;  %v1423_v9 = vsel %vm1363_vm8, %v9813_v20, 0.0 }
 0x26c   :  { %7028 = vmatprep.subr.bf16.mxu1 %v7027_v45  ;;  %v1533_v12 = vsel %vm152_vm3, %v1524_v3, %v1532_v18  ;;  %v1541_v57 = vsel %vm152_vm3, %v1532_v18, %v1540_v50  ;;  %2594 = vmatprep.mubr.f32.mxu1 %v1965_v40  ;;  %v7031_v3 = vpack.c.bf16 %v2221_v25, %v2217_v4  ;;  %v2237_v28 = vld [vmem:[#allocation7 + $0x738] sm:$0xff]  ;;  %v1422_v4 = vsel %vm1363_vm8, %v9763_v34, 0.0 }
 0x26d   :  { %v9945_v49 = vmax.f32 %v9831_v24, %v1533_v12  ;;  %v9947_v62 = vmax.f32 %v1450_v56, %v1541_v57  ;;  %2369 = vmatmul.mubr.f32.gmra.mrb[30].mxu0 %v1963_v6  ;;  %2595 = vmatmul.mubr.f32.gmra.mrb[38].mxu1 %v1963_v6  ;;  %v6905_v24 = vpack.c.bf16 %v2218_v1, %v2214_v33  ;;  %v2236_v57 = vld [vmem:[#allocation7 + $0x730] sm:$0xff]  ;;  %v2239_v6 = vld [vmem:[#allocation7 + $0x748] sm:$0xff]  ;;  %v2241_v1 = vld [vmem:[#allocation7 + $0x758] sm:$0xff] }
 0x26e   :  { %6176 = vmatprep.mubr.msk.f32.mxu0 %vm9450_vm10, %v9942_v63  ;;  %6184 = vmatprep.mubr.msk.f32.mxu1 %vm9450_vm10, %v9942_v63  ;;  %v7035_v56 = vpack.c.bf16 %v2229_v58, %v2225_v35  ;;  %v6909_v18 = vpack.c.bf16 %v2226_v43, %v2222_v38  ;;  %v7037_v25 = vpack.c.bf16 %v2228_v52, %v2224_v16  ;;  %v2243_v33 = vld [vmem:[#allocation7 + $0x768] sm:$0xff]  ;;  %v2245_v54 = vld [vmem:[#allocation7 + $0x778] sm:$0xff]  ;;  %v2244_v43 = vld [vmem:[#allocation7 + $0x770] sm:$0xff] }
 0x26f   :  { %6902 = vmatpush1.bf16.msra.mxu0 %v6901_v26  ;;  %7030 = vmatpush1.bf16.msra.mxu1 %v7029_v55  ;;  %v6911_v40 = vpack.c.bf16 %v2235_v2, %v2231_v51  ;;  %v2230_v26 = vld [vmem:[#allocation7 + $0x700] sm:$0xff]  ;;  %v7039_v12 = vpack.c.bf16 %v2237_v28, %v2233_v21  ;;  %v6915_v58 = vpack.c.bf16 %v2243_v33, %v2239_v6  ;;  %v2247_v16 = vld [vmem:[#allocation7 + $0x788] sm:$0xff]  ;;  %v2249_v52 = vld [vmem:[#allocation7 + $0x798] sm:$0xff] }
 0x270   :  { %6904 = vmatprep.subr.bf16.mxu0 %v6903_v14  ;;  %7032 = vmatprep.subr.bf16.mxu1 %v7031_v3  ;;  %v2234_v55 = vld [vmem:[#allocation7 + $0x720] sm:$0xff]  ;;  %v2232_v14 = vld [vmem:[#allocation7 + $0x710] sm:$0xff]  ;;  %v7043_v38 = vpack.c.bf16 %v2245_v54, %v2241_v1  ;;  %v2253_v51 = vld [vmem:[#allocation7 + $0x7b8] sm:$0xff] }
 0x271   :  { %v11581_v3 = vld [vmem:[#allocation28_spill] sm:$0xff]  ;;  %v6913_v34 = vpack.c.bf16 %v2234_v55, %v2230_v26  ;;  %v7041_v35 = vpack.c.bf16 %v2236_v57, %v2232_v14  ;;  %v11583_v21 = vld [vmem:[#allocation38_spill] sm:$0xff]  ;;  %v7047_v14 = vpack.c.bf16 %v2253_v51, %v2249_v52 }
 0x272   :  { %v11582_v36 = vmax.f32 %v11581_v3, 0.0  ;;  %v9965_v28 = vmax.f32 %v11583_v21, %v1423_v9  ;;  %v2250_v26 = vld [vmem:[#allocation7 + $0x7a0] sm:$0xff]  ;;  %v2248_v55 = vld [vmem:[#allocation7 + $0x790] sm:$0xff]  ;;  %v2255_v57 = vld [vmem:[#allocation7 + $0x7c8] sm:$0xff] }
 0x273   :  { %6906 = vmatpush1.bf16.msra.mxu0 %v6905_v24  ;;  %7034 = vmatpush1.bf16.msra.mxu1 %v7033_v53  ;;  %v2238_v24 = vld [vmem:[#allocation7 + $0x740] sm:$0xff]  ;;  %v2259_v6 = vld [vmem:[#allocation7 + $0x7e8] sm:$0xff]  ;;  %v2257_v33 = vld [vmem:[#allocation7 + $0x7d8] sm:$0xff] }
 0x274   :  { %6908 = vmatprep.subr.bf16.mxu0 %v6907_v60  ;;  %7036 = vmatprep.subr.bf16.mxu1 %v7035_v56  ;;  %v9959_v46 = vmax.f32 %v11582_v36, %v1422_v4  ;;  %v2242_v53 = vld [vmem:[#allocation7 + $0x760] sm:$0xff]  ;;  %v2240_v60 = vld [vmem:[#allocation7 + $0x750] sm:$0xff]  ;;  %v2251_v56 = vld [vmem:[#allocation7 + $0x7a8] sm:$0xff] }
 0x275   :  { %v6917_v20 = vpack.c.bf16 %v2242_v53, %v2238_v24  ;;  %v7045_v4 = vpack.c.bf16 %v2244_v43, %v2240_v60  ;;  %v2261_v1 = vld [vmem:[#allocation7 + $0x7f8] sm:$0xff]  ;;  %v11584_v3 = vld [vmem:[#allocation31_spill] sm:$0xff]  ;;  %v6923_v24 = vpack.c.bf16 %v2259_v6, %v2255_v57  ;;  %v2260_v43 = vld [vmem:[#allocation7 + $0x7f0] sm:$0xff] }
 0x276   :  { %v1510_v2 = vrot.slane %v9959_v46, 1  ;;  %v2254_v53 = vld [vmem:[#allocation7 + $0x7c0] sm:$0xff]  ;;  %v1624_v51 = vld [vmem:[#allocation7 + $0x818] sm:$0xff] }
 0x277   :  { %6910 = vmatpush1.bf16.msra.mxu0 %v6909_v18  ;;  %7038 = vmatpush1.bf16.msra.mxu1 %v7037_v25  ;;  %v1424_v18 = vsel %vm1363_vm8, %v9811_v13, 0.0  ;;  %v6919_v25 = vpack.c.bf16 %v2251_v56, %v2247_v16  ;;  %v11585_v13 = vmax.f32 %v11584_v3, 0.0  ;;  %v2258_v60 = vld [vmem:[#allocation7 + $0x7e0] sm:$0xff]  ;;  %v1622_v16 = vld [vmem:[#allocation7 + $0x808] sm:$0xff]  ;;  %v1628_v21 = vld [vmem:[#allocation7 + $0x838] sm:$0xff] }
 0x278   :  { %6912 = vmatprep.subr.bf16.mxu0 %v6911_v40  ;;  %7040 = vmatprep.subr.bf16.mxu1 %v7039_v12  ;;  %v2246_v40 = vld [vmem:[#allocation7 + $0x780] sm:$0xff]  ;;  %v2252_v12 = vld [vmem:[#allocation7 + $0x7b0] sm:$0xff]  ;;  %v1511_v54 = vsel %vm152_vm3, %v1502_v0, %v1510_v2  ;;  %v7051_v0 = vpack.c.bf16 %v2261_v1, %v2257_v33  ;;  %v1626_v56 = vld [vmem:[#allocation7 + $0x828] sm:$0xff] }
 0x279   :  { %v9974_v36 = vmax.f32 %v11585_v13, %v1424_v18  ;;  %v6921_v9 = vpack.c.bf16 %v2250_v26, %v2246_v40  ;;  %v9980_v52 = vmax.f32 %v9821_v27, %v1511_v54  ;;  %v11586_v18 = vld [vmem:[#allocation33_spill] sm:$0xff]  ;;  %v6925_v40 = vpack.c.bf16 %v2258_v60, %v2254_v53  ;;  %v1621_v57 = vld [vmem:[#allocation7 + $0x800] sm:$0xff]  ;;  %v1630_v3 = vld [vmem:[#allocation7 + $0x848] sm:$0xff] }
 0x27a   :  { %v1426_v26 = vsel %vm1363_vm8, %v9862_v39, 0.0  ;;  %v7055_v27 = vpack.c.bf16 %v1626_v56, %v1622_v16  ;;  %v1625_v6 = vld [vmem:[#allocation7 + $0x820] sm:$0xff]  ;;  %v1623_v33 = vld [vmem:[#allocation7 + $0x810] sm:$0xff]  ;;  %v1634_v13 = vld [vmem:[#allocation7 + $0x868] sm:$0xff]  ;;  %v1918_v56 = vrot.slane %v9857_v32, 6 }
 0x27b   :  { %6914 = vmatpush1.bf16.msra.mxu0 %v6913_v34  ;;  %7042 = vmatpush1.bf16.msra.mxu1 %v7041_v35  ;;  %v1518_v34 = vrot.slane %v9965_v28, 1  ;;  %v1425_v35 = vsel %vm1363_vm8, %v9885_v22, 0.0  ;;  %v1920_v1 = vrot.slane %v9980_v52, 6  ;;  %v1627_v54 = vld [vmem:[#allocation7 + $0x830] sm:$0xff]  ;;  %v1632_v53 = vld [vmem:[#allocation7 + $0x858] sm:$0xff]  ;;  %v1633_v16 = vld [vmem:[#allocation7 + $0x860] sm:$0xff] }
 0x27c   :  { %6916 = vmatprep.subr.bf16.mxu0 %v6915_v58  ;;  %7044 = vmatprep.subr.bf16.mxu1 %v7043_v38  ;;  %v7049_v58 = vpack.c.bf16 %v2252_v12, %v2248_v55  ;;  %v2256_v38 = vld [vmem:[#allocation7 + $0x7d0] sm:$0xff]  ;;  %v7183_v12 = vpack.c.bf16 %v1628_v21, %v1624_v51  ;;  %v1636_v60 = vld [vmem:[#allocation7 + $0x878] sm:$0xff]  ;;  %v7059_v51 = vpack.c.bf16 %v1634_v13, %v1630_v3 }
 0x27d   :  { %v1519_v22 = vsel %vm152_vm3, %v1510_v2, %v1518_v34  ;;  %v7053_v55 = vpack.c.bf16 %v2260_v43, %v2256_v38  ;;  %v1629_v43 = vld [vmem:[#allocation7 + $0x840] sm:$0xff]  ;;  %v1631_v21 = vld [vmem:[#allocation7 + $0x850] sm:$0xff] }
 0x27e   :  { %v9991_v2 = vmax.f32 %v9959_v46, %v1519_v22  ;;  %v1912_v46 = vrot.slane %v9855_v11, 6  ;;  %v1635_v22 = vld [vmem:[#allocation7 + $0x870] sm:$0xff] }
 0x27f   :  { %6918 = vmatpush1.bf16.msra.mxu0 %v6917_v20  ;;  %7046 = vmatpush1.bf16.msra.mxu1 %v7045_v4  ;;  %v1526_v20 = vrot.slane %v9974_v36, 1  ;;  %v11587_v4 = vmax.f32 %v11586_v18, 0.0  ;;  %v1638_v18 = vld [vmem:[#allocation7 + $0x888] sm:$0xff]  ;;  %v7189_v13 = vpack.c.bf16 %v1635_v22, %v1631_v21 }
 0x280   :  { %6920 = vmatprep.subr.bf16.mxu0 %v6919_v25  ;;  %7048 = vmatprep.subr.bf16.mxu1 %v7047_v14  ;;  %v1362_v14 = vpop.permute.xlu0 %1361 }
 0x281   :  { %v9986_v25 = vmax.f32 %v11587_v4, %v1425_v35  ;;  %v1527_v39 = vsel %vm152_vm3, %v1518_v34, %v1526_v20  ;;  %v1427_v38 = vsel %vm1363_vm8, %v1362_v14, 0.0  ;;  %v7185_v34 = vpack.c.bf16 %v1627_v54, %v1623_v33  ;;  %v11590_v54 = vld [vmem:[#allocation37_spill] sm:$0xff] }
 0x282   :  { %v10004_v4 = vmax.f32 %v9965_v28, %v1527_v39  ;;  %v1387_v28 = vsel %vm1363_vm8, %v9658_v59, %v1362_v14  ;;  %v10016_v3 = vmax.f32 %v11590_v54, %v1427_v38  ;;  %v1637_v39 = vld [vmem:[#allocation7 + $0x880] sm:$0xff]  ;;  %v1646_v38 = vld [vmem:[#allocation7 + $0x8c8] sm:$0xff] }
 0x283   :  { %6922 = vmatpush1.bf16.msra.mxu0 %v6921_v9  ;;  %7050 = vmatpush1.bf16.msra.mxu1 %v7049_v58  ;;  %v11588_v9 = vld [vmem:[#allocation35_spill] sm:$0xff] }
 0x284   :  { %6924 = vmatprep.subr.bf16.mxu0 %v6923_v24  ;;  %7052 = vmatprep.subr.bf16.mxu1 %v7051_v0  ;;  %v11589_v35 = vmax.f32 %v11588_v9, 0.0  ;;  %v1534_v24 = vrot.slane %v9986_v25, 1  ;;  %v7057_v0 = vpack.c.bf16 %v1625_v6, %v1621_v57  ;;  %v1644_v57 = vld [vmem:[#allocation7 + $0x8b8] sm:$0xff]  ;;  %v1641_v9 = vld [vmem:[#allocation7 + $0x8a0] sm:$0xff]  ;;  %v1550_v22 = vrot.slane %v10016_v3, 1  ;;  %v1654_v54 = vld [vmem:[#allocation7 + $0x908] sm:$0xff] }
 0x286   :  { %v9997_v58 = vmax.f32 %v11589_v35, %v1426_v26  ;;  %v7187_v26 = vpack.c.bf16 %v1636_v60, %v1632_v53  ;;  %v1535_v33 = vsel %vm152_vm3, %v1526_v20, %v1534_v24  ;;  %v1919_v35 = vsel %vm1909_vm9, %v1912_v46, %v1918_v56  ;;  %v1639_v53 = vld [vmem:[#allocation7 + $0x890] sm:$0xff] }
 0x287   :  { %6926 = vmatpush1.bf16.msra.mxu0 %v6925_v40  ;;  %7054 = vmatpush1.bf16.msra.mxu1 %v7053_v55  ;;  %v1921_v40 = vsel %vm1909_vm9, %v9942_v63, %v1920_v1  ;;  %v1928_v55 = vrot.slane %v9991_v2, 6  ;;  %v7061_v63 = vpack.c.bf16 %v1633_v16, %v1629_v43  ;;  %v1926_v20 = vrot.slane %v9923_v5, 6  ;;  %v1643_v60 = vld [vmem:[#allocation7 + $0x8b0] sm:$0xff]  ;;  %v1650_v16 = vld [vmem:[#allocation7 + $0x8e8] sm:$0xff] }
 0x288   :  { %7056 = vmatprep.subr.bf16.mxu0 %v7055_v27  ;;  %7184 = vmatprep.subr.bf16.mxu1 %v7183_v12  ;;  %v1642_v27 = vld [vmem:[#allocation7 + $0x8a8] sm:$0xff]  ;;  %v1640_v12 = vld [vmem:[#allocation7 + $0x898] sm:$0xff]  ;;  %v1542_v6 = vrot.slane %v9997_v58, 1  ;;  %v10023_v45 = vmax.f32 %v9974_v36, %v1535_v33  ;;  %v7065_v36 = vpack.c.bf16 %v1641_v9, %v1637_v39 }
 0x289   :  { %v7063_v59 = vpack.c.bf16 %v1642_v27, %v1638_v18  ;;  %v7191_v14 = vpack.c.bf16 %v1644_v57, %v1640_v12  ;;  %v1929_v43 = vsel %vm1909_vm9, %v1920_v1, %v1928_v55  ;;  %v7193_v18 = vpack.c.bf16 %v1643_v60, %v1639_v53  ;;  %v1645_v27 = vld [vmem:[#allocation7 + $0x8c0] sm:$0xff]  ;;  %v1656_v9 = vld [vmem:[#allocation7 + $0x918] sm:$0xff] }
 0x28a   :  { %6178 = vmatmul.mubr.msk.f32.vlgmr.msra.gmra.mrb[16].mxu0 %vm9450_vm10, %v1912_v46  ;;  %6186 = vmatmul.mubr.msk.f32.vlgmr.msra.gmra.mrb[24].mxu1 %vm9450_vm10, %v1912_v46  ;;  %v1936_v46 = vrot.slane %v10004_v4, 6  ;;  %v1543_v21 = vsel %vm152_vm3, %v1534_v24, %v1542_v6  ;;  %v1649_v12 = vld [vmem:[#allocation7 + $0x8e0] sm:$0xff]  ;;  %v1927_v1 = vsel %vm1909_vm9, %v1918_v56, %v1926_v20  ;;  %v7067_v57 = vpack.c.bf16 %v1650_v16, %v1646_v38  ;;  %v1651_v24 = vld [vmem:[#allocation7 + $0x8f0] sm:$0xff]  ;;  %v1658_v56 = vld [vmem:[#allocation7 + $0x928] sm:$0xff] }
 0x28b   :  { %2445 = vmatprep.mubr.f32.mxu0 %v1921_v40  ;;  %2671 = vmatprep.mubr.f32.mxu1 %v1921_v40  ;;  %v11591_v40 = vld [vmem:[#allocation36_spill] sm:$0xff]  ;;  %v1551_v53 = vsel %vm152_vm3, %v1542_v6, %v1550_v22  ;;  %v7069_v60 = vpack.c.bf16 %v1649_v12, %v1645_v27  ;;  %v1653_v38 = vld [vmem:[#allocation7 + $0x900] sm:$0xff]  ;;  %v7071_v16 = vpack.c.bf16 %v1658_v56, %v1654_v54  ;;  %v1664_v12 = vld [vmem:[#allocation7 + $0x958] sm:$0xff] }
 0x28c   :  { %7058 = vmatpush1.bf16.msra.mxu0 %v7057_v0  ;;  %7186 = vmatpush1.bf16.msra.mxu1 %v7185_v34  ;;  %v10026_v0 = vmax.f32 %v11591_v40, %v1387_v28  ;;  %v1648_v34 = vld [vmem:[#allocation7 + $0x8d8] sm:$0xff]  ;;  %v1647_v28 = vld [vmem:[#allocation7 + $0x8d0] sm:$0xff]  ;;  %v1937_v39 = vsel %vm1909_vm9, %v1928_v55, %v1936_v46  ;;  %v1657_v40 = vld [vmem:[#allocation7 + $0x920] sm:$0xff]  ;;  %v1942_v55 = vrot.slane %v9945_v49, 6  ;;  %v10047_v27 = vmax.f32 %v9997_v58, %v1551_v53 }
 0x28d   :  { %7060 = vmatprep.subr.bf16.mxu0 %v7059_v51  ;;  %7188 = vmatprep.subr.bf16.mxu1 %v7187_v26  ;;  %v1652_v51 = vld [vmem:[#allocation7 + $0x8f8] sm:$0xff]  ;;  %v1934_v26 = vrot.slane %v9925_v17, 6  ;;  %v1666_v6 = vld [vmem:[#allocation7 + $0x968] sm:$0xff]  ;;  %v1661_v54 = vld [vmem:[#allocation7 + $0x940] sm:$0xff] }
 0x28e   :  { %2446 = vmatmul.mubr.f32.gmra.mrb[18].mxu0 %v1919_v35  ;;  %2672 = vmatmul.mubr.f32.gmra.mrb[26].mxu1 %v1919_v35  ;;  %v7195_v33 = vpack.c.bf16 %v1652_v51, %v1648_v34  ;;  %v10035_v35 = vmax.f32 %v9986_v25, %v1543_v21  ;;  %v7197_v25 = vpack.c.bf16 %v1651_v24, %v1647_v28  ;;  %v1659_v51 = vld [vmem:[#allocation7 + $0x930] sm:$0xff]  ;;  %v1662_v21 = vld [vmem:[#allocation7 + $0x948] sm:$0xff]  ;;  %v1665_v56 = vld [vmem:[#allocation7 + $0x960] sm:$0xff] }
 0x28f   :  { %2451 = vmatprep.mubr.f32.mxu0 %v1929_v43  ;;  %2677 = vmatprep.mubr.f32.mxu1 %v1929_v43  ;;  %v1655_v43 = vld [vmem:[#allocation7 + $0x910] sm:$0xff]  ;;  %v7073_v28 = vpack.c.bf16 %v1657_v40, %v1653_v38  ;;  %v1672_v38 = vld [vmem:[#allocation7 + $0x998] sm:$0xff] }
 0x290   :  { %7062 = vmatpush1.bf16.msra.mxu0 %v7061_v63  ;;  %7190 = vmatpush1.bf16.msra.mxu1 %v7189_v13  ;;  %v1548_v63 = vrot.slane %v10026_v0, 1  ;;  %v1944_v13 = vrot.slane %v10023_v45, 6  ;;  %v7201_v24 = vpack.c.bf16 %v1659_v51, %v1655_v43  ;;  %v1676_v40 = vld [vmem:[#allocation7 + $0x9b8] sm:$0xff]  ;;  %v7077_v43 = vpack.c.bf16 %v1665_v56, %v1661_v54  ;;  %v1673_v51 = vld [vmem:[#allocation7 + $0x9a0] sm:$0xff]  ;;  %v1679_v56 = vld [vmem:[#allocation7 + $0x9d0] sm:$0xff] }
 0x291   :  { %7064 = vmatprep.subr.bf16.mxu0 %v7063_v59  ;;  %7192 = vmatprep.subr.bf16.mxu1 %v7191_v14  ;;  %v1660_v59 = vld [vmem:[#allocation7 + $0x938] sm:$0xff]  ;;  %v1935_v14 = vsel %vm1909_vm9, %v1926_v20, %v1934_v26  ;;  %v1952_v20 = vrot.slane %v10035_v35, 6 }
 0x292   :  { %2452 = vmatmul.mubr.f32.gmra.mrb[20].mxu0 %v1927_v1  ;;  %2678 = vmatmul.mubr.f32.gmra.mrb[28].mxu1 %v1927_v1  ;;  %v7199_v34 = vpack.c.bf16 %v1660_v59, %v1656_v9  ;;  %v1668_v1 = vld [vmem:[#allocation7 + $0x978] sm:$0xff]  ;;  %v1667_v9 = vld [vmem:[#allocation7 + $0x970] sm:$0xff]  ;;  %v1586_v59 = vsel %vm152_vm3, %v1548_v63, 0.0 }
 0x293   :  { %2457 = vmatprep.mubr.f32.mxu0 %v1937_v39  ;;  %2683 = vmatprep.mubr.f32.mxu1 %v1937_v39  ;;  %v7203_v39 = vpack.c.bf16 %v1668_v1, %v1664_v12  ;;  %v1675_v12 = vld [vmem:[#allocation7 + $0x9b0] sm:$0xff]  ;;  %v1682_v1 = vld [vmem:[#allocation7 + $0x9e8] sm:$0xff] }
 0x294   :  { %7066 = vmatpush1.bf16.msra.mxu0 %v7065_v36  ;;  %7194 = vmatpush1.bf16.msra.mxu1 %v7193_v18  ;;  %v1549_v36 = vsel %vm152_vm3, %v1540_v50, %v1548_v63  ;;  %v1945_v18 = vsel %vm1909_vm9, %v1936_v46, %v1944_v13  ;;  %v7075_v50 = vpack.c.bf16 %v1666_v6, %v1662_v21  ;;  %v1671_v21 = vld [vmem:[#allocation7 + $0x990] sm:$0xff] }
 0x295   :  { %7068 = vmatprep.subr.bf16.mxu0 %v7067_v57  ;;  %7196 = vmatprep.subr.bf16.mxu1 %v7195_v33  ;;  %v1587_v57 = vsel %vm152_vm3, %v1550_v22, 0.0  ;;  %v10053_v58 = vmax.f32 %v9899_v29, %v1549_v36  ;;  %v1943_v46 = vsel %vm1909_vm9, %v1934_v26, %v1942_v55  ;;  %v1950_v33 = vrot.slane %v9947_v62, 6  ;;  %v1663_v22 = vld [vmem:[#allocation7 + $0x950] sm:$0xff]  ;;  %v1674_v26 = vld [vmem:[#allocation7 + $0x9a8] sm:$0xff] }
 0x296   :  { %2458 = vmatmul.mubr.f32.gmra.mrb[22].mxu0 %v1935_v14  ;;  %2684 = vmatmul.mubr.f32.gmra.mrb[30].mxu1 %v1935_v14  ;;  %v10059_v53 = vmax.f32 %v10016_v3, %v1587_v57  ;;  %v1953_v29 = vsel %vm1909_vm9, %v1944_v13, %v1952_v20  ;;  %v7205_v14 = vpack.c.bf16 %v1667_v9, %v1663_v22  ;;  %v1684_v57 = vld [vmem:[#allocation7 + $0x9f8] sm:$0xff] }
 0x297   :  { %2463 = vmatprep.mubr.f32.mxu0 %v1945_v18  ;;  %2689 = vmatprep.mubr.f32.mxu1 %v1945_v18  ;;  %v10064_v63 = vmax.f32 %v10026_v0, %v1586_v59  ;;  %v1951_v3 = vsel %vm1909_vm9, %v1942_v55, %v1950_v33  ;;  %v1958_v13 = vrot.slane %v10053_v58, 6  ;;  %v7207_v36 = vpack.c.bf16 %v1676_v40, %v1672_v38  ;;  %v1678_v0 = vld [vmem:[#allocation7 + $0x9c8] sm:$0xff]  ;;  %v1680_v55 = vld [vmem:[#allocation7 + $0x9d8] sm:$0xff]  ;;  %v1683_v59 = vld [vmem:[#allocation7 + $0x9f0] sm:$0xff] }
 0x298   :  { %7070 = vmatpush1.bf16.msra.mxu0 %v7069_v60  ;;  %7198 = vmatpush1.bf16.msra.mxu1 %v7197_v25  ;;  %v1960_v60 = vrot.slane %v10047_v27, 6  ;;  %v1670_v25 = vld [vmem:[#allocation7 + $0x988] sm:$0xff]  ;;  %v1968_v18 = vrot.slane %v10059_v53, 6  ;;  %v7083_v54 = vpack.c.bf16 %v1682_v1, %v1678_v0  ;;  %v7211_v9 = vpack.c.bf16 %v1684_v57, %v1680_v55  ;;  %v1693_v55 = vld [vmem:[#allocation7 + $0xa40] sm:$0xff] }
 0x299   :  { %7072 = vmatprep.subr.bf16.mxu0 %v7071_v16  ;;  %7200 = vmatprep.subr.bf16.mxu1 %v7199_v34  ;;  %v7079_v16 = vpack.c.bf16 %v1674_v26, %v1670_v25  ;;  %v1669_v34 = vld [vmem:[#allocation7 + $0x980] sm:$0xff]  ;;  %v1690_v25 = vld [vmem:[#allocation7 + $0xa28] sm:$0xff]  ;;  %v1688_v26 = vld [vmem:[#allocation7 + $0xa18] sm:$0xff] }
 0x29a   :  { %2464 = vmatmul.mubr.f32.gmra.mrb[24].mxu0 %v1943_v46  ;;  %2690 = vmatmul.mubr.f32.gmra.mrb[32].mxu1 %v1943_v46  ;;  %v1961_v6 = vsel %vm1909_vm9, %v1952_v20, %v1960_v60  ;;  %v1966_v20 = vrot.slane %v10064_v63, 6  ;;  %v1677_v46 = vld [vmem:[#allocation7 + $0x9c0] sm:$0xff]  ;;  %v1969_v22 = vsel %vm1909_vm9, %v1960_v60, %v1968_v18  ;;  %v1687_v60 = vld [vmem:[#allocation7 + $0xa10] sm:$0xff]  ;;  %v1696_v18 = vld [vmem:[#allocation7 + $0xa58] sm:$0xff] }
 0x29b   :  { %2469 = vmatprep.mubr.f32.mxu0 %v1953_v29  ;;  %2695 = vmatprep.mubr.f32.mxu1 %v1953_v29  ;;  %v1686_v29 = vld [vmem:[#allocation7 + $0xa08] sm:$0xff]  ;;  %v1697_v57 = vld [vmem:[#allocation7 + $0xa60] sm:$0xff] }
 0x29c   :  { %7074 = vmatpush1.bf16.msra.mxu0 %v7073_v28  ;;  %7202 = vmatpush1.bf16.msra.mxu1 %v7201_v24  ;;  %v7081_v28 = vpack.c.bf16 %v1673_v51, %v1669_v34  ;;  %v1959_v24 = vsel %vm1909_vm9, %v1950_v33, %v1958_v13  ;;  %v1692_v33 = vld [vmem:[#allocation7 + $0xa38] sm:$0xff]  ;;  %v1967_v40 = vsel %vm1909_vm9, %v1958_v13, %v1966_v20  ;;  %v1691_v51 = vld [vmem:[#allocation7 + $0xa30] sm:$0xff]  ;;  %v1702_v20 = vld [vmem:[#allocation7 + $0xa88] sm:$0xff] }
 0x29d   :  { %7076 = vmatprep.subr.bf16.mxu0 %v7075_v50  ;;  %7204 = vmatprep.subr.bf16.mxu1 %v7203_v39  ;;  %v7209_v50 = vpack.c.bf16 %v1675_v12, %v1671_v21  ;;  %v1681_v39 = vld [vmem:[#allocation7 + $0x9e0] sm:$0xff]  ;;  %v7215_v34 = vpack.c.bf16 %v1692_v33, %v1688_v26  ;;  %v1694_v21 = vld [vmem:[#allocation7 + $0xa48] sm:$0xff]  ;;  %v1700_v12 = vld [vmem:[#allocation7 + $0xa78] sm:$0xff]  ;;  %v7217_v0 = vpack.c.bf16 %v1691_v51, %v1687_v60 }
 0x29e   :  { %2470 = vmatmul.mubr.f32.gmra.mrb[26].mxu0 %v1951_v3  ;;  %2696 = vmatmul.mubr.f32.gmra.mrb[34].mxu1 %v1951_v3  ;;  %v7085_v38 = vpack.c.bf16 %v1681_v39, %v1677_v46  ;;  %v1685_v3 = vld [vmem:[#allocation7 + $0xa00] sm:$0xff]  ;;  %v1704_v46 = vld [vmem:[#allocation7 + $0xa98] sm:$0xff]  ;;  %v1707_v33 = vld [vmem:[#allocation7 + $0xab0] sm:$0xff] }
 0x29f   :  { %2475 = vmatprep.mubr.f32.mxu0 %v1961_v6  ;;  %2701 = vmatprep.mubr.f32.mxu1 %v1961_v6  ;;  %v1698_v6 = vld [vmem:[#allocation7 + $0xa68] sm:$0xff]  ;;  %v1708_v39 = vld [vmem:[#allocation7 + $0xab8] sm:$0xff]  ;;  %v1713_v51 = vld [vmem:[#allocation7 + $0xae0] sm:$0xff] }
 0x2a0   :  { %7078 = vmatpush1.bf16.msra.mxu0 %v7077_v43  ;;  %7206 = vmatpush1.bf16.msra.mxu1 %v7205_v14  ;;  %v7213_v43 = vpack.c.bf16 %v1683_v59, %v1679_v56  ;;  %v7087_v14 = vpack.c.bf16 %v1690_v25, %v1686_v29  ;;  %v7091_v1 = vpack.c.bf16 %v1698_v6, %v1694_v21  ;;  %v1701_v59 = vld [vmem:[#allocation7 + $0xa80] sm:$0xff]  ;;  %v1703_v25 = vld [vmem:[#allocation7 + $0xa90] sm:$0xff] }
 0x2a1   :  { %7080 = vmatprep.subr.bf16.mxu0 %v7079_v16  ;;  %7208 = vmatprep.subr.bf16.mxu1 %v7207_v36  ;;  %v1689_v16 = vld [vmem:[#allocation7 + $0xa20] sm:$0xff]  ;;  %v7093_v56 = vpack.c.bf16 %v1697_v57, %v1693_v55  ;;  %v7223_v26 = vpack.c.bf16 %v1708_v39, %v1704_v46  ;;  %v1711_v21 = vld [vmem:[#allocation7 + $0xad0] sm:$0xff]  ;;  %v1726_v39 = vld [vmem:[#allocation7 + $0xb48] sm:$0xff] }
 0x2a2   :  { %2476 = vmatmul.mubr.f32.gmra.mrb[28].mxu0 %v1959_v24  ;;  %2702 = vmatmul.mubr.f32.gmra.mrb[36].mxu1 %v1959_v24  ;;  %v11592_v36 = vld [vmem:[#allocation50_spill] sm:$0xff]  ;;  %v7089_v13 = vpack.c.bf16 %v1689_v16, %v1685_v3  ;;  %v7219_v24 = vpack.c.bf16 %v1700_v12, %v1696_v18  ;;  %v7225_v16 = vpack.c.bf16 %v1707_v33, %v1703_v25  ;;  %v1715_v18 = vld [vmem:[#allocation7 + $0xaf0] sm:$0xff]  ;;  %v1718_v12 = vld [vmem:[#allocation7 + $0xb08] sm:$0xff] }
 0x2a3   :  { %2481 = vmatprep.mubr.f32.mxu0 %v1969_v22  ;;  %2707 = vmatprep.mubr.f32.mxu1 %v1969_v22  ;;  %v1705_v29 = vld [vmem:[#allocation7 + $0xaa0] sm:$0xff]  ;;  %v7229_v57 = vpack.c.bf16 %v1715_v18, %v1711_v21  ;;  %v1723_v46 = vld [vmem:[#allocation7 + $0xb30] sm:$0xff] }
 0x2a4   :  { %7082 = vmatpush1.bf16.msra.mxu0 %v7081_v28  ;;  %7210 = vmatpush1.bf16.msra.mxu1 %v7209_v50  ;;  %v1695_v28 = vld [vmem:[#allocation7 + $0xa50] sm:$0xff]  ;;  %v7097_v3 = vpack.c.bf16 %v1705_v29, %v1701_v59  ;;  %v1729_v33 = vld [vmem:[#allocation7 + $0xb60] sm:$0xff] }
 0x2a5   :  { %7084 = vmatprep.subr.bf16.mxu0 %v7083_v54  ;;  %7212 = vmatprep.subr.bf16.mxu1 %v7211_v9  ;;  %v1699_v50 = vld [vmem:[#allocation7 + $0xa70] sm:$0xff]  ;;  %v1706_v54 = vld [vmem:[#allocation7 + $0xaa8] sm:$0xff]  ;;  %v1737_v18 = vld [vmem:[#allocation7 + $0xba0] sm:$0xff] }
 0x2a6   :  { %2482 = vmatmul.mubr.f32.gmra.mrb[30].mxu0 %v1967_v40  ;;  %2708 = vmatmul.mubr.f32.gmra.mrb[38].mxu1 %v1967_v40  ;;  %v7221_v22 = vpack.c.bf16 %v1699_v50, %v1695_v28  ;;  %v7095_v9 = vpack.c.bf16 %v1706_v54, %v1702_v20  ;;  %v1714_v40 = vld [vmem:[#allocation7 + $0xae8] sm:$0xff]  ;;  %v1721_v50 = vld [vmem:[#allocation7 + $0xb20] sm:$0xff]  ;;  %v1719_v20 = vld [vmem:[#allocation7 + $0xb10] sm:$0xff] }
 0x2a7   :  { %2778 = vmatprep.mubr.f32.mxu0 %v11592_v36  ;;  %3004 = vmatprep.mubr.f32.mxu1 %v11592_v36  ;;  %v7233_v29 = vpack.c.bf16 %v1723_v46, %v1719_v20  ;;  %v1745_v46 = vld [vmem:[#allocation7 + $0xbe0] sm:$0xff] }
 0x2a8   :  { %7086 = vmatpush1.bf16.msra.mxu0 %v7085_v38  ;;  %7214 = vmatpush1.bf16.msra.mxu1 %v7213_v43  ;;  %v1710_v38 = vld [vmem:[#allocation7 + $0xac8] sm:$0xff]  ;;  %v1712_v43 = vld [vmem:[#allocation7 + $0xad8] sm:$0xff] }
 0x2a9   :  { %7088 = vmatprep.subr.bf16.mxu0 %v7087_v14  ;;  %7216 = vmatprep.subr.bf16.mxu1 %v7215_v34  ;;  %v1716_v14 = vld [vmem:[#allocation7 + $0xaf8] sm:$0xff]  ;;  %v7099_v60 = vpack.c.bf16 %v1714_v40, %v1710_v38  ;;  %v1709_v34 = vld [vmem:[#allocation7 + $0xac0] sm:$0xff]  ;;  %v1727_v38 = vld [vmem:[#allocation7 + $0xb50] sm:$0xff] }
 0x2aa   :  { %v7227_v6 = vpack.c.bf16 %v1716_v14, %v1712_v43  ;;  %v7101_v55 = vpack.c.bf16 %v1713_v51, %v1709_v34  ;;  %v1731_v43 = vld [vmem:[#allocation7 + $0xb70] sm:$0xff]  ;;  %v1734_v14 = vld [vmem:[#allocation7 + $0xb88] sm:$0xff] }
 0x2ab   :  { %v7237_v51 = vpack.c.bf16 %v1731_v43, %v1727_v38  ;;  %v1749_v43 = vld [vmem:[#allocation7 + $0xc00] sm:$0xff] }
 0x2ac   :  { %7090 = vmatpush1.bf16.msra.mxu0 %v7089_v13  ;;  %7218 = vmatpush1.bf16.msra.mxu1 %v7217_v0  ;;  %v1722_v13 = vld [vmem:[#allocation7 + $0xb28] sm:$0xff]  ;;  %v1720_v0 = vld [vmem:[#allocation7 + $0xb18] sm:$0xff] }
 0x2ad   :  { %7092 = vmatprep.subr.bf16.mxu0 %v7091_v1  ;;  %7220 = vmatprep.subr.bf16.mxu1 %v7219_v24  ;;  %v1724_v1 = vld [vmem:[#allocation7 + $0xb38] sm:$0xff]  ;;  %v7103_v28 = vpack.c.bf16 %v1722_v13, %v1718_v12  ;;  %v1717_v24 = vld [vmem:[#allocation7 + $0xb00] sm:$0xff]  ;;  %v1735_v12 = vld [vmem:[#allocation7 + $0xb90] sm:$0xff] }
 0x2ae   :  { %v7231_v54 = vpack.c.bf16 %v1724_v1, %v1720_v0  ;;  %v7105_v59 = vpack.c.bf16 %v1721_v50, %v1717_v24  ;;  %v1739_v0 = vld [vmem:[#allocation7 + $0xbb0] sm:$0xff]  ;;  %v1742_v1 = vld [vmem:[#allocation7 + $0xbc8] sm:$0xff] }
 0x2af   :  { %v7241_v50 = vpack.c.bf16 %v1739_v0, %v1735_v12  ;;  %v1761_v0 = vld [vmem:[#allocation7 + $0xc60] sm:$0xff] }
 0x2b0   :  { %7094 = vmatpush1.bf16.msra.mxu0 %v7093_v56  ;;  %7222 = vmatpush1.bf16.msra.mxu1 %v7221_v22  ;;  %v1730_v56 = vld [vmem:[#allocation7 + $0xb68] sm:$0xff]  ;;  %v1728_v22 = vld [vmem:[#allocation7 + $0xb58] sm:$0xff] }
 0x2b1   :  { %7096 = vmatprep.subr.bf16.mxu0 %v7095_v9  ;;  %7224 = vmatprep.subr.bf16.mxu1 %v7223_v26  ;;  %v1732_v9 = vld [vmem:[#allocation7 + $0xb78] sm:$0xff]  ;;  %v7107_v25 = vpack.c.bf16 %v1730_v56, %v1726_v39  ;;  %v1725_v26 = vld [vmem:[#allocation7 + $0xb40] sm:$0xff]  ;;  %v1743_v39 = vld [vmem:[#allocation7 + $0xbd0] sm:$0xff] }
 0x2b2   :  { %v7235_v40 = vpack.c.bf16 %v1732_v9, %v1728_v22  ;;  %v7109_v34 = vpack.c.bf16 %v1729_v33, %v1725_v26  ;;  %v1747_v22 = vld [vmem:[#allocation7 + $0xbf0] sm:$0xff]  ;;  %v1750_v9 = vld [vmem:[#allocation7 + $0xc08] sm:$0xff] }
 0x2b3   :  { %v7245_v33 = vpack.c.bf16 %v1747_v22, %v1743_v39  ;;  %v1765_v22 = vld [vmem:[#allocation7 + $0xc80] sm:$0xff] }
 0x2b4   :  { %7098 = vmatpush1.bf16.msra.mxu0 %v7097_v3  ;;  %7226 = vmatpush1.bf16.msra.mxu1 %v7225_v16  ;;  %v1738_v3 = vld [vmem:[#allocation7 + $0xba8] sm:$0xff]  ;;  %v1736_v16 = vld [vmem:[#allocation7 + $0xb98] sm:$0xff] }
 0x2b5   :  { %7100 = vmatprep.subr.bf16.mxu0 %v7099_v60  ;;  %7228 = vmatprep.subr.bf16.mxu1 %v7227_v6  ;;  %v1740_v60 = vld [vmem:[#allocation7 + $0xbb8] sm:$0xff]  ;;  %v7111_v21 = vpack.c.bf16 %v1738_v3, %v1734_v14  ;;  %v1733_v6 = vld [vmem:[#allocation7 + $0xb80] sm:$0xff]  ;;  %v1751_v3 = vld [vmem:[#allocation7 + $0xc10] sm:$0xff] }
 0x2b6   :  { %v7239_v13 = vpack.c.bf16 %v1740_v60, %v1736_v16  ;;  %v7113_v24 = vpack.c.bf16 %v1737_v18, %v1733_v6  ;;  %v1753_v14 = vld [vmem:[#allocation7 + $0xc20] sm:$0xff]  ;;  %v1755_v16 = vld [vmem:[#allocation7 + $0xc30] sm:$0xff]  ;;  %v1758_v60 = vld [vmem:[#allocation7 + $0xc48] sm:$0xff] }
 0x2b7   :  { %v7121_v6 = vpack.c.bf16 %v1753_v14, %v1749_v43  ;;  %v7249_v18 = vpack.c.bf16 %v1755_v16, %v1751_v3  ;;  %v1773_v16 = vld [vmem:[#allocation7 + $0xcc0] sm:$0xff] }
 0x2b8   :  { %7102 = vmatpush1.bf16.msra.mxu0 %v7101_v55  ;;  %7230 = vmatpush1.bf16.msra.mxu1 %v7229_v57  ;;  %v1746_v55 = vld [vmem:[#allocation7 + $0xbe8] sm:$0xff]  ;;  %v1744_v57 = vld [vmem:[#allocation7 + $0xbd8] sm:$0xff] }
 0x2b9   :  { %7104 = vmatprep.subr.bf16.mxu0 %v7103_v28  ;;  %7232 = vmatprep.subr.bf16.mxu1 %v7231_v54  ;;  %v1748_v28 = vld [vmem:[#allocation7 + $0xbf8] sm:$0xff]  ;;  %v7115_v20 = vpack.c.bf16 %v1746_v55, %v1742_v1  ;;  %v1741_v54 = vld [vmem:[#allocation7 + $0xbc0] sm:$0xff]  ;;  %v1759_v1 = vld [vmem:[#allocation7 + $0xc50] sm:$0xff] }
 0x2ba   :  { %v7243_v56 = vpack.c.bf16 %v1748_v28, %v1744_v57  ;;  %v7117_v26 = vpack.c.bf16 %v1745_v46, %v1741_v54  ;;  %v11593_v55 = vld [vmem:[#allocation57_spill] sm:$0xff] }
 0x2bb   :  { %v1763_v28 = vld [vmem:[#allocation7 + $0xc70] sm:$0xff]  ;;  %v1772_v54 = vld [vmem:[#allocation7 + $0xcb8] sm:$0xff] }
 0x2bc   :  { %7106 = vmatpush1.bf16.msra.mxu0 %v7105_v59  ;;  %7234 = vmatpush1.bf16.msra.mxu1 %v7233_v29  ;;  %v1754_v59 = vld [vmem:[#allocation7 + $0xc28] sm:$0xff]  ;;  %v1752_v29 = vld [vmem:[#allocation7 + $0xc18] sm:$0xff]  ;;  %v7253_v39 = vpack.c.bf16 %v1763_v28, %v1759_v1  ;;  %v1781_v28 = vld [vmem:[#allocation7 + $0xd00] sm:$0xff] }
 0x2bd   :  { %7108 = vmatprep.subr.bf16.mxu0 %v7107_v25  ;;  %7236 = vmatprep.subr.bf16.mxu1 %v7235_v40  ;;  %v1756_v25 = vld [vmem:[#allocation7 + $0xc38] sm:$0xff]  ;;  %v7119_v38 = vpack.c.bf16 %v1754_v59, %v1750_v9  ;;  %v1769_v9 = vld [vmem:[#allocation7 + $0xca0] sm:$0xff]  ;;  %v1767_v59 = vld [vmem:[#allocation7 + $0xc90] sm:$0xff] }
 0x2be   :  { %v7247_v40 = vpack.c.bf16 %v1756_v25, %v1752_v29  ;;  %v1771_v25 = vld [vmem:[#allocation7 + $0xcb0] sm:$0xff]  ;;  %v7129_v43 = vpack.c.bf16 %v1769_v9, %v1765_v22  ;;  %v1796_v22 = vld [vmem:[#allocation7 + $0xd78] sm:$0xff] }
 0x2bf   :  { %v7257_v14 = vpack.c.bf16 %v1771_v25, %v1767_v59  ;;  %v1789_v25 = vld [vmem:[#allocation7 + $0xd40] sm:$0xff] }
 0x2c0   :  { %7110 = vmatpush1.bf16.msra.mxu0 %v7109_v34  ;;  %7238 = vmatpush1.bf16.msra.mxu1 %v7237_v51  ;;  %v1762_v34 = vld [vmem:[#allocation7 + $0xc68] sm:$0xff]  ;;  %v1760_v51 = vld [vmem:[#allocation7 + $0xc58] sm:$0xff] }
 0x2c1   :  { %7112 = vmatprep.subr.bf16.mxu0 %v7111_v21  ;;  %7240 = vmatprep.subr.bf16.mxu1 %v7239_v13  ;;  %v1764_v21 = vld [vmem:[#allocation7 + $0xc78] sm:$0xff]  ;;  %v7123_v12 = vpack.c.bf16 %v1762_v34, %v1758_v60  ;;  %v1757_v13 = vld [vmem:[#allocation7 + $0xc40] sm:$0xff]  ;;  %v1775_v34 = vld [vmem:[#allocation7 + $0xcd0] sm:$0xff] }
 0x2c2   :  { %v7251_v57 = vpack.c.bf16 %v1764_v21, %v1760_v51  ;;  %v7125_v46 = vpack.c.bf16 %v1761_v0, %v1757_v13  ;;  %v1777_v60 = vld [vmem:[#allocation7 + $0xce0] sm:$0xff]  ;;  %v1779_v21 = vld [vmem:[#allocation7 + $0xcf0] sm:$0xff]  ;;  %v1788_v13 = vld [vmem:[#allocation7 + $0xd38] sm:$0xff] }
 0x2c3   :  { %v7133_v0 = vpack.c.bf16 %v1777_v60, %v1773_v16  ;;  %v7261_v1 = vpack.c.bf16 %v1779_v21, %v1775_v34  ;;  %v1804_v16 = vld [vmem:[#allocation7 + $0xdb8] sm:$0xff]  ;;  %v1797_v21 = vld [vmem:[#allocation7 + $0xd80] sm:$0xff] }
 0x2c4   :  { %7114 = vmatpush1.bf16.msra.mxu0 %v7113_v24  ;;  %7242 = vmatpush1.bf16.msra.mxu1 %v7241_v50  ;;  %v1766_v24 = vld [vmem:[#allocation7 + $0xc88] sm:$0xff] }
 0x2c5   :  { %7116 = vmatprep.subr.bf16.mxu0 %v7115_v20  ;;  %7244 = vmatprep.subr.bf16.mxu1 %v7243_v56  ;;  %v1770_v50 = vld [vmem:[#allocation7 + $0xca8] sm:$0xff]  ;;  %v1768_v20 = vld [vmem:[#allocation7 + $0xc98] sm:$0xff] }
 0x2c6   :  { %v7127_v56 = vpack.c.bf16 %v1770_v50, %v1766_v24  ;;  %v7255_v29 = vpack.c.bf16 %v1772_v54, %v1768_v20  ;;  %v1785_v24 = vld [vmem:[#allocation7 + $0xd20] sm:$0xff]  ;;  %v1783_v50 = vld [vmem:[#allocation7 + $0xd10] sm:$0xff] }
 0x2c7   :  { %v1787_v54 = vld [vmem:[#allocation7 + $0xd30] sm:$0xff]  ;;  %v7137_v9 = vpack.c.bf16 %v1785_v24, %v1781_v28  ;;  %v1812_v28 = vld [vmem:[#allocation7 + $0xdf8] sm:$0xff] }
 0x2c8   :  { %7118 = vmatpush1.bf16.msra.mxu0 %v7117_v26  ;;  %7246 = vmatpush1.bf16.msra.mxu1 %v7245_v33  ;;  %v1774_v26 = vld [vmem:[#allocation7 + $0xcc8] sm:$0xff]  ;;  %v7265_v59 = vpack.c.bf16 %v1787_v54, %v1783_v50  ;;  %v1805_v54 = vld [vmem:[#allocation7 + $0xdc0] sm:$0xff] }
 0x2c9   :  { %7120 = vmatprep.subr.bf16.mxu0 %v7119_v38  ;;  %7248 = vmatprep.subr.bf16.mxu1 %v7247_v40  ;;  %v1778_v33 = vld [vmem:[#allocation7 + $0xce8] sm:$0xff]  ;;  %v1776_v38 = vld [vmem:[#allocation7 + $0xcd8] sm:$0xff] }
 0x2ca   :  { %v1780_v40 = vld [vmem:[#allocation7 + $0xcf8] sm:$0xff]  ;;  %v7131_v3 = vpack.c.bf16 %v1778_v33, %v1774_v26  ;;  %v1793_v26 = vld [vmem:[#allocation7 + $0xd60] sm:$0xff]  ;;  %v1791_v33 = vld [vmem:[#allocation7 + $0xd50] sm:$0xff] }
 0x2cb   :  { %2779 = vmatmul.mubr.f32.vlgmr.msra.gmra.mrb[16].mxu0 %v11593_v55  ;;  %3005 = vmatmul.mubr.f32.vlgmr.msra.gmra.mrb[24].mxu1 %v11593_v55  ;;  %v7259_v51 = vpack.c.bf16 %v1780_v40, %v1776_v38  ;;  %v1795_v40 = vld [vmem:[#allocation7 + $0xd70] sm:$0xff]  ;;  %v7141_v60 = vpack.c.bf16 %v1793_v26, %v1789_v25  ;;  %v1820_v25 = vld [vmem:[#allocation7 + $0xe38] sm:$0xff] }
 0x2cc   :  { %2784 = vmatprep.mubr.f32.mxu0 %v9547_v48  ;;  %7122 = vmatpush1.bf16.msra.mxu0 %v7121_v6  ;;  %v1782_v6 = vld [vmem:[#allocation7 + $0xd08] sm:$0xff]  ;;  %v7269_v34 = vpack.c.bf16 %v1795_v40, %v1791_v33  ;;  %v1813_v40 = vld [vmem:[#allocation7 + $0xe00] sm:$0xff] }
 0x2cd   :  { %3010 = vmatprep.mubr.f32.mxu1 %v9547_v48  ;;  %7250 = vmatpush1.bf16.msra.mxu1 %v7249_v18  ;;  %v1786_v18 = vld [vmem:[#allocation7 + $0xd28] sm:$0xff] }
 0x2ce   :  { %7124 = vmatprep.subr.bf16.mxu0 %v7123_v12  ;;  %7252 = vmatprep.subr.bf16.mxu1 %v7251_v57  ;;  %v1784_v12 = vld [vmem:[#allocation7 + $0xd18] sm:$0xff]  ;;  %v7135_v57 = vpack.c.bf16 %v1786_v18, %v1782_v6  ;;  %v1801_v6 = vld [vmem:[#allocation7 + $0xda0] sm:$0xff]  ;;  %v1799_v18 = vld [vmem:[#allocation7 + $0xd90] sm:$0xff] }
 0x2cf   :  { %2785 = vmatmul.mubr.f32.gmra.mrb[18].mxu0 %v9562_v7  ;;  %3011 = vmatmul.mubr.f32.gmra.mrb[26].mxu1 %v9562_v7  ;;  %v7263_v20 = vpack.c.bf16 %v1788_v13, %v1784_v12  ;;  %v1803_v13 = vld [vmem:[#allocation7 + $0xdb0] sm:$0xff]  ;;  %v7145_v24 = vpack.c.bf16 %v1801_v6, %v1797_v21  ;;  %v1828_v21 = vld [vmem:[#allocation7 + $0xe78] sm:$0xff] }
 0x2d0   :  { %2790 = vmatprep.mubr.f32.mxu0 %v9593_v47  ;;  %7126 = vmatpush1.bf16.msra.mxu0 %v7125_v46  ;;  %v1790_v46 = vld [vmem:[#allocation7 + $0xd48] sm:$0xff]  ;;  %v7273_v50 = vpack.c.bf16 %v1803_v13, %v1799_v18  ;;  %v1821_v13 = vld [vmem:[#allocation7 + $0xe40] sm:$0xff] }
 0x2d1   :  { %3016 = vmatprep.mubr.f32.mxu1 %v9593_v47  ;;  %7254 = vmatpush1.bf16.msra.mxu1 %v7253_v39  ;;  %v1794_v39 = vld [vmem:[#allocation7 + $0xd68] sm:$0xff] }
 0x2d2   :  { %7128 = vmatprep.subr.bf16.mxu0 %v7127_v56  ;;  %7256 = vmatprep.subr.bf16.mxu1 %v7255_v29  ;;  %v1792_v56 = vld [vmem:[#allocation7 + $0xd58] sm:$0xff]  ;;  %v7139_v29 = vpack.c.bf16 %v1794_v39, %v1790_v46  ;;  %v1809_v46 = vld [vmem:[#allocation7 + $0xde0] sm:$0xff]  ;;  %v1807_v39 = vld [vmem:[#allocation7 + $0xdd0] sm:$0xff] }
 0x2d3   :  { %2791 = vmatmul.mubr.f32.gmra.mrb[20].mxu0 %v9595_v42  ;;  %3017 = vmatmul.mubr.f32.gmra.mrb[28].mxu1 %v9595_v42  ;;  %v7267_v38 = vpack.c.bf16 %v1796_v22, %v1792_v56  ;;  %v1811_v22 = vld [vmem:[#allocation7 + $0xdf0] sm:$0xff]  ;;  %v7149_v26 = vpack.c.bf16 %v1809_v46, %v1805_v54  ;;  %v1836_v54 = vld [vmem:[#allocation7 + $0xeb8] sm:$0xff] }
 0x2d4   :  { %2796 = vmatprep.mubr.f32.mxu0 %v9631_v61  ;;  %7130 = vmatpush1.bf16.msra.mxu0 %v7129_v43  ;;  %v1798_v43 = vld [vmem:[#allocation7 + $0xd88] sm:$0xff]  ;;  %v7277_v33 = vpack.c.bf16 %v1811_v22, %v1807_v39  ;;  %v1829_v22 = vld [vmem:[#allocation7 + $0xe80] sm:$0xff] }
 0x2d5   :  { %3022 = vmatprep.mubr.f32.mxu1 %v9631_v61  ;;  %7258 = vmatpush1.bf16.msra.mxu1 %v7257_v14  ;;  %v1802_v14 = vld [vmem:[#allocation7 + $0xda8] sm:$0xff] }
 0x2d6   :  { %7132 = vmatprep.subr.bf16.mxu0 %v7131_v3  ;;  %7260 = vmatprep.subr.bf16.mxu1 %v7259_v51  ;;  %v1800_v3 = vld [vmem:[#allocation7 + $0xd98] sm:$0xff]  ;;  %v7143_v51 = vpack.c.bf16 %v1802_v14, %v1798_v43  ;;  %v1817_v43 = vld [vmem:[#allocation7 + $0xe20] sm:$0xff]  ;;  %v1815_v14 = vld [vmem:[#allocation7 + $0xe10] sm:$0xff] }
 0x2d7   :  { %2797 = vmatmul.mubr.f32.gmra.mrb[22].mxu0 %v9645_v23  ;;  %3023 = vmatmul.mubr.f32.gmra.mrb[30].mxu1 %v9645_v23  ;;  %v7271_v12 = vpack.c.bf16 %v1804_v16, %v1800_v3  ;;  %v1819_v16 = vld [vmem:[#allocation7 + $0xe30] sm:$0xff]  ;;  %v7153_v6 = vpack.c.bf16 %v1817_v43, %v1813_v40  ;;  %v1844_v40 = vld [vmem:[#allocation7 + $0xef8] sm:$0xff] }
 0x2d8   :  { %2802 = vmatprep.mubr.f32.mxu0 %v9698_v8  ;;  %7134 = vmatpush1.bf16.msra.mxu0 %v7133_v0  ;;  %v1806_v0 = vld [vmem:[#allocation7 + $0xdc8] sm:$0xff]  ;;  %v7281_v18 = vpack.c.bf16 %v1819_v16, %v1815_v14  ;;  %v1837_v16 = vld [vmem:[#allocation7 + $0xec0] sm:$0xff] }
 0x2d9   :  { %3028 = vmatprep.mubr.f32.mxu1 %v9698_v8  ;;  %7262 = vmatpush1.bf16.msra.mxu1 %v7261_v1  ;;  %v1810_v1 = vld [vmem:[#allocation7 + $0xde8] sm:$0xff] }
 0x2da   :  { %7136 = vmatprep.subr.bf16.mxu0 %v7135_v57  ;;  %7264 = vmatprep.subr.bf16.mxu1 %v7263_v20  ;;  %v1808_v57 = vld [vmem:[#allocation7 + $0xdd8] sm:$0xff]  ;;  %v7147_v20 = vpack.c.bf16 %v1810_v1, %v1806_v0  ;;  %v1825_v0 = vld [vmem:[#allocation7 + $0xe60] sm:$0xff]  ;;  %v1823_v1 = vld [vmem:[#allocation7 + $0xe50] sm:$0xff] }
 0x2db   :  { %2803 = vmatmul.mubr.f32.gmra.mrb[24].mxu0 %v9701_v44  ;;  %3029 = vmatmul.mubr.f32.gmra.mrb[32].mxu1 %v9701_v44  ;;  %v7275_v56 = vpack.c.bf16 %v1812_v28, %v1808_v57  ;;  %v1827_v28 = vld [vmem:[#allocation7 + $0xe70] sm:$0xff]  ;;  %v7157_v46 = vpack.c.bf16 %v1825_v0, %v1821_v13  ;;  %v1852_v13 = vld [vmem:[#allocation7 + $0xf38] sm:$0xff] }
 0x2dc   :  { %2808 = vmatprep.mubr.f32.mxu0 %v9777_v19  ;;  %7138 = vmatpush1.bf16.msra.mxu0 %v7137_v9  ;;  %v1814_v9 = vld [vmem:[#allocation7 + $0xe08] sm:$0xff]  ;;  %v7285_v39 = vpack.c.bf16 %v1827_v28, %v1823_v1  ;;  %v1845_v28 = vld [vmem:[#allocation7 + $0xf00] sm:$0xff] }
 0x2dd   :  { %3034 = vmatprep.mubr.f32.mxu1 %v9777_v19  ;;  %7266 = vmatpush1.bf16.msra.mxu1 %v7265_v59  ;;  %v1818_v59 = vld [vmem:[#allocation7 + $0xe28] sm:$0xff] }
 0x2de   :  { %7140 = vmatprep.subr.bf16.mxu0 %v7139_v29  ;;  %7268 = vmatprep.subr.bf16.mxu1 %v7267_v38  ;;  %v1816_v29 = vld [vmem:[#allocation7 + $0xe18] sm:$0xff]  ;;  %v7151_v38 = vpack.c.bf16 %v1818_v59, %v1814_v9  ;;  %v1833_v9 = vld [vmem:[#allocation7 + $0xea0] sm:$0xff]  ;;  %v1831_v59 = vld [vmem:[#allocation7 + $0xe90] sm:$0xff] }
 0x2df   :  { %2809 = vmatmul.mubr.f32.gmra.mrb[26].mxu0 %v9834_v31  ;;  %3035 = vmatmul.mubr.f32.gmra.mrb[34].mxu1 %v9834_v31  ;;  %v7279_v3 = vpack.c.bf16 %v1820_v25, %v1816_v29  ;;  %v1835_v25 = vld [vmem:[#allocation7 + $0xeb0] sm:$0xff]  ;;  %v7161_v43 = vpack.c.bf16 %v1833_v9, %v1829_v22  ;;  %v1860_v22 = vld [vmem:[#allocation7 + $0xf78] sm:$0xff] }
 0x2e0   :  { %2814 = vmatprep.mubr.f32.mxu0 %v9801_v10  ;;  %7142 = vmatpush1.bf16.msra.mxu0 %v7141_v60  ;;  %v1822_v60 = vld [vmem:[#allocation7 + $0xe48] sm:$0xff]  ;;  %v7289_v14 = vpack.c.bf16 %v1835_v25, %v1831_v59  ;;  %v1853_v25 = vld [vmem:[#allocation7 + $0xf40] sm:$0xff] }
 0x2e1   :  { %3040 = vmatprep.mubr.f32.mxu1 %v9801_v10  ;;  %7270 = vmatpush1.bf16.msra.mxu1 %v7269_v34  ;;  %v1826_v34 = vld [vmem:[#allocation7 + $0xe68] sm:$0xff] }
 0x2e2   :  { %7144 = vmatprep.subr.bf16.mxu0 %v7143_v51  ;;  %7272 = vmatprep.subr.bf16.mxu1 %v7271_v12  ;;  %v1824_v51 = vld [vmem:[#allocation7 + $0xe58] sm:$0xff]  ;;  %v7155_v12 = vpack.c.bf16 %v1826_v34, %v1822_v60  ;;  %v1841_v60 = vld [vmem:[#allocation7 + $0xee0] sm:$0xff]  ;;  %v1839_v34 = vld [vmem:[#allocation7 + $0xed0] sm:$0xff] }
 0x2e3   :  { %2815 = vmatmul.mubr.f32.gmra.mrb[28].mxu0 %v9865_v15  ;;  %3041 = vmatmul.mubr.f32.gmra.mrb[36].mxu1 %v9865_v15  ;;  %v7283_v57 = vpack.c.bf16 %v1828_v21, %v1824_v51  ;;  %v1843_v21 = vld [vmem:[#allocation7 + $0xef0] sm:$0xff]  ;;  %v7165_v0 = vpack.c.bf16 %v1841_v60, %v1837_v16  ;;  %v1868_v16 = vld [vmem:[#allocation7 + $0xfb8] sm:$0xff] }
 0x2e4   :  { %2820 = vmatprep.mubr.f32.mxu0 %v9894_v41  ;;  %7146 = vmatpush1.bf16.msra.mxu0 %v7145_v24  ;;  %v1830_v24 = vld [vmem:[#allocation7 + $0xe88] sm:$0xff]  ;;  %v7293_v1 = vpack.c.bf16 %v1843_v21, %v1839_v34  ;;  %v1861_v21 = vld [vmem:[#allocation7 + $0xf80] sm:$0xff] }
 0x2e5   :  { %3046 = vmatprep.mubr.f32.mxu1 %v9894_v41  ;;  %7274 = vmatpush1.bf16.msra.mxu1 %v7273_v50  ;;  %v1834_v50 = vld [vmem:[#allocation7 + $0xea8] sm:$0xff] }
 0x2e6   :  { %7148 = vmatprep.subr.bf16.mxu0 %v7147_v20  ;;  %7276 = vmatprep.subr.bf16.mxu1 %v7275_v56  ;;  %v1832_v20 = vld [vmem:[#allocation7 + $0xe98] sm:$0xff]  ;;  %v7159_v56 = vpack.c.bf16 %v1834_v50, %v1830_v24  ;;  %v1849_v24 = vld [vmem:[#allocation7 + $0xf20] sm:$0xff]  ;;  %v1847_v50 = vld [vmem:[#allocation7 + $0xf10] sm:$0xff] }
 0x2e7   :  { %2821 = vmatmul.mubr.f32.gmra.mrb[30].mxu0 %v9902_v37  ;;  %3047 = vmatmul.mubr.f32.gmra.mrb[38].mxu1 %v9902_v37  ;;  %v7287_v29 = vpack.c.bf16 %v1836_v54, %v1832_v20  ;;  %v1851_v54 = vld [vmem:[#allocation7 + $0xf30] sm:$0xff]  ;;  %v7169_v9 = vpack.c.bf16 %v1849_v24, %v1845_v28  ;;  %v1876_v28 = vld [vmem:[#allocation7 + $0xff8] sm:$0xff] }
 0x2e8   :  { %2891 = vmatprep.mubr.f32.mxu0 %v9927_v30  ;;  %7150 = vmatpush1.bf16.msra.mxu0 %v7149_v26  ;;  %v1838_v26 = vld [vmem:[#allocation7 + $0xec8] sm:$0xff]  ;;  %v7297_v59 = vpack.c.bf16 %v1851_v54, %v1847_v50  ;;  %v1869_v54 = vld [vmem:[#allocation7 + $0xfc0] sm:$0xff] }
 0x2e9   :  { %3117 = vmatprep.mubr.f32.mxu1 %v9927_v30  ;;  %7278 = vmatpush1.bf16.msra.mxu1 %v7277_v33  ;;  %v1842_v33 = vld [vmem:[#allocation7 + $0xee8] sm:$0xff] }
 0x2ea   :  { %7152 = vmatprep.subr.bf16.mxu0 %v7151_v38  ;;  %7280 = vmatprep.subr.bf16.mxu1 %v7279_v3  ;;  %v1840_v38 = vld [vmem:[#allocation7 + $0xed8] sm:$0xff]  ;;  %v7163_v3 = vpack.c.bf16 %v1842_v33, %v1838_v26  ;;  %v1857_v26 = vld [vmem:[#allocation7 + $0xf60] sm:$0xff]  ;;  %v1855_v33 = vld [vmem:[#allocation7 + $0xf50] sm:$0xff] }
 0x2eb   :  { %v7291_v51 = vpack.c.bf16 %v1844_v40, %v1840_v38  ;;  %v1859_v40 = vld [vmem:[#allocation7 + $0xf70] sm:$0xff]  ;;  %v7173_v60 = vpack.c.bf16 %v1857_v26, %v1853_v25  ;;  %v3270_v25 = vld [vmem:[#allocation7 + $0x1038] sm:$0xff] }
 0x2ec   :  { %7154 = vmatpush1.bf16.msra.mxu0 %v7153_v6  ;;  %v1846_v6 = vld [vmem:[#allocation7 + $0xf08] sm:$0xff]  ;;  %v7301_v34 = vpack.c.bf16 %v1859_v40, %v1855_v33 }
 0x2ed   :  { %7282 = vmatpush1.bf16.msra.mxu1 %v7281_v18  ;;  %7156 = vmatprep.subr.bf16.mxu0 %v7155_v12  ;;  %v1850_v18 = vld [vmem:[#allocation7 + $0xf28] sm:$0xff]  ;;  %v1848_v12 = vld [vmem:[#allocation7 + $0xf18] sm:$0xff] }
 0x2ee   :  { %7284 = vmatprep.subr.bf16.mxu1 %v7283_v57  ;;  %v7167_v57 = vpack.c.bf16 %v1850_v18, %v1846_v6  ;;  %v7295_v20 = vpack.c.bf16 %v1852_v13, %v1848_v12  ;;  %v1865_v6 = vld [vmem:[#allocation7 + $0xfa0] sm:$0xff]  ;;  %v1863_v18 = vld [vmem:[#allocation7 + $0xf90] sm:$0xff] }
 0x2ef   :  { %v1867_v13 = vld [vmem:[#allocation7 + $0xfb0] sm:$0xff]  ;;  %v7177_v24 = vpack.c.bf16 %v1865_v6, %v1861_v21  ;;  %v3278_v21 = vld [vmem:[#allocation7 + $0x1078] sm:$0xff] }
 0x2f0   :  { %7158 = vmatpush1.bf16.msra.mxu0 %v7157_v46  ;;  %v1854_v46 = vld [vmem:[#allocation7 + $0xf48] sm:$0xff]  ;;  %v7305_v50 = vpack.c.bf16 %v1867_v13, %v1863_v18  ;;  %v3271_v13 = vld [vmem:[#allocation7 + $0x1040] sm:$0xff] }
 0x2f1   :  { %7286 = vmatpush1.bf16.msra.mxu1 %v7285_v39  ;;  %7160 = vmatprep.subr.bf16.mxu0 %v7159_v56  ;;  %v1858_v39 = vld [vmem:[#allocation7 + $0xf68] sm:$0xff]  ;;  %v1856_v56 = vld [vmem:[#allocation7 + $0xf58] sm:$0xff] }
 0x2f2   :  { %7288 = vmatprep.subr.bf16.mxu1 %v7287_v29  ;;  %v7171_v29 = vpack.c.bf16 %v1858_v39, %v1854_v46  ;;  %v7299_v38 = vpack.c.bf16 %v1860_v22, %v1856_v56  ;;  %v1873_v46 = vld [vmem:[#allocation7 + $0xfe0] sm:$0xff]  ;;  %v1871_v39 = vld [vmem:[#allocation7 + $0xfd0] sm:$0xff] }
 0x2f3   :  { %v1875_v22 = vld [vmem:[#allocation7 + $0xff0] sm:$0xff]  ;;  %v7181_v26 = vpack.c.bf16 %v1873_v46, %v1869_v54  ;;  %v3286_v54 = vld [vmem:[#allocation7 + $0x10b8] sm:$0xff] }
 0x2f4   :  { %7162 = vmatpush1.bf16.msra.mxu0 %v7161_v43  ;;  %v1862_v43 = vld [vmem:[#allocation7 + $0xf88] sm:$0xff]  ;;  %v7309_v33 = vpack.c.bf16 %v1875_v22, %v1871_v39  ;;  %v3279_v22 = vld [vmem:[#allocation7 + $0x1080] sm:$0xff] }
 0x2f5   :  { %7290 = vmatpush1.bf16.msra.mxu1 %v7289_v14  ;;  %7164 = vmatprep.subr.bf16.mxu0 %v7163_v3  ;;  %v1866_v14 = vld [vmem:[#allocation7 + $0xfa8] sm:$0xff]  ;;  %v1864_v3 = vld [vmem:[#allocation7 + $0xf98] sm:$0xff] }
 0x2f6   :  { %7292 = vmatprep.subr.bf16.mxu1 %v7291_v51  ;;  %v7175_v51 = vpack.c.bf16 %v1866_v14, %v1862_v43  ;;  %v7303_v12 = vpack.c.bf16 %v1868_v16, %v1864_v3  ;;  %v3263_v43 = vld [vmem:[#allocation7 + $0x1000] sm:$0xff]  ;;  %v3265_v3 = vld [vmem:[#allocation7 + $0x1010] sm:$0xff] }
 0x2f7   :  { %v3267_v14 = vld [vmem:[#allocation7 + $0x1020] sm:$0xff]  ;;  %v3269_v16 = vld [vmem:[#allocation7 + $0x1030] sm:$0xff] }
 0x2f8   :  { %7166 = vmatpush1.bf16.msra.mxu0 %v7165_v0  ;;  %v1870_v0 = vld [vmem:[#allocation7 + $0xfc8] sm:$0xff]  ;;  %v7313_v6 = vpack.c.bf16 %v3267_v14, %v3263_v43  ;;  %v7441_v18 = vpack.c.bf16 %v3269_v16, %v3265_v3  ;;  %v3287_v16 = vld [vmem:[#allocation7 + $0x10c0] sm:$0xff] }
 0x2f9   :  { %7294 = vmatpush1.bf16.msra.mxu1 %v7293_v1  ;;  %7168 = vmatprep.subr.bf16.mxu0 %v7167_v57  ;;  %v1874_v1 = vld [vmem:[#allocation7 + $0xfe8] sm:$0xff]  ;;  %v1872_v57 = vld [vmem:[#allocation7 + $0xfd8] sm:$0xff] }
 0x2fa   :  { %7296 = vmatprep.subr.bf16.mxu1 %v7295_v20  ;;  %v7179_v20 = vpack.c.bf16 %v1874_v1, %v1870_v0  ;;  %v7307_v56 = vpack.c.bf16 %v1876_v28, %v1872_v57  ;;  %v3275_v0 = vld [vmem:[#allocation7 + $0x1060] sm:$0xff]  ;;  %v3273_v1 = vld [vmem:[#allocation7 + $0x1050] sm:$0xff] }
 0x2fb   :  { %v3277_v28 = vld [vmem:[#allocation7 + $0x1070] sm:$0xff]  ;;  %v7317_v46 = vpack.c.bf16 %v3275_v0, %v3271_v13  ;;  %v3302_v13 = vld [vmem:[#allocation7 + $0x1138] sm:$0xff] }
 0x2fc   :  { %7170 = vmatpush1.bf16.msra.mxu0 %v7169_v9  ;;  %v3264_v9 = vld [vmem:[#allocation7 + $0x1008] sm:$0xff]  ;;  %v7445_v39 = vpack.c.bf16 %v3277_v28, %v3273_v1  ;;  %v3295_v28 = vld [vmem:[#allocation7 + $0x1100] sm:$0xff] }
 0x2fd   :  { %7298 = vmatpush1.bf16.msra.mxu1 %v7297_v59  ;;  %7172 = vmatprep.subr.bf16.mxu0 %v7171_v29  ;;  %v3268_v59 = vld [vmem:[#allocation7 + $0x1028] sm:$0xff]  ;;  %v3266_v29 = vld [vmem:[#allocation7 + $0x1018] sm:$0xff] }
 0x2fe   :  { %7300 = vmatprep.subr.bf16.mxu1 %v7299_v38  ;;  %v7311_v38 = vpack.c.bf16 %v3268_v59, %v3264_v9  ;;  %v7439_v40 = vpack.c.bf16 %v3270_v25, %v3266_v29  ;;  %v3283_v9 = vld [vmem:[#allocation7 + $0x10a0] sm:$0xff]  ;;  %v3281_v59 = vld [vmem:[#allocation7 + $0x1090] sm:$0xff] }
 0x2ff   :  { %v3285_v25 = vld [vmem:[#allocation7 + $0x10b0] sm:$0xff]  ;;  %v7321_v43 = vpack.c.bf16 %v3283_v9, %v3279_v22  ;;  %v3310_v22 = vld [vmem:[#allocation7 + $0x1178] sm:$0xff] }
 0x300   :  { %7174 = vmatpush1.bf16.msra.mxu0 %v7173_v60  ;;  %v3272_v60 = vld [vmem:[#allocation7 + $0x1048] sm:$0xff]  ;;  %v7449_v14 = vpack.c.bf16 %v3285_v25, %v3281_v59  ;;  %v3303_v25 = vld [vmem:[#allocation7 + $0x1140] sm:$0xff] }
 0x301   :  { %7302 = vmatpush1.bf16.msra.mxu1 %v7301_v34  ;;  %7176 = vmatprep.subr.bf16.mxu0 %v7175_v51  ;;  %v3276_v34 = vld [vmem:[#allocation7 + $0x1068] sm:$0xff]  ;;  %v3274_v51 = vld [vmem:[#allocation7 + $0x1058] sm:$0xff] }
 0x302   :  { %7304 = vmatprep.subr.bf16.mxu1 %v7303_v12  ;;  %v7315_v12 = vpack.c.bf16 %v3276_v34, %v3272_v60  ;;  %v7443_v57 = vpack.c.bf16 %v3278_v21, %v3274_v51  ;;  %v3291_v60 = vld [vmem:[#allocation7 + $0x10e0] sm:$0xff]  ;;  %v3289_v34 = vld [vmem:[#allocation7 + $0x10d0] sm:$0xff] }
 0x303   :  { %v3293_v21 = vld [vmem:[#allocation7 + $0x10f0] sm:$0xff]  ;;  %v7325_v0 = vpack.c.bf16 %v3291_v60, %v3287_v16  ;;  %v3318_v16 = vld [vmem:[#allocation7 + $0x11b8] sm:$0xff] }
 0x304   :  { %7178 = vmatpush1.bf16.msra.mxu0 %v7177_v24  ;;  %v3280_v24 = vld [vmem:[#allocation7 + $0x1088] sm:$0xff]  ;;  %v7453_v1 = vpack.c.bf16 %v3293_v21, %v3289_v34  ;;  %v3311_v21 = vld [vmem:[#allocation7 + $0x1180] sm:$0xff] }
 0x305   :  { %7306 = vmatpush1.bf16.msra.mxu1 %v7305_v50  ;;  %7180 = vmatprep.subr.bf16.mxu0 %v7179_v20  ;;  %v3284_v50 = vld [vmem:[#allocation7 + $0x10a8] sm:$0xff]  ;;  %v3282_v20 = vld [vmem:[#allocation7 + $0x1098] sm:$0xff] }
 0x306   :  { %7308 = vmatprep.subr.bf16.mxu1 %v7307_v56  ;;  %v7319_v56 = vpack.c.bf16 %v3284_v50, %v3280_v24  ;;  %v7447_v29 = vpack.c.bf16 %v3286_v54, %v3282_v20  ;;  %v3299_v24 = vld [vmem:[#allocation7 + $0x1120] sm:$0xff]  ;;  %v3297_v50 = vld [vmem:[#allocation7 + $0x1110] sm:$0xff] }
 0x307   :  { %v3301_v54 = vld [vmem:[#allocation7 + $0x1130] sm:$0xff]  ;;  %v7329_v9 = vpack.c.bf16 %v3299_v24, %v3295_v28  ;;  %v3326_v28 = vld [vmem:[#allocation7 + $0x11f8] sm:$0xff] }
 0x308   :  { %7182 = vmatpush1.bf16.msra.mxu0 %v7181_v26  ;;  %v3288_v26 = vld [vmem:[#allocation7 + $0x10c8] sm:$0xff]  ;;  %v7457_v59 = vpack.c.bf16 %v3301_v54, %v3297_v50  ;;  %v3319_v54 = vld [vmem:[#allocation7 + $0x11c0] sm:$0xff] }
 0x309   :  { %7310 = vmatpush1.bf16.msra.mxu1 %v7309_v33  ;;  %7312 = vmatprep.subr.bf16.mxu0 %v7311_v38  ;;  %v3292_v33 = vld [vmem:[#allocation7 + $0x10e8] sm:$0xff]  ;;  %v3290_v38 = vld [vmem:[#allocation7 + $0x10d8] sm:$0xff] }
 0x30a   :  { %7440 = vmatprep.subr.bf16.mxu1 %v7439_v40  ;;  %v3294_v40 = vld [vmem:[#allocation7 + $0x10f8] sm:$0xff]  ;;  %v7323_v3 = vpack.c.bf16 %v3292_v33, %v3288_v26  ;;  %v3307_v26 = vld [vmem:[#allocation7 + $0x1160] sm:$0xff]  ;;  %v3305_v33 = vld [vmem:[#allocation7 + $0x1150] sm:$0xff] }
 0x30b   :  { %2892 = vmatmul.mubr.f32.vlgmr.msra.gmra.mrb[16].mxu0 %v9855_v11  ;;  %v7451_v51 = vpack.c.bf16 %v3294_v40, %v3290_v38  ;;  %v3309_v40 = vld [vmem:[#allocation7 + $0x1170] sm:$0xff]  ;;  %v7333_v60 = vpack.c.bf16 %v3307_v26, %v3303_v25  ;;  %v3330_v25 = vld [vmem:[#allocation7 + $0x1218] sm:$0xff] }
 0x30c   :  { %3118 = vmatmul.mubr.f32.vlgmr.msra.gmra.mrb[24].mxu1 %v9855_v11  ;;  %2897 = vmatprep.mubr.f32.mxu0 %v9980_v52  ;;  %v7461_v34 = vpack.c.bf16 %v3309_v40, %v3305_v33  ;;  %v3334_v26 = vld [vmem:[#allocation7 + $0x1238] sm:$0xff] }
 0x30d   :  { %3123 = vmatprep.mubr.f32.mxu1 %v9980_v52  ;;  %7314 = vmatpush1.bf16.msra.mxu0 %v7313_v6  ;;  %v3296_v6 = vld [vmem:[#allocation7 + $0x1108] sm:$0xff] }
 0x30e   :  { %7442 = vmatpush1.bf16.msra.mxu1 %v7441_v18  ;;  %7316 = vmatprep.subr.bf16.mxu0 %v7315_v12  ;;  %v3300_v18 = vld [vmem:[#allocation7 + $0x1128] sm:$0xff]  ;;  %v3298_v12 = vld [vmem:[#allocation7 + $0x1118] sm:$0xff] }
 0x30f   :  { %2898 = vmatmul.mubr.f32.gmra.mrb[18].mxu0 %v9857_v32  ;;  %7444 = vmatprep.subr.bf16.mxu1 %v7443_v57  ;;  %v7327_v57 = vpack.c.bf16 %v3300_v18, %v3296_v6  ;;  %v7455_v20 = vpack.c.bf16 %v3302_v13, %v3298_v12  ;;  %v3315_v6 = vld [vmem:[#allocation7 + $0x11a0] sm:$0xff]  ;;  %v3313_v18 = vld [vmem:[#allocation7 + $0x1190] sm:$0xff] }
 0x310   :  { %3124 = vmatmul.mubr.f32.gmra.mrb[26].mxu1 %v9857_v32  ;;  %2903 = vmatprep.mubr.f32.mxu0 %v9991_v2  ;;  %v3317_v13 = vld [vmem:[#allocation7 + $0x11b0] sm:$0xff]  ;;  %v7337_v24 = vpack.c.bf16 %v3315_v6, %v3311_v21  ;;  %v3336_v21 = vld [vmem:[#allocation7 + $0x1248] sm:$0xff] }
 0x311   :  { %3129 = vmatprep.mubr.f32.mxu1 %v9991_v2  ;;  %7318 = vmatpush1.bf16.msra.mxu0 %v7317_v46  ;;  %v3304_v46 = vld [vmem:[#allocation7 + $0x1148] sm:$0xff]  ;;  %v7465_v50 = vpack.c.bf16 %v3317_v13, %v3313_v18  ;;  %v3342_v18 = vld [vmem:[#allocation7 + $0x1278] sm:$0xff] }
 0x312   :  { %7446 = vmatpush1.bf16.msra.mxu1 %v7445_v39  ;;  %7320 = vmatprep.subr.bf16.mxu0 %v7319_v56  ;;  %v3308_v39 = vld [vmem:[#allocation7 + $0x1168] sm:$0xff]  ;;  %v3306_v56 = vld [vmem:[#allocation7 + $0x1158] sm:$0xff] }
 0x313   :  { %2904 = vmatmul.mubr.f32.gmra.mrb[20].mxu0 %v9923_v5  ;;  %7448 = vmatprep.subr.bf16.mxu1 %v7447_v29  ;;  %v7331_v29 = vpack.c.bf16 %v3308_v39, %v3304_v46  ;;  %v7459_v38 = vpack.c.bf16 %v3310_v22, %v3306_v56  ;;  %v3323_v46 = vld [vmem:[#allocation7 + $0x11e0] sm:$0xff]  ;;  %v3321_v39 = vld [vmem:[#allocation7 + $0x11d0] sm:$0xff]  ;;  %v3170_v22 = vrot.slane %v9547_v48, 2  ;;  %v3340_v6 = vld [vmem:[#allocation7 + $0x1268] sm:$0xff] }
 0x314   :  { %3130 = vmatmul.mubr.f32.gmra.mrb[28].mxu1 %v9923_v5  ;;  %2909 = vmatprep.mubr.f32.mxu0 %v10004_v4  ;;  %v7341_v33 = vpack.c.bf16 %v3323_v46, %v3319_v54  ;;  %v3348_v54 = vld [vmem:[#allocation7 + $0x12a8] sm:$0xff]  ;;  %v3346_v46 = vld [vmem:[#allocation7 + $0x1298] sm:$0xff] }
 0x315   :  { %3135 = vmatprep.mubr.f32.mxu1 %v10004_v4  ;;  %7322 = vmatpush1.bf16.msra.mxu0 %v7321_v43  ;;  %v3312_v43 = vld [vmem:[#allocation7 + $0x1188] sm:$0xff] }
 0x316   :  { %7450 = vmatpush1.bf16.msra.mxu1 %v7449_v14  ;;  %7324 = vmatprep.subr.bf16.mxu0 %v7323_v3  ;;  %v3316_v14 = vld [vmem:[#allocation7 + $0x11a8] sm:$0xff]  ;;  %v3314_v3 = vld [vmem:[#allocation7 + $0x1198] sm:$0xff] }
 0x317   :  { %2910 = vmatmul.mubr.f32.gmra.mrb[22].mxu0 %v9925_v17  ;;  %7452 = vmatprep.subr.bf16.mxu1 %v7451_v51  ;;  %v7335_v51 = vpack.c.bf16 %v3316_v14, %v3312_v43  ;;  %v7463_v12 = vpack.c.bf16 %v3318_v16, %v3314_v3  ;;  %v3327_v14 = vld [vmem:[#allocation7 + $0x1200] sm:$0xff]  ;;  %v3329_v16 = vld [vmem:[#allocation7 + $0x1210] sm:$0xff] }
 0x318   :  { %3136 = vmatmul.mubr.f32.gmra.mrb[30].mxu1 %v9925_v17  ;;  %2915 = vmatprep.mubr.f32.mxu0 %v10023_v45  ;;  %v3331_v3 = vld [vmem:[#allocation7 + $0x1220] sm:$0xff] }
 0x319   :  { %3141 = vmatprep.mubr.f32.mxu1 %v10023_v45  ;;  %7326 = vmatpush1.bf16.msra.mxu0 %v7325_v0  ;;  %v3320_v0 = vld [vmem:[#allocation7 + $0x11c8] sm:$0xff] }
 0x31a   :  { %7454 = vmatpush1.bf16.msra.mxu1 %v7453_v1  ;;  %7328 = vmatprep.subr.bf16.mxu0 %v7327_v57  ;;  %v3324_v1 = vld [vmem:[#allocation7 + $0x11e8] sm:$0xff]  ;;  %v3322_v57 = vld [vmem:[#allocation7 + $0x11d8] sm:$0xff] }
 0x31b   :  { %2916 = vmatmul.mubr.f32.gmra.mrb[24].mxu0 %v9945_v49  ;;  %7456 = vmatprep.subr.bf16.mxu1 %v7455_v20  ;;  %v7339_v20 = vpack.c.bf16 %v3324_v1, %v3320_v0  ;;  %v7467_v56 = vpack.c.bf16 %v3326_v28, %v3322_v57  ;;  %v7347_v0 = vpack.c.bf16 %v3340_v6, %v3336_v21  ;;  %v3335_v1 = vld [vmem:[#allocation7 + $0x1240] sm:$0xff]  ;;  %v3337_v28 = vld [vmem:[#allocation7 + $0x1250] sm:$0xff] }
 0x31c   :  { %3142 = vmatmul.mubr.f32.gmra.mrb[32].mxu1 %v9945_v49  ;;  %2921 = vmatprep.mubr.f32.mxu0 %v10035_v35  ;;  %v3339_v57 = vld [vmem:[#allocation7 + $0x1260] sm:$0xff]  ;;  %v3353_v6 = vld [vmem:[#allocation7 + $0x12d0] sm:$0xff] }
 0x31d   :  { %3147 = vmatprep.mubr.f32.mxu1 %v10035_v35  ;;  %7330 = vmatpush1.bf16.msra.mxu0 %v7329_v9  ;;  %v3325_v9 = vld [vmem:[#allocation7 + $0x11f0] sm:$0xff]  ;;  %v3355_v21 = vld [vmem:[#allocation7 + $0x12e0] sm:$0xff] }
 0x31e   :  { %7458 = vmatpush1.bf16.msra.mxu1 %v7457_v59  ;;  %7332 = vmatprep.subr.bf16.mxu0 %v7331_v29  ;;  %v3328_v59 = vld [vmem:[#allocation7 + $0x1208] sm:$0xff]  ;;  %v7469_v40 = vpack.c.bf16 %v3325_v9, %v3321_v39  ;;  %v3350_v39 = vld [vmem:[#allocation7 + $0x12b8] sm:$0xff] }
 0x31f   :  { %2922 = vmatmul.mubr.f32.gmra.mrb[26].mxu0 %v9947_v62  ;;  %7460 = vmatprep.subr.bf16.mxu1 %v7459_v38  ;;  %v3332_v29 = vld [vmem:[#allocation7 + $0x1228] sm:$0xff]  ;;  %v3169_v38 = vrot.slane %v11592_v36, 2  ;;  %v3338_v36 = vld [vmem:[#allocation7 + $0x1258] sm:$0xff] }
 0x320   :  { %3148 = vmatmul.mubr.f32.gmra.mrb[34].mxu1 %v9947_v62  ;;  %2927 = vmatprep.mubr.f32.mxu0 %v10047_v27  ;;  %v7343_v43 = vpack.c.bf16 %v3332_v29, %v3328_v59  ;;  %v3343_v29 = vld [vmem:[#allocation7 + $0x1280] sm:$0xff] }
 0x321   :  { %3153 = vmatprep.mubr.f32.mxu1 %v10047_v27  ;;  %7334 = vmatpush1.bf16.msra.mxu0 %v7333_v60  ;;  %v3171_v60 = vsel %vm698_vm5, %v3169_v38, %v3170_v22  ;;  %v3349_v38 = vld [vmem:[#allocation7 + $0x12b0] sm:$0xff] }
 0x322   :  { %7462 = vmatpush1.bf16.msra.mxu1 %v7461_v34  ;;  %7336 = vmatprep.subr.bf16.mxu0 %v7335_v51  ;;  %v7471_v34 = vpack.c.bf16 %v3334_v26, %v3330_v25  ;;  %v3333_v51 = vld [vmem:[#allocation7 + $0x1230] sm:$0xff]  ;;  %v3347_v25 = vld [vmem:[#allocation7 + $0x12a0] sm:$0xff] }
 0x323   :  { %2928 = vmatmul.mubr.f32.gmra.mrb[28].mxu0 %v10053_v58  ;;  %7464 = vmatprep.subr.bf16.mxu1 %v7463_v12  ;;  %v7345_v12 = vpack.c.bf16 %v3331_v3, %v3327_v14  ;;  %v7473_v13 = vpack.c.bf16 %v3333_v51, %v3329_v16  ;;  %v3345_v26 = vld [vmem:[#allocation7 + $0x1290] sm:$0xff]  ;;  %v3354_v14 = vld [vmem:[#allocation7 + $0x12d8] sm:$0xff]  ;;  %v7353_v16 = vpack.c.bf16 %v3347_v25, %v3343_v29  ;;  %v3351_v51 = vld [vmem:[#allocation7 + $0x12c0] sm:$0xff] }
 0x324   :  { %3154 = vmatmul.mubr.f32.gmra.mrb[36].mxu1 %v10053_v58  ;;  %2933 = vmatprep.mubr.f32.mxu0 %v10059_v53  ;;  %v3358_v3 = vld [vmem:[#allocation7 + $0x12f8] sm:$0xff] }
 0x325   :  { %3159 = vmatprep.mubr.f32.mxu1 %v10059_v53  ;;  %7338 = vmatpush1.bf16.msra.mxu0 %v7337_v24  ;;  %v7475_v24 = vpack.c.bf16 %v3342_v18, %v3338_v36  ;;  %v7483_v36 = vpack.c.bf16 %v3358_v3, %v3354_v14  ;;  %v3357_v18 = vld [vmem:[#allocation7 + $0x12f0] sm:$0xff]  ;;  %v3374_v29 = vld [vmem:[#allocation7 + $0x1378] sm:$0xff] }
 0x326   :  { %7466 = vmatpush1.bf16.msra.mxu1 %v7465_v50  ;;  %7340 = vmatprep.subr.bf16.mxu0 %v7339_v20  ;;  %v3341_v50 = vld [vmem:[#allocation7 + $0x1270] sm:$0xff]  ;;  %v3344_v20 = vld [vmem:[#allocation7 + $0x1288] sm:$0xff] }
 0x327   :  { %2934 = vmatmul.mubr.f32.gmra.mrb[30].mxu0 %v10064_v63  ;;  %7468 = vmatprep.subr.bf16.mxu1 %v7467_v56  ;;  %v7349_v56 = vpack.c.bf16 %v3339_v57, %v3335_v1  ;;  %v7477_v9 = vpack.c.bf16 %v3341_v50, %v3337_v28  ;;  %v7351_v59 = vpack.c.bf16 %v3348_v54, %v3344_v20  ;;  %v3366_v1 = vld [vmem:[#allocation7 + $0x1338] sm:$0xff]  ;;  %v3359_v50 = vld [vmem:[#allocation7 + $0x1300] sm:$0xff]  ;;  %v3361_v54 = vld [vmem:[#allocation7 + $0x1310] sm:$0xff] }
 0x328   :  { %3160 = vmatmul.mubr.f32.gmra.mrb[38].mxu1 %v10064_v63  ;;  %3583 = vmatprep.mubr.f32.mxu0 %v3171_v60  ;;  %v7357_v57 = vpack.c.bf16 %v3355_v21, %v3351_v51  ;;  %v7485_v28 = vpack.c.bf16 %v3357_v18, %v3353_v6  ;;  %v3363_v20 = vld [vmem:[#allocation7 + $0x1320] sm:$0xff]  ;;  %v3373_v3 = vld [vmem:[#allocation7 + $0x1370] sm:$0xff]  ;;  %v3382_v51 = vld [vmem:[#allocation7 + $0x13b8] sm:$0xff] }
 0x329   :  { %7342 = vmatpush1.bf16.msra.mxu0 %v7341_v33  ;;  %3809 = vmatprep.mubr.f32.mxu1 %v3171_v60  ;;  %v7479_v33 = vpack.c.bf16 %v3350_v39, %v3346_v46  ;;  %v7481_v60 = vpack.c.bf16 %v3349_v38, %v3345_v26  ;;  %v3365_v39 = vld [vmem:[#allocation7 + $0x1330] sm:$0xff]  ;;  %v7361_v25 = vpack.c.bf16 %v3363_v20, %v3359_v50  ;;  %v3367_v38 = vld [vmem:[#allocation7 + $0x1340] sm:$0xff]  ;;  %v3390_v50 = vld [vmem:[#allocation7 + $0x13f8] sm:$0xff] }
 0x32a   :  { %7470 = vmatpush1.bf16.msra.mxu1 %v7469_v40  ;;  %7344 = vmatprep.subr.bf16.mxu0 %v7343_v43  ;;  %v3352_v40 = vld [vmem:[#allocation7 + $0x12c8] sm:$0xff]  ;;  %v7489_v26 = vpack.c.bf16 %v3365_v39, %v3361_v54  ;;  %v3375_v18 = vld [vmem:[#allocation7 + $0x1380] sm:$0xff] }
 0x32b   :  { %7472 = vmatprep.subr.bf16.mxu1 %v7471_v34  ;;  %v3356_v43 = vld [vmem:[#allocation7 + $0x12e8] sm:$0xff]  ;;  %v3383_v39 = vld [vmem:[#allocation7 + $0x13c0] sm:$0xff] }
 0x32c   :  { %v7355_v34 = vpack.c.bf16 %v3356_v43, %v3352_v40  ;;  %v3371_v40 = vld [vmem:[#allocation7 + $0x1360] sm:$0xff]  ;;  %v3369_v43 = vld [vmem:[#allocation7 + $0x1350] sm:$0xff] }
 0x32d   :  { %7346 = vmatpush1.bf16.msra.mxu0 %v7345_v12  ;;  %v3360_v12 = vld [vmem:[#allocation7 + $0x1308] sm:$0xff]  ;;  %v7365_v21 = vpack.c.bf16 %v3371_v40, %v3367_v38  ;;  %v7493_v6 = vpack.c.bf16 %v3373_v3, %v3369_v43  ;;  %v3398_v38 = vld [vmem:[#allocation7 + $0x1438] sm:$0xff]  ;;  %v3167_v3 = vrot.slane %v9562_v7, 2 }
 0x32e   :  { %7474 = vmatpush1.bf16.msra.mxu1 %v7473_v13  ;;  %7348 = vmatprep.subr.bf16.mxu0 %v7347_v0  ;;  %v3364_v13 = vld [vmem:[#allocation7 + $0x1328] sm:$0xff]  ;;  %v3362_v0 = vld [vmem:[#allocation7 + $0x1318] sm:$0xff] }
 0x32f   :  { %7476 = vmatprep.subr.bf16.mxu1 %v7475_v24  ;;  %v7359_v24 = vpack.c.bf16 %v3364_v13, %v3360_v12  ;;  %v7487_v46 = vpack.c.bf16 %v3366_v1, %v3362_v0  ;;  %v3379_v12 = vld [vmem:[#allocation7 + $0x13a0] sm:$0xff]  ;;  %v3377_v13 = vld [vmem:[#allocation7 + $0x1390] sm:$0xff] }
 0x330   :  { %v3381_v1 = vld [vmem:[#allocation7 + $0x13b0] sm:$0xff]  ;;  %v7369_v20 = vpack.c.bf16 %v3379_v12, %v3375_v18  ;;  %v3404_v18 = vld [vmem:[#allocation7 + $0x1468] sm:$0xff]  ;;  %v3166_v12 = vrot.slane %v11593_v55, 2 }
 0x331   :  { %7350 = vmatpush1.bf16.msra.mxu0 %v7349_v56  ;;  %v3368_v56 = vld [vmem:[#allocation7 + $0x1348] sm:$0xff]  ;;  %v7497_v54 = vpack.c.bf16 %v3381_v1, %v3377_v13  ;;  %v3402_v13 = vld [vmem:[#allocation7 + $0x1458] sm:$0xff] }
 0x332   :  { %7478 = vmatpush1.bf16.msra.mxu1 %v7477_v9  ;;  %7352 = vmatprep.subr.bf16.mxu0 %v7351_v59  ;;  %v3372_v9 = vld [vmem:[#allocation7 + $0x1368] sm:$0xff]  ;;  %v3370_v59 = vld [vmem:[#allocation7 + $0x1358] sm:$0xff] }
 0x333   :  { %7480 = vmatprep.subr.bf16.mxu1 %v7479_v33  ;;  %v7363_v33 = vpack.c.bf16 %v3372_v9, %v3368_v56  ;;  %v7491_v14 = vpack.c.bf16 %v3374_v29, %v3370_v59  ;;  %v3387_v56 = vld [vmem:[#allocation7 + $0x13e0] sm:$0xff]  ;;  %v3385_v9 = vld [vmem:[#allocation7 + $0x13d0] sm:$0xff] }
 0x334   :  { %v3389_v29 = vld [vmem:[#allocation7 + $0x13f0] sm:$0xff]  ;;  %v7373_v40 = vpack.c.bf16 %v3387_v56, %v3383_v39  ;;  %v3408_v56 = vld [vmem:[#allocation7 + $0x1488] sm:$0xff] }
 0x335   :  { %7354 = vmatpush1.bf16.msra.mxu0 %v7353_v16  ;;  %v3376_v16 = vld [vmem:[#allocation7 + $0x1388] sm:$0xff]  ;;  %v7501_v43 = vpack.c.bf16 %v3389_v29, %v3385_v9  ;;  %v3405_v39 = vld [vmem:[#allocation7 + $0x1470] sm:$0xff]  ;;  %v3414_v29 = vld [vmem:[#allocation7 + $0x14b8] sm:$0xff] }
 0x336   :  { %7482 = vmatpush1.bf16.msra.mxu1 %v7481_v60  ;;  %7356 = vmatprep.subr.bf16.mxu0 %v7355_v34  ;;  %v3380_v60 = vld [vmem:[#allocation7 + $0x13a8] sm:$0xff]  ;;  %v3378_v34 = vld [vmem:[#allocation7 + $0x1398] sm:$0xff] }
 0x337   :  { %7484 = vmatprep.subr.bf16.mxu1 %v7483_v36  ;;  %v7367_v36 = vpack.c.bf16 %v3380_v60, %v3376_v16  ;;  %v7495_v0 = vpack.c.bf16 %v3382_v51, %v3378_v34  ;;  %v3391_v60 = vld [vmem:[#allocation7 + $0x1400] sm:$0xff]  ;;  %v3393_v51 = vld [vmem:[#allocation7 + $0x1410] sm:$0xff]  ;;  %v3412_v9 = vld [vmem:[#allocation7 + $0x14a8] sm:$0xff] }
 0x338   :  { %v3395_v34 = vld [vmem:[#allocation7 + $0x1420] sm:$0xff] }
 0x339   :  { %7358 = vmatpush1.bf16.msra.mxu0 %v7357_v57  ;;  %v3384_v57 = vld [vmem:[#allocation7 + $0x13c8] sm:$0xff]  ;;  %v7377_v1 = vpack.c.bf16 %v3395_v34, %v3391_v60 }
 0x33a   :  { %7486 = vmatpush1.bf16.msra.mxu1 %v7485_v28  ;;  %7360 = vmatprep.subr.bf16.mxu0 %v7359_v24  ;;  %v3388_v28 = vld [vmem:[#allocation7 + $0x13e8] sm:$0xff]  ;;  %v3386_v24 = vld [vmem:[#allocation7 + $0x13d8] sm:$0xff] }
 0x33b   :  { %7488 = vmatprep.subr.bf16.mxu1 %v7487_v46  ;;  %v7371_v46 = vpack.c.bf16 %v3388_v28, %v3384_v57  ;;  %v7499_v59 = vpack.c.bf16 %v3390_v50, %v3386_v24  ;;  %v3168_v57 = vsel %vm698_vm5, %v3166_v12, %v3167_v3  ;;  %v3178_v28 = vrot.slane %v9595_v42, 2  ;;  %v3399_v50 = vld [vmem:[#allocation7 + $0x1440] sm:$0xff]  ;;  %v3416_v60 = vld [vmem:[#allocation7 + $0x14c8] sm:$0xff] }
 0x33c   :  { %v3420_v34 = vld [vmem:[#allocation7 + $0x14e8] sm:$0xff]  ;;  %v3415_v12 = vld [vmem:[#allocation7 + $0x14c0] sm:$0xff] }
 0x33d   :  { %7362 = vmatpush1.bf16.msra.mxu0 %v7361_v25  ;;  %v3392_v25 = vld [vmem:[#allocation7 + $0x1408] sm:$0xff] }
 0x33e   :  { %7490 = vmatpush1.bf16.msra.mxu1 %v7489_v26  ;;  %7364 = vmatprep.subr.bf16.mxu0 %v7363_v33  ;;  %v3396_v26 = vld [vmem:[#allocation7 + $0x1428] sm:$0xff]  ;;  %v3394_v33 = vld [vmem:[#allocation7 + $0x1418] sm:$0xff] }
 0x33f   :  { %7492 = vmatprep.subr.bf16.mxu1 %v7491_v14  ;;  %v7375_v14 = vpack.c.bf16 %v3396_v26, %v3392_v25  ;;  %v7503_v16 = vpack.c.bf16 %v3398_v38, %v3394_v33  ;;  %v3179_v25 = vsel %vm698_vm5, %v3167_v3, %v3178_v28  ;;  %v7383_v26 = vpack.c.bf16 %v3412_v9, %v3408_v56  ;;  %v3407_v33 = vld [vmem:[#allocation7 + $0x1480] sm:$0xff]  ;;  %v3409_v38 = vld [vmem:[#allocation7 + $0x1490] sm:$0xff]  ;;  %v3418_v3 = vld [vmem:[#allocation7 + $0x14d8] sm:$0xff] }
 0x340   :  { %v3425_v56 = vld [vmem:[#allocation7 + $0x1510] sm:$0xff] }
 0x341   :  { %7366 = vmatpush1.bf16.msra.mxu0 %v7365_v21  ;;  %v3180_v21 = vrot.slane %v9593_v47, 2  ;;  %v3403_v47 = vld [vmem:[#allocation7 + $0x1460] sm:$0xff] }
 0x342   :  { %7494 = vmatpush1.bf16.msra.mxu1 %v7493_v6  ;;  %7368 = vmatprep.subr.bf16.mxu0 %v7367_v36  ;;  %v3397_v6 = vld [vmem:[#allocation7 + $0x1430] sm:$0xff]  ;;  %v3400_v36 = vld [vmem:[#allocation7 + $0x1448] sm:$0xff]  ;;  %v7381_v42 = vpack.c.bf16 %v3403_v47, %v3399_v50  ;;  %v3430_v47 = vld [vmem:[#allocation7 + $0x1538] sm:$0xff] }
 0x343   :  { %7496 = vmatprep.subr.bf16.mxu1 %v7495_v0  ;;  %v3406_v0 = vld [vmem:[#allocation7 + $0x1478] sm:$0xff]  ;;  %v7505_v7 = vpack.c.bf16 %v3397_v6, %v3393_v51  ;;  %v7379_v24 = vpack.c.bf16 %v3404_v18, %v3400_v36  ;;  %v3181_v55 = vsel %vm698_vm5, %v3170_v22, %v3180_v21  ;;  %v3186_v22 = vrot.slane %v9645_v23, 2  ;;  %v3428_v50 = vld [vmem:[#allocation7 + $0x1528] sm:$0xff] }
 0x344   :  { %v3422_v51 = vld [vmem:[#allocation7 + $0x14f8] sm:$0xff]  ;;  %v7387_v18 = vpack.c.bf16 %v3420_v34, %v3416_v60  ;;  %v3220_v34 = vrot.slane %v9894_v41, 2  ;;  %v3443_v41 = vld [vmem:[#allocation7 + $0x15a0] sm:$0xff] }
 0x345   :  { %7370 = vmatpush1.bf16.msra.mxu0 %v7369_v20  ;;  %v3401_v20 = vld [vmem:[#allocation7 + $0x1450] sm:$0xff]  ;;  %v3187_v6 = vsel %vm698_vm5, %v3178_v28, %v3186_v22  ;;  %v3426_v28 = vld [vmem:[#allocation7 + $0x1518] sm:$0xff] }
 0x346   :  { %7498 = vmatpush1.bf16.msra.mxu1 %v7497_v54  ;;  %7372 = vmatprep.subr.bf16.mxu0 %v7371_v46  ;;  %v7507_v54 = vpack.c.bf16 %v3406_v0, %v3402_v13  ;;  %v3188_v46 = vrot.slane %v9631_v61, 2  ;;  %v7509_v48 = vpack.c.bf16 %v3405_v39, %v3401_v20  ;;  %v3411_v61 = vld [vmem:[#allocation7 + $0x14a0] sm:$0xff]  ;;  %v3417_v13 = vld [vmem:[#allocation7 + $0x14d0] sm:$0xff] }
 0x347   :  { %7500 = vmatprep.subr.bf16.mxu1 %v7499_v59  ;;  %v3410_v59 = vld [vmem:[#allocation7 + $0x1498] sm:$0xff]  ;;  %v7385_v23 = vpack.c.bf16 %v3411_v61, %v3407_v33  ;;  %v3423_v39 = vld [vmem:[#allocation7 + $0x1500] sm:$0xff] }
 0x349   :  { %7374 = vmatpush1.bf16.msra.mxu0 %v7373_v40  ;;  %v3189_v40 = vsel %vm698_vm5, %v3180_v21, %v3188_v46  ;;  %v3194_v21 = vrot.slane %v9701_v44, 2 }
 0x34a   :  { %7502 = vmatpush1.bf16.msra.mxu1 %v7501_v43  ;;  %7376 = vmatprep.subr.bf16.mxu0 %v7375_v14  ;;  %v7511_v43 = vpack.c.bf16 %v3414_v29, %v3410_v59  ;;  %v3196_v14 = vrot.slane %v9698_v8, 2  ;;  %v3419_v8 = vld [vmem:[#allocation7 + $0x14e0] sm:$0xff]  ;;  %v7519_v59 = vpack.c.bf16 %v3430_v47, %v3426_v28  ;;  %v3212_v29 = vrot.slane %v9801_v10, 2  ;;  %v3450_v28 = vld [vmem:[#allocation7 + $0x15d8] sm:$0xff] }
 0x34b   :  { %7504 = vmatprep.subr.bf16.mxu1 %v7503_v16  ;;  %v3413_v16 = vld [vmem:[#allocation7 + $0x14b0] sm:$0xff]  ;;  %v7389_v44 = vpack.c.bf16 %v3419_v8, %v3415_v12  ;;  %v3195_v20 = vsel %vm698_vm5, %v3186_v22, %v3194_v21  ;;  %v3434_v22 = vld [vmem:[#allocation7 + $0x1558] sm:$0xff]  ;;  %v3435_v10 = vld [vmem:[#allocation7 + $0x1560] sm:$0xff]  ;;  %v3218_v12 = vrot.slane %v9902_v37, 2 }
 0x34c   :  { %3584 = vmatmul.mubr.f32.vlgmr.msra.gmra.mrb[16].mxu0 %v3168_v57  ;;  %v7513_v36 = vpack.c.bf16 %v3413_v16, %v3409_v38  ;;  %v3197_v0 = vsel %vm698_vm5, %v3188_v46, %v3196_v14  ;;  %v3210_v38 = vrot.slane %v9865_v15, 2  ;;  %v3454_v47 = vld [vmem:[#allocation7 + $0x15f8] sm:$0xff] }
 0x34d   :  { %3810 = vmatmul.mubr.f32.vlgmr.msra.gmra.mrb[24].mxu1 %v3168_v57  ;;  %3589 = vmatprep.mubr.f32.mxu0 %v3181_v55  ;;  %v3204_v57 = vrot.slane %v9777_v19, 2  ;;  %v3427_v19 = vld [vmem:[#allocation7 + $0x1520] sm:$0xff] }
 0x34e   :  { %7378 = vmatpush1.bf16.msra.mxu0 %v7377_v1  ;;  %3815 = vmatprep.mubr.f32.mxu1 %v3181_v55  ;;  %v7515_v1 = vpack.c.bf16 %v3422_v51, %v3418_v3  ;;  %v3437_v3 = vld [vmem:[#allocation7 + $0x1570] sm:$0xff]  ;;  %v3440_v51 = vld [vmem:[#allocation7 + $0x1588] sm:$0xff]  ;;  %v3219_v37 = vsel %vm698_vm5, %v3210_v38, %v3218_v12 }
 0x34f   :  { %7506 = vmatpush1.bf16.msra.mxu1 %v7505_v7  ;;  %7380 = vmatprep.subr.bf16.mxu0 %v7379_v24  ;;  %v3421_v7 = vld [vmem:[#allocation7 + $0x14f0] sm:$0xff]  ;;  %v3424_v24 = vld [vmem:[#allocation7 + $0x1508] sm:$0xff]  ;;  %v3205_v9 = vsel %vm698_vm5, %v3196_v14, %v3204_v57  ;;  %v3213_v16 = vsel %vm698_vm5, %v3204_v57, %v3212_v29 }
 0x350   :  { %3590 = vmatmul.mubr.f32.gmra.mrb[18].mxu0 %v3179_v25  ;;  %7508 = vmatprep.subr.bf16.mxu1 %v7507_v54  ;;  %v7517_v55 = vpack.c.bf16 %v3421_v7, %v3417_v13  ;;  %v3202_v54 = vrot.slane %v9834_v31, 2  ;;  %v7391_v46 = vpack.c.bf16 %v3428_v50, %v3424_v24  ;;  %v7393_v31 = vpack.c.bf16 %v3427_v19, %v3423_v39  ;;  %v3433_v14 = vld [vmem:[#allocation7 + $0x1550] sm:$0xff]  ;;  %v3439_v13 = vld [vmem:[#allocation7 + $0x1580] sm:$0xff]  ;;  %v3448_v24 = vld [vmem:[#allocation7 + $0x15c8] sm:$0xff] }
 0x351   :  { %3816 = vmatmul.mubr.f32.gmra.mrb[26].mxu1 %v3179_v25  ;;  %3595 = vmatprep.mubr.f32.mxu0 %v3189_v40  ;;  %v3432_v25 = vld [vmem:[#allocation7 + $0x1548] sm:$0xff]  ;;  %v3445_v7 = vld [vmem:[#allocation7 + $0x15b0] sm:$0xff]  ;;  %v7531_v19 = vpack.c.bf16 %v3454_v47, %v3450_v28 }
 0x352   :  { %7382 = vmatpush1.bf16.msra.mxu0 %v7381_v42  ;;  %3821 = vmatprep.mubr.f32.mxu1 %v3189_v40  ;;  %v3429_v42 = vld [vmem:[#allocation7 + $0x1530] sm:$0xff]  ;;  %v3203_v33 = vsel %vm698_vm5, %v3194_v21, %v3202_v54  ;;  %v3211_v21 = vsel %vm698_vm5, %v3202_v54, %v3210_v38  ;;  %v3452_v50 = vld [vmem:[#allocation7 + $0x15e8] sm:$0xff]  ;;  %v3447_v54 = vld [vmem:[#allocation7 + $0x15c0] sm:$0xff] }
 0x353   :  { %7510 = vmatpush1.bf16.msra.mxu1 %v7509_v48  ;;  %7384 = vmatprep.subr.bf16.mxu0 %v7383_v26  ;;  %v3436_v48 = vld [vmem:[#allocation7 + $0x1568] sm:$0xff]  ;;  %v3438_v26 = vld [vmem:[#allocation7 + $0x1578] sm:$0xff]  ;;  %v7521_v61 = vpack.c.bf16 %v3429_v42, %v3425_v56  ;;  %v3449_v39 = vld [vmem:[#allocation7 + $0x15d0] sm:$0xff]  ;;  %v3175_v56 = vrot.slane %v9927_v30, 2 }
 0x354   :  { %3596 = vmatmul.mubr.f32.gmra.mrb[20].mxu0 %v3187_v6  ;;  %7512 = vmatprep.subr.bf16.mxu1 %v7511_v43  ;;  %v7395_v40 = vpack.c.bf16 %v3436_v48, %v3432_v25  ;;  %v3431_v43 = vld [vmem:[#allocation7 + $0x1540] sm:$0xff]  ;;  %v7523_v60 = vpack.c.bf16 %v3438_v26, %v3434_v22  ;;  %v3460_v42 = vld [vmem:[#allocation7 + $0x1628] sm:$0xff]  ;;  %v3458_v25 = vld [vmem:[#allocation7 + $0x1618] sm:$0xff] }
 0x355   :  { %3822 = vmatmul.mubr.f32.gmra.mrb[28].mxu1 %v3187_v6  ;;  %3601 = vmatprep.mubr.f32.mxu0 %v3197_v0  ;;  %v3442_v6 = vld [vmem:[#allocation7 + $0x1598] sm:$0xff]  ;;  %v7397_v15 = vpack.c.bf16 %v3435_v10, %v3431_v43  ;;  %v3459_v30 = vld [vmem:[#allocation7 + $0x1620] sm:$0xff]  ;;  %v3461_v43 = vld [vmem:[#allocation7 + $0x1630] sm:$0xff] }
 0x356   :  { %7386 = vmatpush1.bf16.msra.mxu0 %v7385_v23  ;;  %3827 = vmatprep.mubr.f32.mxu1 %v3197_v0  ;;  %v3444_v23 = vld [vmem:[#allocation7 + $0x15a8] sm:$0xff]  ;;  %v3441_v0 = vld [vmem:[#allocation7 + $0x1590] sm:$0xff]  ;;  %v3462_v48 = vld [vmem:[#allocation7 + $0x1638] sm:$0xff] }
 0x357   :  { %7514 = vmatpush1.bf16.msra.mxu1 %v7513_v36  ;;  %7388 = vmatprep.subr.bf16.mxu0 %v7387_v18  ;;  %v3446_v36 = vld [vmem:[#allocation7 + $0x15b8] sm:$0xff]  ;;  %v7525_v18 = vpack.c.bf16 %v3437_v3, %v3433_v14  ;;  %v7399_v8 = vpack.c.bf16 %v3444_v23, %v3440_v51  ;;  %v3464_v10 = vld [vmem:[#allocation7 + $0x1648] sm:$0xff]  ;;  %v3463_v23 = vld [vmem:[#allocation7 + $0x1640] sm:$0xff] }
 0x358   :  { %3602 = vmatmul.mubr.f32.gmra.mrb[22].mxu0 %v3195_v20  ;;  %7516 = vmatprep.subr.bf16.mxu1 %v7515_v1  ;;  %v3221_v1 = vsel %vm698_vm5, %v3212_v29, %v3220_v34  ;;  %v7527_v57 = vpack.c.bf16 %v3446_v36, %v3442_v6  ;;  %v3456_v29 = vld [vmem:[#allocation7 + $0x1608] sm:$0xff]  ;;  %v3467_v6 = vld [vmem:[#allocation7 + $0x1660] sm:$0xff]  ;;  %v3465_v36 = vld [vmem:[#allocation7 + $0x1650] sm:$0xff] }
 0x359   :  { %3828 = vmatmul.mubr.f32.gmra.mrb[30].mxu1 %v3195_v20  ;;  %3607 = vmatprep.mubr.f32.mxu0 %v3205_v9  ;;  %v7529_v20 = vpack.c.bf16 %v3445_v7, %v3441_v0  ;;  %v3468_v14 = vld [vmem:[#allocation7 + $0x1668] sm:$0xff]  ;;  %v3475_v7 = vld [vmem:[#allocation7 + $0x16a0] sm:$0xff]  ;;  %v3477_v28 = vld [vmem:[#allocation7 + $0x16b0] sm:$0xff] }
 0x35a   :  { %7390 = vmatpush1.bf16.msra.mxu0 %v7389_v44  ;;  %3833 = vmatprep.mubr.f32.mxu1 %v3205_v9  ;;  %v7401_v44 = vpack.c.bf16 %v3443_v41, %v3439_v13  ;;  %v3176_v9 = vrot.slane %v9980_v52, 2  ;;  %v7411_v51 = vpack.c.bf16 %v3468_v14, %v3464_v10  ;;  %v3474_v13 = vld [vmem:[#allocation7 + $0x1698] sm:$0xff]  ;;  %v7413_v41 = vpack.c.bf16 %v3467_v6, %v3463_v23  ;;  %v3480_v47 = vld [vmem:[#allocation7 + $0x16c8] sm:$0xff]  ;;  %v3495_v23 = vld [vmem:[#allocation7 + $0x1740] sm:$0xff] }
 0x35b   :  { %7518 = vmatpush1.bf16.msra.mxu1 %v7517_v55  ;;  %7392 = vmatprep.subr.bf16.mxu0 %v7391_v46  ;;  %v7403_v55 = vpack.c.bf16 %v3452_v50, %v3448_v24  ;;  %v3451_v46 = vld [vmem:[#allocation7 + $0x15e0] sm:$0xff]  ;;  %v3473_v24 = vld [vmem:[#allocation7 + $0x1690] sm:$0xff]  ;;  %v3496_v10 = vld [vmem:[#allocation7 + $0x1748] sm:$0xff]  ;;  %v3198_v52 = vrot.slane %v9945_v49, 2 }
 0x35c   :  { %3608 = vmatmul.mubr.f32.gmra.mrb[24].mxu0 %v3203_v33  ;;  %7520 = vmatprep.subr.bf16.mxu1 %v7519_v59  ;;  %v3453_v59 = vld [vmem:[#allocation7 + $0x15f0] sm:$0xff]  ;;  %v7405_v22 = vpack.c.bf16 %v3451_v46, %v3447_v54  ;;  %v3177_v38 = vsel %vm698_vm5, %v3175_v56, %v3176_v9  ;;  %v7545_v54 = vpack.c.bf16 %v3477_v28, %v3473_v24  ;;  %v3500_v14 = vld [vmem:[#allocation7 + $0x1768] sm:$0xff]  ;;  %v3499_v6 = vld [vmem:[#allocation7 + $0x1760] sm:$0xff] }
 0x35d   :  { %3834 = vmatmul.mubr.f32.gmra.mrb[32].mxu1 %v3203_v33  ;;  %3613 = vmatprep.mubr.f32.mxu0 %v3213_v16  ;;  %v7533_v26 = vpack.c.bf16 %v3453_v59, %v3449_v39  ;;  %v3455_v33 = vld [vmem:[#allocation7 + $0x1600] sm:$0xff]  ;;  %v3481_v56 = vld [vmem:[#allocation7 + $0x16d0] sm:$0xff] }
 0x35e   :  { %7394 = vmatpush1.bf16.msra.mxu0 %v7393_v31  ;;  %3839 = vmatprep.mubr.f32.mxu1 %v3213_v16  ;;  %v7407_v31 = vpack.c.bf16 %v3460_v42, %v3456_v29  ;;  %v3466_v16 = vld [vmem:[#allocation7 + $0x1658] sm:$0xff]  ;;  %v3479_v39 = vld [vmem:[#allocation7 + $0x16c0] sm:$0xff]  ;;  %v3485_v29 = vld [vmem:[#allocation7 + $0x16f0] sm:$0xff] }
 0x35f   :  { %7522 = vmatpush1.bf16.msra.mxu1 %v7521_v61  ;;  %7396 = vmatprep.subr.bf16.mxu0 %v7395_v40  ;;  %v3457_v61 = vld [vmem:[#allocation7 + $0x1610] sm:$0xff]  ;;  %v7535_v40 = vpack.c.bf16 %v3462_v48, %v3458_v25  ;;  %v3488_v42 = vld [vmem:[#allocation7 + $0x1708] sm:$0xff]  ;;  %v3490_v48 = vld [vmem:[#allocation7 + $0x1718] sm:$0xff] }
 0x360   :  { %3614 = vmatmul.mubr.f32.gmra.mrb[26].mxu0 %v3211_v21  ;;  %7524 = vmatprep.subr.bf16.mxu1 %v7523_v60  ;;  %v3470_v60 = vld [vmem:[#allocation7 + $0x1678] sm:$0xff]  ;;  %v7537_v3 = vpack.c.bf16 %v3461_v43, %v3457_v61  ;;  %v3492_v25 = vld [vmem:[#allocation7 + $0x1728] sm:$0xff]  ;;  %v3491_v61 = vld [vmem:[#allocation7 + $0x1720] sm:$0xff] }
 0x361   :  { %3840 = vmatmul.mubr.f32.gmra.mrb[34].mxu1 %v3211_v21  ;;  %3619 = vmatprep.mubr.f32.mxu0 %v3221_v1  ;;  %v3469_v21 = vld [vmem:[#allocation7 + $0x1670] sm:$0xff] }
 0x362   :  { %7398 = vmatpush1.bf16.msra.mxu0 %v7397_v15  ;;  %3845 = vmatprep.mubr.f32.mxu1 %v3221_v1  ;;  %v7539_v15 = vpack.c.bf16 %v3470_v60, %v3466_v16  ;;  %v7541_v0 = vpack.c.bf16 %v3469_v21, %v3465_v36  ;;  %v3493_v43 = vld [vmem:[#allocation7 + $0x1730] sm:$0xff]  ;;  %v3498_v16 = vld [vmem:[#allocation7 + $0x1758] sm:$0xff] }
 0x363   :  { %7526 = vmatpush1.bf16.msra.mxu1 %v7525_v18  ;;  %7400 = vmatprep.subr.bf16.mxu0 %v7399_v8  ;;  %v3472_v18 = vld [vmem:[#allocation7 + $0x1688] sm:$0xff]  ;;  %v3502_v60 = vld [vmem:[#allocation7 + $0x1778] sm:$0xff]  ;;  %v3497_v36 = vld [vmem:[#allocation7 + $0x1750] sm:$0xff] }
 0x364   :  { %3620 = vmatmul.mubr.f32.gmra.mrb[28].mxu0 %v3219_v37  ;;  %7528 = vmatprep.subr.bf16.mxu1 %v7527_v57  ;;  %v3476_v8 = vld [vmem:[#allocation7 + $0x16a8] sm:$0xff]  ;;  %v3471_v57 = vld [vmem:[#allocation7 + $0x1680] sm:$0xff]  ;;  %v3501_v21 = vld [vmem:[#allocation7 + $0x1770] sm:$0xff] }
 0x365   :  { %3846 = vmatmul.mubr.f32.gmra.mrb[36].mxu1 %v3219_v37  ;;  %6187 = vmatprep.mubr.msk.f32.mxu0 %vm698_vm5, %v3220_v34  ;;  %v7415_v1 = vpack.c.bf16 %v3476_v8, %v3472_v18  ;;  %v3482_v37 = vld [vmem:[#allocation7 + $0x16d8] sm:$0xff]  ;;  %v3504_v18 = vld [vmem:[#allocation7 + $0x1788] sm:$0xff]  ;;  %v3505_v24 = vld [vmem:[#allocation7 + $0x1790] sm:$0xff] }
 0x366   :  { %7402 = vmatpush1.bf16.msra.mxu0 %v7401_v44  ;;  %6191 = vmatprep.mubr.msk.f32.mxu1 %vm698_vm5, %v3220_v34  ;;  %v7409_v34 = vpack.c.bf16 %v3459_v30, %v3455_v33  ;;  %v3484_v44 = vld [vmem:[#allocation7 + $0x16e8] sm:$0xff]  ;;  %v7423_v33 = vpack.c.bf16 %v3492_v25, %v3488_v42  ;;  %v3487_v30 = vld [vmem:[#allocation7 + $0x1700] sm:$0xff]  ;;  %v3509_v28 = vld [vmem:[#allocation7 + $0x17b0] sm:$0xff] }
 0x367   :  { %7530 = vmatpush1.bf16.msra.mxu1 %v7529_v20  ;;  %7404 = vmatprep.subr.bf16.mxu0 %v7403_v55  ;;  %v3486_v20 = vld [vmem:[#allocation7 + $0x16f8] sm:$0xff]  ;;  %v7417_v55 = vpack.c.bf16 %v3475_v7, %v3471_v57  ;;  %v7419_v46 = vpack.c.bf16 %v3484_v44, %v3480_v47  ;;  %v3508_v8 = vld [vmem:[#allocation7 + $0x17a8] sm:$0xff]  ;;  %v3503_v57 = vld [vmem:[#allocation7 + $0x1780] sm:$0xff] }
 0x368   :  { %6188 = vmatmul.mubr.msk.f32.gmra.mrb[30].mxu0 %vm698_vm5, %v3218_v12  ;;  %7532 = vmatprep.subr.bf16.mxu1 %v7531_v19  ;;  %v3483_v19 = vld [vmem:[#allocation7 + $0x16e0] sm:$0xff]  ;;  %v7547_v59 = vpack.c.bf16 %v3486_v20, %v3482_v37  ;;  %v3512_v47 = vld [vmem:[#allocation7 + $0x17c8] sm:$0xff]  ;;  %v3514_v37 = vld [vmem:[#allocation7 + $0x17d8] sm:$0xff] }
 0x369   :  { %6192 = vmatmul.mubr.msk.f32.gmra.mrb[38].mxu1 %vm698_vm5, %v3218_v12  ;;  %3696 = vmatprep.mubr.f32.mxu0 %v3177_v38  ;;  %v3478_v12 = vld [vmem:[#allocation7 + $0x16b8] sm:$0xff]  ;;  %v3507_v7 = vld [vmem:[#allocation7 + $0x17a0] sm:$0xff]  ;;  %v3516_v44 = vld [vmem:[#allocation7 + $0x17e8] sm:$0xff] }
 0x36a   :  { %7406 = vmatpush1.bf16.msra.mxu0 %v7405_v22  ;;  %3922 = vmatprep.mubr.f32.mxu1 %v3177_v38  ;;  %v7543_v50 = vpack.c.bf16 %v3478_v12, %v3474_v13  ;;  %v3494_v22 = vld [vmem:[#allocation7 + $0x1738] sm:$0xff]  ;;  %v3489_v38 = vld [vmem:[#allocation7 + $0x1710] sm:$0xff] }
 0x36b   :  { %7534 = vmatpush1.bf16.msra.mxu1 %v7533_v26  ;;  %7408 = vmatprep.subr.bf16.mxu0 %v7407_v31  ;;  %v7421_v26 = vpack.c.bf16 %v3483_v19, %v3479_v39  ;;  %v7549_v31 = vpack.c.bf16 %v3485_v29, %v3481_v56  ;;  %v3506_v13 = vld [vmem:[#allocation7 + $0x1798] sm:$0xff]  ;;  %v3511_v39 = vld [vmem:[#allocation7 + $0x17c0] sm:$0xff]  ;;  %v3517_v29 = vld [vmem:[#allocation7 + $0x17f0] sm:$0xff] }
 0x36c   :  { %7536 = vmatprep.subr.bf16.mxu1 %v7535_v40  ;;  %v7551_v40 = vpack.c.bf16 %v3494_v22, %v3490_v48  ;;  %v3510_v12 = vld [vmem:[#allocation7 + $0x17b8] sm:$0xff]  ;;  %v3515_v19 = vld [vmem:[#allocation7 + $0x17e0] sm:$0xff]  ;;  %v3172_v48 = vrot.slane %v9855_v11, 2  ;;  %v3173_v22 = vrot.slane %v9857_v32, 2  ;;  %v3190_v32 = vrot.slane %v9925_v17, 2 }
 0x36d   :  { %v3518_v20 = vld [vmem:[#allocation7 + $0x17f8] sm:$0xff]  ;;  %v7437_v42 = vpack.c.bf16 %v3515_v19, %v3511_v39 }
 0x36e   :  { %7410 = vmatpush1.bf16.msra.mxu0 %v7409_v34  ;;  %v7425_v34 = vpack.c.bf16 %v3491_v61, %v3487_v30  ;;  %v7563_v56 = vpack.c.bf16 %v3518_v20, %v3514_v37  ;;  %v3192_v61 = vrot.slane %v10004_v4, 2  ;;  %v3199_v17 = vsel %vm698_vm5, %v3190_v32, %v3198_v52  ;;  %v4397_v39 = vld [vmem:[#allocation10 + $0x290] sm:$0xff]  ;;  %v4398_v19 = vld [vmem:[#allocation10 + $0x298] sm:$0xff] }
 0x36f   :  { %7538 = vmatpush1.bf16.msra.mxu1 %v7537_v3  ;;  %7412 = vmatprep.subr.bf16.mxu0 %v7411_v51  ;;  %v7553_v3 = vpack.c.bf16 %v3493_v43, %v3489_v38  ;;  %v7427_v51 = vpack.c.bf16 %v3500_v14, %v3496_v10  ;;  %v3200_v38 = vrot.slane %v10023_v45, 2  ;;  %v3216_v43 = vrot.slane %v10047_v27, 2 }
 0x370   :  { %7540 = vmatprep.subr.bf16.mxu1 %v7539_v15  ;;  %v7555_v15 = vpack.c.bf16 %v3502_v60, %v3498_v16  ;;  %v3214_v10 = vrot.slane %v10053_v58, 2  ;;  %v3224_v14 = vrot.slane %v10059_v53, 2  ;;  %v3222_v16 = vrot.slane %v10064_v63, 2  ;;  %v4427_v53 = vld [vmem:[#allocation10 + $0x380] sm:$0xff]  ;;  %v4428_v63 = vld [vmem:[#allocation10 + $0x388] sm:$0xff] }
 0x371   :  { %v3201_v4 = vsel %vm698_vm5, %v3192_v61, %v3200_v38  ;;  %v4411_v60 = vld [vmem:[#allocation10 + $0x300] sm:$0xff] }
 0x372   :  { %7414 = vmatpush1.bf16.msra.mxu0 %v7413_v41  ;;  %v7429_v41 = vpack.c.bf16 %v3499_v6, %v3495_v23  ;;  %v3225_v27 = vsel %vm698_vm5, %v3216_v43, %v3224_v14  ;;  %v3223_v58 = vsel %vm698_vm5, %v3214_v10, %v3222_v16  ;;  %v4396_v23 = vld [vmem:[#allocation10 + $0x288] sm:$0xff] }
 0x373   :  { %7542 = vmatpush1.bf16.msra.mxu1 %v7541_v0  ;;  %7416 = vmatprep.subr.bf16.mxu0 %v7415_v1  ;;  %v7557_v0 = vpack.c.bf16 %v3501_v21, %v3497_v36  ;;  %v7431_v1 = vpack.c.bf16 %v3508_v8, %v3504_v18  ;;  %v11594_v21 = vld [vmem:[#allocation20_spill] sm:$0xff] }
 0x374   :  { %7544 = vmatprep.subr.bf16.mxu1 %v7543_v50  ;;  %v7559_v50 = vpack.c.bf16 %v3510_v12, %v3506_v13  ;;  %v11595_v18 = vsub.s32 2, %v11594_v21  ;;  %v11596_v13 = vsub.s32 1, %v11594_v21 }
 0x376   :  { %7418 = vmatpush1.bf16.msra.mxu0 %v7417_v55  ;;  %v7433_v55 = vpack.c.bf16 %v3507_v7, %v3503_v57  ;;  %v4429_v57 = vld [vmem:[#allocation10 + $0x390] sm:$0xff] }
 0x377   :  { %7546 = vmatpush1.bf16.msra.mxu1 %v7545_v54  ;;  %7420 = vmatprep.subr.bf16.mxu0 %v7419_v46  ;;  %v7561_v54 = vpack.c.bf16 %v3509_v28, %v3505_v24  ;;  %v7435_v46 = vpack.c.bf16 %v3516_v44, %v3512_v47  ;;  %v4430_v28 = vld [vmem:[#allocation10 + $0x398] sm:$0xff]  ;;  %v4413_v47 = vld [vmem:[#allocation10 + $0x310] sm:$0xff] }
 0x378   :  { %7548 = vmatprep.subr.bf16.mxu1 %v7547_v59  ;;  %v3513_v59 = vld [vmem:[#allocation7 + $0x17d0] sm:$0xff]  ;;  %v4414_v44 = vld [vmem:[#allocation10 + $0x318] sm:$0xff] }
 0x379   :  { %v7565_v25 = vpack.c.bf16 %v3517_v29, %v3513_v59  ;;  %v7571_v59 = vpack.c.bf16 %v4398_v19, %v4397_v39  ;;  %v4382_v29 = vld [vmem:[#allocation10 + $0x218] sm:$0xff] }
 0x37a   :  { %7422 = vmatpush1.bf16.msra.mxu0 %v7421_v26  ;;  %v3184_v26 = vrot.slane %v9991_v2, 2 }
 0x37b   :  { %7550 = vmatpush1.bf16.msra.mxu1 %v7549_v31  ;;  %7424 = vmatprep.subr.bf16.mxu0 %v7423_v33  ;;  %v3174_v31 = vsel %vm698_vm5, %v3172_v48, %v3173_v22  ;;  %v3182_v33 = vrot.slane %v9923_v5, 2 }
 0x37c   :  { %7552 = vmatprep.subr.bf16.mxu1 %v7551_v40  ;;  %v3185_v30 = vsel %vm698_vm5, %v3176_v9, %v3184_v26  ;;  %v3193_v2 = vsel %vm698_vm5, %v3184_v26, %v3192_v61  ;;  %v3208_v9 = vrot.slane %v10035_v35, 2  ;;  %v3206_v40 = vrot.slane %v9947_v62, 2  ;;  %v4416_v61 = vld [vmem:[#allocation10 + $0x328] sm:$0xff] }
 0x37d   :  { %v3183_v11 = vsel %vm698_vm5, %v3173_v22, %v3182_v33  ;;  %v3191_v5 = vsel %vm698_vm5, %v3182_v33, %v3190_v32 }
 0x37e   :  { %7426 = vmatpush1.bf16.msra.mxu0 %v7425_v34  ;;  %v3209_v45 = vsel %vm698_vm5, %v3200_v38, %v3208_v9  ;;  %v3207_v49 = vsel %vm698_vm5, %v3198_v52, %v3206_v40  ;;  %v3217_v35 = vsel %vm698_vm5, %v3208_v9, %v3216_v43  ;;  %v3215_v62 = vsel %vm698_vm5, %v3206_v40, %v3214_v10  ;;  %v4383_v52 = vld [vmem:[#allocation10 + $0x220] sm:$0xff]  ;;  %v4434_v43 = vld [vmem:[#allocation10 + $0x3b8] sm:$0xff] }
 0x37f   :  { %7554 = vmatpush1.bf16.msra.mxu1 %v7553_v3  ;;  %7428 = vmatprep.subr.bf16.mxu0 %v7427_v51  ;;  %v7599_v34 = vpack.c.bf16 %v4428_v63, %v4427_v53  ;;  %v4412_v3 = vld [vmem:[#allocation10 + $0x308] sm:$0xff]  ;;  %v4395_v51 = vld [vmem:[#allocation10 + $0x280] sm:$0xff]  ;;  %v4385_v53 = vld [vmem:[#allocation10 + $0x230] sm:$0xff] }
 0x380   :  { %7556 = vmatprep.subr.bf16.mxu1 %v7555_v15  ;;  %v7601_v6 = vpack.c.bf16 %v4412_v3, %v4411_v60  ;;  %v7567_v36 = vpack.c.bf16 %v4396_v23, %v4395_v51  ;;  %v10214_v15 = vld [vmem:[#allocation8] sm:$0xf]  ;;  %v4435_v60 = vld [vmem:[#allocation10 + $0x3c0] sm:$0xff]  ;;  %v4436_v23 = vld [vmem:[#allocation10 + $0x3c8] sm:$0xff] }
 0x381   :  { %v10219_v8 = vrot.slane %v10214_v15, %v11595_v18  ;;  %v10224_v12 = vrot.slane %v10214_v15, %v11596_v13  ;;  %v4386_v63 = vld [vmem:[#allocation10 + $0x238] sm:$0xff]  ;;  %v7615_v18 = vpack.c.bf16 %v4436_v23, %v4435_v60  ;;  %v4420_v13 = vld [vmem:[#allocation10 + $0x348] sm:$0xff] }
 0x382   :  { %7430 = vmatpush1.bf16.msra.mxu0 %v7429_v41 }
 0x383   :  { %7558 = vmatpush1.bf16.msra.mxu1 %v7557_v0  ;;  %7432 = vmatprep.subr.bf16.mxu0 %v7431_v1  ;;  %v4379_v0 = vld [vmem:[#allocation10 + $0x200] sm:$0xff]  ;;  %v4380_v1 = vld [vmem:[#allocation10 + $0x208] sm:$0xff] }
 0x384   :  { %7560 = vmatprep.subr.bf16.mxu1 %v7559_v50  ;;  %v7569_v50 = vpack.c.bf16 %v4380_v1, %v4379_v0  ;;  %v4403_v0 = vld [vmem:[#allocation10 + $0x2c0] sm:$0xff]  ;;  %v4404_v1 = vld [vmem:[#allocation10 + $0x2c8] sm:$0xff] }
 0x386   :  { %7434 = vmatpush1.bf16.msra.mxu0 %v7433_v55 }
 0x387   :  { %7562 = vmatpush1.bf16.msra.mxu1 %v7561_v54  ;;  %7436 = vmatprep.subr.bf16.mxu0 %v7435_v46  ;;  %v7603_v54 = vpack.c.bf16 %v4430_v28, %v4429_v57  ;;  %v7605_v46 = vpack.c.bf16 %v4414_v44, %v4413_v47  ;;  %v11597_v57 = vsub.s32 0, %v11594_v21  ;;  %v7581_v28 = vpack.c.bf16 %v4386_v63, %v4385_v53  ;;  %v4406_v53 = vld [vmem:[#allocation10 + $0x2d8] sm:$0xff] }
 0x388   :  { %7564 = vmatprep.subr.bf16.mxu1 %v7563_v56  ;;  %v4381_v56 = vld [vmem:[#allocation10 + $0x210] sm:$0xff]  ;;  %v7583_v44 = vpack.c.bf16 %v4404_v1, %v4403_v0 }
 0x38a   :  { %7438 = vmatpush1.bf16.msra.mxu0 %v7437_v42  ;;  %v4431_v42 = vld [vmem:[#allocation10 + $0x3a0] sm:$0xff] }
 0x38b   :  { %7566 = vmatpush1.bf16.msra.mxu1 %v7565_v25  ;;  %7568 = vmatprep.subr.bf16.mxu0 %v7567_v36  ;;  %v4432_v25 = vld [vmem:[#allocation10 + $0x3a8] sm:$0xff] }
 0x38c   :  { %7600 = vmatprep.subr.bf16.mxu1 %v7599_v34  ;;  %v7607_v33 = vpack.c.bf16 %v4432_v25, %v4431_v42 }
 0x38d   :  { %3697 = vmatmul.mubr.f32.vlgmr.msra.gmra.mrb[16].mxu0 %v3174_v31 }
 0x38e   :  { %3923 = vmatmul.mubr.f32.vlgmr.msra.gmra.mrb[24].mxu1 %v3174_v31  ;;  %3702 = vmatprep.mubr.f32.mxu0 %v3185_v30  ;;  %v7573_v31 = vpack.c.bf16 %v4382_v29, %v4381_v56 }
 0x38f   :  { %3928 = vmatprep.mubr.f32.mxu1 %v3185_v30  ;;  %7602 = vmatpush3.bf16.msra.mxu1 %v7601_v6  ;;  %v4415_v30 = vld [vmem:[#allocation10 + $0x320] sm:$0xff] }
 0x390   :  { %7570 = vmatpush3.bf16.msra.mxu0 %v7569_v50  ;;  %7604 = vmatprep.subr.bf16.mxu1 %v7603_v54  ;;  %v7609_v38 = vpack.c.bf16 %v4416_v61, %v4415_v30  ;;  %v4419_v6 = vld [vmem:[#allocation10 + $0x340] sm:$0xff] }
 0x391   :  { %3703 = vmatmul.mubr.f32.gmra.mrb[18].mxu0 %v3183_v11  ;;  %7572 = vmatprep.subr.bf16.mxu0 %v7571_v59  ;;  %v7617_v39 = vpack.c.bf16 %v4420_v13, %v4419_v6  ;;  %v4387_v61 = vld [vmem:[#allocation10 + $0x240] sm:$0xff] }
 0x392   :  { %3929 = vmatmul.mubr.f32.gmra.mrb[26].mxu1 %v3183_v11  ;;  %3708 = vmatprep.mubr.f32.mxu0 %v3193_v2  ;;  %v4399_v11 = vld [vmem:[#allocation10 + $0x2a0] sm:$0xff] }
 0x393   :  { %3934 = vmatprep.mubr.f32.mxu1 %v3193_v2  ;;  %7606 = vmatpush3.bf16.msra.mxu1 %v7605_v46 }
 0x394   :  { %7608 = vmatprep.subr.bf16.mxu1 %v7607_v33  ;;  %7574 = vmatpush3.bf16.msra.mxu0 %v7573_v31 }
 0x395   :  { %3709 = vmatmul.mubr.f32.gmra.mrb[20].mxu0 %v3191_v5 }
 0x396   :  { %3935 = vmatmul.mubr.f32.gmra.mrb[28].mxu1 %v3191_v5  ;;  %3714 = vmatprep.mubr.f32.mxu0 %v3201_v4  ;;  %v4400_v5 = vld [vmem:[#allocation10 + $0x2a8] sm:$0xff] }
 0x397   :  { %3940 = vmatprep.mubr.f32.mxu1 %v3201_v4  ;;  %v4384_v4 = vld [vmem:[#allocation10 + $0x228] sm:$0xff]  ;;  %v7575_v40 = vpack.c.bf16 %v4400_v5, %v4399_v11  ;;  %7610 = vmatpush3.bf16.msra.mxu1 %v7609_v38  ;;  %v4437_v38 = vld [vmem:[#allocation10 + $0x3d0] sm:$0xff] }
 0x398   :  { %v7577_v10 = vpack.c.bf16 %v4384_v4, %v4383_v52  ;;  %v4388_v11 = vld [vmem:[#allocation10 + $0x248] sm:$0xff] }
 0x399   :  { %3715 = vmatmul.mubr.f32.gmra.mrb[22].mxu0 %v3199_v17  ;;  %7576 = vmatprep.subr.bf16.mxu0 %v7575_v40  ;;  %v7585_v40 = vpack.c.bf16 %v4388_v11, %v4387_v61 }
 0x39a   :  { %3941 = vmatmul.mubr.f32.gmra.mrb[30].mxu1 %v3199_v17  ;;  %3720 = vmatprep.mubr.f32.mxu0 %v3209_v45 }
 0x39b   :  { %3946 = vmatprep.mubr.f32.mxu1 %v3209_v45  ;;  %v4433_v45 = vld [vmem:[#allocation10 + $0x3b0] sm:$0xff]  ;;  %7578 = vmatpush3.bf16.msra.mxu0 %v7577_v10 }
 0x39d   :  { %3721 = vmatmul.mubr.f32.gmra.mrb[24].mxu0 %v3207_v49 }
 0x39e   :  { %3947 = vmatmul.mubr.f32.gmra.mrb[32].mxu1 %v3207_v49  ;;  %3726 = vmatprep.mubr.f32.mxu0 %v3217_v35  ;;  %v4417_v49 = vld [vmem:[#allocation10 + $0x330] sm:$0xff] }
 0x39f   :  { %3952 = vmatprep.mubr.f32.mxu1 %v3217_v35  ;;  %v7611_v35 = vpack.c.bf16 %v4434_v43, %v4433_v45  ;;  %v4438_v45 = vld [vmem:[#allocation10 + $0x3d8] sm:$0xff]  ;;  %v4421_v43 = vld [vmem:[#allocation10 + $0x350] sm:$0xff] }
 0x3a1   :  { %3727 = vmatmul.mubr.f32.gmra.mrb[26].mxu0 %v3215_v62  ;;  %7612 = vmatprep.subr.bf16.mxu1 %v7611_v35 }
 0x3a2   :  { %3953 = vmatmul.mubr.f32.gmra.mrb[34].mxu1 %v3215_v62  ;;  %3732 = vmatprep.mubr.f32.mxu0 %v3225_v27  ;;  %v4401_v62 = vld [vmem:[#allocation10 + $0x2b0] sm:$0xff] }
 0x3a3   :  { %3958 = vmatprep.mubr.f32.mxu1 %v3225_v27 }
 0x3a5   :  { %3733 = vmatmul.mubr.f32.gmra.mrb[28].mxu0 %v3223_v58 }
 0x3a6   :  { %3959 = vmatmul.mubr.f32.gmra.mrb[36].mxu1 %v3223_v58  ;;  %6189 = vmatprep.mubr.msk.f32.mxu0 %vm698_vm5, %v3224_v14 }
 0x3a7   :  { %6193 = vmatprep.mubr.msk.f32.mxu1 %vm698_vm5, %v3224_v14  ;;  %v4418_v14 = vld [vmem:[#allocation10 + $0x338] sm:$0xff] }
 0x3a8   :  { %v7613_v51 = vpack.c.bf16 %v4418_v14, %v4417_v49  ;;  %v4422_v49 = vld [vmem:[#allocation10 + $0x358] sm:$0xff] }
 0x3a9   :  { %6190 = vmatmul.mubr.msk.f32.gmra.mrb[30].mxu0 %vm698_vm5, %v3222_v16  ;;  %v7621_v6 = vpack.c.bf16 %v4422_v49, %v4421_v43 }
 0x3aa   :  { %6194 = vmatmul.mubr.msk.f32.gmra.mrb[38].mxu1 %vm698_vm5, %v3222_v16  ;;  %v4402_v16 = vld [vmem:[#allocation10 + $0x2b8] sm:$0xff] }
 0x3ab   :  { %v7579_v58 = vpack.c.bf16 %v4402_v16, %v4401_v62  ;;  %7614 = vmatpush3.bf16.msra.mxu1 %v7613_v51 }
 0x3ac   :  { %7616 = vmatprep.subr.bf16.mxu1 %v7615_v18 }
 0x3ad   :  { %7580 = vmatprep.subr.bf16.mxu0 %v7579_v58  ;;  %v4405_v58 = vld [vmem:[#allocation10 + $0x2d0] sm:$0xff] }
 0x3ae   :  { %7582 = vmatpush3.bf16.msra.mxu0 %v7581_v28  ;;  %v7587_v1 = vpack.c.bf16 %v4406_v53, %v4405_v58 }
 0x3af   :  { %7584 = vmatprep.subr.bf16.mxu0 %v7583_v44  ;;  %7618 = vmatpush3.bf16.msra.mxu1 %v7617_v39  ;;  %v4389_v44 = vld [vmem:[#allocation10 + $0x250] sm:$0xff]  ;;  %v4390_v39 = vld [vmem:[#allocation10 + $0x258] sm:$0xff] }
 0x3b0   :  { %v7589_v11 = vpack.c.bf16 %v4390_v39, %v4389_v44  ;;  %v4391_v44 = vld [vmem:[#allocation10 + $0x260] sm:$0xff]  ;;  %v4392_v39 = vld [vmem:[#allocation10 + $0x268] sm:$0xff] }
 0x3b2   :  { %7586 = vmatpush3.bf16.msra.mxu0 %v7585_v40  ;;  %v4424_v40 = vld [vmem:[#allocation10 + $0x368] sm:$0xff] }
 0x3b3   :  { %7588 = vmatprep.subr.bf16.mxu0 %v7587_v1 }
 0x3b6   :  { %7590 = vmatpush3.bf16.msra.mxu0 %v7589_v11 }
 0x460   :  { %v10226_v41 = vpop.f32.mrb[16].mxu0 }
 0x461   :  { %v3924_v7 = vpop.f32.mrb[24].mxu1  ;;  %v3700_v24 = vpop.f32.mrb[17].mxu0 }
 0x462   :  { %v10229_v37 = vadd.f32 %v10219_v8, %v3924_v7  ;;  %v10232_v20 = vadd.f32 %v10224_v12, %v3700_v24  ;;  %v10234_v55 = vpop.f32.mrb[25].mxu1  ;;  %v10262_v7 = vrot.slane %v10214_v15, %v11597_v57  ;;  %v11598_v24 = vsub.s32 3, %v11594_v21 }
 0x464   :  { %v11389_v48 = vmax.f32 %v10229_v37, 0.0  ;;  %v11391_v22 = vmax.f32 %v10232_v20, 0.0  ;;  %v10238_v26 = vpop.f32.mrb[18].mxu0  ;;  %v10267_v50 = vrot.slane %v10214_v15, %v11598_v24  ;;  %v10279_v21 = vadd.f32 %v10262_v7, %v10226_v41 }
 0x465   :  { %v10240_v32 = vpop.f32.mrb[26].mxu1  ;;  %v10242_v2 = vpop.f32.mrb[19].mxu0  ;;  %v10333_v57 = vadd.f32 %v10262_v7, %v10238_v26 }
 0x466   :  { %v8320_v9 = vpack.i.bf16 %v11389_v48, %v11391_v22  ;;  %v10248_v17 = vpop.f32.mrb[27].mxu1  ;;  %v10283_v15 = vadd.f32 %v10267_v50, %v10234_v55  ;;  %v11387_v33 = vmax.f32 %v10279_v21, 0.0  ;;  %v10301_v5 = vadd.f32 %v10219_v8, %v10240_v32  ;;  %v10528_v22 = vld [vmem:[#allocation10 + $0x1a8] sm:$0xff] }
 0x467   :  { %v7619_v32 = vpack.c.bf16 %v4438_v45, %v4437_v38  ;;  %v10322_v18 = vadd.f32 %v10224_v12, %v10242_v2  ;;  %v4440_v38 = vld [vmem:[#allocation10 + $0x3e8] sm:$0xff] }
 0x468   :  { %8321 = vrot.lane.b32.xlu1 %v8320_v9, %s8604_s17  ;;  %v10251_v27 = vpop.f32.mrb[20].mxu0  ;;  %v4060_v55 = vmax.f32 %v10283_v15, 0.0  ;;  %v10541_v15 = vld [vmem:[#allocation10 + $0xa8] sm:$0xff] }
 0x469   :  { %v10253_v34 = vpop.f32.mrb[28].mxu1  ;;  %v10255_v3 = vpop.f32.mrb[21].mxu0  ;;  %11600 = vst [vmem:[#allocation42_spill] sm:$0xff] %v10322_v18  ;;  %7620 = vmatprep.subr.bf16.mxu1 %v7619_v32  ;;  %v4408_v32 = vld [vmem:[#allocation10 + $0x2e8] sm:$0xff]  ;;  %v11365_v58 = vmax.f32 %v10322_v18, 0.0 }
 0x46a   :  { %v10257_v36 = vpop.f32.mrb[29].mxu1  ;;  %7622 = vmatpush3.bf16.msra.mxu1 %v7621_v6  ;;  %v11368_v6 = vmax.f32 %v10333_v57, 0.0 }
 0x46c   :  { %v10269_v47 = vpop.f32.mrb[22].mxu0 }
 0x46d   :  { %v10271_v54 = vpop.f32.mrb[30].mxu1  ;;  %v10273_v46 = vpop.f32.mrb[23].mxu0 }
 0x46e   :  { %v10275_v19 = vpop.f32.mrb[31].mxu1 }
 0x470   :  { %v3722_v56 = vpop.f32.mrb[24].mxu0 }
 0x471   :  { %v10286_v59 = vadd.f32 %v10262_v7, %v3722_v56  ;;  %v3948_v29 = vpop.f32.mrb[32].mxu1  ;;  %v3724_v42 = vpop.f32.mrb[25].mxu0  ;;  %v4439_v56 = vld [vmem:[#allocation10 + $0x3e0] sm:$0xff] }
 0x472   :  { %v10289_v25 = vadd.f32 %v10219_v8, %v3948_v29  ;;  %v10292_v31 = vadd.f32 %v10224_v12, %v3724_v42  ;;  %v3950_v41 = vpop.f32.mrb[33].mxu1  ;;  %v11366_v29 = vmax.f32 %v10301_v5, 0.0  ;;  %v10341_v42 = vadd.f32 %v10267_v50, %v10248_v17 }
 0x473   :  { %v10297_v30 = vadd.f32 %v10267_v50, %v3950_v41  ;;  %v11386_v10 = vmax.f32 %v10286_v59, 0.0 }
 0x474   :  { %v11390_v52 = vmax.f32 %v10289_v25, 0.0  ;;  %v11388_v4 = vmax.f32 %v10292_v31, 0.0  ;;  %v3728_v9 = vpop.f32.mrb[26].mxu0  ;;  %11602 = vst [vmem:[#allocation44_spill] sm:$0xff] %v10341_v42 }
 0x475   :  { %v4076_v35 = vmax.f32 %v10297_v30, 0.0  ;;  %v10308_v14 = vadd.f32 %v10262_v7, %v3728_v9  ;;  %v3954_v62 = vpop.f32.mrb[34].mxu1  ;;  %v3730_v16 = vpop.f32.mrb[27].mxu0  ;;  %v8335_v26 = vpack.i.bf16 %v11386_v10, %v11387_v33  ;;  %v4423_v9 = vld [vmem:[#allocation10 + $0x360] sm:$0xff]  ;;  %v10520_v10 = vld [vmem:[#allocation10 + $0x18] sm:$0xff]  ;;  %v10556_v30 = vld [vmem:[#allocation10 + $0x1b0] sm:$0xff] }
 0x476   :  { %v8325_v63 = vpack.i.bf16 %v11388_v4, %v4060_v55  ;;  %v10315_v60 = vadd.f32 %v10219_v8, %v3954_v62  ;;  %v10318_v51 = vadd.f32 %v10224_v12, %v3730_v16  ;;  %v3956_v23 = vpop.f32.mrb[35].mxu1  ;;  %v7623_v62 = vpack.c.bf16 %v4440_v38, %v4439_v56  ;;  %v4407_v16 = vld [vmem:[#allocation10 + $0x2e0] sm:$0xff]  ;;  %v4441_v56 = vld [vmem:[#allocation10 + $0x3f0] sm:$0xff] }
 0x477   :  { %v8330_v13 = vpack.i.bf16 %v4076_v35, %v11390_v52  ;;  %v10329_v0 = vadd.f32 %v10267_v50, %v3956_v23  ;;  %v11385_v45 = vmax.f32 %v10308_v14, 0.0  ;;  %v7625_v23 = vpack.c.bf16 %v4424_v40, %v4423_v9  ;;  %v4442_v40 = vld [vmem:[#allocation10 + $0x3f8] sm:$0xff]  ;;  %v10526_v52 = vld [vmem:[#allocation10 + $0x1a0] sm:$0xff] }
 0x478   :  { %11599 = vst [vmem:[#allocation24_spill] sm:$0xff] %v10318_v51  ;;  %v11363_v24 = vmax.f32 %v10315_v60, 0.0  ;;  %v11362_v28 = vmax.f32 %v10318_v51, 0.0  ;;  %8326 = vrot.lane.b32.xlu0 %v8325_v63, %s8604_s17  ;;  %v3734_v2 = vpop.f32.mrb[28].mxu0  ;;  %7624 = vmatprep.subr.bf16.mxu1 %v7623_v62  ;;  %v7591_v1 = vpack.c.bf16 %v4408_v32, %v4407_v16  ;;  %v11367_v38 = vmax.f32 %v10341_v42, 0.0  ;;  %v4425_v62 = vld [vmem:[#allocation10 + $0x370] sm:$0xff] }
 0x479   :  { %11601 = vst [vmem:[#allocation41_spill] sm:$0xff] %v10329_v0  ;;  %v3960_v41 = vpop.f32.mrb[36].mxu1  ;;  %8331 = vrot.lane.b32.xlu1 %v8330_v13, %s8604_s17  ;;  %v3736_v61 = vpop.f32.mrb[29].mxu0  ;;  %v11364_v43 = vmax.f32 %v10329_v0, 0.0  ;;  %7626 = vmatpush3.bf16.msra.mxu1 %v7625_v23  ;;  %v7593_v9 = vpack.c.bf16 %v4392_v39, %v4391_v44  ;;  %v4426_v16 = vld [vmem:[#allocation10 + $0x378] sm:$0xff]  ;;  %v8345_v44 = vpack.i.bf16 %v11366_v29, %v11365_v58  ;;  %v10649_v42 = vld [vmem:[#allocation10 + $0x1e0] sm:$0xff] }
 0x47a   :  { %v8340_v17 = vpack.i.bf16 %v11363_v24, %v11362_v28  ;;  %v3962_v49 = vpop.f32.mrb[37].mxu1  ;;  %v10356_v53 = vadd.f32 %v10219_v8, %v3960_v41  ;;  %v10359_v63 = vadd.f32 %v10224_v12, %v3736_v61  ;;  %v10368_v41 = vadd.f32 %v10219_v8, %v10253_v34  ;;  %7592 = vmatprep.subr.bf16.mxu0 %v7591_v1  ;;  %v4409_v24 = vld [vmem:[#allocation10 + $0x2f0] sm:$0xff]  ;;  %v4410_v23 = vld [vmem:[#allocation10 + $0x2f8] sm:$0xff] }
 0x47b   :  { %v10372_v61 = vadd.f32 %v10224_v12, %v10255_v3  ;;  %v8350_v32 = vpack.i.bf16 %v11385_v45, %v11364_v43  ;;  %v10380_v34 = vadd.f32 %v10262_v7, %v3734_v2  ;;  %v10383_v3 = vadd.f32 %v10267_v50, %v3962_v49  ;;  %7594 = vmatpush3.bf16.msra.mxu0 %v7593_v9  ;;  %v10518_v45 = vld [vmem:[#allocation10 + $0x10] sm:$0xff] }
 0x47c   :  { %11603 = vst [vmem:[#allocation43_spill] sm:$0xff] %v10356_v53  ;;  %11604 = vst [vmem:[#allocation46_spill] sm:$0xff] %v10359_v63  ;;  %8336 = vrot.lane.b32.xlu0 %v8335_v26, %s8604_s17  ;;  %v10363_v13 = vpop.f32.mrb[30].mxu0  ;;  %v11380_v39 = vmax.f32 %v10356_v53, 0.0  ;;  %v11382_v43 = vmax.f32 %v10359_v63, 0.0  ;;  %v7629_v2 = vpack.c.bf16 %v4426_v16, %v4425_v62  ;;  %v10393_v49 = vadd.f32 %v10262_v7, %v10251_v27  ;;  %v10607_v53 = vld [vmem:[#allocation10 + $0x48] sm:$0xff] }
 0x47d   :  { %11605 = vst [vmem:[#allocation45_spill] sm:$0xff] %v10368_v41  ;;  %11606 = vst [vmem:[#allocation49_spill] sm:$0xff] %v10372_v61  ;;  %v3966_v11 = vpop.f32.mrb[38].mxu1  ;;  %8341 = vrot.lane.b32.xlu1 %v8340_v17, %s8604_s17  ;;  %v3742_v26 = vpop.f32.mrb[31].mxu0  ;;  %v7627_v17 = vpack.c.bf16 %v4442_v40, %v4441_v56  ;;  %v7595_v1 = vpack.c.bf16 %v4410_v23, %v4409_v24  ;;  %v4393_v56 = vld [vmem:[#allocation10 + $0x270] sm:$0xff]  ;;  %v4394_v40 = vld [vmem:[#allocation10 + $0x278] sm:$0xff]  ;;  %v8355_v58 = vpack.i.bf16 %v11368_v6, %v11367_v38 }
 0x47e   :  { %11607 = vst [vmem:[#allocation48_spill] sm:$0xff] %v10380_v34  ;;  %v3968_v28 = vpop.f32.mrb[39].mxu1  ;;  %11608 = vst [vmem:[#allocation39_spill] sm:$0xff] %v10393_v49  ;;  %v10402_v29 = vadd.f32 %v10267_v50, %v10257_v36  ;;  %v7597_v27 = vpack.c.bf16 %v4394_v40, %v4393_v56  ;;  %v11378_v9 = vmax.f32 %v10368_v41, 0.0  ;;  %v11379_v62 = vmax.f32 %v10372_v61, 0.0  ;;  %v4330_v56 = vld [vmem:[#allocation10 + $0x80] sm:$0xff] }
 0x47f   :  { %7628 = vmatprep.subr.bf16.mxu1 %v7627_v17  ;;  %v11381_v24 = vmax.f32 %v10380_v34, 0.0  ;;  %v11384_v16 = vmax.f32 %v10383_v3, 0.0  ;;  %7596 = vmatprep.subr.bf16.mxu0 %v7595_v1  ;;  %v4363_v17 = vld [vmem:[#allocation10 + $0x188] sm:$0xff]  ;;  %v8360_v36 = vpack.i.bf16 %v11380_v39, %v11382_v43  ;;  %v10414_v23 = vadd.f32 %v10219_v8, %v3966_v11  ;;  %v10510_v39 = vld [vmem:[#allocation10 + $0x118] sm:$0xff]  ;;  %11635 = vst [vmem:[#allocation33_spill] sm:$0xff] %v10607_v53 }
 0x480   :  { %8351 = vrot.lane.b32.xlu0 %v8350_v32, %s8604_s17  ;;  %11609 = vst [vmem:[#allocation23_spill] sm:$0xff] %v10402_v29  ;;  %7630 = vmatpush3.bf16.msra.mxu1 %v7629_v2  ;;  %v4362_v32 = vld [vmem:[#allocation10 + $0x180] sm:$0xff]  ;;  %v4331_v40 = vld [vmem:[#allocation10 + $0x88] sm:$0xff]  ;;  %v11377_v38 = vmax.f32 %v10393_v49, 0.0  ;;  %v11383_v6 = vmax.f32 %v10402_v29, 0.0  ;;  %v8365_v11 = vpack.i.bf16 %v11378_v9, %v11379_v62  ;;  %v10504_v9 = vld [vmem:[#allocation10 + $0x190] sm:$0xff] }
 0x481   :  { %8346 = vrot.lane.b32.xlu1 %v8345_v44, %s8604_s17  ;;  %11610 = vst [vmem:[#allocation21_spill] sm:$0xff] %v10414_v23  ;;  %v10417_v44 = vadd.f32 %v10224_v12, %v3742_v26  ;;  %7598 = vmatpush3.bf16.msra.mxu0 %v7597_v27  ;;  %v7663_v2 = vpack.c.bf16 %v4363_v17, %v4362_v32  ;;  %v10508_v62 = vld [vmem:[#allocation10 + $0x110] sm:$0xff]  ;;  %v10583_v49 = vld [vmem:[#allocation10 + $0x1c0] sm:$0xff]  ;;  %v11630_v41 = vmax.f32 %v10279_v21, 0.0  ;;  %v10633_v34 = vld [vmem:[#allocation10 + $0x158] sm:$0xff] }
 0x482   :  { %v7631_v1 = vpack.c.bf16 %v4331_v40, %v4330_v56  ;;  %v8370_v26 = vpack.i.bf16 %v11381_v24, %v11384_v16  ;;  %v10436_v27 = vadd.f32 %v10267_v50, %v3968_v28  ;;  %v10440_v32 = vadd.f32 %v10219_v8, %v10271_v54  ;;  %v10516_v16 = vld [vmem:[#allocation10 + $0x98] sm:$0xff]  ;;  %11629 = vst [vmem:[#allocation32_spill] sm:$0xff] %v10583_v49  ;;  %v10623_v29 = vld [vmem:[#allocation10 + $0x150] sm:$0xff]  ;;  %v10661_v49 = vld [vmem:[#allocation10 + $0x160] sm:$0xff] }
 0x483   :  { %11611 = vst [vmem:[#allocation53_spill] sm:$0xff] %v10417_v44  ;;  %7664 = vmatprep.subr.bf16.mxu1 %v7663_v2  ;;  %v10444_v17 = vadd.f32 %v10224_v12, %v10273_v46  ;;  %v11372_v2 = vmax.f32 %v10417_v44, 0.0  ;;  %v8375_v8 = vpack.i.bf16 %v11377_v38, %v11383_v6  ;;  %v10460_v12 = vadd.f32 %v10267_v50, %v10275_v19  ;;  %v10560_v44 = vld [vmem:[#allocation10 + $0x130] sm:$0xff]  ;;  %v10637_v21 = vld [vmem:[#allocation10 + $0xd8] sm:$0xff]  ;;  %v10679_v53 = vld [vmem:[#allocation10 + $0xe8] sm:$0xff] }
 0x484   :  { %8356 = vrot.lane.b32.xlu0 %v8355_v58, %s8604_s17  ;;  %v10433_v58 = vadd.f32 %v10262_v7, %v10363_v13  ;;  %11613 = vst [vmem:[#allocation54_spill] sm:$0xff] %v10436_v27  ;;  %7632 = vmatprep.subr.bf16.mxu0 %v7631_v1  ;;  %11614 = vst [vmem:[#allocation47_spill] sm:$0xff] %v10440_v32  ;;  %v10451_v13 = vadd.f32 %v10262_v7, %v10269_v47  ;;  %v11376_v46 = vmax.f32 %v10436_v27, 0.0 }
 0x485   :  { %8361 = vrot.lane.b32.xlu1 %v8360_v36, %s8604_s17  ;;  %11615 = vst [vmem:[#allocation27_spill] sm:$0xff] %v10444_v17  ;;  %v11369_v36 = vmax.f32 %v10414_v23, 0.0  ;;  %11617 = vst [vmem:[#allocation25_spill] sm:$0xff] %v10460_v12  ;;  %v11371_v28 = vmax.f32 %v10440_v32, 0.0  ;;  %v11373_v7 = vmax.f32 %v10444_v17, 0.0  ;;  %v11375_v19 = vmax.f32 %v10460_v12, 0.0 }
 0x486   :  { %11612 = vst [vmem:[#allocation52_spill] sm:$0xff] %v10433_v58  ;;  %11616 = vst [vmem:[#allocation40_spill] sm:$0xff] %v10451_v13  ;;  %v11370_v54 = vmax.f32 %v10433_v58, 0.0  ;;  %v11374_v50 = vmax.f32 %v10451_v13, 0.0  ;;  %v11622_v23 = vmax.f32 %v10229_v37, 0.0  ;;  %v10558_v58 = vld [vmem:[#allocation10 + $0x1b8] sm:$0xff] }
 0x487   :  { %v8380_v47 = vpack.i.bf16 %v11369_v36, %v11372_v2  ;;  %v8385_v40 = vpack.i.bf16 %v11371_v28, %v11373_v7  ;;  %v10492_v2 = vld [vmem:[#allocation10 + $0x100] sm:$0xff]  ;;  %11623 = vst [vmem:[#allocation26_spill] sm:$0xff] %v10560_v44  ;;  %v10562_v17 = vld [vmem:[#allocation10 + $0x138] sm:$0xff]  ;;  %11637 = vst [vmem:[#allocation35_spill] sm:$0xff] %v10623_v29 }
 0x488   :  { %8371 = vrot.lane.b32.xlu0 %v8370_v26, %s8604_s17  ;;  %v8390_v56 = vpack.i.bf16 %v11370_v54, %v11376_v46  ;;  %v8395_v1 = vpack.i.bf16 %v11374_v50, %v11375_v19  ;;  %v10497_v19 = vld [vmem:[#allocation10 + $0x108] sm:$0xff]  ;;  %v10499_v46 = vld [vmem:[#allocation10] sm:$0xff]  ;;  %11638 = vst [vmem:[#allocation37_spill] sm:$0xff] %v10633_v34  ;;  %v10635_v44 = vld [vmem:[#allocation10 + $0xd0] sm:$0xff] }
 0x489   :  { %8366 = vrot.lane.b32.xlu1 %v8365_v11, %s8604_s17  ;;  %11639 = vst [vmem:[#allocation36_spill] sm:$0xff] %v10635_v44  ;;  %11640 = vst [vmem:[#allocation50_spill] sm:$0xff] %v10637_v21  ;;  %v10692_v44 = vld [vmem:[#allocation10 + $0x68] sm:$0xff] }
 0x48a   :  { %11643 = vst [vmem:[#allocation58_spill] sm:$0xff] %v10649_v42  ;;  %11647 = vst [vmem:[#allocation62_spill] sm:$0xff] %v10661_v49  ;;  %v10704_v42 = vld [vmem:[#allocation10 + $0x170] sm:$0xff] }
 0x48b   :  { %11651 = vst [vmem:[#allocation66_spill] sm:$0xff] %v10692_v44 }
 0x48c   :  { %8376 = vrot.lane.b32.xlu0 %v8375_v8, %s8604_s17 }
 0x48d   :  { %8381 = vrot.lane.b32.xlu1 %v8380_v47, %s8604_s17 }
 0x490   :  { %8391 = vrot.lane.b32.xlu0 %v8390_v56, %s8604_s17 }
 0x491   :  { %8386 = vrot.lane.b32.xlu1 %v8385_v40, %s8604_s17 }
 0x494   :  { %8396 = vrot.lane.b32.xlu0 %v8395_v1, %s8604_s17 }
 0x4da   :  { %v8322_v11 = vpop.permute.xlu1 %8321 }
 0x4db   :  { %v8324_v8 = vunpack.i.h.bf16 %v8322_v11  ;;  %v8323_v47 = vunpack.i.l.bf16 %v8322_v11  ;;  %v10501_v11 = vld [vmem:[#allocation10 + $0x8] sm:$0xff] }
 0x4dd   :  { %v4187_v38 = vsel %vm4185_vm11, %v8323_v47, %v8324_v8 }
 0x4ea   :  { %v10489_v26 = vpop.permute.xlu0 %8326 }
 0x4eb   :  { %v8332_v36 = vpop.permute.xlu1 %8331  ;;  %v8328_v54 = vunpack.i.l.bf16 %v10489_v26  ;;  %v8329_v7 = vunpack.i.h.bf16 %v10489_v26  ;;  %v10512_v26 = vld [vmem:[#allocation10 + $0x90] sm:$0xff] }
 0x4ec   :  { %v8334_v28 = vunpack.i.h.bf16 %v8332_v36  ;;  %v8333_v56 = vunpack.i.l.bf16 %v8332_v36  ;;  %v10506_v36 = vld [vmem:[#allocation10 + $0x198] sm:$0xff] }
 0x4ed   :  { %v4242_v50 = vsel %vm4185_vm11, %v8328_v54, 0.0  ;;  %v4188_v43 = vsel %vm4185_vm11, %v8324_v8, %v8328_v54  ;;  %v10532_v54 = vld [vmem:[#allocation10 + $0x128] sm:$0xff]  ;;  %v11618_v8 = vmax.f32 %v10232_v20, 0.0 }
 0x4ee   :  { %v4246_v40 = vsel %vm4185_vm11, %v8334_v28, 0.0  ;;  %v8337_v1 = vpop.permute.xlu0 %8336  ;;  %v4200_v24 = vsel %vm4185_vm11, %v8333_v56, %v8334_v28  ;;  %v4253_v4 = vmax.f32 %v4060_v55, %v4242_v50  ;;  %v10530_v28 = vld [vmem:[#allocation10 + $0x120] sm:$0xff]  ;;  %v4199_v32 = vsel %vm4185_vm11, %v8329_v7, %v8333_v56  ;;  %v10545_v50 = vld [vmem:[#allocation10 + $0x28] sm:$0xff] }
 0x4ef   :  { %v8338_v6 = vunpack.i.l.bf16 %v8337_v1  ;;  %v4269_v33 = vmax.f32 %v4076_v35, %v4246_v40  ;;  %v8339_v48 = vunpack.i.h.bf16 %v8337_v1  ;;  %v4251_v13 = vmax.f32 %v11618_v8, %v4187_v38  ;;  %v10539_v35 = vld [vmem:[#allocation10 + $0xa0] sm:$0xff]  ;;  %11620 = vst [vmem:[#allocation55_spill] sm:$0xff] %v10545_v50  ;;  %v10611_v63 = vpop.permute.xlu1 %8341  ;;  %v10621_v50 = vld [vmem:[#allocation10 + $0x1d8] sm:$0xff] }
 0x4f0   :  { %v10543_v55 = vld [vmem:[#allocation10 + $0x20] sm:$0xff]  ;;  %v11621_v40 = vmax.f32 %v10289_v25, 0.0  ;;  %v4252_v20 = vmax.f32 %v11622_v23, %v4188_v43  ;;  %v10574_v23 = vld [vmem:[#allocation10 + $0xb8] sm:$0xff]  ;;  %v11627_v8 = vmax.f32 %v10292_v31, 0.0  ;;  %v4293_v37 = vrot.slane %v4253_v4, 2  ;;  %v10585_v43 = vld [vmem:[#allocation10 + $0x1c8] sm:$0xff] }
 0x4f1   :  { %11619 = vst [vmem:[#allocation56_spill] sm:$0xff] %v10543_v55  ;;  %v4186_v38 = vsel %vm4185_vm11, %v8338_v6, %v8323_v47  ;;  %11625 = vst [vmem:[#allocation22_spill] sm:$0xff] %v10574_v23  ;;  %v10576_v47 = vld [vmem:[#allocation10 + $0x30] sm:$0xff]  ;;  %v4198_v27 = vsel %vm4185_vm11, %v8339_v48, %v8329_v7  ;;  %v10581_v25 = vld [vmem:[#allocation10 + $0x38] sm:$0xff]  ;;  %v4291_v6 = vrot.slane %v4251_v13, 2  ;;  %v11636_v31 = vmax.f32 %v10286_v59, 0.0 }
 0x4f2   :  { %v4268_v1 = vmax.f32 %v11621_v40, %v4200_v24  ;;  %v10552_v56 = vpop.permute.xlu0 %8351  ;;  %v10572_v24 = vld [vmem:[#allocation10 + $0xb0] sm:$0xff]  ;;  %11626 = vst [vmem:[#allocation29_spill] sm:$0xff] %v10576_v47  ;;  %v4297_v40 = vrot.slane %v4269_v33, 2  ;;  %v4267_v12 = vmax.f32 %v11627_v8, %v4199_v32  ;;  %11628 = vst [vmem:[#allocation34_spill] sm:$0xff] %v10581_v25  ;;  %v4250_v61 = vmax.f32 %v11630_v41, %v4186_v38  ;;  %v10593_v32 = vld [vmem:[#allocation10 + $0x140] sm:$0xff] }
 0x4f3   :  { %11624 = vst [vmem:[#allocation30_spill] sm:$0xff] %v10572_v24  ;;  %11631 = vst [vmem:[#allocation51_spill] sm:$0xff] %v10593_v32  ;;  %v10595_v8 = vld [vmem:[#allocation10 + $0x148] sm:$0xff]  ;;  %v10597_v48 = vld [vmem:[#allocation10 + $0xc0] sm:$0xff]  ;;  %v4292_v18 = vrot.slane %v4252_v20, 2  ;;  %v4266_v51 = vmax.f32 %v11636_v31, %v4198_v27  ;;  %v10627_v27 = vmax.f32 %v4253_v4, %v4293_v37  ;;  %v10639_v23 = vmax.f32 %v4251_v13, %v4291_v6 }
 0x4f4   :  { %11632 = vst [vmem:[#allocation28_spill] sm:$0xff] %v10595_v8  ;;  %11633 = vst [vmem:[#allocation38_spill] sm:$0xff] %v10597_v48  ;;  %v4296_v7 = vrot.slane %v4268_v1, 2  ;;  %v10603_v41 = vld [vmem:[#allocation10 + $0xc8] sm:$0xff]  ;;  %v10605_v38 = vld [vmem:[#allocation10 + $0x40] sm:$0xff]  ;;  %v10625_v0 = vmax.f32 %v4269_v33, %v4297_v40  ;;  %v4295_v59 = vrot.slane %v4267_v12, 2  ;;  %v10683_v48 = vpop.permute.xlu1 %8346 }
 0x4f5   :  { %11634 = vst [vmem:[#allocation31_spill] sm:$0xff] %v10605_v38  ;;  %v10619_v55 = vld [vmem:[#allocation10 + $0x1d0] sm:$0xff]  ;;  %v4290_v24 = vrot.slane %v4250_v61, 2  ;;  %v10647_v40 = vld [vmem:[#allocation10 + $0x58] sm:$0xff]  ;;  %v10653_v25 = vmax.f32 %v4252_v20, %v4292_v18  ;;  %v10659_v33 = vld [vmem:[#allocation10 + $0x1e8] sm:$0xff]  ;;  %v4294_v32 = vrot.slane %v4266_v51, 2 }
 0x4f6   :  { %v10629_v31 = vpop.permute.xlu0 %8356  ;;  %v10645_v37 = vld [vmem:[#allocation10 + $0x50] sm:$0xff]  ;;  %11642 = vst [vmem:[#allocation20_spill] sm:$0xff] %v10647_v40  ;;  %v10651_v47 = vmax.f32 %v4268_v1, %v4296_v7  ;;  %11646 = vst [vmem:[#allocation61_spill] sm:$0xff] %v10659_v33  ;;  %v10663_v4 = vld [vmem:[#allocation10 + $0x168] sm:$0xff]  ;;  %v10671_v20 = vmax.f32 %v4267_v12, %v4295_v59  ;;  %v4461_v7 = vrot.slane %v10627_v27, 4  ;;  %v4462_v6 = vrot.slane %v10625_v0, 3 }
 0x4f7   :  { %11641 = vst [vmem:[#allocation57_spill] sm:$0xff] %v10645_v37  ;;  %11645 = vst [vmem:[#allocation60_spill] sm:$0xff] %v10653_v25  ;;  %v10677_v38 = vld [vmem:[#allocation10 + $0xe0] sm:$0xff]  ;;  %v10681_v8 = vmax.f32 %v4250_v61, %v4290_v24  ;;  %v4455_v18 = vrot.slane %v10639_v23, 4  ;;  %v10694_v13 = vld [vmem:[#allocation10 + $0x1f0] sm:$0xff]  ;;  %v4458_v24 = vrot.slane %v10653_v25, 4  ;;  %v10708_v49 = vmax.f32 %v4266_v51, %v4294_v32 }
 0x4f8   :  { %11644 = vst [vmem:[#allocation59_spill] sm:$0xff] %v10651_v47  ;;  %11648 = vst [vmem:[#allocation63_spill] sm:$0xff] %v10663_v4  ;;  %v10690_v1 = vld [vmem:[#allocation10 + $0x60] sm:$0xff]  ;;  %v4456_v37 = vrot.slane %v10671_v20, 3  ;;  %v4463_v61 = vsel %vm4453_vm12, %v4462_v6, %v4461_v7  ;;  %v4459_v40 = vrot.slane %v10651_v47, 3  ;;  %v10702_v12 = vld [vmem:[#allocation10 + $0x1f8] sm:$0xff]  ;;  %v8354_v47 = vunpack.i.h.bf16 %v10552_v56 }
 0x4f9   :  { %11649 = vst [vmem:[#allocation64_spill] sm:$0xff] %v10681_v8  ;;  %11650 = vst [vmem:[#allocation65_spill] sm:$0xff] %v10690_v1  ;;  %v10706_v59 = vld [vmem:[#allocation10 + $0x178] sm:$0xff]  ;;  %4602 = vmatprep.mubr.f32.mxu1 %v4463_v61  ;;  %v4614_v33 = vrot.slane %v10625_v0, 7  ;;  %v10714_v7 = vld [vmem:[#allocation10 + $0xf0] sm:$0xff]  ;;  %v11660_v51 = vunpack.i.l.bf16 %v10552_v56 }
 0x4fa   :  { %v10700_v21 = vpop.permute.xlu0 %8371  ;;  %11652 = vst [vmem:[#allocation67_spill] sm:$0xff] %v10708_v49  ;;  %11653 = vst [vmem:[#allocation68_spill] sm:$0xff] %v10714_v7  ;;  %v10716_v25 = vld [vmem:[#allocation10 + $0xf8] sm:$0xff]  ;;  %v4457_v29 = vsel %vm4453_vm12, %v4456_v37, %v4455_v18  ;;  %v4460_v34 = vsel %vm4453_vm12, %v4459_v40, %v4458_v24  ;;  %v10723_v32 = vld [vmem:[#allocation10 + $0x70] sm:$0xff] }
 0x4fb   :  { %11654 = vst [vmem:[#allocation69_spill] sm:$0xff] %v10716_v25  ;;  %11655 = vst [vmem:[#allocation70_spill] sm:$0xff] %v10723_v32  ;;  %v10725_v61 = vld [vmem:[#allocation10 + $0x78] sm:$0xff]  ;;  %4532 = vmatprep.mubr.f32.mxu0 %v4457_v29  ;;  %4603 = vmatmul.mubr.f32.vlgmr.msra.gmra.mrb[40].mxu1 %v4460_v34  ;;  %v4615_v6 = vsel %vm4453_vm12, %v4614_v33, %v10627_v27  ;;  %v10734_v40 = vld [vmem:[#allocation10 + $0x580] sm:$0xff]  ;;  %v11658_v34 = vpack.c.bf16 %v10497_v19, %v10492_v2  ;;  %v4451_v27 = vrot.slane %v10681_v8, 4  ;;  %v10759_v2 = vpop.permute.xlu1 %8361 }
 0x4fc   :  { %11656 = vst [vmem:[#allocation71_spill] sm:$0xff] %v10725_v61  ;;  %11657 = vst [vmem:[#allocation72_spill] sm:$0xff] %v10734_v40  ;;  %v10736_v18 = vld [vmem:[#allocation10 + $0x588] sm:$0xff]  ;;  %v10738_v24 = vld [vmem:[#allocation10 + $0x500] sm:$0xff]  ;;  %4754 = vmatprep.mubr.f32.mxu1 %v4615_v6  ;;  %v11661_v29 = vunpack.i.h.bf16 %v10611_v63  ;;  %v4452_v6 = vrot.slane %v10708_v49, 3  ;;  %v4610_v33 = vrot.slane %v10671_v20, 7  ;;  %v11663_v8 = vunpack.i.l.bf16 %v10611_v63 }
 0x4fd   :  { %7666 = vmatpush3.bf16.msra.mxu1 %v11658_v34  ;;  %v10748_v37 = vld [vmem:[#allocation10 + $0x508] sm:$0xff]  ;;  %v10750_v4 = vld [vmem:[#allocation10 + $0x480] sm:$0xff]  ;;  %v11662_v34 = vpack.c.bf16 %v10506_v36, %v10504_v9  ;;  %v10781_v36 = vld [vmem:[#allocation10 + $0x590] sm:$0xff]  ;;  %v8359_v20 = vunpack.i.h.bf16 %v10629_v31  ;;  %v11664_v32 = vmax.f32 %v10315_v60, 0.0  ;;  %v11665_v49 = vunpack.i.l.bf16 %v10629_v31 }
 0x4fe   :  { %11659 = vst [vmem:[#allocation73_spill] sm:$0xff] %v10750_v4  ;;  %v10752_v0 = vld [vmem:[#allocation10 + $0x488] sm:$0xff]  ;;  %v4203_v1 = vsel %vm4185_vm11, %v11661_v29, %v11660_v51  ;;  %v4201_v7 = vsel %vm4185_vm11, %v8354_v47, %v11663_v8  ;;  %v10771_v44 = vpop.permute.xlu0 %8376  ;;  %v10777_v19 = vld [vmem:[#allocation10 + $0x400] sm:$0xff]  ;;  %v4454_v47 = vsel %vm4453_vm12, %v4452_v6, %v4451_v27  ;;  %v10789_v51 = vld [vmem:[#allocation10 + $0x598] sm:$0xff]  ;;  %v11666_v40 = vunpack.i.h.bf16 %v10683_v48 }
 0x4ff   :  { %7668 = vmatprep.subr.bf16.mxu1 %v11662_v34  ;;  %v10779_v9 = vld [vmem:[#allocation10 + $0x408] sm:$0xff]  ;;  %v10791_v25 = vld [vmem:[#allocation10 + $0x510] sm:$0xff]  ;;  %v10793_v29 = vld [vmem:[#allocation10 + $0x518] sm:$0xff]  ;;  %v4272_v61 = vmax.f32 %v11664_v32, %v4203_v1  ;;  %4533 = vmatmul.mubr.f32.vlgmr.msra.gmra.mrb[32].mxu0 %v4454_v47  ;;  %v4611_v6 = vsel %vm4453_vm12, %v4610_v33, %v10639_v23  ;;  %v11667_v34 = vpack.c.bf16 %v10510_v39, %v10508_v62  ;;  %v11668_v8 = vmax.f32 %v10308_v14, 0.0 }
 0x500   :  { %v4191_v27 = vsel %vm4185_vm11, %v11666_v40, %v11665_v49  ;;  %v8348_v60 = vunpack.i.l.bf16 %v10683_v48  ;;  %v11669_v1 = vunpack.i.l.bf16 %v10700_v21  ;;  %v11670_v49 = vpack.c.bf16 %v10501_v11, %v10499_v46  ;;  %4684 = vmatprep.mubr.f32.mxu0 %v4611_v6  ;;  %v10817_v40 = vld [vmem:[#allocation10 + $0x490] sm:$0xff]  ;;  %v10835_v47 = vld [vmem:[#allocation10 + $0x418] sm:$0xff]  ;;  %v11735_v11 = vld [vmem:[#allocation36_spill] sm:$0xff] }
 0x501   :  { %7670 = vmatpush3.bf16.msra.mxu1 %v11667_v34  ;;  %v4270_v4 = vmax.f32 %v11668_v8, %v4201_v7  ;;  %v8378_v23 = vunpack.i.l.bf16 %v10771_v44  ;;  %v11671_v39 = vpack.c.bf16 %v10516_v16, %v10512_v26  ;;  %v11672_v14 = vpack.c.bf16 %v10528_v22, %v10526_v52  ;;  %v10831_v7 = vld [vmem:[#allocation10 + $0x498] sm:$0xff]  ;;  %v10833_v33 = vld [vmem:[#allocation10 + $0x410] sm:$0xff]  ;;  %v8367_v34 = vpop.permute.xlu1 %8366 }
 0x502   :  { %v4248_v32 = vsel %vm4185_vm11, %v11669_v1, 0.0  ;;  %7634 = vmatpush3.bf16.msra.mxu0 %v11670_v49  ;;  %v7731_v46 = vpack.c.bf16 %v10789_v51, %v10781_v36  ;;  %v4189_v16 = vsel %vm4185_vm11, %v8359_v20, %v8348_v60  ;;  %v11673_v22 = vmax.f32 %v10301_v5, 0.0  ;;  %v11769_v51 = vld [vmem:[#allocation64_spill] sm:$0xff] }
 0x503   :  { %7636 = vmatprep.subr.bf16.mxu0 %v11671_v39  ;;  %7672 = vmatprep.subr.bf16.mxu1 %v11672_v14  ;;  %v8364_v26 = vunpack.i.h.bf16 %v10759_v2  ;;  %v8363_v8 = vunpack.i.l.bf16 %v10759_v2  ;;  %v11674_v6 = vunpack.i.l.bf16 %v10552_v56  ;;  %v4774_v49 = vrot.slane %v4272_v61, 2 }
 0x504   :  { %v4256_v52 = vmax.f32 %v11673_v22, %v4191_v27  ;;  %v8374_v39 = vunpack.i.h.bf16 %v10700_v21  ;;  %v11675_v14 = vmax.f32 %v10383_v3, 0.0  ;;  %v11676_v20 = vpack.c.bf16 %v10532_v54, %v10530_v28  ;;  %v11686_v28 = vld [vmem:[#allocation23_spill] sm:$0xff] }
 0x505   :  { %v4247_v1 = vsel %vm4185_vm11, %v11674_v6, 0.0  ;;  %v4772_v5 = vrot.slane %v4270_v4, 2  ;;  %v4244_v2 = vsel %vm4185_vm11, %v8378_v23, 0.0  ;;  %v11677_v56 = vpack.c.bf16 %v10520_v10, %v10518_v45 }
 0x506   :  { %v4277_v62 = vmax.f32 %v11675_v14, %v4248_v32  ;;  %7674 = vmatpush3.bf16.msra.mxu1 %v11676_v20  ;;  %v11678_v27 = vpack.c.bf16 %v10558_v58, %v10556_v30  ;;  %v11679_v54 = vunpack.i.l.bf16 %v10629_v31  ;;  %v11680_v22 = vmax.f32 %v10333_v57, 0.0 }
 0x507   :  { %7638 = vmatpush3.bf16.msra.mxu0 %v11677_v56  ;;  %v8369_v14 = vunpack.i.h.bf16 %v8367_v34  ;;  %v8368_v10 = vunpack.i.l.bf16 %v8367_v34  ;;  %v11681_v45 = vpack.c.bf16 %v10541_v15, %v10539_v35  ;;  %v11682_v58 = vunpack.i.h.bf16 %v10611_v63  ;;  %v11684_v56 = vld [vmem:[#allocation41_spill] sm:$0xff] }
 0x508   :  { %7676 = vmatprep.subr.bf16.mxu1 %v11678_v27  ;;  %v4243_v32 = vsel %vm4185_vm11, %v11679_v54, 0.0  ;;  %v4254_v6 = vmax.f32 %v11680_v22, %v4189_v16  ;;  %v11683_v30 = vunpack.i.l.bf16 %v10611_v63  ;;  %v11685_v27 = vmax.f32 %v11684_v56, 0.0 }
 0x509   :  { %7640 = vmatprep.subr.bf16.mxu0 %v11681_v45  ;;  %v4770_v54 = vrot.slane %v4256_v52, 2  ;;  %v4205_v57 = vsel %vm4185_vm11, %v8363_v8, %v8364_v26  ;;  %v4790_v16 = vmax.f32 %v4272_v61, %v4774_v49  ;;  %v4204_v34 = vsel %vm4185_vm11, %v8374_v39, %v8363_v8  ;;  %v11688_v45 = vld [vmem:[#allocation26_spill] sm:$0xff]  ;;  %v11693_v61 = vld [vmem:[#allocation55_spill] sm:$0xff]  ;;  %v11694_v49 = vld [vmem:[#allocation56_spill] sm:$0xff] }
 0x50a   :  { %v4202_v20 = vsel %vm4185_vm11, %v11683_v30, %v11682_v58  ;;  %v10879_v31 = vmax.f32 %v11685_v27, %v4247_v1  ;;  %v5255_v22 = vrot.slane %v4277_v62, 2  ;;  %v11687_v35 = vmax.f32 %v11686_v28, 0.0  ;;  %v11691_v30 = vld [vmem:[#allocation44_spill] sm:$0xff] }
 0x50b   :  { %v11689_v3 = vpack.c.bf16 %v10562_v17, %v11688_v45  ;;  %v4788_v63 = vmax.f32 %v4270_v4, %v4772_v5  ;;  %v11690_v58 = vunpack.i.h.bf16 %v10683_v48  ;;  %v11692_v56 = vmax.f32 %v11691_v30, 0.0  ;;  %v11696_v39 = vld [vmem:[#allocation32_spill] sm:$0xff]  ;;  %v11698_v17 = vld [vmem:[#allocation46_spill] sm:$0xff] }
 0x50c   :  { %v4261_v15 = vmax.f32 %v11687_v35, %v4244_v2  ;;  %v11695_v8 = vpack.c.bf16 %v11693_v61, %v11694_v49  ;;  %v11697_v2 = vpack.c.bf16 %v10585_v43, %v11696_v39  ;;  %v4768_v28 = vrot.slane %v4254_v6, 2  ;;  %v11702_v35 = vld [vmem:[#allocation30_spill] sm:$0xff]  ;;  %v11706_v43 = vld [vmem:[#allocation48_spill] sm:$0xff] }
 0x50d   :  { %7678 = vmatpush3.bf16.msra.mxu1 %v11689_v3  ;;  %v4190_v1 = vsel %vm4185_vm11, %v8348_v60, %v11690_v58  ;;  %v10893_v27 = vmax.f32 %v11692_v56, %v4243_v32  ;;  %v11699_v3 = vmax.f32 %v11698_v17, 0.0  ;;  %v11700_v48 = vunpack.i.l.bf16 %v10700_v21  ;;  %v11701_v32 = vld [vmem:[#allocation22_spill] sm:$0xff]  ;;  %v11704_v58 = vld [vmem:[#allocation24_spill] sm:$0xff] }
 0x50e   :  { %7642 = vmatpush3.bf16.msra.mxu0 %v11695_v8  ;;  %7680 = vmatprep.subr.bf16.mxu1 %v11697_v2  ;;  %v4193_v5 = vsel %vm4185_vm11, %v8368_v10, %v8369_v14  ;;  %v11703_v45 = vpack.c.bf16 %v11701_v32, %v11702_v35  ;;  %v11705_v30 = vmax.f32 %v11704_v58, 0.0  ;;  %v11707_v61 = vmax.f32 %v11706_v43, 0.0  ;;  %v11708_v39 = vld [vmem:[#allocation42_spill] sm:$0xff]  ;;  %v11711_v32 = vld [vmem:[#allocation51_spill] sm:$0xff] }
 0x50f   :  { %v4275_v4 = vmax.f32 %v11699_v3, %v4205_v57  ;;  %v4206_v60 = vsel %vm4185_vm11, %v8364_v26, %v11700_v48  ;;  %v8379_v8 = vunpack.i.h.bf16 %v10771_v44  ;;  %v4786_v57 = vmax.f32 %v4256_v52, %v4770_v54  ;;  %v10923_v3 = vpop.permute.xlu0 %8391  ;;  %v11710_v48 = vld [vmem:[#allocation28_spill] sm:$0xff]  ;;  %v11713_v58 = vld [vmem:[#allocation43_spill] sm:$0xff] }
 0x510   :  { %7644 = vmatprep.subr.bf16.mxu0 %v11703_v45  ;;  %v10912_v56 = vmax.f32 %v11705_v30, %v4202_v20  ;;  %v4274_v49 = vmax.f32 %v11707_v61, %v4204_v34  ;;  %v11709_v21 = vmax.f32 %v11708_v39, 0.0  ;;  %v10921_v26 = vmax.f32 %v4277_v62, %v5255_v22  ;;  %v11715_v30 = vld [vmem:[#allocation49_spill] sm:$0xff]  ;;  %v11717_v62 = vld [vmem:[#allocation34_spill] sm:$0xff]  ;;  %v11727_v44 = vld [vmem:[#allocation31_spill] sm:$0xff] }
 0x511   :  { %v5251_v17 = vrot.slane %v4261_v15, 2  ;;  %v11712_v35 = vpack.c.bf16 %v11710_v48, %v11711_v32  ;;  %v4869_v20 = vrot.slane %v4790_v16, 7  ;;  %v4775_v45 = vrot.slane %v10879_v31, 2  ;;  %v11718_v22 = vld [vmem:[#allocation29_spill] sm:$0xff]  ;;  %v11721_v48 = vld [vmem:[#allocation38_spill] sm:$0xff] }
 0x512   :  { %v10919_v2 = vmax.f32 %v11709_v21, %v4190_v1  ;;  %v4771_v34 = vrot.slane %v10893_v27, 2  ;;  %v11714_v52 = vmax.f32 %v11713_v58, 0.0  ;;  %v11716_v1 = vmax.f32 %v11715_v30, 0.0 }
 0x513   :  { %7682 = vmatpush3.bf16.msra.mxu1 %v11712_v35  ;;  %v11719_v61 = vpack.c.bf16 %v11717_v62, %v11718_v22  ;;  %v11720_v39 = vpack.c.bf16 %v10621_v50, %v10619_v55  ;;  %v5253_v21 = vrot.slane %v4275_v4, 2  ;;  %v11722_v32 = vpack.c.bf16 %v10603_v41, %v11721_v48  ;;  %v11723_v50 = vld [vmem:[#allocation37_spill] sm:$0xff]  ;;  %v11724_v62 = vld [vmem:[#allocation35_spill] sm:$0xff] }
 0x514   :  { %v4276_v54 = vmax.f32 %v11714_v52, %v4206_v60  ;;  %v4259_v43 = vmax.f32 %v11716_v1, %v4193_v5  ;;  %v10944_v35 = vsel %vm4453_vm12, %v4869_v20, %v4786_v57  ;;  %v4784_v60 = vmax.f32 %v4254_v6, %v4768_v28  ;;  %v10950_v1 = vpop.permute.xlu1 %8381  ;;  %v10969_v48 = vld [vmem:[#allocation10 + $0x5a8] sm:$0xff] }
 0x515   :  { %7646 = vmatpush3.bf16.msra.mxu0 %v11719_v61  ;;  %7684 = vmatprep.subr.bf16.mxu1 %v11720_v39  ;;  %v4865_v58 = vrot.slane %v4788_v63, 7  ;;  %v5252_v52 = vrot.slane %v4274_v49, 2  ;;  %v4192_v5 = vsel %vm4185_vm11, %v8379_v8, %v8368_v10  ;;  %v4194_v30 = vsel %vm4185_vm11, %v8369_v14, %v8378_v23  ;;  %v11726_v8 = vld [vmem:[#allocation33_spill] sm:$0xff]  ;;  %v11730_v14 = vld [vmem:[#allocation58_spill] sm:$0xff]  ;;  %v10967_v39 = vld [vmem:[#allocation10 + $0x5a0] sm:$0xff] }
 0x516   :  { %7648 = vmatprep.subr.bf16.mxu0 %v11722_v32  ;;  %v5089_v55 = vrot.slane %v4786_v57, 4  ;;  %v11725_v22 = vpack.c.bf16 %v11723_v50, %v11724_v62  ;;  %v5090_v20 = vrot.slane %v4790_v16, 3  ;;  %v10958_v6 = vmax.f32 %v4261_v15, %v5251_v17  ;;  %v11729_v23 = vld [vmem:[#allocation61_spill] sm:$0xff]  ;;  %v10973_v62 = vpop.permute.xlu0 %8396 }
 0x517   :  { %v10956_v41 = vsel %vm4453_vm12, %v4865_v58, %v4784_v60  ;;  %v5351_v28 = vrot.slane %v10921_v26, 7  ;;  %v5254_v10 = vrot.slane %v4276_v54, 2  ;;  %v11728_v61 = vpack.c.bf16 %v11726_v8, %v11727_v44  ;;  %v11732_v15 = vld [vmem:[#allocation45_spill] sm:$0xff] }
 0x518   :  { %7686 = vmatpush3.bf16.msra.mxu1 %v11725_v22  ;;  %v11731_v57 = vpack.c.bf16 %v11729_v23, %v11730_v14  ;;  %v5083_v32 = vrot.slane %v4784_v60, 4  ;;  %v5084_v58 = vrot.slane %v4788_v63, 3  ;;  %v5249_v16 = vrot.slane %v4259_v43, 2  ;;  %v11734_v22 = vld [vmem:[#allocation50_spill] sm:$0xff]  ;;  %v11737_v60 = vld [vmem:[#allocation39_spill] sm:$0xff] }
 0x519   :  { %7650 = vmatpush3.bf16.msra.mxu0 %v11728_v61  ;;  %v11733_v17 = vmax.f32 %v11732_v15, 0.0  ;;  %v11736_v8 = vpack.c.bf16 %v11734_v22, %v11735_v11  ;;  %v10979_v44 = vsel %vm4453_vm12, %v5090_v20, %v5089_v55  ;;  %v10983_v61 = vsel %vm4453_vm12, %v5351_v28, %v10958_v6  ;;  %v11739_v15 = vld [vmem:[#allocation63_spill] sm:$0xff]  ;;  %v11740_v28 = vld [vmem:[#allocation62_spill] sm:$0xff] }
 0x51a   :  { %7688 = vmatprep.subr.bf16.mxu1 %v11731_v57  ;;  %v10985_v23 = vmax.f32 %v4275_v4, %v5253_v21  ;;  %v10988_v63 = vmax.f32 %v10879_v31, %v4775_v45  ;;  %v10993_v57 = vsel %vm4453_vm12, %v5084_v58, %v5083_v32  ;;  %v10995_v11 = vmax.f32 %v4259_v43, %v5249_v16  ;;  %v11007_v21 = vpop.permute.xlu1 %8386  ;;  %v11743_v32 = vld [vmem:[#allocation57_spill] sm:$0xff]  ;;  %v11746_v22 = vld [vmem:[#allocation59_spill] sm:$0xff] }
 0x51b   :  { %v4260_v50 = vmax.f32 %v11733_v17, %v4194_v30  ;;  %7652 = vmatprep.subr.bf16.mxu0 %v11736_v8  ;;  %v11738_v30 = vmax.f32 %v11737_v60, 0.0  ;;  %v4773_v55 = vrot.slane %v10912_v56, 2  ;;  %v11446_v20 = vunpack.i.l.bf16 %v10923_v3 }
 0x51c   :  { %v11741_v17 = vpack.c.bf16 %v11739_v15, %v11740_v28  ;;  %v5347_v4 = vrot.slane %v10985_v23, 7  ;;  %v11005_v45 = vmax.f32 %v4274_v49, %v5252_v52  ;;  %v11447_v43 = vunpack.i.l.bf16 %v10973_v62 }
 0x51d   :  { %v4258_v14 = vmax.f32 %v11738_v30, %v4192_v5  ;;  %v11742_v5 = vld [vmem:[#allocation20_spill] sm:$0xff]  ;;  %v11745_v16 = vpack.c.bf16 %v10702_v12, %v10694_v13  ;;  %v4612_v8 = vrot.slane %v11746_v22, 7  ;;  %v11018_v60 = vmax.f32 %v10893_v27, %v4771_v34 }
 0x51e   :  { %7690 = vmatpush3.bf16.msra.mxu1 %v11741_v17  ;;  %v11744_v58 = vpack.c.bf16 %v11742_v5, %v11743_v32  ;;  %v11020_v30 = vmax.f32 %v4276_v54, %v5254_v10  ;;  %v5250_v49 = vrot.slane %v4260_v50, 2  ;;  %v11747_v15 = vpack.c.bf16 %v10679_v53, %v10677_v38  ;;  %v11749_v5 = vld [vmem:[#allocation66_spill] sm:$0xff]  ;;  %v11750_v32 = vld [vmem:[#allocation65_spill] sm:$0xff] }
 0x51f   :  { %7692 = vmatprep.subr.bf16.mxu1 %v11745_v16  ;;  %v11028_v28 = vsel %vm4453_vm12, %v5347_v4, %v10995_v11  ;;  %v5248_v13 = vrot.slane %v4258_v14, 2  ;;  %v8383_v12 = vunpack.i.l.bf16 %v10950_v1  ;;  %v4871_v17 = vrot.slane %v10988_v63, 7  ;;  %v11752_v16 = vld [vmem:[#allocation60_spill] sm:$0xff] }
 0x520   :  { %7654 = vmatpush3.bf16.msra.mxu0 %v11744_v58  ;;  %v4769_v27 = vrot.slane %v10919_v2, 2  ;;  %v8394_v34 = vunpack.i.h.bf16 %v10923_v3  ;;  %v4249_v54 = vsel %vm4185_vm11, %v11446_v20, 0.0  ;;  %v8389_v53 = vunpack.i.h.bf16 %v11007_v21 }
 0x521   :  { %7656 = vmatprep.subr.bf16.mxu0 %v11747_v15  ;;  %v8388_v38 = vunpack.i.l.bf16 %v11007_v21  ;;  %v11748_v10 = vpack.c.bf16 %v10706_v59, %v10704_v42  ;;  %v4245_v4 = vsel %vm4185_vm11, %v11447_v43, 0.0  ;;  %v11751_v58 = vpack.c.bf16 %v11749_v5, %v11750_v32  ;;  %v11753_v15 = vld [vmem:[#allocation72_spill] sm:$0xff]  ;;  %v11755_v59 = vld [vmem:[#allocation69_spill] sm:$0xff]  ;;  %v4816_v21 = vld [vmem:[#allocation10 + $0x4b8] sm:$0xff] }
 0x522   :  { %v4613_v22 = vsel %vm4453_vm12, %v4612_v8, %v11752_v16  ;;  %v11754_v31 = vpack.c.bf16 %v10736_v18, %v11753_v15  ;;  %v4872_v20 = vsel %vm4453_vm12, %v4871_v17, %v11018_v60  ;;  %v5572_v42 = vrot.slane %v10958_v6, 4  ;;  %v11758_v18 = vld [vmem:[#allocation67_spill] sm:$0xff] }
 0x523   :  { %7694 = vmatpush3.bf16.msra.mxu1 %v11748_v10  ;;  %v11756_v10 = vld [vmem:[#allocation68_spill] sm:$0xff]  ;;  %v11060_v43 = vmax.f32 %v10912_v56, %v4773_v55  ;;  %v11062_v5 = vmax.f32 %v4260_v50, %v5250_v49  ;;  %v5349_v8 = vrot.slane %v11020_v30, 7  ;;  %v5573_v32 = vrot.slane %v10921_v26, 3  ;;  %v4847_v55 = vld [vmem:[#allocation10 + $0x5b0] sm:$0xff]  ;;  %v4848_v49 = vld [vmem:[#allocation10 + $0x5b8] sm:$0xff] }
 0x524   :  { %7658 = vmatpush3.bf16.msra.mxu0 %v11751_v58  ;;  %7728 = vmatprep.subr.bf16.mxu1 %v11754_v31  ;;  %v11757_v52 = vpack.c.bf16 %v11755_v59, %v11756_v10  ;;  %v4608_v31 = vrot.slane %v11758_v18, 7  ;;  %v11068_v17 = vmax.f32 %v10919_v2, %v4769_v27  ;;  %v4829_v6 = vld [vmem:[#allocation10 + $0x520] sm:$0xff]  ;;  %v4830_v58 = vld [vmem:[#allocation10 + $0x528] sm:$0xff]  ;;  %v5345_v56 = vrot.slane %v11005_v45, 7  ;;  %v11763_v59 = vld [vmem:[#allocation70_spill] sm:$0xff] }
 0x525   :  { %v11070_v16 = vld [vmem:[#allocation10 + $0x4a0] sm:$0xff]  ;;  %v11759_v50 = vpack.c.bf16 %v10748_v37, %v10738_v24  ;;  %v11078_v26 = vld [vmem:[#allocation10 + $0x4a8] sm:$0xff]  ;;  %v11082_v2 = vsel %vm4453_vm12, %v5349_v8, %v11062_v5  ;;  %v11085_v27 = vsel %vm4453_vm12, %v5573_v32, %v5572_v42  ;;  %v4196_v24 = vsel %vm4185_vm11, %v8388_v38, %v8389_v53 }
 0x526   :  { %7660 = vmatprep.subr.bf16.mxu0 %v11757_v52  ;;  %4755 = vmatmul.mubr.f32.vlgmr.msra.gmra.mrb[42].mxu1 %v4613_v22  ;;  %v11072_v52 = vmax.f32 %v4258_v14, %v5248_v13  ;;  %v5566_v14 = vrot.slane %v10995_v11, 4  ;;  %v5567_v13 = vrot.slane %v10985_v23, 3  ;;  %v11760_v22 = vld [vmem:[#allocation54_spill] sm:$0xff]  ;;  %v8399_v23 = vunpack.i.h.bf16 %v10973_v62  ;;  %v11767_v32 = vld [vmem:[#allocation73_spill] sm:$0xff] }
 0x527   :  { %7730 = vmatpush3.bf16.msra.mxu1 %v11759_v50  ;;  %5011 = vmatprep.mubr.f32.mxu1 %v4872_v20  ;;  %v11761_v15 = vmax.f32 %v11760_v22, 0.0  ;;  %v11762_v20 = vld [vmem:[#allocation71_spill] sm:$0xff]  ;;  %v11768_v18 = vpack.c.bf16 %v10752_v0, %v11767_v32  ;;  %v4867_v50 = vrot.slane %v11060_v43, 7  ;;  %v4609_v36 = vsel %vm4453_vm12, %v4608_v31, %v11769_v51  ;;  %v4815_v51 = vld [vmem:[#allocation10 + $0x4b0] sm:$0xff] }
 0x528   :  { %v11764_v10 = vpack.c.bf16 %v11762_v20, %v11763_v59  ;;  %7732 = vmatprep.subr.bf16.mxu1 %v7731_v46  ;;  %v11104_v11 = vsel %vm4453_vm12, %v5345_v56, %v11072_v52  ;;  %v11114_v22 = vsel %vm4453_vm12, %v5567_v13, %v5566_v14  ;;  %v7737_v46 = vpack.c.bf16 %v4830_v58, %v4829_v6  ;;  %v11122_v20 = vld [vmem:[#allocation10 + $0x428] sm:$0xff]  ;;  %v4831_v6 = vld [vmem:[#allocation10 + $0x530] sm:$0xff]  ;;  %v4832_v58 = vld [vmem:[#allocation10 + $0x538] sm:$0xff] }
 0x529   :  { %v11091_v37 = vmax.f32 %v11761_v15, %v4249_v54  ;;  %v11765_v54 = vld [vmem:[#allocation25_spill] sm:$0xff]  ;;  %v7703_v56 = vpack.c.bf16 %v11078_v26, %v11070_v16  ;;  %v11120_v15 = vld [vmem:[#allocation10 + $0x420] sm:$0xff]  ;;  %v11770_v0 = vunpack.i.h.bf16 %v10950_v1  ;;  %v4868_v14 = vsel %vm4453_vm12, %v4867_v50, %v11068_v17 }
 0x52a   :  { %7662 = vmatpush3.bf16.msra.mxu0 %v11764_v10  ;;  %v11766_v42 = vmax.f32 %v11765_v54, 0.0  ;;  %v4207_v10 = vsel %vm4185_vm11, %v8394_v34, %v8383_v12  ;;  %v11771_v31 = vpack.c.bf16 %v10793_v29, %v10791_v25  ;;  %v11772_v16 = vunpack.i.l.bf16 %v10923_v3  ;;  %v4849_v25 = vld [vmem:[#allocation10 + $0x5c0] sm:$0xff]  ;;  %v4850_v29 = vld [vmem:[#allocation10 + $0x5c8] sm:$0xff] }
 0x52b   :  { %7696 = vmatprep.subr.bf16.mxu0 %v11768_v18  ;;  %v4208_v59 = vsel %vm4185_vm11, %v8383_v12, %v11770_v0  ;;  %v11773_v26 = vmov %v11770_v0  ;;  %v11776_v12 = vunpack.i.l.bf16 %v10973_v62  ;;  %v5569_v3 = vrot.slane %v11062_v5, 4 }
 0x52c   :  { %v4265_v8 = vmax.f32 %v11766_v42, %v4245_v4  ;;  %v7739_v4 = vpack.c.bf16 %v4848_v49, %v4847_v55  ;;  %7734 = vmatpush3.bf16.msra.mxu1 %v11771_v31  ;;  %v4209_v55 = vsel %vm4185_vm11, %v11773_v26, %v11772_v16  ;;  %v11774_v49 = vld [vmem:[#allocation27_spill] sm:$0xff]  ;;  %v11777_v42 = vpack.c.bf16 %v10779_v9, %v10777_v19  ;;  %v11788_v26 = vld [vmem:[#allocation40_spill] sm:$0xff] }
 0x52d   :  { %4685 = vmatmul.mubr.f32.vlgmr.msra.gmra.mrb[34].mxu0 %v4609_v36  ;;  %v11775_v13 = vmax.f32 %v11774_v49, 0.0  ;;  %v4197_v34 = vsel %vm4185_vm11, %v8389_v53, %v11776_v12  ;;  %v5735_v1 = vrot.slane %v11091_v37, 2  ;;  %v4195_v32 = vsel %vm4185_vm11, %v8399_v23, %v8388_v38  ;;  %v11780_v53 = vld [vmem:[#allocation53_spill] sm:$0xff]  ;;  %v11786_v31 = vld [vmem:[#allocation47_spill] sm:$0xff] }
 0x52e   :  { %7698 = vmatpush3.bf16.msra.mxu0 %v11777_v42  ;;  %4941 = vmatprep.mubr.f32.mxu0 %v4868_v14  ;;  %v11778_v62 = vpack.c.bf16 %v10831_v7, %v10817_v40  ;;  %v11779_v19 = vpack.c.bf16 %v10969_v48, %v10967_v39  ;;  %v7705_v9 = vpack.c.bf16 %v11122_v20, %v11120_v15  ;;  %v11781_v5 = vmax.f32 %v11780_v53, 0.0  ;;  %v4799_v36 = vld [vmem:[#allocation10 + $0x430] sm:$0xff]  ;;  %v11782_v40 = vld [vmem:[#allocation52_spill] sm:$0xff]  ;;  %v4800_v20 = vld [vmem:[#allocation10 + $0x438] sm:$0xff] }
 0x52f   :  { %v4263_v54 = vmax.f32 %v11775_v13, %v4196_v24  ;;  %v5731_v24 = vrot.slane %v4265_v8, 2  ;;  %v7741_v50 = vpack.c.bf16 %v4832_v58, %v4831_v6  ;;  %v5570_v38 = vrot.slane %v11020_v30, 3  ;;  %v11784_v14 = vld [vmem:[#allocation21_spill] sm:$0xff]  ;;  %v4833_v6 = vld [vmem:[#allocation10 + $0x540] sm:$0xff] }
 0x530   :  { %7700 = vmatprep.subr.bf16.mxu0 %v11778_v62  ;;  %7736 = vmatprep.subr.bf16.mxu1 %v11779_v19  ;;  %v4279_v18 = vmax.f32 %v11781_v5, %v4208_v59  ;;  %v5563_v23 = vrot.slane %v11072_v52, 4  ;;  %v11783_v7 = vmax.f32 %v11782_v40, 0.0  ;;  %v11785_v39 = vmax.f32 %v11784_v14, 0.0  ;;  %v4834_v58 = vld [vmem:[#allocation10 + $0x548] sm:$0xff]  ;;  %v4851_v52 = vld [vmem:[#allocation10 + $0x5d0] sm:$0xff]  ;;  %v4817_v62 = vld [vmem:[#allocation10 + $0x4c0] sm:$0xff] }
 0x531   :  { %v11787_v16 = vmax.f32 %v11786_v31, 0.0  ;;  %7738 = vmatpush3.bf16.msra.mxu1 %v7737_v46  ;;  %v7743_v59 = vpack.c.bf16 %v4850_v29, %v4849_v25  ;;  %v11789_v49 = vmax.f32 %v11788_v26, 0.0  ;;  %v11790_v30 = vpack.c.bf16 %v10835_v47, %v10833_v33  ;;  %v4818_v19 = vld [vmem:[#allocation10 + $0x4c8] sm:$0xff]  ;;  %v4820_v14 = vld [vmem:[#allocation10 + $0x4d8] sm:$0xff] }
 0x532   :  { %v4278_v0 = vmax.f32 %v11783_v7, %v4207_v10  ;;  %v4280_v48 = vmax.f32 %v11785_v39, %v4209_v55  ;;  %7740 = vmatprep.subr.bf16.mxu1 %v7739_v4  ;;  %v4852_v10 = vld [vmem:[#allocation10 + $0x5d8] sm:$0xff]  ;;  %v11175_v55 = vsel %vm4453_vm12, %v5570_v38, %v5569_v3  ;;  %v5564_v12 = vrot.slane %v11005_v45, 3  ;;  %v4801_v3 = vld [vmem:[#allocation10 + $0x440] sm:$0xff]  ;;  %v4802_v5 = vld [vmem:[#allocation10 + $0x448] sm:$0xff] }
 0x533   :  { %v4264_v15 = vmax.f32 %v11787_v16, %v4197_v34  ;;  %v4262_v13 = vmax.f32 %v11789_v49, %v4195_v32  ;;  %7702 = vmatpush3.bf16.msra.mxu0 %v11790_v30  ;;  %v5729_v46 = vrot.slane %v4263_v54, 2  ;;  %v7707_v34 = vpack.c.bf16 %v4816_v21, %v4815_v51  ;;  %v4835_v38 = vld [vmem:[#allocation10 + $0x550] sm:$0xff]  ;;  %v4804_v30 = vld [vmem:[#allocation10 + $0x458] sm:$0xff] }
 0x534   :  { %7704 = vmatprep.subr.bf16.mxu0 %v7703_v56  ;;  %v5747_v42 = vmax.f32 %v4265_v8, %v5731_v24  ;;  %v5751_v25 = vmax.f32 %v11091_v37, %v5735_v1  ;;  %v7709_v29 = vpack.c.bf16 %v4800_v20, %v4799_v36  ;;  %v7745_v32 = vpack.c.bf16 %v4834_v58, %v4833_v6  ;;  %v4836_v37 = vld [vmem:[#allocation10 + $0x558] sm:$0xff]  ;;  %v4853_v1 = vld [vmem:[#allocation10 + $0x5e0] sm:$0xff]  ;;  %v4854_v24 = vld [vmem:[#allocation10 + $0x5e8] sm:$0xff] }
 0x535   :  { %v11180_v33 = vsel %vm4453_vm12, %v5564_v12, %v5563_v23  ;;  %v5733_v47 = vrot.slane %v4279_v18, 2  ;;  %v5734_v4 = vrot.slane %v4280_v48, 2  ;;  %v5730_v53 = vrot.slane %v4264_v15, 2  ;;  %7742 = vmatpush3.bf16.msra.mxu1 %v7741_v50  ;;  %v4819_v7 = vld [vmem:[#allocation10 + $0x4d0] sm:$0xff]  ;;  %v4837_v6 = vld [vmem:[#allocation10 + $0x560] sm:$0xff] }
 0x536   :  { %v7747_v45 = vpack.c.bf16 %v4852_v10, %v4851_v52  ;;  %v5831_v56 = vrot.slane %v5751_v25, 7  ;;  %v5732_v51 = vrot.slane %v4278_v0, 2  ;;  %v5728_v8 = vrot.slane %v4262_v13, 2  ;;  %7744 = vmatprep.subr.bf16.mxu1 %v7743_v59  ;;  %v4803_v59 = vld [vmem:[#allocation10 + $0x450] sm:$0xff]  ;;  %v4856_v10 = vld [vmem:[#allocation10 + $0x5f8] sm:$0xff] }
 0x537   :  { %7706 = vmatpush3.bf16.msra.mxu0 %v7705_v9  ;;  %v5745_v21 = vmax.f32 %v4263_v54, %v5729_v46  ;;  %v5749_v36 = vmax.f32 %v4279_v18, %v5733_v47  ;;  %v7711_v23 = vpack.c.bf16 %v4818_v19, %v4817_v62  ;;  %v7713_v50 = vpack.c.bf16 %v4802_v5, %v4801_v3  ;;  %v4838_v54 = vld [vmem:[#allocation10 + $0x568] sm:$0xff]  ;;  %v4855_v52 = vld [vmem:[#allocation10 + $0x5f0] sm:$0xff]  ;;  %v4821_v46 = vld [vmem:[#allocation10 + $0x4e0] sm:$0xff] }
 0x538   :  { %7708 = vmatprep.subr.bf16.mxu0 %v7707_v34  ;;  %v11183_v40 = vsel %vm4453_vm12, %v5831_v56, %v5747_v42  ;;  %v7749_v31 = vpack.c.bf16 %v4836_v37, %v4835_v38  ;;  %v7751_v16 = vpack.c.bf16 %v4854_v24, %v4853_v1  ;;  %v5746_v20 = vmax.f32 %v4264_v15, %v5730_v53  ;;  %v4822_v34 = vld [vmem:[#allocation10 + $0x4e8] sm:$0xff]  ;;  %v4823_v3 = vld [vmem:[#allocation10 + $0x4f0] sm:$0xff]  ;;  %v4824_v5 = vld [vmem:[#allocation10 + $0x4f8] sm:$0xff] }
 0x539   :  { %v5827_v39 = vrot.slane %v5749_v36, 7  ;;  %7746 = vmatpush3.bf16.msra.mxu1 %v7745_v32  ;;  %v5750_v9 = vmax.f32 %v4280_v48, %v5734_v4  ;;  %v5744_v58 = vmax.f32 %v4262_v13, %v5728_v8  ;;  %v5748_v26 = vmax.f32 %v4278_v0, %v5732_v51  ;;  %v4839_v0 = vld [vmem:[#allocation10 + $0x570] sm:$0xff]  ;;  %v4840_v32 = vld [vmem:[#allocation10 + $0x578] sm:$0xff]  ;;  %v4806_v47 = vld [vmem:[#allocation10 + $0x468] sm:$0xff] }
 0x53a   :  { %7748 = vmatprep.subr.bf16.mxu1 %v7747_v45  ;;  %v7715_v49 = vpack.c.bf16 %v4820_v14, %v4819_v7  ;;  %v7753_v48 = vpack.c.bf16 %v4838_v54, %v4837_v6  ;;  %v7717_v25 = vpack.c.bf16 %v4804_v30, %v4803_v59  ;;  %v7755_v13 = vpack.c.bf16 %v4856_v10, %v4855_v52  ;;  %v5067_v4 = vld [vmem:[#allocation10 + $0x780] sm:$0xff]  ;;  %v5068_v53 = vld [vmem:[#allocation10 + $0x788] sm:$0xff]  ;;  %v4807_v56 = vld [vmem:[#allocation10 + $0x470] sm:$0xff] }
 0x53b   :  { %7710 = vmatpush3.bf16.msra.mxu0 %v7709_v29  ;;  %v11186_v18 = vsel %vm4453_vm12, %v5827_v39, %v5745_v21  ;;  %v5829_v12 = vrot.slane %v5750_v9, 7  ;;  %v5825_v15 = vrot.slane %v5748_v26, 7  ;;  %v4805_v29 = vld [vmem:[#allocation10 + $0x460] sm:$0xff]  ;;  %v7719_v19 = vpack.c.bf16 %v4822_v34, %v4821_v46  ;;  %v5052_v37 = vld [vmem:[#allocation10 + $0x708] sm:$0xff]  ;;  %v4808_v24 = vld [vmem:[#allocation10 + $0x478] sm:$0xff] }
 0x53c   :  { %7712 = vmatprep.subr.bf16.mxu0 %v7711_v23  ;;  %v7757_v45 = vpack.c.bf16 %v4840_v32, %v4839_v0  ;;  %v7721_v38 = vpack.c.bf16 %v4806_v47, %v4805_v29  ;;  %v7791_v51 = vpack.c.bf16 %v5068_v53, %v5067_v4  ;;  %v5051_v8 = vld [vmem:[#allocation10 + $0x700] sm:$0xff]  ;;  %v7723_v1 = vpack.c.bf16 %v4824_v5, %v4823_v3  ;;  %v5069_v21 = vld [vmem:[#allocation10 + $0x790] sm:$0xff]  ;;  %v5070_v36 = vld [vmem:[#allocation10 + $0x798] sm:$0xff] }
 0x53d   :  { %7750 = vmatpush3.bf16.msra.mxu1 %v7749_v31  ;;  %v11189_v42 = vsel %vm4453_vm12, %v5829_v12, %v5746_v20  ;;  %v11192_v62 = vsel %vm4453_vm12, %v5825_v15, %v5744_v58  ;;  %v5092_v23 = vrot.slane %v11018_v60, 4  ;;  %v5036_v7 = vld [vmem:[#allocation10 + $0x688] sm:$0xff]  ;;  %v7793_v14 = vpack.c.bf16 %v5052_v37, %v5051_v8  ;;  %v5053_v20 = vld [vmem:[#allocation10 + $0x710] sm:$0xff]  ;;  %v5054_v9 = vld [vmem:[#allocation10 + $0x718] sm:$0xff] }
 0x53e   :  { %7752 = vmatprep.subr.bf16.mxu1 %v7751_v16  ;;  %v7725_v39 = vpack.c.bf16 %v4808_v24, %v4807_v56  ;;  %v5093_v31 = vrot.slane %v10988_v63, 3  ;;  %v7795_v16 = vpack.c.bf16 %v5070_v36, %v5069_v21  ;;  %v5019_v6 = vld [vmem:[#allocation10 + $0x600] sm:$0xff]  ;;  %v5020_v54 = vld [vmem:[#allocation10 + $0x608] sm:$0xff]  ;;  %v5037_v58 = vld [vmem:[#allocation10 + $0x690] sm:$0xff]  ;;  %v5086_v52 = vrot.slane %v11068_v17, 4 }
 0x53f   :  { %7714 = vmatpush3.bf16.msra.mxu0 %v7713_v50  ;;  %v5035_v50 = vld [vmem:[#allocation10 + $0x680] sm:$0xff]  ;;  %v5038_v26 = vld [vmem:[#allocation10 + $0x698] sm:$0xff]  ;;  %v5072_v30 = vld [vmem:[#allocation10 + $0x7a8] sm:$0xff]  ;;  %v7797_v63 = vpack.c.bf16 %v5054_v9, %v5053_v20  ;;  %v7761_v10 = vpack.c.bf16 %v5020_v54, %v5019_v6  ;;  %v5087_v15 = vrot.slane %v11060_v43, 3 }
 0x540   :  { %7716 = vmatprep.subr.bf16.mxu0 %v7715_v49  ;;  %v7759_v59 = vpack.c.bf16 %v5036_v7, %v5035_v50  ;;  %v5094_v60 = vsel %vm4453_vm12, %v5093_v31, %v5092_v23  ;;  %v5071_v49 = vld [vmem:[#allocation10 + $0x7a0] sm:$0xff]  ;;  %v5021_v12 = vld [vmem:[#allocation10 + $0x610] sm:$0xff]  ;;  %v5056_v34 = vld [vmem:[#allocation10 + $0x728] sm:$0xff] }
 0x541   :  { %7754 = vmatpush3.bf16.msra.mxu1 %v7753_v48  ;;  %v5055_v46 = vld [vmem:[#allocation10 + $0x720] sm:$0xff]  ;;  %v5022_v48 = vld [vmem:[#allocation10 + $0x618] sm:$0xff]  ;;  %v5073_v29 = vld [vmem:[#allocation10 + $0x7b0] sm:$0xff]  ;;  %v5088_v17 = vsel %vm4453_vm12, %v5087_v15, %v5086_v52 }
 0x542   :  { %7756 = vmatprep.subr.bf16.mxu1 %v7755_v13  ;;  %v5074_v13 = vld [vmem:[#allocation10 + $0x7b8] sm:$0xff]  ;;  %v5039_v0 = vld [vmem:[#allocation10 + $0x6a0] sm:$0xff]  ;;  %v5040_v32 = vld [vmem:[#allocation10 + $0x6a8] sm:$0xff]  ;;  %v7765_v47 = vpack.c.bf16 %v5022_v48, %v5021_v12 }
 0x543   :  { %7718 = vmatpush3.bf16.msra.mxu0 %v7717_v25  ;;  %v7799_v25 = vpack.c.bf16 %v5072_v30, %v5071_v49  ;;  %v5023_v4 = vld [vmem:[#allocation10 + $0x620] sm:$0xff]  ;;  %v7803_v53 = vpack.c.bf16 %v5074_v13, %v5073_v29  ;;  %v5057_v3 = vld [vmem:[#allocation10 + $0x730] sm:$0xff]  ;;  %v5058_v43 = vld [vmem:[#allocation10 + $0x738] sm:$0xff]  ;;  %v7767_v5 = vpack.c.bf16 %v5040_v32, %v5039_v0 }
 0x544   :  { %7720 = vmatprep.subr.bf16.mxu0 %v7719_v19  ;;  %v7801_v19 = vpack.c.bf16 %v5056_v34, %v5055_v46  ;;  %v5076_v56 = vld [vmem:[#allocation10 + $0x7c8] sm:$0xff]  ;;  %v5042_v8 = vld [vmem:[#allocation10 + $0x6b8] sm:$0xff]  ;;  %v5059_v21 = vld [vmem:[#allocation10 + $0x740] sm:$0xff] }
 0x545   :  { %7758 = vmatpush3.bf16.msra.mxu1 %v7757_v45  ;;  %v5024_v45 = vld [vmem:[#allocation10 + $0x628] sm:$0xff]  ;;  %v5026_v50 = vld [vmem:[#allocation10 + $0x638] sm:$0xff]  ;;  %v5077_v7 = vld [vmem:[#allocation10 + $0x7d0] sm:$0xff] }
 0x546   :  { %7792 = vmatprep.subr.bf16.mxu1 %v7791_v51  ;;  %v5041_v51 = vld [vmem:[#allocation10 + $0x6b0] sm:$0xff]  ;;  %v7769_v37 = vpack.c.bf16 %v5024_v45, %v5023_v4  ;;  %v5060_v36 = vld [vmem:[#allocation10 + $0x748] sm:$0xff]  ;;  %v5027_v9 = vld [vmem:[#allocation10 + $0x640] sm:$0xff] }
 0x547   :  { %7722 = vmatpush3.bf16.msra.mxu0 %v7721_v38  ;;  %v5075_v38 = vld [vmem:[#allocation10 + $0x7c0] sm:$0xff]  ;;  %v7771_v23 = vpack.c.bf16 %v5042_v8, %v5041_v51  ;;  %v5044_v31 = vld [vmem:[#allocation10 + $0x6c8] sm:$0xff]  ;;  %v5061_v6 = vld [vmem:[#allocation10 + $0x750] sm:$0xff] }
 0x548   :  { %7724 = vmatprep.subr.bf16.mxu0 %v7723_v1  ;;  %5012 = vmatmul.mubr.f32.vlgmr.msra.gmra.mrb[44].mxu1 %v10944_v35  ;;  %v7763_v35 = vpack.c.bf16 %v5038_v26, %v5037_v58  ;;  %v5025_v1 = vld [vmem:[#allocation10 + $0x630] sm:$0xff]  ;;  %v7807_v24 = vpack.c.bf16 %v5076_v56, %v5075_v38  ;;  %v5062_v54 = vld [vmem:[#allocation10 + $0x758] sm:$0xff]  ;;  %v5079_v26 = vld [vmem:[#allocation10 + $0x7e0] sm:$0xff] }
 0x549   :  { %7794 = vmatpush3.bf16.msra.mxu1 %v7793_v14  ;;  %5233 = vmatprep.mubr.f32.mxu1 %v5094_v60  ;;  %v5078_v14 = vld [vmem:[#allocation10 + $0x7d8] sm:$0xff]  ;;  %v7773_v20 = vpack.c.bf16 %v5026_v50, %v5025_v1  ;;  %v5028_v60 = vld [vmem:[#allocation10 + $0x648] sm:$0xff]  ;;  %v5045_v30 = vld [vmem:[#allocation10 + $0x6d0] sm:$0xff] }
 0x54a   :  { %7796 = vmatprep.subr.bf16.mxu1 %v7795_v16  ;;  %v7809_v16 = vpack.c.bf16 %v5060_v36, %v5059_v21  ;;  %v5080_v49 = vld [vmem:[#allocation10 + $0x7e8] sm:$0xff]  ;;  %v5046_v52 = vld [vmem:[#allocation10 + $0x6d8] sm:$0xff]  ;;  %v5029_v12 = vld [vmem:[#allocation10 + $0x650] sm:$0xff] }
 0x54b   :  { %7726 = vmatpush3.bf16.msra.mxu0 %v7725_v39  ;;  %v5043_v39 = vld [vmem:[#allocation10 + $0x6c0] sm:$0xff]  ;;  %v7815_v46 = vpack.c.bf16 %v5080_v49, %v5079_v26  ;;  %v5064_v15 = vld [vmem:[#allocation10 + $0x768] sm:$0xff]  ;;  %v5030_v48 = vld [vmem:[#allocation10 + $0x658] sm:$0xff] }
 0x54c   :  { %7760 = vmatprep.subr.bf16.mxu0 %v7759_v59  ;;  %v7811_v59 = vpack.c.bf16 %v5078_v14, %v5077_v7  ;;  %v7775_v58 = vpack.c.bf16 %v5044_v31, %v5043_v39  ;;  %v5063_v34 = vld [vmem:[#allocation10 + $0x760] sm:$0xff]  ;;  %v5082_v29 = vld [vmem:[#allocation10 + $0x7f8] sm:$0xff]  ;;  %v5048_v0 = vld [vmem:[#allocation10 + $0x6e8] sm:$0xff] }
 0x54d   :  { %7798 = vmatpush3.bf16.msra.mxu1 %v7797_v63  ;;  %v7813_v63 = vpack.c.bf16 %v5062_v54, %v5061_v6  ;;  %v5047_v13 = vld [vmem:[#allocation10 + $0x6e0] sm:$0xff]  ;;  %v7817_v32 = vpack.c.bf16 %v5064_v15, %v5063_v34  ;;  %v5065_v4 = vld [vmem:[#allocation10 + $0x770] sm:$0xff]  ;;  %v5322_v45 = vld [vmem:[#allocation10 + $0x988] sm:$0xff] }
 0x54e   :  { %4942 = vmatmul.mubr.f32.vlgmr.msra.gmra.mrb[36].mxu0 %v10956_v41  ;;  %7800 = vmatprep.subr.bf16.mxu1 %v7799_v25  ;;  %v7805_v41 = vpack.c.bf16 %v5058_v43, %v5057_v3  ;;  %v5081_v25 = vld [vmem:[#allocation10 + $0x7f0] sm:$0xff]  ;;  %v7783_v3 = vpack.c.bf16 %v5048_v0, %v5047_v13  ;;  %v5032_v43 = vld [vmem:[#allocation10 + $0x668] sm:$0xff]  ;;  %v5050_v56 = vld [vmem:[#allocation10 + $0x6f8] sm:$0xff] }
 0x54f   :  { %7762 = vmatpush3.bf16.msra.mxu0 %v7761_v10  ;;  %5163 = vmatprep.mubr.f32.mxu0 %v5088_v17  ;;  %v7777_v10 = vpack.c.bf16 %v5028_v60, %v5027_v9  ;;  %v7781_v17 = vpack.c.bf16 %v5030_v48, %v5029_v12  ;;  %v5049_v38 = vld [vmem:[#allocation10 + $0x6f0] sm:$0xff]  ;;  %v5305_v1 = vld [vmem:[#allocation10 + $0x900] sm:$0xff]  ;;  %v5034_v36 = vld [vmem:[#allocation10 + $0x678] sm:$0xff] }
 0x550   :  { %7764 = vmatprep.subr.bf16.mxu0 %v7763_v35  ;;  %v7779_v35 = vpack.c.bf16 %v5046_v52, %v5045_v30  ;;  %v7787_v21 = vpack.c.bf16 %v5050_v56, %v5049_v38  ;;  %v5324_v50 = vld [vmem:[#allocation10 + $0x998] sm:$0xff]  ;;  %v5289_v7 = vld [vmem:[#allocation10 + $0x880] sm:$0xff]  ;;  %v5290_v14 = vld [vmem:[#allocation10 + $0x888] sm:$0xff] }
 0x551   :  { %7802 = vmatpush3.bf16.msra.mxu1 %v7801_v19  ;;  %v5031_v19 = vld [vmem:[#allocation10 + $0x660] sm:$0xff]  ;;  %v5308_v9 = vld [vmem:[#allocation10 + $0x918] sm:$0xff]  ;;  %v5274_v54 = vld [vmem:[#allocation10 + $0x808] sm:$0xff] }
 0x552   :  { %7804 = vmatprep.subr.bf16.mxu1 %v7803_v53  ;;  %v5066_v53 = vld [vmem:[#allocation10 + $0x778] sm:$0xff]  ;;  %v7785_v8 = vpack.c.bf16 %v5032_v43, %v5031_v19  ;;  %v5273_v6 = vld [vmem:[#allocation10 + $0x800] sm:$0xff]  ;;  %v5326_v49 = vld [vmem:[#allocation10 + $0x9a8] sm:$0xff] }
 0x553   :  { %7766 = vmatpush3.bf16.msra.mxu0 %v7765_v47  ;;  %v7819_v47 = vpack.c.bf16 %v5082_v29, %v5081_v25  ;;  %v7821_v51 = vpack.c.bf16 %v5066_v53, %v5065_v4  ;;  %v5292_v60 = vld [vmem:[#allocation10 + $0x898] sm:$0xff]  ;;  %v5325_v26 = vld [vmem:[#allocation10 + $0x9a0] sm:$0xff]  ;;  %v7825_v52 = vpack.c.bf16 %v5274_v54, %v5273_v6  ;;  %v5310_v12 = vld [vmem:[#allocation10 + $0x928] sm:$0xff] }
 0x554   :  { %7768 = vmatprep.subr.bf16.mxu0 %v7767_v5  ;;  %v5321_v5 = vld [vmem:[#allocation10 + $0x980] sm:$0xff]  ;;  %v5276_v34 = vld [vmem:[#allocation10 + $0x818] sm:$0xff]  ;;  %v7863_v15 = vpack.c.bf16 %v5326_v49, %v5325_v26  ;;  %v5294_v25 = vld [vmem:[#allocation10 + $0x8a8] sm:$0xff] }
 0x555   :  { %7806 = vmatpush3.bf16.msra.mxu1 %v7805_v41  ;;  %v5033_v41 = vld [vmem:[#allocation10 + $0x670] sm:$0xff]  ;;  %v5328_v48 = vld [vmem:[#allocation10 + $0x9b8] sm:$0xff]  ;;  %v5277_v13 = vld [vmem:[#allocation10 + $0x820] sm:$0xff] }
 0x556   :  { %7808 = vmatprep.subr.bf16.mxu1 %v7807_v24  ;;  %v5306_v24 = vld [vmem:[#allocation10 + $0x908] sm:$0xff]  ;;  %v7789_v31 = vpack.c.bf16 %v5034_v36, %v5033_v41  ;;  %v5329_v4 = vld [vmem:[#allocation10 + $0x9c0] sm:$0xff]  ;;  %v5296_v43 = vld [vmem:[#allocation10 + $0x8b8] sm:$0xff] }
 0x557   :  { %7770 = vmatpush3.bf16.msra.mxu0 %v7769_v37  ;;  %v7855_v37 = vpack.c.bf16 %v5322_v45, %v5321_v5  ;;  %v7857_v39 = vpack.c.bf16 %v5306_v24, %v5305_v1  ;;  %v5330_v53 = vld [vmem:[#allocation10 + $0x9c8] sm:$0xff]  ;;  %v5279_v45 = vld [vmem:[#allocation10 + $0x830] sm:$0xff]  ;;  %v5313_v38 = vld [vmem:[#allocation10 + $0x940] sm:$0xff] }
 0x558   :  { %7772 = vmatprep.subr.bf16.mxu0 %v7771_v23  ;;  %v5323_v23 = vld [vmem:[#allocation10 + $0x990] sm:$0xff]  ;;  %v5314_v56 = vld [vmem:[#allocation10 + $0x948] sm:$0xff]  ;;  %v5297_v1 = vld [vmem:[#allocation10 + $0x8c0] sm:$0xff] }
 0x559   :  { %7810 = vmatpush3.bf16.msra.mxu1 %v7809_v16  ;;  %v7859_v16 = vpack.c.bf16 %v5324_v50, %v5323_v23  ;;  %v5331_v41 = vld [vmem:[#allocation10 + $0x9d0] sm:$0xff]  ;;  %v5298_v24 = vld [vmem:[#allocation10 + $0x8c8] sm:$0xff]  ;;  %v5281_v23 = vld [vmem:[#allocation10 + $0x840] sm:$0xff] }
 0x55a   :  { %7812 = vmatprep.subr.bf16.mxu1 %v7811_v59  ;;  %v7823_v59 = vpack.c.bf16 %v5290_v14, %v5289_v7  ;;  %v5315_v7 = vld [vmem:[#allocation10 + $0x950] sm:$0xff]  ;;  %v5316_v14 = vld [vmem:[#allocation10 + $0x958] sm:$0xff]  ;;  %v5317_v26 = vld [vmem:[#allocation10 + $0x960] sm:$0xff] }
 0x55b   :  { %7774 = vmatpush3.bf16.msra.mxu0 %v7773_v20  ;;  %v5307_v20 = vld [vmem:[#allocation10 + $0x910] sm:$0xff]  ;;  %v7877_v6 = vpack.c.bf16 %v5316_v14, %v5315_v7  ;;  %v5318_v49 = vld [vmem:[#allocation10 + $0x968] sm:$0xff]  ;;  %v5551_v7 = vld [vmem:[#allocation10 + $0xba0] sm:$0xff] }
 0x55c   :  { %7776 = vmatprep.subr.bf16.mxu0 %v7775_v58  ;;  %v5291_v58 = vld [vmem:[#allocation10 + $0x890] sm:$0xff]  ;;  %v7861_v30 = vpack.c.bf16 %v5308_v9, %v5307_v20  ;;  %v5334_v20 = vld [vmem:[#allocation10 + $0x9e8] sm:$0xff] }
 0x55d   :  { %7814 = vmatpush3.bf16.msra.mxu1 %v7813_v63  ;;  %v5275_v63 = vld [vmem:[#allocation10 + $0x810] sm:$0xff]  ;;  %v5552_v14 = vld [vmem:[#allocation10 + $0xba8] sm:$0xff] }
 0x55e   :  { %7816 = vmatprep.subr.bf16.mxu1 %v7815_v46  ;;  %v7827_v46 = vpack.c.bf16 %v5292_v60, %v5291_v58  ;;  %v5299_v9 = vld [vmem:[#allocation10 + $0x8d0] sm:$0xff] }
 0x55f   :  { %7778 = vmatpush3.bf16.msra.mxu0 %v7777_v10  ;;  %v5309_v10 = vld [vmem:[#allocation10 + $0x920] sm:$0xff]  ;;  %v5283_v58 = vld [vmem:[#allocation10 + $0x850] sm:$0xff] }
 0x560   :  { %7780 = vmatprep.subr.bf16.mxu0 %v7779_v35  ;;  %v5327_v35 = vld [vmem:[#allocation10 + $0x9b0] sm:$0xff]  ;;  %v7865_v29 = vpack.c.bf16 %v5310_v12, %v5309_v10  ;;  %v5336_v10 = vld [vmem:[#allocation10 + $0x9f8] sm:$0xff]  ;;  %v5301_v12 = vld [vmem:[#allocation10 + $0x8e0] sm:$0xff] }
 0x561   :  { %7818 = vmatpush3.bf16.msra.mxu1 %v7817_v32  ;;  %v7867_v0 = vpack.c.bf16 %v5328_v48, %v5327_v35  ;;  %v5311_v32 = vld [vmem:[#allocation10 + $0x930] sm:$0xff]  ;;  %v5285_v35 = vld [vmem:[#allocation10 + $0x860] sm:$0xff] }
 0x562   :  { %7820 = vmatprep.subr.bf16.mxu1 %v7819_v47  ;;  %v5278_v47 = vld [vmem:[#allocation10 + $0x828] sm:$0xff] }
 0x563   :  { %7782 = vmatpush3.bf16.msra.mxu0 %v7781_v17  ;;  %v5312_v17 = vld [vmem:[#allocation10 + $0x938] sm:$0xff]  ;;  %v7833_v5 = vpack.c.bf16 %v5278_v47, %v5277_v13  ;;  %v5547_v13 = vld [vmem:[#allocation10 + $0xb80] sm:$0xff] }
 0x564   :  { %7784 = vmatprep.subr.bf16.mxu0 %v7783_v3  ;;  %v5295_v3 = vld [vmem:[#allocation10 + $0x8b0] sm:$0xff] }
 0x565   :  { %7822 = vmatpush3.bf16.msra.mxu1 %v7821_v51  ;;  %v7835_v51 = vpack.c.bf16 %v5296_v43, %v5295_v3  ;;  %v5531_v3 = vld [vmem:[#allocation10 + $0xb00] sm:$0xff]  ;;  %v5532_v43 = vld [vmem:[#allocation10 + $0xb08] sm:$0xff] }
 0x566   :  { %7856 = vmatprep.subr.bf16.mxu1 %v7855_v37  ;;  %v5332_v37 = vld [vmem:[#allocation10 + $0x9d8] sm:$0xff] }
 0x567   :  { %7786 = vmatpush3.bf16.msra.mxu0 %v7785_v8  ;;  %v5280_v8 = vld [vmem:[#allocation10 + $0x838] sm:$0xff]  ;;  %v7875_v50 = vpack.c.bf16 %v5332_v37, %v5331_v41  ;;  %v5533_v37 = vld [vmem:[#allocation10 + $0xb10] sm:$0xff] }
 0x568   :  { %7788 = vmatprep.subr.bf16.mxu0 %v7787_v21  ;;  %5234 = vmatmul.mubr.f32.vlgmr.msra.gmra.mrb[46].mxu1 %v10979_v44  ;;  %v5293_v44 = vld [vmem:[#allocation10 + $0x8a0] sm:$0xff]  ;;  %v7873_v21 = vpack.c.bf16 %v5314_v56, %v5313_v38  ;;  %v7837_v36 = vpack.c.bf16 %v5280_v8, %v5279_v45  ;;  %v5549_v45 = vld [vmem:[#allocation10 + $0xb90] sm:$0xff]  ;;  %v5516_v56 = vld [vmem:[#allocation10 + $0xa88] sm:$0xff] }
 0x569   :  { %7858 = vmatpush3.bf16.msra.mxu1 %v7857_v39  ;;  %5491 = vmatprep.mubr.f32.mxu1 %v10983_v61  ;;  %v7829_v61 = vpack.c.bf16 %v5276_v34, %v5275_v63  ;;  %v7831_v19 = vpack.c.bf16 %v5294_v25, %v5293_v44  ;;  %v7839_v39 = vpack.c.bf16 %v5298_v24, %v5297_v1  ;;  %v5335_v63 = vld [vmem:[#allocation10 + $0x9f0] sm:$0xff]  ;;  %v5320_v25 = vld [vmem:[#allocation10 + $0x978] sm:$0xff]  ;;  %v5515_v38 = vld [vmem:[#allocation10 + $0xa80] sm:$0xff] }
 0x56a   :  { %7860 = vmatprep.subr.bf16.mxu1 %v7859_v16  ;;  %v5333_v16 = vld [vmem:[#allocation10 + $0x9e0] sm:$0xff]  ;;  %v7881_v34 = vpack.c.bf16 %v5318_v49, %v5317_v26  ;;  %v7883_v48 = vpack.c.bf16 %v5336_v10, %v5335_v63  ;;  %v5319_v44 = vld [vmem:[#allocation10 + $0x970] sm:$0xff]  ;;  %v5534_v1 = vld [vmem:[#allocation10 + $0xb18] sm:$0xff]  ;;  %v7887_v24 = vpack.c.bf16 %v5516_v56, %v5515_v38 }
 0x56b   :  { %7790 = vmatpush3.bf16.msra.mxu0 %v7789_v31  ;;  %v5282_v31 = vld [vmem:[#allocation10 + $0x848] sm:$0xff]  ;;  %v7879_v60 = vpack.c.bf16 %v5334_v20, %v5333_v16  ;;  %v5501_v16 = vld [vmem:[#allocation10 + $0xa10] sm:$0xff]  ;;  %v5535_v20 = vld [vmem:[#allocation10 + $0xb20] sm:$0xff] }
 0x56c   :  { %7824 = vmatprep.subr.bf16.mxu0 %v7823_v59  ;;  %v5300_v59 = vld [vmem:[#allocation10 + $0x8d8] sm:$0xff]  ;;  %v7841_v54 = vpack.c.bf16 %v5282_v31, %v5281_v23  ;;  %v5517_v23 = vld [vmem:[#allocation10 + $0xa90] sm:$0xff]  ;;  %v5520_v26 = vld [vmem:[#allocation10 + $0xaa8] sm:$0xff] }
 0x56d   :  { %7862 = vmatpush3.bf16.msra.mxu1 %v7861_v30  ;;  %v7843_v30 = vpack.c.bf16 %v5300_v59, %v5299_v9  ;;  %v5536_v9 = vld [vmem:[#allocation10 + $0xb28] sm:$0xff]  ;;  %v5537_v63 = vld [vmem:[#allocation10 + $0xb30] sm:$0xff]  ;;  %v5538_v10 = vld [vmem:[#allocation10 + $0xb38] sm:$0xff] }
 0x56e   :  { %5164 = vmatmul.mubr.f32.vlgmr.msra.gmra.mrb[38].mxu0 %v10993_v57  ;;  %7864 = vmatprep.subr.bf16.mxu1 %v7863_v15  ;;  %v7869_v57 = vpack.c.bf16 %v5312_v17, %v5311_v32  ;;  %v5303_v32 = vld [vmem:[#allocation10 + $0x8f0] sm:$0xff]  ;;  %v5304_v17 = vld [vmem:[#allocation10 + $0x8f8] sm:$0xff]  ;;  %v7929_v49 = vpack.c.bf16 %v5536_v9, %v5535_v20  ;;  %v5559_v38 = vld [vmem:[#allocation10 + $0xbe0] sm:$0xff] }
 0x56f   :  { %7826 = vmatpush3.bf16.msra.mxu0 %v7825_v52  ;;  %5421 = vmatprep.mubr.f32.mxu0 %v11028_v28  ;;  %v7871_v28 = vpack.c.bf16 %v5330_v53, %v5329_v4  ;;  %v5284_v52 = vld [vmem:[#allocation10 + $0x858] sm:$0xff]  ;;  %v5287_v4 = vld [vmem:[#allocation10 + $0x870] sm:$0xff]  ;;  %v5560_v56 = vld [vmem:[#allocation10 + $0xbe8] sm:$0xff] }
 0x570   :  { %7828 = vmatprep.subr.bf16.mxu0 %v7827_v46  ;;  %v5302_v46 = vld [vmem:[#allocation10 + $0x8e8] sm:$0xff]  ;;  %v7845_v15 = vpack.c.bf16 %v5284_v52, %v5283_v58  ;;  %v5553_v58 = vld [vmem:[#allocation10 + $0xbb0] sm:$0xff]  ;;  %v5511_v9 = vld [vmem:[#allocation10 + $0xa60] sm:$0xff] }
 0x571   :  { %7866 = vmatpush3.bf16.msra.mxu1 %v7865_v29  ;;  %v7847_v29 = vpack.c.bf16 %v5302_v46, %v5301_v12  ;;  %v5504_v46 = vld [vmem:[#allocation10 + $0xa28] sm:$0xff] }
 0x572   :  { %7868 = vmatprep.subr.bf16.mxu1 %v7867_v0  ;;  %v5548_v0 = vld [vmem:[#allocation10 + $0xb88] sm:$0xff] }
 0x573   :  { %7830 = vmatpush3.bf16.msra.mxu0 %v7829_v61  ;;  %v5286_v61 = vld [vmem:[#allocation10 + $0x868] sm:$0xff]  ;;  %v7919_v53 = vpack.c.bf16 %v5548_v0, %v5547_v13  ;;  %v5506_v0 = vld [vmem:[#allocation10 + $0xa38] sm:$0xff] }
 0x574   :  { %7832 = vmatprep.subr.bf16.mxu0 %v7831_v19  ;;  %v7885_v19 = vpack.c.bf16 %v5320_v25, %v5319_v44  ;;  %v7849_v47 = vpack.c.bf16 %v5286_v61, %v5285_v35  ;;  %v5521_v35 = vld [vmem:[#allocation10 + $0xab0] sm:$0xff]  ;;  %v5540_v61 = vld [vmem:[#allocation10 + $0xb48] sm:$0xff] }
 0x575   :  { %7870 = vmatpush3.bf16.msra.mxu1 %v7869_v57  ;;  %v7851_v57 = vpack.c.bf16 %v5304_v17, %v5303_v32  ;;  %v5505_v25 = vld [vmem:[#allocation10 + $0xa30] sm:$0xff]  ;;  %v5558_v17 = vld [vmem:[#allocation10 + $0xbd8] sm:$0xff] }
 0x576   :  { %7872 = vmatprep.subr.bf16.mxu1 %v7871_v28  ;;  %v5550_v28 = vld [vmem:[#allocation10 + $0xb98] sm:$0xff]  ;;  %v5557_v32 = vld [vmem:[#allocation10 + $0xbd0] sm:$0xff] }
 0x577   :  { %7834 = vmatpush3.bf16.msra.mxu0 %v7833_v5  ;;  %v5288_v5 = vld [vmem:[#allocation10 + $0x878] sm:$0xff]  ;;  %v7923_v41 = vpack.c.bf16 %v5550_v28, %v5549_v45  ;;  %v5508_v28 = vld [vmem:[#allocation10 + $0xa48] sm:$0xff] }
 0x578   :  { %7836 = vmatprep.subr.bf16.mxu0 %v7835_v51  ;;  %v7921_v51 = vpack.c.bf16 %v5532_v43, %v5531_v3  ;;  %v7853_v8 = vpack.c.bf16 %v5288_v5, %v5287_v4  ;;  %v5507_v3 = vld [vmem:[#allocation10 + $0xa40] sm:$0xff]  ;;  %v7939_v43 = vpack.c.bf16 %v5558_v17, %v5557_v32  ;;  %v5542_v5 = vld [vmem:[#allocation10 + $0xb58] sm:$0xff]  ;;  %v5754_v17 = vld [vmem:[#allocation10 + $0xc08] sm:$0xff] }
 0x579   :  { %7874 = vmatpush3.bf16.msra.mxu1 %v7873_v21  ;;  %v5499_v21 = vld [vmem:[#allocation10 + $0xa00] sm:$0xff] }
 0x57a   :  { %7876 = vmatprep.subr.bf16.mxu1 %v7875_v50  ;;  %v5518_v50 = vld [vmem:[#allocation10 + $0xa98] sm:$0xff]  ;;  %v5753_v32 = vld [vmem:[#allocation10 + $0xc00] sm:$0xff] }
 0x57b   :  { %7838 = vmatpush3.bf16.msra.mxu0 %v7837_v36  ;;  %v5500_v36 = vld [vmem:[#allocation10 + $0xa08] sm:$0xff]  ;;  %v7891_v59 = vpack.c.bf16 %v5518_v50, %v5517_v23  ;;  %v5510_v50 = vld [vmem:[#allocation10 + $0xa58] sm:$0xff] }
 0x57c   :  { %7840 = vmatprep.subr.bf16.mxu0 %v7839_v39  ;;  %v7925_v39 = vpack.c.bf16 %v5534_v1, %v5533_v37  ;;  %v7889_v31 = vpack.c.bf16 %v5500_v36, %v5499_v21  ;;  %v7905_v37 = vpack.c.bf16 %v5508_v28, %v5507_v3  ;;  %v5509_v1 = vld [vmem:[#allocation10 + $0xa50] sm:$0xff]  ;;  %v5543_v21 = vld [vmem:[#allocation10 + $0xb60] sm:$0xff]  ;;  %v5544_v36 = vld [vmem:[#allocation10 + $0xb68] sm:$0xff] }
 0x57d   :  { %7878 = vmatpush3.bf16.msra.mxu1 %v7877_v6  ;;  %v5502_v6 = vld [vmem:[#allocation10 + $0xa18] sm:$0xff]  ;;  %v7909_v20 = vpack.c.bf16 %v5510_v50, %v5509_v1  ;;  %v5757_v1 = vld [vmem:[#allocation10 + $0xc20] sm:$0xff]  ;;  %v5758_v50 = vld [vmem:[#allocation10 + $0xc28] sm:$0xff] }
 0x57e   :  { %7880 = vmatprep.subr.bf16.mxu1 %v7879_v60  ;;  %v5554_v60 = vld [vmem:[#allocation10 + $0xbb8] sm:$0xff] }
 0x57f   :  { %7842 = vmatpush3.bf16.msra.mxu0 %v7841_v54  ;;  %v7927_v54 = vpack.c.bf16 %v5552_v14, %v5551_v7  ;;  %v7931_v52 = vpack.c.bf16 %v5554_v60, %v5553_v58  ;;  %v5561_v7 = vld [vmem:[#allocation10 + $0xbf0] sm:$0xff]  ;;  %v5562_v14 = vld [vmem:[#allocation10 + $0xbf8] sm:$0xff]  ;;  %v5512_v60 = vld [vmem:[#allocation10 + $0xa68] sm:$0xff] }
 0x580   :  { %7844 = vmatprep.subr.bf16.mxu0 %v7843_v30  ;;  %v5503_v30 = vld [vmem:[#allocation10 + $0xa20] sm:$0xff] }
 0x581   :  { %7882 = vmatpush3.bf16.msra.mxu1 %v7881_v34  ;;  %v5555_v34 = vld [vmem:[#allocation10 + $0xbc0] sm:$0xff]  ;;  %v7897_v44 = vpack.c.bf16 %v5504_v46, %v5503_v30  ;;  %v5786_v46 = vld [vmem:[#allocation10 + $0xd08] sm:$0xff] }
 0x582   :  { %7884 = vmatprep.subr.bf16.mxu1 %v7883_v48  ;;  %v5522_v48 = vld [vmem:[#allocation10 + $0xab8] sm:$0xff] }
 0x583   :  { %7846 = vmatpush3.bf16.msra.mxu0 %v7845_v15  ;;  %v5556_v15 = vld [vmem:[#allocation10 + $0xbc8] sm:$0xff]  ;;  %v7899_v13 = vpack.c.bf16 %v5522_v48, %v5521_v35  ;;  %v5803_v35 = vld [vmem:[#allocation10 + $0xd90] sm:$0xff]  ;;  %v5804_v48 = vld [vmem:[#allocation10 + $0xd98] sm:$0xff] }
 0x584   :  { %7848 = vmatprep.subr.bf16.mxu0 %v7847_v29  ;;  %v5539_v29 = vld [vmem:[#allocation10 + $0xb40] sm:$0xff] }
 0x585   :  { %7886 = vmatpush3.bf16.msra.mxu1 %v7885_v19  ;;  %v5523_v19 = vld [vmem:[#allocation10 + $0xac0] sm:$0xff]  ;;  %v7937_v4 = vpack.c.bf16 %v5540_v61, %v5539_v29  ;;  %v7987_v29 = vpack.c.bf16 %v5804_v48, %v5803_v35  ;;  %v5787_v61 = vld [vmem:[#allocation10 + $0xd10] sm:$0xff]  ;;  %v5780_v48 = vld [vmem:[#allocation10 + $0xcd8] sm:$0xff] }
 0x586   :  { %7920 = vmatprep.subr.bf16.mxu1 %v7919_v53  ;;  %v7901_v53 = vpack.c.bf16 %v5506_v0, %v5505_v25  ;;  %v5779_v35 = vld [vmem:[#allocation10 + $0xcd0] sm:$0xff] }
 0x587   :  { %7850 = vmatpush3.bf16.msra.mxu0 %v7849_v47  ;;  %v5524_v47 = vld [vmem:[#allocation10 + $0xac8] sm:$0xff] }
 0x588   :  { %7852 = vmatprep.subr.bf16.mxu0 %v7851_v57  ;;  %5492 = vmatmul.mubr.f32.vlgmr.msra.gmra.mrb[48].mxu1 %v11082_v2  ;;  %v5519_v2 = vld [vmem:[#allocation10 + $0xaa0] sm:$0xff]  ;;  %v5541_v57 = vld [vmem:[#allocation10 + $0xb50] sm:$0xff]  ;;  %v7903_v45 = vpack.c.bf16 %v5524_v47, %v5523_v19  ;;  %v5772_v47 = vld [vmem:[#allocation10 + $0xc98] sm:$0xff] }
 0x589   :  { %7922 = vmatpush3.bf16.msra.mxu1 %v7921_v51  ;;  %5713 = vmatprep.mubr.f32.mxu1 %v11085_v27  ;;  %v7893_v27 = vpack.c.bf16 %v5502_v6, %v5501_v16  ;;  %v7895_v12 = vpack.c.bf16 %v5520_v26, %v5519_v2  ;;  %v5525_v51 = vld [vmem:[#allocation10 + $0xad0] sm:$0xff]  ;;  %v7945_v16 = vpack.c.bf16 %v5544_v36, %v5543_v21  ;;  %v5801_v2 = vld [vmem:[#allocation10 + $0xd80] sm:$0xff]  ;;  %v5802_v26 = vld [vmem:[#allocation10 + $0xd88] sm:$0xff] }
 0x58a   :  { %7924 = vmatprep.subr.bf16.mxu1 %v7923_v41  ;;  %v7941_v41 = vpack.c.bf16 %v5542_v5, %v5541_v57  ;;  %v5545_v6 = vld [vmem:[#allocation10 + $0xb70] sm:$0xff]  ;;  %v5789_v5 = vld [vmem:[#allocation10 + $0xd20] sm:$0xff]  ;;  %v5792_v36 = vld [vmem:[#allocation10 + $0xd38] sm:$0xff] }
 0x58b   :  { %7854 = vmatpush3.bf16.msra.mxu0 %v7853_v8  ;;  %v5526_v8 = vld [vmem:[#allocation10 + $0xad8] sm:$0xff]  ;;  %v5771_v19 = vld [vmem:[#allocation10 + $0xc90] sm:$0xff] }
 0x58c   :  { %7888 = vmatprep.subr.bf16.mxu0 %v7887_v24  ;;  %v7943_v24 = vpack.c.bf16 %v5560_v56, %v5559_v38  ;;  %v7907_v23 = vpack.c.bf16 %v5526_v8, %v5525_v51  ;;  %v5755_v57 = vld [vmem:[#allocation10 + $0xc10] sm:$0xff]  ;;  %v7955_v28 = vpack.c.bf16 %v5772_v47, %v5771_v19  ;;  %v5756_v38 = vld [vmem:[#allocation10 + $0xc18] sm:$0xff]  ;;  %v5781_v19 = vld [vmem:[#allocation10 + $0xce0] sm:$0xff] }
 0x58d   :  { %7926 = vmatpush3.bf16.msra.mxu1 %v7925_v39  ;;  %v5527_v39 = vld [vmem:[#allocation10 + $0xae0] sm:$0xff]  ;;  %v5807_v51 = vld [vmem:[#allocation10 + $0xdb0] sm:$0xff]  ;;  %v5808_v8 = vld [vmem:[#allocation10 + $0xdb8] sm:$0xff] }
 0x58e   :  { %5422 = vmatmul.mubr.f32.vlgmr.msra.gmra.mrb[40].mxu0 %v11104_v11  ;;  %7928 = vmatprep.subr.bf16.mxu1 %v7927_v54  ;;  %v7933_v11 = vpack.c.bf16 %v5538_v10, %v5537_v63  ;;  %v5546_v54 = vld [vmem:[#allocation10 + $0xb78] sm:$0xff]  ;;  %v5513_v63 = vld [vmem:[#allocation10 + $0xa70] sm:$0xff]  ;;  %v7983_v10 = vpack.c.bf16 %v5802_v26, %v5801_v2  ;;  %v5777_v2 = vld [vmem:[#allocation10 + $0xcc0] sm:$0xff] }
 0x58f   :  { %7890 = vmatpush3.bf16.msra.mxu0 %v7889_v31  ;;  %5643 = vmatprep.mubr.f32.mxu0 %v11114_v22  ;;  %v7935_v22 = vpack.c.bf16 %v5556_v15, %v5555_v34  ;;  %v5528_v31 = vld [vmem:[#allocation10 + $0xae8] sm:$0xff]  ;;  %v7949_v30 = vpack.c.bf16 %v5546_v54, %v5545_v6  ;;  %v5514_v15 = vld [vmem:[#allocation10 + $0xa78] sm:$0xff]  ;;  %v5791_v21 = vld [vmem:[#allocation10 + $0xd30] sm:$0xff] }
 0x590   :  { %7892 = vmatprep.subr.bf16.mxu0 %v7891_v59  ;;  %v7947_v59 = vpack.c.bf16 %v5562_v14, %v5561_v7  ;;  %v7911_v58 = vpack.c.bf16 %v5528_v31, %v5527_v39  ;;  %v5809_v7 = vld [vmem:[#allocation10 + $0xdc0] sm:$0xff]  ;;  %v5810_v14 = vld [vmem:[#allocation10 + $0xdc8] sm:$0xff]  ;;  %v5775_v39 = vld [vmem:[#allocation10 + $0xcb0] sm:$0xff] }
 0x591   :  { %7930 = vmatpush3.bf16.msra.mxu1 %v7929_v49  ;;  %v5529_v49 = vld [vmem:[#allocation10 + $0xaf0] sm:$0xff]  ;;  %v5776_v31 = vld [vmem:[#allocation10 + $0xcb8] sm:$0xff]  ;;  %v5778_v26 = vld [vmem:[#allocation10 + $0xcc8] sm:$0xff] }
 0x592   :  { %7932 = vmatprep.subr.bf16.mxu1 %v7931_v52  ;;  %v7913_v52 = vpack.c.bf16 %v5512_v60, %v5511_v9  ;;  %v5793_v9 = vld [vmem:[#allocation10 + $0xd40] sm:$0xff]  ;;  %v7963_v6 = vpack.c.bf16 %v5776_v31, %v5775_v39  ;;  %v5760_v54 = vld [vmem:[#allocation10 + $0xc38] sm:$0xff]  ;;  %v5782_v47 = vld [vmem:[#allocation10 + $0xce8] sm:$0xff] }
 0x593   :  { %7894 = vmatpush3.bf16.msra.mxu0 %v7893_v27  ;;  %v5530_v27 = vld [vmem:[#allocation10 + $0xaf8] sm:$0xff] }
 0x594   :  { %7896 = vmatprep.subr.bf16.mxu0 %v7895_v12  ;;  %v5785_v12 = vld [vmem:[#allocation10 + $0xd00] sm:$0xff]  ;;  %v7915_v34 = vpack.c.bf16 %v5530_v27, %v5529_v49  ;;  %v5812_v60 = vld [vmem:[#allocation10 + $0xdd8] sm:$0xff] }
 0x595   :  { %7934 = vmatpush3.bf16.msra.mxu1 %v7933_v11  ;;  %v5769_v11 = vld [vmem:[#allocation10 + $0xc80] sm:$0xff]  ;;  %v7985_v25 = vpack.c.bf16 %v5786_v46, %v5785_v12  ;;  %v7967_v12 = vpack.c.bf16 %v5778_v26, %v5777_v2  ;;  %v5762_v46 = vld [vmem:[#allocation10 + $0xc48] sm:$0xff]  ;;  %v5991_v2 = vld [vmem:[%s11287_s7 + $0x20] sm:$0xff] }
 0x596   :  { %7936 = vmatprep.subr.bf16.mxu1 %v7935_v22  ;;  %v7917_v22 = vpack.c.bf16 %v5514_v15, %v5513_v63  ;;  %v5795_v63 = vld [vmem:[#allocation10 + $0xd50] sm:$0xff]  ;;  %v5814_v15 = vld [vmem:[#allocation10 + $0xde8] sm:$0xff]  ;;  %v5992_v26 = vld [vmem:[%s11287_s7 + $0x28] sm:$0xff] }
 0x597   :  { %7898 = vmatpush3.bf16.msra.mxu0 %v7897_v44  ;;  %v5770_v44 = vld [vmem:[#allocation10 + $0xc88] sm:$0xff] }
 0x598   :  { %7900 = vmatprep.subr.bf16.mxu0 %v7899_v13  ;;  %v5788_v13 = vld [vmem:[#allocation10 + $0xd18] sm:$0xff]  ;;  %v7951_v0 = vpack.c.bf16 %v5770_v44, %v5769_v11 }
 0x599   :  { %7938 = vmatpush3.bf16.msra.mxu1 %v7937_v4  ;;  %v5805_v4 = vld [vmem:[#allocation10 + $0xda0] sm:$0xff]  ;;  %v7989_v3 = vpack.c.bf16 %v5788_v13, %v5787_v61  ;;  %v5798_v61 = vld [vmem:[#allocation10 + $0xd68] sm:$0xff]  ;;  %v7971_v13 = vpack.c.bf16 %v5780_v48, %v5779_v35 }
 0x59a   :  { %7940 = vmatprep.subr.bf16.mxu1 %v7939_v43  ;;  %v7953_v43 = vpack.c.bf16 %v5754_v17, %v5753_v32  ;;  %v5815_v32 = vld [vmem:[#allocation10 + $0xdf0] sm:$0xff]  ;;  %v5816_v17 = vld [vmem:[#allocation10 + $0xdf8] sm:$0xff] }
 0x59b   :  { %7902 = vmatpush3.bf16.msra.mxu0 %v7901_v53  ;;  %v5806_v53 = vld [vmem:[#allocation10 + $0xda8] sm:$0xff] }
 0x59c   :  { %7904 = vmatprep.subr.bf16.mxu0 %v7903_v45  ;;  %v5790_v45 = vld [vmem:[#allocation10 + $0xd28] sm:$0xff]  ;;  %v7991_v56 = vpack.c.bf16 %v5806_v53, %v5805_v4 }
 0x59d   :  { %7942 = vmatpush3.bf16.msra.mxu1 %v7941_v41  ;;  %v5774_v41 = vld [vmem:[#allocation10 + $0xca8] sm:$0xff] }
 0x59e   :  { %7944 = vmatprep.subr.bf16.mxu1 %v7943_v24  ;;  %v7995_v24 = vpack.c.bf16 %v5808_v8, %v5807_v51 }
 0x59f   :  { %7906 = vmatpush3.bf16.msra.mxu0 %v7905_v37  ;;  %v7993_v37 = vpack.c.bf16 %v5790_v45, %v5789_v5  ;;  %v7975_v5 = vpack.c.bf16 %v5782_v47, %v5781_v19  ;;  %v5765_v45 = vld [vmem:[#allocation10 + $0xc60] sm:$0xff]  ;;  %v6001_v19 = vld [vmem:[%s11287_s7 + $0x70] sm:$0xff]  ;;  %v6002_v47 = vld [vmem:[%s11287_s7 + $0x78] sm:$0xff] }
 0x5a0   :  { %7908 = vmatprep.subr.bf16.mxu0 %v7907_v23 }
 0x5a1   :  { %7946 = vmatpush3.bf16.msra.mxu1 %v7945_v16  ;;  %v7961_v16 = vpack.c.bf16 %v5758_v50, %v5757_v1 }
 0x5a2   :  { %7948 = vmatprep.subr.bf16.mxu1 %v7947_v59  ;;  %v5794_v59 = vld [vmem:[#allocation10 + $0xd48] sm:$0xff] }
 0x5a3   :  { %7910 = vmatpush3.bf16.msra.mxu0 %v7909_v20  ;;  %v5759_v20 = vld [vmem:[#allocation10 + $0xc30] sm:$0xff]  ;;  %v8001_v49 = vpack.c.bf16 %v5794_v59, %v5793_v9  ;;  %v5989_v59 = vld [vmem:[%s11287_s7 + $0x10] sm:$0xff] }
 0x5a4   :  { %7912 = vmatprep.subr.bf16.mxu0 %v7911_v58  ;;  %v5811_v58 = vld [vmem:[#allocation10 + $0xdd0] sm:$0xff]  ;;  %v7965_v27 = vpack.c.bf16 %v5760_v54, %v5759_v20 }
 0x5a5   :  { %7950 = vmatpush3.bf16.msra.mxu1 %v7949_v30  ;;  %v5761_v30 = vld [vmem:[#allocation10 + $0xc40] sm:$0xff] }
 0x5a6   :  { %7984 = vmatprep.subr.bf16.mxu1 %v7983_v10  ;;  %v5796_v10 = vld [vmem:[#allocation10 + $0xd58] sm:$0xff]  ;;  %v7969_v44 = vpack.c.bf16 %v5762_v46, %v5761_v30  ;;  %v5994_v30 = vld [vmem:[%s11287_s7 + $0x38] sm:$0xff] }
 0x5a7   :  { %7914 = vmatpush3.bf16.msra.mxu0 %v7913_v52  ;;  %v8003_v52 = vpack.c.bf16 %v5812_v60, %v5811_v58  ;;  %v8005_v11 = vpack.c.bf16 %v5796_v10, %v5795_v63  ;;  %v5990_v58 = vld [vmem:[%s11287_s7 + $0x18] sm:$0xff]  ;;  %v5995_v10 = vld [vmem:[%s11287_s7 + $0x40] sm:$0xff] }
 0x5a8   :  { %7916 = vmatprep.subr.bf16.mxu0 %v7915_v34  ;;  %5714 = vmatmul.mubr.f32.vlgmr.msra.gmra.mrb[50].mxu1 %v11175_v55  ;;  %v5773_v55 = vld [vmem:[#allocation10 + $0xca0] sm:$0xff]  ;;  %v8019_v60 = vpack.c.bf16 %v5990_v58, %v5989_v59 }
 0x5a9   :  { %7986 = vmatpush3.bf16.msra.mxu1 %v7985_v25  ;;  %5971 = vmatprep.mubr.f32.mxu1 %v11183_v40  ;;  %v7957_v40 = vpack.c.bf16 %v5756_v38, %v5755_v57  ;;  %v7959_v23 = vpack.c.bf16 %v5774_v41, %v5773_v55  ;;  %v5813_v34 = vld [vmem:[#allocation10 + $0xde0] sm:$0xff]  ;;  %v5763_v25 = vld [vmem:[#allocation10 + $0xc50] sm:$0xff]  ;;  %v5800_v57 = vld [vmem:[#allocation10 + $0xd78] sm:$0xff] }
 0x5aa   :  { %7988 = vmatprep.subr.bf16.mxu1 %v7987_v29  ;;  %v5797_v29 = vld [vmem:[#allocation10 + $0xd60] sm:$0xff]  ;;  %v5783_v38 = vld [vmem:[#allocation10 + $0xcf0] sm:$0xff] }
 0x5ab   :  { %7918 = vmatpush3.bf16.msra.mxu0 %v7917_v22  ;;  %v8007_v22 = vpack.c.bf16 %v5814_v15, %v5813_v34  ;;  %v8009_v4 = vpack.c.bf16 %v5798_v61, %v5797_v29  ;;  %v5767_v41 = vld [vmem:[#allocation10 + $0xc70] sm:$0xff]  ;;  %v5999_v61 = vld [vmem:[%s11287_s7 + $0x60] sm:$0xff]  ;;  %v6196_v58 = vld [vmem:[#allocation13] ss:$0 sm:$0xff] }
 0x5ac   :  { %7952 = vmatprep.subr.bf16.mxu0 %v7951_v0  ;;  %v5764_v0 = vld [vmem:[#allocation10 + $0xc58] sm:$0xff]  ;;  %v5998_v29 = vld [vmem:[%s11287_s7 + $0x58] sm:$0xff] }
 0x5ad   :  { %7990 = vmatpush3.bf16.msra.mxu1 %v7989_v3  ;;  %v7973_v53 = vpack.c.bf16 %v5764_v0, %v5763_v25  ;;  %v8011_v3 = vpack.c.bf16 %v5816_v17, %v5815_v32  ;;  %v6000_v0 = vld [vmem:[%s11287_s7 + $0x68] sm:$0xff]  ;;  %v11791_v32 = vmov 0.0  }
 0x5ae   :  { %5644 = vmatmul.mubr.f32.vlgmr.msra.gmra.mrb[42].mxu0 %v11180_v33  ;;  %7992 = vmatprep.subr.bf16.mxu1 %v7991_v56  ;;  %v7997_v33 = vpack.c.bf16 %v5792_v36, %v5791_v21  ;;  %v5784_v56 = vld [vmem:[#allocation10 + $0xcf8] sm:$0xff]  ;;  %v8034_v17 = vpack.c.bf16 %v6000_v0, %v5999_v61 }
 0x5af   :  { %7954 = vmatpush3.bf16.msra.mxu0 %v7953_v43  ;;  %5901 = vmatprep.mubr.f32.mxu0 %v11186_v18  ;;  %v7999_v18 = vpack.c.bf16 %v5810_v14, %v5809_v7  ;;  %v5799_v43 = vld [vmem:[#allocation10 + $0xd70] sm:$0xff]  ;;  %v7979_v55 = vpack.c.bf16 %v5784_v56, %v5783_v38 }
 0x5b0   :  { %7956 = vmatprep.subr.bf16.mxu0 %v7955_v28  ;;  %v5766_v28 = vld [vmem:[#allocation10 + $0xc68] sm:$0xff]  ;;  %v8013_v51 = vpack.c.bf16 %v5800_v57, %v5799_v43 }
 0x5b1   :  { %7994 = vmatpush3.bf16.msra.mxu1 %v7993_v37  ;;  %v7977_v8 = vpack.c.bf16 %v5766_v28, %v5765_v45  ;;  %v5768_v37 = vld [vmem:[#allocation10 + $0xc78] sm:$0xff] }
 0x5b2   :  { %7996 = vmatprep.subr.bf16.mxu1 %v7995_v24 }
 0x5b3   :  { %7958 = vmatpush3.bf16.msra.mxu0 %v7957_v40  ;;  %v7981_v40 = vpack.c.bf16 %v5768_v37, %v5767_v41 }
 0x5b4   :  { %7960 = vmatprep.subr.bf16.mxu0 %v7959_v23 }
 0x5b5   :  { %7998 = vmatpush3.bf16.msra.mxu1 %v7997_v33 }
 0x5b6   :  { %8000 = vmatprep.subr.bf16.mxu1 %v7999_v18 }
 0x5b7   :  { %7962 = vmatpush3.bf16.msra.mxu0 %v7961_v16 }
 0x5b8   :  { %7964 = vmatprep.subr.bf16.mxu0 %v7963_v6  ;;  %v8605_v6 = vmov 0.0|0.0  }
 0x5b9   :  { %8002 = vmatpush3.bf16.msra.mxu1 %v8001_v49  ;;  %v8022_v49 = vpack.c.bf16 %v5992_v26, %v5991_v2 }
 0x5ba   :  { %8004 = vmatprep.subr.bf16.mxu1 %v8003_v52 }
 0x5bb   :  { %7966 = vmatpush3.bf16.msra.mxu0 %v7965_v27  ;;  %v5993_v27 = vld [vmem:[%s11287_s7 + $0x30] sm:$0xff] }
 0x5bc   :  { %7968 = vmatprep.subr.bf16.mxu0 %v7967_v12  ;;  %v8025_v52 = vpack.c.bf16 %v5994_v30, %v5993_v27  ;;  %v5996_v12 = vld [vmem:[%s11287_s7 + $0x48] sm:$0xff] }
 0x5bd   :  { %8006 = vmatpush3.bf16.msra.mxu1 %v8005_v11  ;;  %v8028_v34 = vpack.c.bf16 %v5996_v12, %v5995_v10 }
 0x5be   :  { %8008 = vmatprep.subr.bf16.mxu1 %v8007_v22  ;;  %v5997_v22 = vld [vmem:[%s11287_s7 + $0x50] sm:$0xff] }
 0x5bf   :  { %7970 = vmatpush3.bf16.msra.mxu0 %v7969_v44 }
 0x5c0   :  { %7972 = vmatprep.subr.bf16.mxu0 %v7971_v13  ;;  %v8031_v13 = vpack.c.bf16 %v5998_v29, %v5997_v22 }
 0x5c1   :  { %8010 = vmatpush3.bf16.msra.mxu1 %v8009_v4  ;;  %v8037_v4 = vpack.c.bf16 %v6002_v47, %v6001_v19 }
 0x5c2   :  { %8012 = vmatprep.subr.bf16.mxu1 %v8011_v3 }
 0x5c3   :  { %7974 = vmatpush3.bf16.msra.mxu0 %v7973_v53 }
 0x5c4   :  { %7976 = vmatprep.subr.bf16.mxu0 %v7975_v5 }
 0x5c5   :  { %8014 = vmatpush3.bf16.msra.mxu1 %v8013_v51 }
 0x5c7   :  { %7978 = vmatpush3.bf16.msra.mxu0 %v7977_v8 }
 0x5c8   :  { %7980 = vmatprep.subr.bf16.mxu0 %v7979_v55  ;;  %5972 = vmatmul.mubr.f32.vlgmr.msra.gmra.mrb[52].mxu1 %v11189_v42  ;;  %v5987_v42 = vld [vmem:[%s11287_s7] sm:$0xff] }
 0x5cb   :  { %7982 = vmatpush3.bf16.msra.mxu0 %v7981_v40 }
 0x5cc   :  { %8015 = vmatprep.subr.bf16.mxu0 %v8605_v6 }
 0x5ce   :  { %5902 = vmatmul.mubr.f32.vlgmr.msra.gmra.mrb[44].mxu0 %v11192_v62  ;;  %v6264_v1 = vpop.f32.mrb[40].mxu1  ;;  %v5988_v62 = vld [vmem:[%s11287_s7 + $0x8] sm:$0xff]  ;;  %s8607_s7 = smov [#allocation14]  }
 0x5cf   :  { %v6265_v24 = vpop.f32.mrb[41].mxu1  ;;  %v8016_v54 = vpack.c.bf16 %v5988_v62, %v5987_v42  ;;  %6736 = vmatprep.mubr.msk.f32.mxu0 %vm8606_vm13, %v11791_v32  ;;  %v6195_v62 = vld [vmem:[#allocation11] ss:$0 sm:$0xff]  ;;  %s6099_s22 = sshll.u32 %s8607_s7, 4  ;;  %s6100_s22 = int_to_ptr.vmem [resolvable:$true] %s6099_s22 }
 0x5d0   :  { %v6266_v21 = vadd.f32 %v6265_v24, %v6264_v1  ;;  %s8558_s4 = scalar_lea.vmem %s6100_s22, 32  ;;  %p8563_p1 = scmp.lt.s32.totalorder %s6100_s22, %s6100_s22 }
 0x5d1   :  { %8017 = vmatpush3.bf16.msra.mxu0 %v8016_v54  ;;  %p8559_p0 = scmp.ne.s32.totalorder %s6100_s22, %s8558_s4  ;;  %p8564_p2 = scmp.lt.s32.totalorder %s8558_s4, %s8558_s4 }
 0x5d2   :  { %v6229_v36 = vpop.f32.mrb[32].mxu0  ;;  %8018 = vmatprep.subr.bf16.mxu0 %v8605_v6 }
 0x5d3   :  { %v6230_v23 = vpop.f32.mrb[33].mxu0  ;;  %p8565_p3 = por %p8564_p2, %p8563_p1 }
 0x5d4   :  { %v6231_v50 = vadd.f32 %v6230_v23, %v6229_v36 }
 0x5d5   :  { %8020 = vmatpush3.bf16.msra.mxu0 %v8019_v60  ;;  %p8566_p4 = pnand %p8565_p3, %p8559_p0 }
 0x5d6   :  { %v4605_v7 = vadd.f32 %v6266_v21, %v6231_v50  ;;  %8021 = vmatprep.subr.bf16.mxu0 %v8605_v6 }
 0x5d9   :  { %8023 = vmatpush3.bf16.msra.mxu0 %v8022_v49 }
 0x5da   :  { %8024 = vmatprep.subr.bf16.mxu0 %v8605_v6 }
 0x5dd   :  { %8026 = vmatpush3.bf16.msra.mxu0 %v8025_v52 }
 0x5de   :  { %8027 = vmatprep.subr.bf16.mxu0 %v8605_v6 }
 0x5e1   :  { %8029 = vmatpush3.bf16.msra.mxu0 %v8028_v34 }
 0x5e2   :  { %8030 = vmatprep.subr.bf16.mxu0 %v8605_v6 }
 0x5e5   :  { %8032 = vmatpush3.bf16.msra.mxu0 %v8031_v13 }
 0x5e6   :  { %8033 = vmatprep.subr.bf16.mxu0 %v8605_v6 }
 0x5e9   :  { %8035 = vmatpush3.bf16.msra.mxu0 %v8034_v17 }
 0x5ea   :  { %8036 = vmatprep.subr.bf16.mxu0 %v8605_v6 }
 0x5ed   :  { %8038 = vmatpush3.bf16.msra.mxu0 %v8037_v4 }
 0x5f9   :  { %v6334_v14 = vpop.f32.mrb[42].mxu1 }
 0x5fa   :  { %v6335_v39 = vpop.f32.mrb[43].mxu1 }
 0x5fb   :  { %v6336_v31 = vadd.f32 %v6335_v39, %v6334_v14 }
 0x600   :  { %v6299_v33 = vpop.f32.mrb[34].mxu0 }
 0x601   :  { %v6300_v16 = vpop.f32.mrb[35].mxu0 }
 0x602   :  { %v6301_v20 = vadd.f32 %v6300_v16, %v6299_v33 }
 0x604   :  { %v4687_v18 = vadd.f32 %v6301_v20, %v4605_v7 }
 0x606   :  { %v4757_v9 = vadd.f32 %v6336_v31, %v4687_v18 }
 0x61b   :  { %v6404_v63 = vpop.f32.mrb[44].mxu1 }
 0x61c   :  { %v6405_v46 = vpop.f32.mrb[45].mxu1 }
 0x61d   :  { %v6406_v15 = vadd.f32 %v6405_v46, %v6404_v63 }
 0x621   :  { %v6369_v35 = vpop.f32.mrb[36].mxu0 }
 0x622   :  { %v6370_v48 = vpop.f32.mrb[37].mxu0 }
 0x623   :  { %v6371_v11 = vadd.f32 %v6370_v48, %v6369_v35 }
 0x625   :  { %v5014_v44 = vadd.f32 %v6406_v15, %v6371_v11 }
 0x627   :  { %v5017_v25 = vadd.f32 %v5014_v44, %v4757_v9 }
 0x63b   :  { %v6474_v53 = vpop.f32.mrb[46].mxu1 }
 0x63c   :  { %v6475_v3 = vpop.f32.mrb[47].mxu1 }
 0x63d   :  { %v6476_v43 = vadd.f32 %v6475_v3, %v6474_v53 }
 0x641   :  { %v6439_v57 = vpop.f32.mrb[38].mxu0 }
 0x642   :  { %v6440_v5 = vpop.f32.mrb[39].mxu0 }
 0x643   :  { %v6441_v45 = vadd.f32 %v6440_v5, %v6439_v57 }
 0x645   :  { %v5236_v28 = vadd.f32 %v6476_v43, %v6441_v45 }
 0x647   :  { %v5239_v38 = vadd.f32 %v5236_v28, %v5017_v25 }
 0x65b   :  { %v6544_v56 = vpop.f32.mrb[48].mxu1 }
 0x65c   :  { %v6545_v51 = vpop.f32.mrb[49].mxu1 }
 0x65d   :  { %v6546_v8 = vadd.f32 %v6545_v51, %v6544_v56 }
 0x661   :  { %v6509_v55 = vpop.f32.mrb[40].mxu0 }
 0x662   :  { %v6510_v41 = vpop.f32.mrb[41].mxu0 }
 0x663   :  { %v6511_v37 = vadd.f32 %v6510_v41, %v6509_v55 }
 0x665   :  { %v5494_v40 = vadd.f32 %v6546_v8, %v6511_v37 }
 0x667   :  { %v5497_v1 = vadd.f32 %v5494_v40, %v5239_v38 }
 0x67b   :  { %v6614_v24 = vpop.f32.mrb[50].mxu1 }
 0x67c   :  { %v6615_v21 = vpop.f32.mrb[51].mxu1 }
 0x67d   :  { %v6616_v36 = vadd.f32 %v6615_v21, %v6614_v24 }
 0x681   :  { %v6579_v23 = vpop.f32.mrb[42].mxu0 }
 0x682   :  { %v6580_v50 = vpop.f32.mrb[43].mxu0 }
 0x683   :  { %v6581_v7 = vadd.f32 %v6580_v50, %v6579_v23 }
 0x685   :  { %v5716_v14 = vadd.f32 %v6616_v36, %v6581_v7 }
 0x687   :  { %v5719_v39 = vadd.f32 %v5716_v14, %v5497_v1 }
 0x69b   :  { %v6684_v31 = vpop.f32.mrb[52].mxu1 }
 0x69c   :  { %v6685_v33 = vpop.f32.mrb[53].mxu1 }
 0x69d   :  { %v6686_v16 = vadd.f32 %v6685_v33, %v6684_v31 }
 0x6a1   :  { %v6649_v20 = vpop.f32.mrb[44].mxu0 }
 0x6a2   :  { %v6650_v18 = vpop.f32.mrb[45].mxu0 }
 0x6a3   :  { %v6651_v9 = vadd.f32 %v6650_v18, %v6649_v20 }
 0x6a5   :  { %v5974_v42 = vadd.f32 %v6686_v16, %v6651_v9 }
 0x6a7   :  { %v5977_v59 = vadd.f32 %v5974_v42, %v5719_v39 }
 0x6a9   :  { %v5985_v6 = vadd.f32 %v6195_v62, %v5977_v59 }
 0x6ab   :  { %v5986_v54 = vmax.f32 %v5985_v6, 0.0 }
 0x6ad   :  { %6737 = vmatmul.mubr.f32.vlgmr.msra.gmra.mrb[46].mxu0 %v5986_v54 }
 0x780   :  { %v6076_v60 = vpop.f32.mrb[46].mxu0 }
 0x781   :  { %v6077_v2 = vadd.f32 %v6196_v58, %v6076_v60  ;;  %v6738_v26 = vpop.f32.mrb[47].mxu0 }
 0x783   :  { %v6081_v49 = vsel %vm6080_vm14, %v6077_v2, -inf }
 0x784   :  { %6082 = vmax.xlane.f32.xlu1 %v6081_v49 }
 0x811   :  { %v6083_v27 = vpop.xlane.xlu1 %6082 }
 0x812   :  { %v6084_v30 = vsub.f32 %v6077_v2, %v6083_v27 }
 0x814   :  { %v6085_v52 = vmul.f32 1.442695, %v6084_v30 }
 0x816   :  { %8400 = vpow2.f32 %v6085_v52 }
 0x820   :  { %v8401_v63 = vpop.eup %8400 }
 0x821   :  { %v6087_v10 = vsel %vm6080_vm14, %v8401_v63, 0.0 }
 0x822   :  { %6088 = vadd.xlane.f32.xlu0 %v6087_v10 }
 0x8af   :  { %v6089_v12 = vpop.xlane.xlu0 %6088 }
 0x8b0   :  { %8402 = vrcp.f32 %v6089_v12 }
 0x8ba   :  { %v8403_v46 = vpop.eup %8402 }
 0x8bb   :  { %v6091_v34 = vmul.f32 %v8403_v46, %v8401_v63 }
 0x8bd   :  { %6092 = vst.msk [vmem:[#allocation14] sm:$0x3] %vm6080_vm14, %v6091_v34 }
 0x8be   :  { %8569 = shalt.err (!%p8566_p4)
}
 0x8bf   :  { %s8570_s24 = scalar_lea.hbm %s11289_s9, 32 }
 0x8c0   :  { %p8571_p5 = scmp.ne.s32.totalorder %s11289_s9, %s8570_s24  ;;  %p8574_p6 = scmp.lt.u32.totalorder %s8570_s24, %s11289_s9 }
 0x8c2   :  { %p8576_p7 = pnand %p8574_p6, %p8571_p5 }
 0x8c4   :  { %8579 = shalt.err (!%p8576_p7)
}
 0x8c5   :  { %6102 = dma.vmem_to_hbm [thread:$0]  %s6100_s22, 32, %s11289_s9, [#allocation4]  }
 0x8c6   :  { %8588 = dma.done.wait [#allocation4], 32  }
 0x8c7   :  { %8589 = vsyncadd [#allocation4], 4294967264 }
 0x8c8   :  { %6106 = vsyncpa [#allocation3], 1 }
 0x8c9   :  { %6107 = vsyncpa [#allocation6], 1 }
 0x8ca   :  { %6108 = vsyncpa [#allocation9], 1 }
 0x8cb   :  { %6109 = vsyncpa [#allocation12], 1 }
 0x8cc   :  { %6110 = vsyncpa [#allocation4], 1 }

</bundles_post_ra>
